<compile_context>
chip_gen: v7x
topology: tpu7x:2x2x1
jax: 0.10.0
libtpu: 0.0.40
codegen_flags: <defaults>
</compile_context>

<pallas_src>
import jax
import jax.numpy as jnp
from jax import lax
from jax.experimental import pallas as pl
from jax.experimental.pallas import tpu as pltpu

_EPS = 1e-5  # PyTorch BatchNorm3d default eps


def _vmem_limit(est_bytes):
    """~80% of the physical per-core VMEM (v7x: 64 MiB, v5e/v6e: 128 MiB),
    never below the 32 MiB default scoped limit, never above the budget."""
    try:
        cap = getattr(pltpu.get_tpu_info(), "vmem_capacity_bytes", 64 * 1024 * 1024)
    except Exception:  # non-TPU tracing / interpret mode
        cap = 64 * 1024 * 1024
    budget = (cap * 4) // 5
    return int(min(budget, max(32 * 1024 * 1024, 2 * est_bytes)))


# ---------------------------------------------------------------------------
# The fused kernel: conv1+BN1+ReLU -> conv2(3x3x3 grouped)+BN2+ReLU
#                   -> conv3(1x1x1)+BN3 + identity residual + ReLU
# ---------------------------------------------------------------------------
def _bottleneck_kernel(x_ref, xprev_ref, xnext_ref,
                       w1_ref, s1_ref, b1_ref,
                       w2_ref, s2_ref, b2_ref,
                       w3_ref, s3_ref, b3_ref,
                       o_ref, h1p_ref):
    """One grid step = one (batch item, depth tile).  Everything between the
    f32 input tile and the lane-dense f32 output tile stays in VMEM."""
    dt = pl.program_id(1)
    _, d_tile, H, W, Cin = x_ref.shape
    Cmid = w1_ref.shape[1]
    Cout = w3_ref.shape[1]
    HW = H * W

    w1 = w1_ref[...]
    s1 = s1_ref[...]
    b1 = b1_ref[...]

    def conv1_bn_relu(rows_f32):
        # (rows, Cin) f32 -> (rows, Cmid) bf16 after folded BN1 + ReLU.
        acc = jnp.dot(rows_f32.astype(jnp.bfloat16), w1,
                      preferred_element_type=jnp.float32)
        return jnp.maximum(acc * s1 + b1, 0.0).astype(jnp.bfloat16)

    # --- conv1 into a zero-padded (d_tile+2, H+2, W+2, Cmid) bf16 VMEM slab ---
    # Spatial padding and depth-halo padding are handled right here; the conv1
    # result never goes to HBM.
    h1p_ref[...] = jnp.zeros_like(h1p_ref)

    x_main = x_ref[0]                                       # (d_tile, H, W, Cin) f32
    h_main = conv1_bn_relu(x_main.reshape(d_tile * HW, Cin))
    h1p_ref[1:1 + d_tile, 1:1 + H, 1:1 + W, :] = h_main.reshape(d_tile, H, W, Cmid)

    @pl.when(dt > 0)                      # "up" depth halo (zero-padding at dt==0)
    def _():
        h = conv1_bn_relu(xprev_ref[0, 0].reshape(HW, Cin))
        h1p_ref[0:1, 1:1 + H, 1:1 + W, :] = h.reshape(1, H, W, Cmid)

    @pl.when(dt < pl.num_programs(1) - 1)  # "down" depth halo
    def _():
        h = conv1_bn_relu(xnext_ref[0, 0].reshape(HW, Cin))
        h1p_ref[1 + d_tile:2 + d_tile, 1:1 + H, 1:1 + W, :] = h.reshape(1, H, W, Cmid)

    # --- conv2: 27 tap matmuls, bf16 ref slices, f32 accumulation -------------
    acc2 = jnp.zeros((d_tile * HW, Cmid), jnp.float32)
    for kd in range(3):
        for kh in range(3):
            for kw in range(3):
                t = (kd * 3 + kh) * 3 + kw
                view = h1p_ref[kd:kd + d_tile, kh:kh + H, kw:kw + W, :]
                acc2 = acc2 + jnp.dot(view.reshape(d_tile * HW, Cmid), w2_ref[t],
                                      preferred_element_type=jnp.float32)

    h2 = jnp.maximum(acc2 * s2_ref[...] + b2_ref[...], 0.0).astype(jnp.bfloat16)

    # --- conv3 + BN3 + identity residual + ReLU (lane-dense Cout store) -------
    y = jnp.dot(h2, w3_ref[...], preferred_element_type=jnp.float32)
    y = y * s3_ref[...] + b3_ref[...] + x_main.reshape(d_tile * HW, Cout)
    o_ref[...] = jnp.maximum(y, 0.0).reshape(1, d_tile, H, W, Cout).astype(o_ref.dtype)


# ---------------------------------------------------------------------------
# Glue helpers (plain JAX)
# ---------------------------------------------------------------------------
def _fold_bn(bn, eps=_EPS):
    gamma, beta, mean, var = bn
    scale = gamma / jnp.sqrt(var + eps)
    shift = beta - mean * scale
    return scale.astype(jnp.float32), shift.astype(jnp.float32)


def _dense_grouped_weight_per_tap(w, groups):
    """Grouped 3x3x3 weight (Cout2, Cin2/groups, 3,3,3) -> (27, Cin2, Cout2)
    dense block-diagonal matmul weights, one matrix per (kd, kh, kw) tap
    (flat index t = (kd*3 + kh)*3 + kw, matching the in-kernel loop)."""
    Cout2, cpg_in, _, _, _ = w.shape
    Cin2 = groups * cpg_in
    cpg_out = Cout2 // groups
    w_t = jnp.transpose(w, (2, 3, 4, 1, 0))          # (3,3,3, ci_local, co)
    dense = jnp.zeros((3, 3, 3, Cin2, Cout2), w.dtype)
    for g in range(groups):
        dense = dense.at[..., g * cpg_in:(g + 1) * cpg_in,
                         g * cpg_out:(g + 1) * cpg_out].set(
            w_t[..., :, g * cpg_out:(g + 1) * cpg_out])
    return dense.reshape(27, Cin2, Cout2)


# ---------------------------------------------------------------------------
# Bottleneck forward (Pallas path)
# ---------------------------------------------------------------------------
def bottleneck_forward_ndhwc(x_ndhwc, params, cardinality, stride=1, d_tile=None):
    """Channels-last entry point (avoids extra NCDHW<->NDHWC HBM passes)."""
    N, D, H, W, Cin = x_ndhwc.shape
    assert stride == 1, "identity residual path only (stride=1, downsample=None)"

    w1 = params["conv1_w"]                    # (Cmid, Cin, 1, 1, 1)
    Cmid = w1.shape[0]
    w3 = params["conv3_w"]                    # (Cout, Cmid, 1, 1, 1)
    Cout = w3.shape[0]
    assert Cout == Cin, "identity residual requires inplanes == planes * expansion"

    s1, b1 = _fold_bn(params["bn1"])
    s2, b2 = _fold_bn(params["bn2"])
    s3, b3 = _fold_bn(params["bn3"])

    if d_tile is None:
        d_tile = D                 # whole-depth tile per step at small shapes
        if N == 1 and D % 2 == 0:
            d_tile = D // 2        # keep a >=2-extent parallel axis for v7x's 2 TCs
    assert D % d_tile == 0
    n_dt = D // d_tile

    # bf16 MXU operands; f32 accumulation and f32 BN/ReLU/residual epilogues.
    w1_bf = jnp.transpose(w1.reshape(Cmid, Cin)).astype(jnp.bfloat16)        # (Cin, Cmid)
    w2_bf = _dense_grouped_weight_per_tap(
        params["conv2_w"], cardinality).astype(jnp.bfloat16)                 # (27, Cmid, Cmid)
    w3_bf = jnp.transpose(w3.reshape(Cout, Cmid)).astype(jnp.bfloat16)       # (Cmid, Cout)

    # Single f32 stream of x: serves both conv1 input (cast in-kernel) and the
    # identity residual (kept f32).  No separate residual stream.
    x = x_ndhwc.astype(jnp.float32)

    est = (2 * (d_tile + 2) * H * W * Cin * 4              # x tile + halos (dbl-buffered)
           + 2 * d_tile * H * W * Cout * 4                 # output tile (dbl-buffered)
           + 2 * (27 * Cmid * Cmid + Cin * Cmid + Cmid * Cout) * 2   # weights
           + (d_tile + 2) * (H + 2) * (W + 2) * Cmid * 2   # padded conv1 slab scratch
           + 2 * d_tile * H * W * Cmid * 4)                # conv2 accumulator values

    zmap2 = lambda n, dt: (0, 0)

    return pl.pallas_call(
        _bottleneck_kernel,
        out_shape=jax.ShapeDtypeStruct((N, D, H, W, Cout), jnp.float32),
        grid=(N, n_dt),
        in_specs=[
            # main x depth tile
            pl.BlockSpec((1, d_tile, H, W, Cin), lambda n, dt: (n, dt, 0, 0, 0)),
            # "up" / "down" depth-halo slices (clamped index; gated in-kernel)
            pl.BlockSpec((1, 1, H, W, Cin),
                         lambda n, dt: (n, jnp.maximum(dt * d_tile - 1, 0), 0, 0, 0)),
            pl.BlockSpec((1, 1, H, W, Cin),
                         lambda n, dt: (n, jnp.minimum((dt + 1) * d_tile, D - 1), 0, 0, 0)),
            pl.BlockSpec((Cin, Cmid), zmap2),               # w1
            pl.BlockSpec((1, Cmid), zmap2),                 # BN1 scale
            pl.BlockSpec((1, Cmid), zmap2),                 # BN1 shift
            pl.BlockSpec((27, Cmid, Cmid), lambda n, dt: (0, 0, 0)),  # w2 (per-tap)
            pl.BlockSpec((1, Cmid), zmap2),                 # BN2 scale
            pl.BlockSpec((1, Cmid), zmap2),                 # BN2 shift
            pl.BlockSpec((Cmid, Cout), zmap2),              # w3
            pl.BlockSpec((1, Cout), zmap2),                 # BN3 scale
            pl.BlockSpec((1, Cout), zmap2),                 # BN3 shift
        ],
        out_specs=pl.BlockSpec((1, d_tile, H, W, Cout), lambda n, dt: (n, dt, 0, 0, 0)),
        scratch_shapes=[pltpu.VMEM((d_tile + 2, H + 2, W + 2, Cmid), jnp.bfloat16)],
        compiler_params=pltpu.CompilerParams(
            dimension_semantics=("parallel", "parallel"),
            vmem_limit_bytes=_vmem_limit(est)),
    )(x, x, x,
      w1_bf, s1.reshape(1, Cmid), b1.reshape(1, Cmid),
      w2_bf, s2.reshape(1, Cmid), b2.reshape(1, Cmid),
      w3_bf, s3.reshape(1, Cout), b3.reshape(1, Cout))


def bottleneck_forward(x_ncdhw, params, cardinality, stride=1, d_tile=None):
    # NCDHW wrapper matching the PyTorch module layout.
    x = jnp.transpose(x_ncdhw, (0, 2, 3, 4, 1)).astype(jnp.float32)
    out = bottleneck_forward_ndhwc(x, params, cardinality, stride, d_tile)
    return jnp.transpose(out, (0, 4, 1, 2, 3))


# ---------------------------------------------------------------------------
# Pure-JAX reference (eval semantics, same bf16 rounding points) for checking
# ---------------------------------------------------------------------------
def _bn_eval(y, bn, eps=_EPS):
    gamma, beta, mean, var = bn
    sh = (1, -1, 1, 1, 1)
    return (y - mean.reshape(sh)) * (gamma.reshape(sh) /
                                     jnp.sqrt(var.reshape(sh) + eps)) + beta.reshape(sh)


def ref_forward(x, params, cardinality, stride=1):
    dn = ("NCDHW", "OIDHW", "NCDHW")

    def conv(inp, w, strides, pad, groups=1):
        return lax.conv_general_dilated(
            inp.astype(jnp.bfloat16), w.astype(jnp.bfloat16), strides, pad,
            dimension_numbers=dn, feature_group_count=groups,
            preferred_element_type=jnp.float32)

    out = jax.nn.relu(_bn_eval(conv(x, params["conv1_w"], (1, 1, 1), [(0, 0)] * 3),
                               params["bn1"]))
    out = jax.nn.relu(_bn_eval(conv(out, params["conv2_w"], (stride,) * 3,
                                    [(1, 1)] * 3, cardinality), params["bn2"]))
    out = _bn_eval(conv(out, params["conv3_w"], (1, 1, 1), [(0, 0)] * 3), params["bn3"])
    return jax.nn.relu(out + x)


# ---------------------------------------------------------------------------
# Deterministic parameter init (shapes from Bottleneck.__init__)
# ---------------------------------------------------------------------------
def init_params(key, inplanes, planes, cardinality, expansion=2):
    mid = cardinality * int(planes / 32)
    cpg = mid // cardinality
    cout = planes * expansion
    ks = jax.random.split(key, 6)

    def bn(k, c):
        k1, k2, k3, k4 = jax.random.split(k, 4)
        gamma = 1.0 + 0.1 * jax.random.normal(k1, (c,), jnp.float32)
        beta = 0.1 * jax.random.normal(k2, (c,), jnp.float32)
        mean = 0.1 * jax.random.normal(k3, (c,), jnp.float32)
        var = jax.random.uniform(k4, (c,), jnp.float32, minval=0.5, maxval=1.5)
        return (gamma, beta, mean, var)

    return {
        "conv1_w": 0.1 * jax.random.normal(ks[0], (mid, inplanes, 1, 1, 1), jnp.float32),
        "bn1": bn(ks[1], mid),
        "conv2_w": 0.1 * jax.random.normal(ks[2], (mid, cpg, 3, 3, 3), jnp.float32),
        "bn2": bn(ks[3], mid),
        "conv3_w": 0.1 * jax.random.normal(ks[4], (cout, mid, 1, 1, 1), jnp.float32),
        "bn3": bn(ks[5], cout),
    }


if __name__ == "__main__":
    key = jax.random.PRNGKey(0)
    # Small but TPU-friendly: inplanes = planes*expansion so the identity
    # residual applies (downsample=None, stride=1).
    N, D, H, W = 2, 4, 8, 8
    planes, cardinality, stride = 64, 32, 1
    inplanes = planes * 2                      # 128
    params = init_params(key, inplanes, planes, cardinality)
    x = jax.random.normal(jax.random.fold_in(key, 99),
                          (N, inplanes, D, H, W), jnp.float32)

    fwd = jax.jit(bottleneck_forward,
                  static_argnames=("cardinality", "stride", "d_tile"))
    out = jax.block_until_ready(fwd(x, params, cardinality=cardinality, stride=stride))

    ref = jax.block_until_ready(ref_forward(x, params, cardinality, stride))
    assert out.shape == ref.shape, (out.shape, ref.shape)
    max_err = float(jnp.max(jnp.abs(out - ref)))
    # bf16 matmul operands (both paths) -> loose-but-meaningful tolerance.
    if not bool(jnp.allclose(out, ref, atol=2e-2, rtol=2e-2)):
        raise AssertionError(f"Pallas/Reference mismatch, max abs err={max_err}")
    print("KERNEL_OK")
</pallas_src>

<mosaic_0001>
module attributes {stable_mosaic.version = 11 : i64} {
  func.func @_bottleneck_kernel(%arg0: i32, %arg1: i32, %arg2: memref<1x4x8x8x128xf32, #tpu.memory_space<vmem>>, %arg3: memref<1x1x8x8x128xf32, #tpu.memory_space<vmem>>, %arg4: memref<1x1x8x8x128xf32, #tpu.memory_space<vmem>>, %arg5: memref<128x64xbf16, #tpu.memory_space<vmem>>, %arg6: memref<1x64xf32, #tpu.memory_space<vmem>>, %arg7: memref<1x64xf32, #tpu.memory_space<vmem>>, %arg8: memref<27x64x64xbf16, #tpu.memory_space<vmem>>, %arg9: memref<1x64xf32, #tpu.memory_space<vmem>>, %arg10: memref<1x64xf32, #tpu.memory_space<vmem>>, %arg11: memref<64x128xbf16, #tpu.memory_space<vmem>>, %arg12: memref<1x128xf32, #tpu.memory_space<vmem>>, %arg13: memref<1x128xf32, #tpu.memory_space<vmem>>, %arg14: memref<1x4x8x8x128xf32, #tpu.memory_space<vmem>>, %arg15: memref<6x10x10x64xbf16, #tpu.memory_space<vmem>>) attributes {dimension_semantics = [#tpu.dimension_semantics<parallel>, #tpu.dimension_semantics<parallel>], iteration_bounds = array<i64: 2, 1>, scalar_prefetch = 0 : i64, scratch_operands = 1 : i64, tpu.core_type = #tpu.core_type<tc>, window_params = [{transform_indices = @transform_0, window_bounds = array<i64: 1, 4, 8, 8, 128>}, {transform_indices = @transform_1, window_bounds = array<i64: 1, 1, 8, 8, 128>}, {transform_indices = @transform_2, window_bounds = array<i64: 1, 1, 8, 8, 128>}, {pipeline_mode = #tpu.pipeline_mode<synchronous>, transform_indices = @transform_3, window_bounds = array<i64: 128, 64>}, {pipeline_mode = #tpu.pipeline_mode<synchronous>, transform_indices = @transform_4, window_bounds = array<i64: 1, 64>}, {pipeline_mode = #tpu.pipeline_mode<synchronous>, transform_indices = @transform_5, window_bounds = array<i64: 1, 64>}, {pipeline_mode = #tpu.pipeline_mode<synchronous>, transform_indices = @transform_6, window_bounds = array<i64: 27, 64, 64>}, {pipeline_mode = #tpu.pipeline_mode<synchronous>, transform_indices = @transform_7, window_bounds = array<i64: 1, 64>}, {pipeline_mode = #tpu.pipeline_mode<synchronous>, transform_indices = @transform_8, window_bounds = array<i64: 1, 64>}, {pipeline_mode = #tpu.pipeline_mode<synchronous>, transform_indices = @transform_9, window_bounds = array<i64: 64, 128>}, {pipeline_mode = #tpu.pipeline_mode<synchronous>, transform_indices = @transform_10, window_bounds = array<i64: 1, 128>}, {pipeline_mode = #tpu.pipeline_mode<synchronous>, transform_indices = @transform_11, window_bounds = array<i64: 1, 128>}, {transform_indices = @transform_12, window_bounds = array<i64: 1, 4, 8, 8, 128>}]} {
    %c0 = arith.constant 0 : index
    %c0_0 = arith.constant 0 : index
    %0 = vector.load %arg5[%c0, %c0_0] : memref<128x64xbf16, #tpu.memory_space<vmem>>, vector<128x64xbf16>
    %c0_1 = arith.constant 0 : index
    %c0_2 = arith.constant 0 : index
    %1 = vector.load %arg6[%c0_1, %c0_2] : memref<1x64xf32, #tpu.memory_space<vmem>>, vector<1x64xf32>
    %c0_3 = arith.constant 0 : index
    %c0_4 = arith.constant 0 : index
    %2 = vector.load %arg7[%c0_3, %c0_4] : memref<1x64xf32, #tpu.memory_space<vmem>>, vector<1x64xf32>
    %cst = arith.constant 0.000000e+00 : bf16
    %3 = vector.broadcast %cst : bf16 to vector<6x10x10x64xbf16>
    %c0_5 = arith.constant 0 : index
    %c0_6 = arith.constant 0 : index
    %c0_7 = arith.constant 0 : index
    %c0_8 = arith.constant 0 : index
    %4 = vector.load %arg15[%c0_5, %c0_6, %c0_7, %c0_8] : memref<6x10x10x64xbf16, #tpu.memory_space<vmem>>, vector<6x10x10x64xbf16>
    tpu.vector_store %arg15[%c0_5, %c0_6, %c0_7, %c0_8], %3 {strides = array<i32>} : memref<6x10x10x64xbf16, #tpu.memory_space<vmem>>, vector<6x10x10x64xbf16>,
    %c0_9 = arith.constant 0 : index
    %c0_10 = arith.constant 0 : index
    %c0_11 = arith.constant 0 : index
    %c0_12 = arith.constant 0 : index
    %c0_13 = arith.constant 0 : index
    %5 = vector.load %arg2[%c0_9, %c0_10, %c0_11, %c0_12, %c0_13] : memref<1x4x8x8x128xf32, #tpu.memory_space<vmem>>, vector<1x4x8x8x128xf32>
    %6 = vector.shape_cast %5 : vector<1x4x8x8x128xf32> to vector<4x8x8x128xf32>
    %7 = vector.shape_cast %6 : vector<4x8x8x128xf32> to vector<256x128xf32>
    %8 = arith.truncf %7 : vector<256x128xf32> to vector<256x128xbf16>
    %cst_14 = arith.constant dense<0.000000e+00> : vector<256x64xf32>
    %9 = tpu.matmul %8, %0, %cst_14 {dimension_numbers = #tpu.dot_dimension_numbers<[1], [0], [0], [1], [0, 0, 1, 1], [], []>} : vector<256x128xbf16>, vector<128x64xbf16>, vector<256x64xf32> -> vector<256x64xf32>
    %10 = vector.broadcast %1 : vector<1x64xf32> to vector<256x64xf32>
    %11 = arith.mulf %9, %10 : vector<256x64xf32>
    %12 = vector.broadcast %2 : vector<1x64xf32> to vector<256x64xf32>
    %13 = arith.addf %11, %12 : vector<256x64xf32>
    %cst_15 = arith.constant 0.000000e+00 : f32
    %14 = vector.broadcast %cst_15 : f32 to vector<256x64xf32>
    %15 = arith.maximumf %13, %14 : vector<256x64xf32>
    %16 = arith.truncf %15 : vector<256x64xf32> to vector<256x64xbf16>
    %17 = vector.shape_cast %16 : vector<256x64xbf16> to vector<4x8x8x64xbf16>
    %c1 = arith.constant 1 : index
    %c1_16 = arith.constant 1 : index
    %c1_17 = arith.constant 1 : index
    %c0_18 = arith.constant 0 : index
    %18 = vector.load %arg15[%c1, %c1_16, %c1_17, %c0_18] : memref<6x10x10x64xbf16, #tpu.memory_space<vmem>>, vector<4x8x8x64xbf16>
    tpu.vector_store %arg15[%c1, %c1_16, %c1_17, %c0_18], %17 {strides = array<i32>} : memref<6x10x10x64xbf16, #tpu.memory_space<vmem>>, vector<4x8x8x64xbf16>,
    %c0_i32 = arith.constant 0 : i32
    %19 = arith.cmpi sgt, %arg1, %c0_i32 : i32
    %20 = arith.extui %19 : i1 to i32
    %c0_i32_19 = arith.constant 0 : i32
    %21 = arith.cmpi ne, %20, %c0_i32_19 : i32
    scf.if %21 {
      %c0_232 = arith.constant 0 : index
      %c0_233 = arith.constant 0 : index
      %c0_234 = arith.constant 0 : index
      %c0_235 = arith.constant 0 : index
      %c0_236 = arith.constant 0 : index
      %211 = vector.load %arg3[%c0_232, %c0_233, %c0_234, %c0_235, %c0_236] : memref<1x1x8x8x128xf32, #tpu.memory_space<vmem>>, vector<1x1x8x8x128xf32>
      %212 = vector.shape_cast %211 : vector<1x1x8x8x128xf32> to vector<8x8x128xf32>
      %213 = vector.shape_cast %212 : vector<8x8x128xf32> to vector<64x128xf32>
      %214 = arith.truncf %213 : vector<64x128xf32> to vector<64x128xbf16>
      %cst_237 = arith.constant dense<0.000000e+00> : vector<64x64xf32>
      %215 = tpu.matmul %214, %0, %cst_237 {dimension_numbers = #tpu.dot_dimension_numbers<[1], [0], [0], [1], [0, 0, 1, 1], [], []>} : vector<64x128xbf16>, vector<128x64xbf16>, vector<64x64xf32> -> vector<64x64xf32>
      %216 = vector.broadcast %1 : vector<1x64xf32> to vector<64x64xf32>
      %217 = arith.mulf %215, %216 : vector<64x64xf32>
      %218 = vector.broadcast %2 : vector<1x64xf32> to vector<64x64xf32>
      %219 = arith.addf %217, %218 : vector<64x64xf32>
      %cst_238 = arith.constant 0.000000e+00 : f32
      %220 = vector.broadcast %cst_238 : f32 to vector<64x64xf32>
      %221 = arith.maximumf %219, %220 : vector<64x64xf32>
      %222 = arith.truncf %221 : vector<64x64xf32> to vector<64x64xbf16>
      %223 = vector.shape_cast %222 : vector<64x64xbf16> to vector<1x8x8x64xbf16>
      %c0_239 = arith.constant 0 : index
      %c1_240 = arith.constant 1 : index
      %c1_241 = arith.constant 1 : index
      %c0_242 = arith.constant 0 : index
      %224 = vector.load %arg15[%c0_239, %c1_240, %c1_241, %c0_242] : memref<6x10x10x64xbf16, #tpu.memory_space<vmem>>, vector<1x8x8x64xbf16>
      tpu.vector_store %arg15[%c0_239, %c1_240, %c1_241, %c0_242], %223 {strides = array<i32>} : memref<6x10x10x64xbf16, #tpu.memory_space<vmem>>, vector<1x8x8x64xbf16>,
    } else {
    }
    %c0_i32_20 = arith.constant 0 : i32
    %22 = arith.cmpi slt, %arg1, %c0_i32_20 : i32
    %23 = arith.extui %22 : i1 to i32
    %c0_i32_21 = arith.constant 0 : i32
    %24 = arith.cmpi ne, %23, %c0_i32_21 : i32
    scf.if %24 {
      %c0_232 = arith.constant 0 : index
      %c0_233 = arith.constant 0 : index
      %c0_234 = arith.constant 0 : index
      %c0_235 = arith.constant 0 : index
      %c0_236 = arith.constant 0 : index
      %211 = vector.load %arg4[%c0_232, %c0_233, %c0_234, %c0_235, %c0_236] : memref<1x1x8x8x128xf32, #tpu.memory_space<vmem>>, vector<1x1x8x8x128xf32>
      %212 = vector.shape_cast %211 : vector<1x1x8x8x128xf32> to vector<8x8x128xf32>
      %213 = vector.shape_cast %212 : vector<8x8x128xf32> to vector<64x128xf32>
      %214 = arith.truncf %213 : vector<64x128xf32> to vector<64x128xbf16>
      %cst_237 = arith.constant dense<0.000000e+00> : vector<64x64xf32>
      %215 = tpu.matmul %214, %0, %cst_237 {dimension_numbers = #tpu.dot_dimension_numbers<[1], [0], [0], [1], [0, 0, 1, 1], [], []>} : vector<64x128xbf16>, vector<128x64xbf16>, vector<64x64xf32> -> vector<64x64xf32>
      %216 = vector.broadcast %1 : vector<1x64xf32> to vector<64x64xf32>
      %217 = arith.mulf %215, %216 : vector<64x64xf32>
      %218 = vector.broadcast %2 : vector<1x64xf32> to vector<64x64xf32>
      %219 = arith.addf %217, %218 : vector<64x64xf32>
      %cst_238 = arith.constant 0.000000e+00 : f32
      %220 = vector.broadcast %cst_238 : f32 to vector<64x64xf32>
      %221 = arith.maximumf %219, %220 : vector<64x64xf32>
      %222 = arith.truncf %221 : vector<64x64xf32> to vector<64x64xbf16>
      %223 = vector.shape_cast %222 : vector<64x64xbf16> to vector<1x8x8x64xbf16>
      %c5_239 = arith.constant 5 : index
      %c1_240 = arith.constant 1 : index
      %c1_241 = arith.constant 1 : index
      %c0_242 = arith.constant 0 : index
      %224 = vector.load %arg15[%c5_239, %c1_240, %c1_241, %c0_242] : memref<6x10x10x64xbf16, #tpu.memory_space<vmem>>, vector<1x8x8x64xbf16>
      tpu.vector_store %arg15[%c5_239, %c1_240, %c1_241, %c0_242], %223 {strides = array<i32>} : memref<6x10x10x64xbf16, #tpu.memory_space<vmem>>, vector<1x8x8x64xbf16>,
    } else {
    }
    %cst_22 = arith.constant 0.000000e+00 : f32
    %25 = vector.broadcast %cst_22 : f32 to vector<256x64xf32>
    %c0_23 = arith.constant 0 : index
    %c0_24 = arith.constant 0 : index
    %c0_25 = arith.constant 0 : index
    %c0_26 = arith.constant 0 : index
    %26 = vector.load %arg15[%c0_23, %c0_24, %c0_25, %c0_26] : memref<6x10x10x64xbf16, #tpu.memory_space<vmem>>, vector<4x8x8x64xbf16>
    %27 = vector.shape_cast %26 : vector<4x8x8x64xbf16> to vector<256x64xbf16>
    %c0_27 = arith.constant 0 : index
    %c0_28 = arith.constant 0 : index
    %c0_29 = arith.constant 0 : index
    %28 = vector.load %arg8[%c0_27, %c0_28, %c0_29] : memref<27x64x64xbf16, #tpu.memory_space<vmem>>, vector<1x64x64xbf16>
    %29 = vector.shape_cast %28 : vector<1x64x64xbf16> to vector<64x64xbf16>
    %cst_30 = arith.constant dense<0.000000e+00> : vector<256x64xf32>
    %30 = tpu.matmul %27, %29, %cst_30 {dimension_numbers = #tpu.dot_dimension_numbers<[1], [0], [0], [1], [0, 0, 1, 1], [], []>} : vector<256x64xbf16>, vector<64x64xbf16>, vector<256x64xf32> -> vector<256x64xf32>
    %31 = arith.addf %25, %30 : vector<256x64xf32>
    %c0_31 = arith.constant 0 : index
    %c0_32 = arith.constant 0 : index
    %c1_33 = arith.constant 1 : index
    %c0_34 = arith.constant 0 : index
    %32 = vector.load %arg15[%c0_31, %c0_32, %c1_33, %c0_34] : memref<6x10x10x64xbf16, #tpu.memory_space<vmem>>, vector<4x8x8x64xbf16>
    %33 = vector.shape_cast %32 : vector<4x8x8x64xbf16> to vector<256x64xbf16>
    %c1_35 = arith.constant 1 : index
    %c0_36 = arith.constant 0 : index
    %c0_37 = arith.constant 0 : index
    %34 = vector.load %arg8[%c1_35, %c0_36, %c0_37] : memref<27x64x64xbf16, #tpu.memory_space<vmem>>, vector<1x64x64xbf16>
    %35 = vector.shape_cast %34 : vector<1x64x64xbf16> to vector<64x64xbf16>
    %cst_38 = arith.constant dense<0.000000e+00> : vector<256x64xf32>
    %36 = tpu.matmul %33, %35, %cst_38 {dimension_numbers = #tpu.dot_dimension_numbers<[1], [0], [0], [1], [0, 0, 1, 1], [], []>} : vector<256x64xbf16>, vector<64x64xbf16>, vector<256x64xf32> -> vector<256x64xf32>
    %37 = arith.addf %31, %36 : vector<256x64xf32>
    %c0_39 = arith.constant 0 : index
    %c0_40 = arith.constant 0 : index
    %c2 = arith.constant 2 : index
    %c0_41 = arith.constant 0 : index
    %38 = vector.load %arg15[%c0_39, %c0_40, %c2, %c0_41] : memref<6x10x10x64xbf16, #tpu.memory_space<vmem>>, vector<4x8x8x64xbf16>
    %39 = vector.shape_cast %38 : vector<4x8x8x64xbf16> to vector<256x64xbf16>
    %c2_42 = arith.constant 2 : index
    %c0_43 = arith.constant 0 : index
    %c0_44 = arith.constant 0 : index
    %40 = vector.load %arg8[%c2_42, %c0_43, %c0_44] : memref<27x64x64xbf16, #tpu.memory_space<vmem>>, vector<1x64x64xbf16>
    %41 = vector.shape_cast %40 : vector<1x64x64xbf16> to vector<64x64xbf16>
    %cst_45 = arith.constant dense<0.000000e+00> : vector<256x64xf32>
    %42 = tpu.matmul %39, %41, %cst_45 {dimension_numbers = #tpu.dot_dimension_numbers<[1], [0], [0], [1], [0, 0, 1, 1], [], []>} : vector<256x64xbf16>, vector<64x64xbf16>, vector<256x64xf32> -> vector<256x64xf32>
    %43 = arith.addf %37, %42 : vector<256x64xf32>
    %c0_46 = arith.constant 0 : index
    %c1_47 = arith.constant 1 : index
    %c0_48 = arith.constant 0 : index
    %c0_49 = arith.constant 0 : index
    %44 = vector.load %arg15[%c0_46, %c1_47, %c0_48, %c0_49] : memref<6x10x10x64xbf16, #tpu.memory_space<vmem>>, vector<4x8x8x64xbf16>
    %45 = vector.shape_cast %44 : vector<4x8x8x64xbf16> to vector<256x64xbf16>
    %c3 = arith.constant 3 : index
    %c0_50 = arith.constant 0 : index
    %c0_51 = arith.constant 0 : index
    %46 = vector.load %arg8[%c3, %c0_50, %c0_51] : memref<27x64x64xbf16, #tpu.memory_space<vmem>>, vector<1x64x64xbf16>
    %47 = vector.shape_cast %46 : vector<1x64x64xbf16> to vector<64x64xbf16>
    %cst_52 = arith.constant dense<0.000000e+00> : vector<256x64xf32>
    %48 = tpu.matmul %45, %47, %cst_52 {dimension_numbers = #tpu.dot_dimension_numbers<[1], [0], [0], [1], [0, 0, 1, 1], [], []>} : vector<256x64xbf16>, vector<64x64xbf16>, vector<256x64xf32> -> vector<256x64xf32>
    %49 = arith.addf %43, %48 : vector<256x64xf32>
    %c0_53 = arith.constant 0 : index
    %c1_54 = arith.constant 1 : index
    %c1_55 = arith.constant 1 : index
    %c0_56 = arith.constant 0 : index
    %50 = vector.load %arg15[%c0_53, %c1_54, %c1_55, %c0_56] : memref<6x10x10x64xbf16, #tpu.memory_space<vmem>>, vector<4x8x8x64xbf16>
    %51 = vector.shape_cast %50 : vector<4x8x8x64xbf16> to vector<256x64xbf16>
    %c4 = arith.constant 4 : index
    %c0_57 = arith.constant 0 : index
    %c0_58 = arith.constant 0 : index
    %52 = vector.load %arg8[%c4, %c0_57, %c0_58] : memref<27x64x64xbf16, #tpu.memory_space<vmem>>, vector<1x64x64xbf16>
    %53 = vector.shape_cast %52 : vector<1x64x64xbf16> to vector<64x64xbf16>
    %cst_59 = arith.constant dense<0.000000e+00> : vector<256x64xf32>
    %54 = tpu.matmul %51, %53, %cst_59 {dimension_numbers = #tpu.dot_dimension_numbers<[1], [0], [0], [1], [0, 0, 1, 1], [], []>} : vector<256x64xbf16>, vector<64x64xbf16>, vector<256x64xf32> -> vector<256x64xf32>
    %55 = arith.addf %49, %54 : vector<256x64xf32>
    %c0_60 = arith.constant 0 : index
    %c1_61 = arith.constant 1 : index
    %c2_62 = arith.constant 2 : index
    %c0_63 = arith.constant 0 : index
    %56 = vector.load %arg15[%c0_60, %c1_61, %c2_62, %c0_63] : memref<6x10x10x64xbf16, #tpu.memory_space<vmem>>, vector<4x8x8x64xbf16>
    %57 = vector.shape_cast %56 : vector<4x8x8x64xbf16> to vector<256x64xbf16>
    %c5 = arith.constant 5 : index
    %c0_64 = arith.constant 0 : index
    %c0_65 = arith.constant 0 : index
    %58 = vector.load %arg8[%c5, %c0_64, %c0_65] : memref<27x64x64xbf16, #tpu.memory_space<vmem>>, vector<1x64x64xbf16>
    %59 = vector.shape_cast %58 : vector<1x64x64xbf16> to vector<64x64xbf16>
    %cst_66 = arith.constant dense<0.000000e+00> : vector<256x64xf32>
    %60 = tpu.matmul %57, %59, %cst_66 {dimension_numbers = #tpu.dot_dimension_numbers<[1], [0], [0], [1], [0, 0, 1, 1], [], []>} : vector<256x64xbf16>, vector<64x64xbf16>, vector<256x64xf32> -> vector<256x64xf32>
    %61 = arith.addf %55, %60 : vector<256x64xf32>
    %c0_67 = arith.constant 0 : index
    %c2_68 = arith.constant 2 : index
    %c0_69 = arith.constant 0 : index
    %c0_70 = arith.constant 0 : index
    %62 = vector.load %arg15[%c0_67, %c2_68, %c0_69, %c0_70] : memref<6x10x10x64xbf16, #tpu.memory_space<vmem>>, vector<4x8x8x64xbf16>
    %63 = vector.shape_cast %62 : vector<4x8x8x64xbf16> to vector<256x64xbf16>
    %c6 = arith.constant 6 : index
    %c0_71 = arith.constant 0 : index
    %c0_72 = arith.constant 0 : index
    %64 = vector.load %arg8[%c6, %c0_71, %c0_72] : memref<27x64x64xbf16, #tpu.memory_space<vmem>>, vector<1x64x64xbf16>
    %65 = vector.shape_cast %64 : vector<1x64x64xbf16> to vector<64x64xbf16>
    %cst_73 = arith.constant dense<0.000000e+00> : vector<256x64xf32>
    %66 = tpu.matmul %63, %65, %cst_73 {dimension_numbers = #tpu.dot_dimension_numbers<[1], [0], [0], [1], [0, 0, 1, 1], [], []>} : vector<256x64xbf16>, vector<64x64xbf16>, vector<256x64xf32> -> vector<256x64xf32>
    %67 = arith.addf %61, %66 : vector<256x64xf32>
    %c0_74 = arith.constant 0 : index
    %c2_75 = arith.constant 2 : index
    %c1_76 = arith.constant 1 : index
    %c0_77 = arith.constant 0 : index
    %68 = vector.load %arg15[%c0_74, %c2_75, %c1_76, %c0_77] : memref<6x10x10x64xbf16, #tpu.memory_space<vmem>>, vector<4x8x8x64xbf16>
    %69 = vector.shape_cast %68 : vector<4x8x8x64xbf16> to vector<256x64xbf16>
    %c7 = arith.constant 7 : index
    %c0_78 = arith.constant 0 : index
    %c0_79 = arith.constant 0 : index
    %70 = vector.load %arg8[%c7, %c0_78, %c0_79] : memref<27x64x64xbf16, #tpu.memory_space<vmem>>, vector<1x64x64xbf16>
    %71 = vector.shape_cast %70 : vector<1x64x64xbf16> to vector<64x64xbf16>
    %cst_80 = arith.constant dense<0.000000e+00> : vector<256x64xf32>
    %72 = tpu.matmul %69, %71, %cst_80 {dimension_numbers = #tpu.dot_dimension_numbers<[1], [0], [0], [1], [0, 0, 1, 1], [], []>} : vector<256x64xbf16>, vector<64x64xbf16>, vector<256x64xf32> -> vector<256x64xf32>
    %73 = arith.addf %67, %72 : vector<256x64xf32>
    %c0_81 = arith.constant 0 : index
    %c2_82 = arith.constant 2 : index
    %c2_83 = arith.constant 2 : index
    %c0_84 = arith.constant 0 : index
    %74 = vector.load %arg15[%c0_81, %c2_82, %c2_83, %c0_84] : memref<6x10x10x64xbf16, #tpu.memory_space<vmem>>, vector<4x8x8x64xbf16>
    %75 = vector.shape_cast %74 : vector<4x8x8x64xbf16> to vector<256x64xbf16>
    %c8 = arith.constant 8 : index
    %c0_85 = arith.constant 0 : index
    %c0_86 = arith.constant 0 : index
    %76 = vector.load %arg8[%c8, %c0_85, %c0_86] : memref<27x64x64xbf16, #tpu.memory_space<vmem>>, vector<1x64x64xbf16>
    %77 = vector.shape_cast %76 : vector<1x64x64xbf16> to vector<64x64xbf16>
    %cst_87 = arith.constant dense<0.000000e+00> : vector<256x64xf32>
    %78 = tpu.matmul %75, %77, %cst_87 {dimension_numbers = #tpu.dot_dimension_numbers<[1], [0], [0], [1], [0, 0, 1, 1], [], []>} : vector<256x64xbf16>, vector<64x64xbf16>, vector<256x64xf32> -> vector<256x64xf32>
    %79 = arith.addf %73, %78 : vector<256x64xf32>
    %c1_88 = arith.constant 1 : index
    %c0_89 = arith.constant 0 : index
    %c0_90 = arith.constant 0 : index
    %c0_91 = arith.constant 0 : index
    %80 = vector.load %arg15[%c1_88, %c0_89, %c0_90, %c0_91] : memref<6x10x10x64xbf16, #tpu.memory_space<vmem>>, vector<4x8x8x64xbf16>
    %81 = vector.shape_cast %80 : vector<4x8x8x64xbf16> to vector<256x64xbf16>
    %c9 = arith.constant 9 : index
    %c0_92 = arith.constant 0 : index
    %c0_93 = arith.constant 0 : index
    %82 = vector.load %arg8[%c9, %c0_92, %c0_93] : memref<27x64x64xbf16, #tpu.memory_space<vmem>>, vector<1x64x64xbf16>
    %83 = vector.shape_cast %82 : vector<1x64x64xbf16> to vector<64x64xbf16>
    %cst_94 = arith.constant dense<0.000000e+00> : vector<256x64xf32>
    %84 = tpu.matmul %81, %83, %cst_94 {dimension_numbers = #tpu.dot_dimension_numbers<[1], [0], [0], [1], [0, 0, 1, 1], [], []>} : vector<256x64xbf16>, vector<64x64xbf16>, vector<256x64xf32> -> vector<256x64xf32>
    %85 = arith.addf %79, %84 : vector<256x64xf32>
    %c1_95 = arith.constant 1 : index
    %c0_96 = arith.constant 0 : index
    %c1_97 = arith.constant 1 : index
    %c0_98 = arith.constant 0 : index
    %86 = vector.load %arg15[%c1_95, %c0_96, %c1_97, %c0_98] : memref<6x10x10x64xbf16, #tpu.memory_space<vmem>>, vector<4x8x8x64xbf16>
    %87 = vector.shape_cast %86 : vector<4x8x8x64xbf16> to vector<256x64xbf16>
    %c10 = arith.constant 10 : index
    %c0_99 = arith.constant 0 : index
    %c0_100 = arith.constant 0 : index
    %88 = vector.load %arg8[%c10, %c0_99, %c0_100] : memref<27x64x64xbf16, #tpu.memory_space<vmem>>, vector<1x64x64xbf16>
    %89 = vector.shape_cast %88 : vector<1x64x64xbf16> to vector<64x64xbf16>
    %cst_101 = arith.constant dense<0.000000e+00> : vector<256x64xf32>
    %90 = tpu.matmul %87, %89, %cst_101 {dimension_numbers = #tpu.dot_dimension_numbers<[1], [0], [0], [1], [0, 0, 1, 1], [], []>} : vector<256x64xbf16>, vector<64x64xbf16>, vector<256x64xf32> -> vector<256x64xf32>
    %91 = arith.addf %85, %90 : vector<256x64xf32>
    %c1_102 = arith.constant 1 : index
    %c0_103 = arith.constant 0 : index
    %c2_104 = arith.constant 2 : index
    %c0_105 = arith.constant 0 : index
    %92 = vector.load %arg15[%c1_102, %c0_103, %c2_104, %c0_105] : memref<6x10x10x64xbf16, #tpu.memory_space<vmem>>, vector<4x8x8x64xbf16>
    %93 = vector.shape_cast %92 : vector<4x8x8x64xbf16> to vector<256x64xbf16>
    %c11 = arith.constant 11 : index
    %c0_106 = arith.constant 0 : index
    %c0_107 = arith.constant 0 : index
    %94 = vector.load %arg8[%c11, %c0_106, %c0_107] : memref<27x64x64xbf16, #tpu.memory_space<vmem>>, vector<1x64x64xbf16>
    %95 = vector.shape_cast %94 : vector<1x64x64xbf16> to vector<64x64xbf16>
    %cst_108 = arith.constant dense<0.000000e+00> : vector<256x64xf32>
    %96 = tpu.matmul %93, %95, %cst_108 {dimension_numbers = #tpu.dot_dimension_numbers<[1], [0], [0], [1], [0, 0, 1, 1], [], []>} : vector<256x64xbf16>, vector<64x64xbf16>, vector<256x64xf32> -> vector<256x64xf32>
    %97 = arith.addf %91, %96 : vector<256x64xf32>
    %c1_109 = arith.constant 1 : index
    %c1_110 = arith.constant 1 : index
    %c0_111 = arith.constant 0 : index
    %c0_112 = arith.constant 0 : index
    %98 = vector.load %arg15[%c1_109, %c1_110, %c0_111, %c0_112] : memref<6x10x10x64xbf16, #tpu.memory_space<vmem>>, vector<4x8x8x64xbf16>
    %99 = vector.shape_cast %98 : vector<4x8x8x64xbf16> to vector<256x64xbf16>
    %c12 = arith.constant 12 : index
    %c0_113 = arith.constant 0 : index
    %c0_114 = arith.constant 0 : index
    %100 = vector.load %arg8[%c12, %c0_113, %c0_114] : memref<27x64x64xbf16, #tpu.memory_space<vmem>>, vector<1x64x64xbf16>
    %101 = vector.shape_cast %100 : vector<1x64x64xbf16> to vector<64x64xbf16>
    %cst_115 = arith.constant dense<0.000000e+00> : vector<256x64xf32>
    %102 = tpu.matmul %99, %101, %cst_115 {dimension_numbers = #tpu.dot_dimension_numbers<[1], [0], [0], [1], [0, 0, 1, 1], [], []>} : vector<256x64xbf16>, vector<64x64xbf16>, vector<256x64xf32> -> vector<256x64xf32>
    %103 = arith.addf %97, %102 : vector<256x64xf32>
    %c1_116 = arith.constant 1 : index
    %c1_117 = arith.constant 1 : index
    %c1_118 = arith.constant 1 : index
    %c0_119 = arith.constant 0 : index
    %104 = vector.load %arg15[%c1_116, %c1_117, %c1_118, %c0_119] : memref<6x10x10x64xbf16, #tpu.memory_space<vmem>>, vector<4x8x8x64xbf16>
    %105 = vector.shape_cast %104 : vector<4x8x8x64xbf16> to vector<256x64xbf16>
    %c13 = arith.constant 13 : index
    %c0_120 = arith.constant 0 : index
    %c0_121 = arith.constant 0 : index
    %106 = vector.load %arg8[%c13, %c0_120, %c0_121] : memref<27x64x64xbf16, #tpu.memory_space<vmem>>, vector<1x64x64xbf16>
    %107 = vector.shape_cast %106 : vector<1x64x64xbf16> to vector<64x64xbf16>
    %cst_122 = arith.constant dense<0.000000e+00> : vector<256x64xf32>
    %108 = tpu.matmul %105, %107, %cst_122 {dimension_numbers = #tpu.dot_dimension_numbers<[1], [0], [0], [1], [0, 0, 1, 1], [], []>} : vector<256x64xbf16>, vector<64x64xbf16>, vector<256x64xf32> -> vector<256x64xf32>
    %109 = arith.addf %103, %108 : vector<256x64xf32>
    %c1_123 = arith.constant 1 : index
    %c1_124 = arith.constant 1 : index
    %c2_125 = arith.constant 2 : index
    %c0_126 = arith.constant 0 : index
    %110 = vector.load %arg15[%c1_123, %c1_124, %c2_125, %c0_126] : memref<6x10x10x64xbf16, #tpu.memory_space<vmem>>, vector<4x8x8x64xbf16>
    %111 = vector.shape_cast %110 : vector<4x8x8x64xbf16> to vector<256x64xbf16>
    %c14 = arith.constant 14 : index
    %c0_127 = arith.constant 0 : index
    %c0_128 = arith.constant 0 : index
    %112 = vector.load %arg8[%c14, %c0_127, %c0_128] : memref<27x64x64xbf16, #tpu.memory_space<vmem>>, vector<1x64x64xbf16>
    %113 = vector.shape_cast %112 : vector<1x64x64xbf16> to vector<64x64xbf16>
    %cst_129 = arith.constant dense<0.000000e+00> : vector<256x64xf32>
    %114 = tpu.matmul %111, %113, %cst_129 {dimension_numbers = #tpu.dot_dimension_numbers<[1], [0], [0], [1], [0, 0, 1, 1], [], []>} : vector<256x64xbf16>, vector<64x64xbf16>, vector<256x64xf32> -> vector<256x64xf32>
    %115 = arith.addf %109, %114 : vector<256x64xf32>
    %c1_130 = arith.constant 1 : index
    %c2_131 = arith.constant 2 : index
    %c0_132 = arith.constant 0 : index
    %c0_133 = arith.constant 0 : index
    %116 = vector.load %arg15[%c1_130, %c2_131, %c0_132, %c0_133] : memref<6x10x10x64xbf16, #tpu.memory_space<vmem>>, vector<4x8x8x64xbf16>
    %117 = vector.shape_cast %116 : vector<4x8x8x64xbf16> to vector<256x64xbf16>
    %c15 = arith.constant 15 : index
    %c0_134 = arith.constant 0 : index
    %c0_135 = arith.constant 0 : index
    %118 = vector.load %arg8[%c15, %c0_134, %c0_135] : memref<27x64x64xbf16, #tpu.memory_space<vmem>>, vector<1x64x64xbf16>
    %119 = vector.shape_cast %118 : vector<1x64x64xbf16> to vector<64x64xbf16>
    %cst_136 = arith.constant dense<0.000000e+00> : vector<256x64xf32>
    %120 = tpu.matmul %117, %119, %cst_136 {dimension_numbers = #tpu.dot_dimension_numbers<[1], [0], [0], [1], [0, 0, 1, 1], [], []>} : vector<256x64xbf16>, vector<64x64xbf16>, vector<256x64xf32> -> vector<256x64xf32>
    %121 = arith.addf %115, %120 : vector<256x64xf32>
    %c1_137 = arith.constant 1 : index
    %c2_138 = arith.constant 2 : index
    %c1_139 = arith.constant 1 : index
    %c0_140 = arith.constant 0 : index
    %122 = vector.load %arg15[%c1_137, %c2_138, %c1_139, %c0_140] : memref<6x10x10x64xbf16, #tpu.memory_space<vmem>>, vector<4x8x8x64xbf16>
    %123 = vector.shape_cast %122 : vector<4x8x8x64xbf16> to vector<256x64xbf16>
    %c16 = arith.constant 16 : index
    %c0_141 = arith.constant 0 : index
    %c0_142 = arith.constant 0 : index
    %124 = vector.load %arg8[%c16, %c0_141, %c0_142] : memref<27x64x64xbf16, #tpu.memory_space<vmem>>, vector<1x64x64xbf16>
    %125 = vector.shape_cast %124 : vector<1x64x64xbf16> to vector<64x64xbf16>
    %cst_143 = arith.constant dense<0.000000e+00> : vector<256x64xf32>
    %126 = tpu.matmul %123, %125, %cst_143 {dimension_numbers = #tpu.dot_dimension_numbers<[1], [0], [0], [1], [0, 0, 1, 1], [], []>} : vector<256x64xbf16>, vector<64x64xbf16>, vector<256x64xf32> -> vector<256x64xf32>
    %127 = arith.addf %121, %126 : vector<256x64xf32>
    %c1_144 = arith.constant 1 : index
    %c2_145 = arith.constant 2 : index
    %c2_146 = arith.constant 2 : index
    %c0_147 = arith.constant 0 : index
    %128 = vector.load %arg15[%c1_144, %c2_145, %c2_146, %c0_147] : memref<6x10x10x64xbf16, #tpu.memory_space<vmem>>, vector<4x8x8x64xbf16>
    %129 = vector.shape_cast %128 : vector<4x8x8x64xbf16> to vector<256x64xbf16>
    %c17 = arith.constant 17 : index
    %c0_148 = arith.constant 0 : index
    %c0_149 = arith.constant 0 : index
    %130 = vector.load %arg8[%c17, %c0_148, %c0_149] : memref<27x64x64xbf16, #tpu.memory_space<vmem>>, vector<1x64x64xbf16>
    %131 = vector.shape_cast %130 : vector<1x64x64xbf16> to vector<64x64xbf16>
    %cst_150 = arith.constant dense<0.000000e+00> : vector<256x64xf32>
    %132 = tpu.matmul %129, %131, %cst_150 {dimension_numbers = #tpu.dot_dimension_numbers<[1], [0], [0], [1], [0, 0, 1, 1], [], []>} : vector<256x64xbf16>, vector<64x64xbf16>, vector<256x64xf32> -> vector<256x64xf32>
    %133 = arith.addf %127, %132 : vector<256x64xf32>
    %c2_151 = arith.constant 2 : index
    %c0_152 = arith.constant 0 : index
    %c0_153 = arith.constant 0 : index
    %c0_154 = arith.constant 0 : index
    %134 = vector.load %arg15[%c2_151, %c0_152, %c0_153, %c0_154] : memref<6x10x10x64xbf16, #tpu.memory_space<vmem>>, vector<4x8x8x64xbf16>
    %135 = vector.shape_cast %134 : vector<4x8x8x64xbf16> to vector<256x64xbf16>
    %c18 = arith.constant 18 : index
    %c0_155 = arith.constant 0 : index
    %c0_156 = arith.constant 0 : index
    %136 = vector.load %arg8[%c18, %c0_155, %c0_156] : memref<27x64x64xbf16, #tpu.memory_space<vmem>>, vector<1x64x64xbf16>
    %137 = vector.shape_cast %136 : vector<1x64x64xbf16> to vector<64x64xbf16>
    %cst_157 = arith.constant dense<0.000000e+00> : vector<256x64xf32>
    %138 = tpu.matmul %135, %137, %cst_157 {dimension_numbers = #tpu.dot_dimension_numbers<[1], [0], [0], [1], [0, 0, 1, 1], [], []>} : vector<256x64xbf16>, vector<64x64xbf16>, vector<256x64xf32> -> vector<256x64xf32>
    %139 = arith.addf %133, %138 : vector<256x64xf32>
    %c2_158 = arith.constant 2 : index
    %c0_159 = arith.constant 0 : index
    %c1_160 = arith.constant 1 : index
    %c0_161 = arith.constant 0 : index
    %140 = vector.load %arg15[%c2_158, %c0_159, %c1_160, %c0_161] : memref<6x10x10x64xbf16, #tpu.memory_space<vmem>>, vector<4x8x8x64xbf16>
    %141 = vector.shape_cast %140 : vector<4x8x8x64xbf16> to vector<256x64xbf16>
    %c19 = arith.constant 19 : index
    %c0_162 = arith.constant 0 : index
    %c0_163 = arith.constant 0 : index
    %142 = vector.load %arg8[%c19, %c0_162, %c0_163] : memref<27x64x64xbf16, #tpu.memory_space<vmem>>, vector<1x64x64xbf16>
    %143 = vector.shape_cast %142 : vector<1x64x64xbf16> to vector<64x64xbf16>
    %cst_164 = arith.constant dense<0.000000e+00> : vector<256x64xf32>
    %144 = tpu.matmul %141, %143, %cst_164 {dimension_numbers = #tpu.dot_dimension_numbers<[1], [0], [0], [1], [0, 0, 1, 1], [], []>} : vector<256x64xbf16>, vector<64x64xbf16>, vector<256x64xf32> -> vector<256x64xf32>
    %145 = arith.addf %139, %144 : vector<256x64xf32>
    %c2_165 = arith.constant 2 : index
    %c0_166 = arith.constant 0 : index
    %c2_167 = arith.constant 2 : index
    %c0_168 = arith.constant 0 : index
    %146 = vector.load %arg15[%c2_165, %c0_166, %c2_167, %c0_168] : memref<6x10x10x64xbf16, #tpu.memory_space<vmem>>, vector<4x8x8x64xbf16>
    %147 = vector.shape_cast %146 : vector<4x8x8x64xbf16> to vector<256x64xbf16>
    %c20 = arith.constant 20 : index
    %c0_169 = arith.constant 0 : index
    %c0_170 = arith.constant 0 : index
    %148 = vector.load %arg8[%c20, %c0_169, %c0_170] : memref<27x64x64xbf16, #tpu.memory_space<vmem>>, vector<1x64x64xbf16>
    %149 = vector.shape_cast %148 : vector<1x64x64xbf16> to vector<64x64xbf16>
    %cst_171 = arith.constant dense<0.000000e+00> : vector<256x64xf32>
    %150 = tpu.matmul %147, %149, %cst_171 {dimension_numbers = #tpu.dot_dimension_numbers<[1], [0], [0], [1], [0, 0, 1, 1], [], []>} : vector<256x64xbf16>, vector<64x64xbf16>, vector<256x64xf32> -> vector<256x64xf32>
    %151 = arith.addf %145, %150 : vector<256x64xf32>
    %c2_172 = arith.constant 2 : index
    %c1_173 = arith.constant 1 : index
    %c0_174 = arith.constant 0 : index
    %c0_175 = arith.constant 0 : index
    %152 = vector.load %arg15[%c2_172, %c1_173, %c0_174, %c0_175] : memref<6x10x10x64xbf16, #tpu.memory_space<vmem>>, vector<4x8x8x64xbf16>
    %153 = vector.shape_cast %152 : vector<4x8x8x64xbf16> to vector<256x64xbf16>
    %c21 = arith.constant 21 : index
    %c0_176 = arith.constant 0 : index
    %c0_177 = arith.constant 0 : index
    %154 = vector.load %arg8[%c21, %c0_176, %c0_177] : memref<27x64x64xbf16, #tpu.memory_space<vmem>>, vector<1x64x64xbf16>
    %155 = vector.shape_cast %154 : vector<1x64x64xbf16> to vector<64x64xbf16>
    %cst_178 = arith.constant dense<0.000000e+00> : vector<256x64xf32>
    %156 = tpu.matmul %153, %155, %cst_178 {dimension_numbers = #tpu.dot_dimension_numbers<[1], [0], [0], [1], [0, 0, 1, 1], [], []>} : vector<256x64xbf16>, vector<64x64xbf16>, vector<256x64xf32> -> vector<256x64xf32>
    %157 = arith.addf %151, %156 : vector<256x64xf32>
    %c2_179 = arith.constant 2 : index
    %c1_180 = arith.constant 1 : index
    %c1_181 = arith.constant 1 : index
    %c0_182 = arith.constant 0 : index
    %158 = vector.load %arg15[%c2_179, %c1_180, %c1_181, %c0_182] : memref<6x10x10x64xbf16, #tpu.memory_space<vmem>>, vector<4x8x8x64xbf16>
    %159 = vector.shape_cast %158 : vector<4x8x8x64xbf16> to vector<256x64xbf16>
    %c22 = arith.constant 22 : index
    %c0_183 = arith.constant 0 : index
    %c0_184 = arith.constant 0 : index
    %160 = vector.load %arg8[%c22, %c0_183, %c0_184] : memref<27x64x64xbf16, #tpu.memory_space<vmem>>, vector<1x64x64xbf16>
    %161 = vector.shape_cast %160 : vector<1x64x64xbf16> to vector<64x64xbf16>
    %cst_185 = arith.constant dense<0.000000e+00> : vector<256x64xf32>
    %162 = tpu.matmul %159, %161, %cst_185 {dimension_numbers = #tpu.dot_dimension_numbers<[1], [0], [0], [1], [0, 0, 1, 1], [], []>} : vector<256x64xbf16>, vector<64x64xbf16>, vector<256x64xf32> -> vector<256x64xf32>
    %163 = arith.addf %157, %162 : vector<256x64xf32>
    %c2_186 = arith.constant 2 : index
    %c1_187 = arith.constant 1 : index
    %c2_188 = arith.constant 2 : index
    %c0_189 = arith.constant 0 : index
    %164 = vector.load %arg15[%c2_186, %c1_187, %c2_188, %c0_189] : memref<6x10x10x64xbf16, #tpu.memory_space<vmem>>, vector<4x8x8x64xbf16>
    %165 = vector.shape_cast %164 : vector<4x8x8x64xbf16> to vector<256x64xbf16>
    %c23 = arith.constant 23 : index
    %c0_190 = arith.constant 0 : index
    %c0_191 = arith.constant 0 : index
    %166 = vector.load %arg8[%c23, %c0_190, %c0_191] : memref<27x64x64xbf16, #tpu.memory_space<vmem>>, vector<1x64x64xbf16>
    %167 = vector.shape_cast %166 : vector<1x64x64xbf16> to vector<64x64xbf16>
    %cst_192 = arith.constant dense<0.000000e+00> : vector<256x64xf32>
    %168 = tpu.matmul %165, %167, %cst_192 {dimension_numbers = #tpu.dot_dimension_numbers<[1], [0], [0], [1], [0, 0, 1, 1], [], []>} : vector<256x64xbf16>, vector<64x64xbf16>, vector<256x64xf32> -> vector<256x64xf32>
    %169 = arith.addf %163, %168 : vector<256x64xf32>
    %c2_193 = arith.constant 2 : index
    %c2_194 = arith.constant 2 : index
    %c0_195 = arith.constant 0 : index
    %c0_196 = arith.constant 0 : index
    %170 = vector.load %arg15[%c2_193, %c2_194, %c0_195, %c0_196] : memref<6x10x10x64xbf16, #tpu.memory_space<vmem>>, vector<4x8x8x64xbf16>
    %171 = vector.shape_cast %170 : vector<4x8x8x64xbf16> to vector<256x64xbf16>
    %c24 = arith.constant 24 : index
    %c0_197 = arith.constant 0 : index
    %c0_198 = arith.constant 0 : index
    %172 = vector.load %arg8[%c24, %c0_197, %c0_198] : memref<27x64x64xbf16, #tpu.memory_space<vmem>>, vector<1x64x64xbf16>
    %173 = vector.shape_cast %172 : vector<1x64x64xbf16> to vector<64x64xbf16>
    %cst_199 = arith.constant dense<0.000000e+00> : vector<256x64xf32>
    %174 = tpu.matmul %171, %173, %cst_199 {dimension_numbers = #tpu.dot_dimension_numbers<[1], [0], [0], [1], [0, 0, 1, 1], [], []>} : vector<256x64xbf16>, vector<64x64xbf16>, vector<256x64xf32> -> vector<256x64xf32>
    %175 = arith.addf %169, %174 : vector<256x64xf32>
    %c2_200 = arith.constant 2 : index
    %c2_201 = arith.constant 2 : index
    %c1_202 = arith.constant 1 : index
    %c0_203 = arith.constant 0 : index
    %176 = vector.load %arg15[%c2_200, %c2_201, %c1_202, %c0_203] : memref<6x10x10x64xbf16, #tpu.memory_space<vmem>>, vector<4x8x8x64xbf16>
    %177 = vector.shape_cast %176 : vector<4x8x8x64xbf16> to vector<256x64xbf16>
    %c25 = arith.constant 25 : index
    %c0_204 = arith.constant 0 : index
    %c0_205 = arith.constant 0 : index
    %178 = vector.load %arg8[%c25, %c0_204, %c0_205] : memref<27x64x64xbf16, #tpu.memory_space<vmem>>, vector<1x64x64xbf16>
    %179 = vector.shape_cast %178 : vector<1x64x64xbf16> to vector<64x64xbf16>
    %cst_206 = arith.constant dense<0.000000e+00> : vector<256x64xf32>
    %180 = tpu.matmul %177, %179, %cst_206 {dimension_numbers = #tpu.dot_dimension_numbers<[1], [0], [0], [1], [0, 0, 1, 1], [], []>} : vector<256x64xbf16>, vector<64x64xbf16>, vector<256x64xf32> -> vector<256x64xf32>
    %181 = arith.addf %175, %180 : vector<256x64xf32>
    %c2_207 = arith.constant 2 : index
    %c2_208 = arith.constant 2 : index
    %c2_209 = arith.constant 2 : index
    %c0_210 = arith.constant 0 : index
    %182 = vector.load %arg15[%c2_207, %c2_208, %c2_209, %c0_210] : memref<6x10x10x64xbf16, #tpu.memory_space<vmem>>, vector<4x8x8x64xbf16>
    %183 = vector.shape_cast %182 : vector<4x8x8x64xbf16> to vector<256x64xbf16>
    %c26 = arith.constant 26 : index
    %c0_211 = arith.constant 0 : index
    %c0_212 = arith.constant 0 : index
    %184 = vector.load %arg8[%c26, %c0_211, %c0_212] : memref<27x64x64xbf16, #tpu.memory_space<vmem>>, vector<1x64x64xbf16>
    %185 = vector.shape_cast %184 : vector<1x64x64xbf16> to vector<64x64xbf16>
    %cst_213 = arith.constant dense<0.000000e+00> : vector<256x64xf32>
    %186 = tpu.matmul %183, %185, %cst_213 {dimension_numbers = #tpu.dot_dimension_numbers<[1], [0], [0], [1], [0, 0, 1, 1], [], []>} : vector<256x64xbf16>, vector<64x64xbf16>, vector<256x64xf32> -> vector<256x64xf32>
    %187 = arith.addf %181, %186 : vector<256x64xf32>
    %c0_214 = arith.constant 0 : index
    %c0_215 = arith.constant 0 : index
    %188 = vector.load %arg9[%c0_214, %c0_215] : memref<1x64xf32, #tpu.memory_space<vmem>>, vector<1x64xf32>
    %189 = vector.broadcast %188 : vector<1x64xf32> to vector<256x64xf32>
    %190 = arith.mulf %187, %189 : vector<256x64xf32>
    %c0_216 = arith.constant 0 : index
    %c0_217 = arith.constant 0 : index
    %191 = vector.load %arg10[%c0_216, %c0_217] : memref<1x64xf32, #tpu.memory_space<vmem>>, vector<1x64xf32>
    %192 = vector.broadcast %191 : vector<1x64xf32> to vector<256x64xf32>
    %193 = arith.addf %190, %192 : vector<256x64xf32>
    %cst_218 = arith.constant 0.000000e+00 : f32
    %194 = vector.broadcast %cst_218 : f32 to vector<256x64xf32>
    %195 = arith.maximumf %193, %194 : vector<256x64xf32>
    %196 = arith.truncf %195 : vector<256x64xf32> to vector<256x64xbf16>
    %c0_219 = arith.constant 0 : index
    %c0_220 = arith.constant 0 : index
    %197 = vector.load %arg11[%c0_219, %c0_220] : memref<64x128xbf16, #tpu.memory_space<vmem>>, vector<64x128xbf16>
    %cst_221 = arith.constant dense<0.000000e+00> : vector<256x128xf32>
    %198 = tpu.matmul %196, %197, %cst_221 {dimension_numbers = #tpu.dot_dimension_numbers<[1], [0], [0], [1], [0, 0, 1, 1], [], []>} : vector<256x64xbf16>, vector<64x128xbf16>, vector<256x128xf32> -> vector<256x128xf32>
    %c0_222 = arith.constant 0 : index
    %c0_223 = arith.constant 0 : index
    %199 = vector.load %arg12[%c0_222, %c0_223] : memref<1x128xf32, #tpu.memory_space<vmem>>, vector<1x128xf32>
    %200 = vector.broadcast %199 : vector<1x128xf32> to vector<256x128xf32>
    %201 = arith.mulf %198, %200 : vector<256x128xf32>
    %c0_224 = arith.constant 0 : index
    %c0_225 = arith.constant 0 : index
    %202 = vector.load %arg13[%c0_224, %c0_225] : memref<1x128xf32, #tpu.memory_space<vmem>>, vector<1x128xf32>
    %203 = vector.broadcast %202 : vector<1x128xf32> to vector<256x128xf32>
    %204 = arith.addf %201, %203 : vector<256x128xf32>
    %205 = vector.shape_cast %6 : vector<4x8x8x128xf32> to vector<256x128xf32>
    %206 = arith.addf %204, %205 : vector<256x128xf32>
    %cst_226 = arith.constant 0.000000e+00 : f32
    %207 = vector.broadcast %cst_226 : f32 to vector<256x128xf32>
    %208 = arith.maximumf %206, %207 : vector<256x128xf32>
    %209 = vector.shape_cast %208 : vector<256x128xf32> to vector<1x4x8x8x128xf32>
    %c0_227 = arith.constant 0 : index
    %c0_228 = arith.constant 0 : index
    %c0_229 = arith.constant 0 : index
    %c0_230 = arith.constant 0 : index
    %c0_231 = arith.constant 0 : index
    %210 = vector.load %arg14[%c0_227, %c0_228, %c0_229, %c0_230, %c0_231] : memref<1x4x8x8x128xf32, #tpu.memory_space<vmem>>, vector<1x4x8x8x128xf32>
    tpu.vector_store %arg14[%c0_227, %c0_228, %c0_229, %c0_230, %c0_231], %209 {strides = array<i32>} : memref<1x4x8x8x128xf32, #tpu.memory_space<vmem>>, vector<1x4x8x8x128xf32>,
    return
  }
  func.func @transform_0(%arg0: i32, %arg1: i32) -> (i32, i32, i32, i32, i32) {
    %c0_i32 = arith.constant 0 : i32
    %c0_i32_0 = arith.constant 0 : i32
    %c0_i32_1 = arith.constant 0 : i32
    %c0_i32_2 = arith.constant 0 : i32
    return %arg0, %arg1, %c0_i32, %c0_i32_0, %c0_i32_1 : i32, i32, i32, i32, i32
  }
  func.func @transform_1(%arg0: i32, %arg1: i32) -> (i32, i32, i32, i32, i32) {
    %c4_i32 = arith.constant 4 : i32
    %0 = arith.muli %arg1, %c4_i32 : i32
    %c1_i32 = arith.constant 1 : i32
    %1 = arith.subi %0, %c1_i32 : i32
    %c0_i32 = arith.constant 0 : i32
    %2 = arith.maxsi %1, %c0_i32 : i32
    %c0_i32_0 = arith.constant 0 : i32
    %c0_i32_1 = arith.constant 0 : i32
    %c0_i32_2 = arith.constant 0 : i32
    %c0_i32_3 = arith.constant 0 : i32
    return %arg0, %2, %c0_i32_0, %c0_i32_1, %c0_i32_2 : i32, i32, i32, i32, i32
  }
  func.func @transform_2(%arg0: i32, %arg1: i32) -> (i32, i32, i32, i32, i32) {
    %c1_i32 = arith.constant 1 : i32
    %0 = arith.addi %arg1, %c1_i32 : i32
    %c4_i32 = arith.constant 4 : i32
    %1 = arith.muli %0, %c4_i32 : i32
    %c3_i32 = arith.constant 3 : i32
    %2 = arith.minsi %1, %c3_i32 : i32
    %c0_i32 = arith.constant 0 : i32
    %c0_i32_0 = arith.constant 0 : i32
    %c0_i32_1 = arith.constant 0 : i32
    %c0_i32_2 = arith.constant 0 : i32
    return %arg0, %2, %c0_i32, %c0_i32_0, %c0_i32_1 : i32, i32, i32, i32, i32
  }
  func.func @transform_3(%arg0: i32, %arg1: i32) -> (i32, i32) {
    %c0_i32 = arith.constant 0 : i32
    %c0_i32_0 = arith.constant 0 : i32
    %c0_i32_1 = arith.constant 0 : i32
    return %c0_i32, %c0_i32_0 : i32, i32
  }
  func.func @transform_4(%arg0: i32, %arg1: i32) -> (i32, i32) {
    %c0_i32 = arith.constant 0 : i32
    %c0_i32_0 = arith.constant 0 : i32
    %c0_i32_1 = arith.constant 0 : i32
    return %c0_i32, %c0_i32_0 : i32, i32
  }
  func.func @transform_5(%arg0: i32, %arg1: i32) -> (i32, i32) {
    %c0_i32 = arith.constant 0 : i32
    %c0_i32_0 = arith.constant 0 : i32
    %c0_i32_1 = arith.constant 0 : i32
    return %c0_i32, %c0_i32_0 : i32, i32
  }
  func.func @transform_6(%arg0: i32, %arg1: i32) -> (i32, i32, i32) {
    %c0_i32 = arith.constant 0 : i32
    %c0_i32_0 = arith.constant 0 : i32
    %c0_i32_1 = arith.constant 0 : i32
    %c0_i32_2 = arith.constant 0 : i32
    return %c0_i32, %c0_i32_0, %c0_i32_1 : i32, i32, i32
  }
  func.func @transform_7(%arg0: i32, %arg1: i32) -> (i32, i32) {
    %c0_i32 = arith.constant 0 : i32
    %c0_i32_0 = arith.constant 0 : i32
    %c0_i32_1 = arith.constant 0 : i32
    return %c0_i32, %c0_i32_0 : i32, i32
  }
  func.func @transform_8(%arg0: i32, %arg1: i32) -> (i32, i32) {
    %c0_i32 = arith.constant 0 : i32
    %c0_i32_0 = arith.constant 0 : i32
    %c0_i32_1 = arith.constant 0 : i32
    return %c0_i32, %c0_i32_0 : i32, i32
  }
  func.func @transform_9(%arg0: i32, %arg1: i32) -> (i32, i32) {
    %c0_i32 = arith.constant 0 : i32
    %c0_i32_0 = arith.constant 0 : i32
    %c0_i32_1 = arith.constant 0 : i32
    return %c0_i32, %c0_i32_0 : i32, i32
  }
  func.func @transform_10(%arg0: i32, %arg1: i32) -> (i32, i32) {
    %c0_i32 = arith.constant 0 : i32
    %c0_i32_0 = arith.constant 0 : i32
    %c0_i32_1 = arith.constant 0 : i32
    return %c0_i32, %c0_i32_0 : i32, i32
  }
  func.func @transform_11(%arg0: i32, %arg1: i32) -> (i32, i32) {
    %c0_i32 = arith.constant 0 : i32
    %c0_i32_0 = arith.constant 0 : i32
    %c0_i32_1 = arith.constant 0 : i32
    return %c0_i32, %c0_i32_0 : i32, i32
  }
  func.func @transform_12(%arg0: i32, %arg1: i32) -> (i32, i32, i32, i32, i32) {
    %c0_i32 = arith.constant 0 : i32
    %c0_i32_0 = arith.constant 0 : i32
    %c0_i32_1 = arith.constant 0 : i32
    %c0_i32_2 = arith.constant 0 : i32
    return %arg0, %arg1, %c0_i32, %c0_i32_0, %c0_i32_1 : i32, i32, i32, i32, i32
  }
}

</mosaic_0001>

<bundles_post_ra>
// kernel: bottleneck_forward.1
= control target key start
LH: loop header
LB: loop body
LE: loop exit
PB: predicated region body
PF: predicated region fallthrough
CT: control target
= control target key end

     0   :  { %17 = vsyncpa [#allocation4], 0  ;;  %s27922_s0 = inlined_call_operand.vmem [shape: f32[2,4,8,8,128], index: 0, kind: input, shape index: {}, may-alias: {0,1,2}]   ;;  %s27923_s1 = inlined_call_operand.vmem [shape: f32[2,4,8,8,128], index: 1, kind: input, shape index: {}, may-alias: {0,1,2}]   ;;  %s27924_s2 = inlined_call_operand.vmem [shape: f32[2,4,8,8,128], index: 2, kind: input, shape index: {}, may-alias: {0,1,2}]   ;;  %s27925_s3 = inlined_call_operand.vmem [shape: bf16[128,64], index: 3, kind: input, shape index: {}]   ;;  %s27926_s4 = inlined_call_operand.vmem [shape: f32[1,64], index: 4, kind: input, shape index: {}]   ;;  %s27927_s5 = inlined_call_operand.vmem [shape: f32[1,64], index: 5, kind: input, shape index: {}]   ;;  %s27928_s6 = inlined_call_operand.vmem [shape: bf16[27,64,64], index: 6, kind: input, shape index: {}]   ;;  %s27929_s7 = inlined_call_operand.vmem [shape: f32[1,64], index: 7, kind: input, shape index: {}]   ;;  %s27930_s8 = inlined_call_operand.vmem [shape: f32[1,64], index: 8, kind: input, shape index: {}]   ;;  %s27931_s9 = inlined_call_operand.vmem [shape: bf16[64,128], index: 9, kind: input, shape index: {}]   ;;  %s27932_s10 = inlined_call_operand.vmem [shape: f32[1,128], index: 10, kind: input, shape index: {}]   ;;  %s27933_s11 = inlined_call_operand.vmem [shape: f32[1,128], index: 11, kind: input, shape index: {}]   ;;  %s27934_s12 = inlined_call_operand.hbm [shape: f32[2,4,8,8,128], index: 12, kind: output, shape index: {}]  }
   0x1   :  { %19 = vsyncpa [#allocation4 + $0x1], 0  ;;  %s23615_s19 = smov 0   ;;  %s23617_s20 = smov 0  }
   0x2   :  { %s23619_s21 = smov 0   ;;  %s23621_s22 = smov 0  }
   0x3   :  { %s23623_s23 = smov 0   ;;  %s23625_s24 = smov 0  }
   0x4 LB: > { %s18700_s25 = sadd.s32 4294967295, %s23544_s24   ;;  %s18701_s26 = sadd.s32 4294967294, %s23544_s24   ;;  %s23544_s24 = sphi %s23625_s24, %s25_s24   ;;  %s23540_s23 = sphi %s23623_s23, %s28009_s23   ;;  %s23536_s22 = sphi %s23621_s22, %s28008_s22   ;;  %s23532_s21 = sphi %s23619_s21, %s28007_s21   ;;  %s23528_s20 = sphi %s23617_s20, %s28006_s20   ;;  %s23524_s19 = sphi %s23615_s19, %s28005_s19  }
   0x5   : > { %s37_s27 = sadd.s32 1, %s23540_s23  ;;  %s335_s28 = sadd.s32 1, %s23532_s21 }
   0x6   : > { %p39_p0 = scmp.ge.s32.totalorder %s37_s27, 2  ;;  %p345_p1 = scmp.ne.s32.totalorder %s23532_s21, %s23528_s20 }
   0x7   : > { %p346_p2 = scmp.eq.s32.totalorder %s18700_s25, 1  ;;  %p351_p3 = scmp.ne.s32.totalorder %s23528_s20, %s23524_s19 }
   0x8   : > { %s28011_s27 = smov (%p39_p0, %s37_s27), 0  ;;  %p352_p5 = scmp.eq.s32.totalorder %s18701_s26, 1 }
   0x9   : > { %p23655_p4 = por %p346_p2, %p345_p1  ;;  %s330_s1 = ssub.s32 %s23540_s23, %s28011_s27 }
   0xa   : > { %p18704_p6 = scmp.ge.s32.totalorder %s23544_s24, 1  ;;  %p333_p7 = scmp.eq.s32.totalorder %s330_s1, 0 }
   0xb   : > { %p23662_p8 = por %p352_p5, %p351_p3  ;;  %p451_p9 = scmp.lt.s32.totalorder %s23544_s24, 3 }
   0xc   : > { %s23668_s2 = scalar_select %p333_p7, %s23532_s21, %s335_s28  }
   0xd   : > { %p452_p10 = pnand %p18704_p6, %p451_p9 }
   0xf   : > { %455 = sbr.rel (%p452_p10) target bundleno = 1859 (0x743), region = 68 }
  0x16   : > { %v22970_v0 = vld [vmem:[%s27925_s3] sm:$0xff]   ;;  %p525_p11 = scmp.lt.s32.totalorder %s23536_s22, 1  ;;  %v23677_v1 = vld [vmem:[%s27925_s3 + $0x8] sm:$0xff]   ;;  %vm589_vm0 = vcmask 519168   ;;  %v23686_v2 = vld [vmem:[%s27925_s3 + $0x10] sm:$0xff]   ;;  %v23546_v3 = vmov 0  }
  0x17   : > { %20904 = vmatprep.subr.bf16.mxu0 %v22970_v0  ;;  %617 = vst.msk [vmem:[#allocation2 + $0x68] sm:$0xf] %vm589_vm0, %v23546_v3  ;;  %590 = vst.msk [vmem:[#allocation2] sm:$0xf] %vm589_vm0, %v23546_v3  ;;  %vm591_vm1 = vcmask 516096   ;;  %v22973_v4 = vld [vmem:[%s27925_s3 + $0x18] sm:$0xff]  }
  0x18   : > { %s23680_s17 = scalar_select %p525_p11, %s23536_s22, 1  ;;  %20905 = vmatpush3.bf16.msra.mxu0 %v22970_v0  ;;  %593 = vst.msk [vmem:[#allocation2 + $0x8] sm:$0xf] %vm589_vm0, %v23546_v3  ;;  %595 = vst.msk [vmem:[#allocation2 + $0x10] sm:$0xf] %vm589_vm0, %v23546_v3  ;;  %v22974_v8 = vld [vmem:[%s27925_s3 + $0x20] sm:$0xff]  }
  0x19   : > { %20906 = vmatprep.subr.bf16.mxu0 %v23677_v1  ;;  %597 = vst.msk [vmem:[#allocation2 + $0x18] sm:$0xf] %vm589_vm0, %v23546_v3  ;;  %599 = vst.msk [vmem:[#allocation2 + $0x20] sm:$0xf] %vm589_vm0, %v23546_v3  ;;  %v22975_v9 = vld [vmem:[%s27925_s3 + $0x28] sm:$0xff]   ;;  %v22976_v10 = vld [vmem:[%s27925_s3 + $0x30] sm:$0xff]  }
  0x1a   : > { %s20267_s26 = sshll.u32 %s23680_s17, 8  ;;  %601 = vst.msk [vmem:[#allocation2 + $0x28] sm:$0xf] %vm589_vm0, %v23546_v3  ;;  %603 = vst.msk [vmem:[#allocation2 + $0x30] sm:$0xf] %vm589_vm0, %v23546_v3  ;;  %v22977_v11 = vld [vmem:[%s27925_s3 + $0x38] sm:$0xff]  }
  0x1b   : > { %605 = vst.msk [vmem:[#allocation2 + $0x38] sm:$0xf] %vm589_vm0, %v23546_v3  ;;  %607 = vst.msk [vmem:[#allocation2 + $0x40] sm:$0xf] %vm589_vm0, %v23546_v3  ;;  %s23814_s13 = scalar_lea.vmem %s27922_s0, %s20267_s26  ;;  %v22978_v57 = vld [vmem:[%s27928_s6 + $0x20] sm:$0xff]   ;;  %v22979_v58 = vld [vmem:[%s27928_s6 + $0x28] sm:$0xff]  }
  0x1c   : > { %609 = vst.msk [vmem:[#allocation2 + $0x48] sm:$0xf] %vm589_vm0, %v23546_v3  ;;  %611 = vst.msk [vmem:[#allocation2 + $0x50] sm:$0xf] %vm589_vm0, %v23546_v3  ;;  %20907 = vmatpush3.bf16.msra.mxu0 %v23677_v1  ;;  %v711_v5 = vld [vmem:[%s23814_s13] sm:$0xff]  ;;  %v712_v6 = vld [vmem:[%s23814_s13 + $0x8] sm:$0xff] }
  0x1d   : > { %613 = vst.msk [vmem:[#allocation2 + $0x58] sm:$0xf] %vm589_vm0, %v23546_v3  ;;  %615 = vst.msk [vmem:[#allocation2 + $0x60] sm:$0xf] %vm589_vm0, %v23546_v3  ;;  %20908 = vmatprep.subr.bf16.mxu0 %v23686_v2  ;;  %v743_v7 = vpack.c.bf16 %v712_v6, %v711_v5  ;;  %v713_v12 = vld [vmem:[%s23814_s13 + $0x10] sm:$0xff]  ;;  %v714_v13 = vld [vmem:[%s23814_s13 + $0x18] sm:$0xff] }
  0x1e   : > { %619 = vst.msk [vmem:[#allocation2 + $0x70] sm:$0xf] %vm589_vm0, %v23546_v3  ;;  %621 = vst.msk [vmem:[#allocation2 + $0x78] sm:$0xf] %vm589_vm0, %v23546_v3  ;;  %v715_v14 = vld [vmem:[%s23814_s13 + $0x20] sm:$0xff]  ;;  %v716_v15 = vld [vmem:[%s23814_s13 + $0x28] sm:$0xff]  ;;  %v744_v16 = vpack.c.bf16 %v714_v13, %v713_v12 }
  0x1f   : > { %623 = vst.msk [vmem:[#allocation2 + $0x80] sm:$0xf] %vm589_vm0, %v23546_v3  ;;  %625 = vst.msk [vmem:[#allocation2 + $0x88] sm:$0xf] %vm589_vm0, %v23546_v3  ;;  %20920 = vmatprep.mubr.bf16.mxu0 %v743_v7  ;;  %v745_v17 = vpack.c.bf16 %v716_v15, %v715_v14  ;;  %v717_v18 = vld [vmem:[%s23814_s13 + $0x30] sm:$0xff]  ;;  %v718_v19 = vld [vmem:[%s23814_s13 + $0x38] sm:$0xff] }
  0x20   : > { %627 = vst.msk [vmem:[#allocation2 + $0x90] sm:$0xf] %vm589_vm0, %v23546_v3  ;;  %629 = vst.msk [vmem:[#allocation2 + $0x98] sm:$0xf] %vm589_vm0, %v23546_v3  ;;  %20909 = vmatpush3.bf16.msra.mxu0 %v23686_v2  ;;  %v719_v20 = vld [vmem:[%s23814_s13 + $0x40] sm:$0xff]  ;;  %v720_v21 = vld [vmem:[%s23814_s13 + $0x48] sm:$0xff]  ;;  %v746_v22 = vpack.c.bf16 %v718_v19, %v717_v18 }
  0x21   : > { %631 = vst.msk [vmem:[#allocation2 + $0xa0] sm:$0xf] %vm589_vm0, %v23546_v3  ;;  %633 = vst.msk [vmem:[#allocation2 + $0xa8] sm:$0xf] %vm589_vm0, %v23546_v3  ;;  %20910 = vmatprep.subr.bf16.mxu0 %v22973_v4  ;;  %v747_v23 = vpack.c.bf16 %v720_v21, %v719_v20  ;;  %v721_v24 = vld [vmem:[%s23814_s13 + $0x50] sm:$0xff]  ;;  %v722_v25 = vld [vmem:[%s23814_s13 + $0x58] sm:$0xff] }
  0x22   : > { %635 = vst.msk [vmem:[#allocation2 + $0xb0] sm:$0xf] %vm589_vm0, %v23546_v3  ;;  %637 = vst.msk [vmem:[#allocation2 + $0xb8] sm:$0xf] %vm589_vm0, %v23546_v3  ;;  %v723_v26 = vld [vmem:[%s23814_s13 + $0x60] sm:$0xff]  ;;  %v724_v27 = vld [vmem:[%s23814_s13 + $0x68] sm:$0xff]  ;;  %v748_v28 = vpack.c.bf16 %v722_v25, %v721_v24 }
  0x23   : > { %639 = vst.msk [vmem:[#allocation2 + $0xc0] sm:$0xf] %vm589_vm0, %v23546_v3  ;;  %641 = vst.msk [vmem:[#allocation2 + $0xc8] sm:$0xf] %vm589_vm0, %v23546_v3  ;;  %v749_v29 = vpack.c.bf16 %v724_v27, %v723_v26  ;;  %v725_v30 = vld [vmem:[%s23814_s13 + $0x70] sm:$0xff]  ;;  %v726_v31 = vld [vmem:[%s23814_s13 + $0x78] sm:$0xff] }
  0x24   : > { %643 = vst.msk [vmem:[#allocation2 + $0xd0] sm:$0xf] %vm589_vm0, %v23546_v3  ;;  %645 = vst.msk [vmem:[#allocation2 + $0xd8] sm:$0xf] %vm589_vm0, %v23546_v3  ;;  %20911 = vmatpush3.bf16.msra.mxu0 %v22973_v4  ;;  %v727_v32 = vld [vmem:[%s23814_s13 + $0x80] sm:$0xff]  ;;  %v728_v33 = vld [vmem:[%s23814_s13 + $0x88] sm:$0xff]  ;;  %v750_v34 = vpack.c.bf16 %v726_v31, %v725_v30 }
  0x25   : > { %647 = vst.msk [vmem:[#allocation2 + $0xe0] sm:$0xf] %vm589_vm0, %v23546_v3  ;;  %649 = vst.msk [vmem:[#allocation2 + $0xe8] sm:$0xf] %vm589_vm0, %v23546_v3  ;;  %20912 = vmatprep.subr.bf16.mxu0 %v22974_v8  ;;  %v751_v35 = vpack.c.bf16 %v728_v33, %v727_v32  ;;  %v729_v36 = vld [vmem:[%s23814_s13 + $0x90] sm:$0xff]  ;;  %v730_v37 = vld [vmem:[%s23814_s13 + $0x98] sm:$0xff] }
  0x26   : > { %651 = vst.msk [vmem:[#allocation2 + $0xf0] sm:$0xf] %vm589_vm0, %v23546_v3  ;;  %653 = vst.msk [vmem:[#allocation2 + $0xf8] sm:$0xf] %vm589_vm0, %v23546_v3  ;;  %v731_v38 = vld [vmem:[%s23814_s13 + $0xa0] sm:$0xff]  ;;  %v732_v39 = vld [vmem:[%s23814_s13 + $0xa8] sm:$0xff]  ;;  %v752_v40 = vpack.c.bf16 %v730_v37, %v729_v36 }
  0x27   : > { %655 = vst.msk [vmem:[#allocation2 + $0x100] sm:$0xf] %vm589_vm0, %v23546_v3  ;;  %657 = vst.msk [vmem:[#allocation2 + $0x108] sm:$0xf] %vm589_vm0, %v23546_v3  ;;  %v753_v41 = vpack.c.bf16 %v732_v39, %v731_v38  ;;  %v733_v42 = vld [vmem:[%s23814_s13 + $0xb0] sm:$0xff]  ;;  %v734_v43 = vld [vmem:[%s23814_s13 + $0xb8] sm:$0xff] }
  0x28   : > { %659 = vst.msk [vmem:[#allocation2 + $0x110] sm:$0xf] %vm589_vm0, %v23546_v3  ;;  %661 = vst.msk [vmem:[#allocation2 + $0x118] sm:$0xf] %vm589_vm0, %v23546_v3  ;;  %20913 = vmatpush3.bf16.msra.mxu0 %v22974_v8  ;;  %v735_v44 = vld [vmem:[%s23814_s13 + $0xc0] sm:$0xff]  ;;  %v736_v45 = vld [vmem:[%s23814_s13 + $0xc8] sm:$0xff]  ;;  %v754_v46 = vpack.c.bf16 %v734_v43, %v733_v42 }
  0x29   : > { %663 = vst.msk [vmem:[#allocation2 + $0x120] sm:$0xf] %vm589_vm0, %v23546_v3  ;;  %665 = vst.msk [vmem:[#allocation2 + $0x128] sm:$0xf] %vm589_vm0, %v23546_v3  ;;  %20914 = vmatprep.subr.bf16.mxu0 %v22975_v9  ;;  %v755_v47 = vpack.c.bf16 %v736_v45, %v735_v44  ;;  %v737_v48 = vld [vmem:[%s23814_s13 + $0xd0] sm:$0xff]  ;;  %v738_v49 = vld [vmem:[%s23814_s13 + $0xd8] sm:$0xff] }
  0x2a   : > { %667 = vst.msk [vmem:[#allocation2 + $0x130] sm:$0xf] %vm589_vm0, %v23546_v3  ;;  %669 = vst.msk [vmem:[#allocation2 + $0x138] sm:$0xf] %vm589_vm0, %v23546_v3  ;;  %v739_v50 = vld [vmem:[%s23814_s13 + $0xe0] sm:$0xff]  ;;  %v740_v51 = vld [vmem:[%s23814_s13 + $0xe8] sm:$0xff]  ;;  %v756_v52 = vpack.c.bf16 %v738_v49, %v737_v48 }
  0x2b   : > { %671 = vst.msk [vmem:[#allocation2 + $0x140] sm:$0xf] %vm589_vm0, %v23546_v3  ;;  %673 = vst.msk [vmem:[#allocation2 + $0x148] sm:$0xf] %vm589_vm0, %v23546_v3  ;;  %v757_v53 = vpack.c.bf16 %v740_v51, %v739_v50  ;;  %v741_v54 = vld [vmem:[%s23814_s13 + $0xf0] sm:$0xff]  ;;  %v742_v55 = vld [vmem:[%s23814_s13 + $0xf8] sm:$0xff] }
  0x2c   : > { %675 = vst.msk [vmem:[#allocation2 + $0x150] sm:$0xf] %vm589_vm0, %v23546_v3  ;;  %677 = vst.msk [vmem:[#allocation2 + $0x158] sm:$0xf] %vm589_vm0, %v23546_v3  ;;  %20915 = vmatpush3.bf16.msra.mxu0 %v22975_v9  ;;  %v758_v56 = vpack.c.bf16 %v742_v55, %v741_v54  ;;  %v2207_v59 = vld [vmem:[#allocation2] sm:$0xf] }
  0x2d   : > { %679 = vst.msk [vmem:[#allocation2 + $0x160] sm:$0xf] %vm589_vm0, %v23546_v3  ;;  %681 = vst.msk [vmem:[#allocation2 + $0x168] sm:$0xf] %vm589_vm0, %v23546_v3  ;;  %20916 = vmatprep.subr.bf16.mxu0 %v22976_v10  ;;  %v2208_v60 = vld [vmem:[#allocation2 + $0x8] sm:$0xf] }
  0x2e   : > { %683 = vst.msk [vmem:[#allocation2 + $0x170] sm:$0xf] %vm589_vm0, %v23546_v3  ;;  %685 = vst.msk [vmem:[#allocation2 + $0x178] sm:$0xf] %vm589_vm0, %v23546_v3  ;;  %v22980_v61 = vld [vmem:[%s27928_s6 + $0x30] sm:$0xff]   ;;  %v2283_v62 = vshrl.u32 %v2207_v59, 16 }
  0x2f   : > { %687 = vst.msk [vmem:[#allocation2 + $0x180] sm:$0xf] %vm589_vm0, %v23546_v3  ;;  %689 = vst.msk [vmem:[#allocation2 + $0x188] sm:$0xf] %vm589_vm0, %v23546_v3  ;;  %v2286_v63 = vshll.u32 %v2207_v59, 16  ;;  %v2297_v0 = vshrl.u32 %v2208_v60, 16 }
  0x30   : > { %691 = vst.msk [vmem:[#allocation2 + $0x190] sm:$0xf] %vm589_vm0, %v23546_v3  ;;  %693 = vst.msk [vmem:[#allocation2 + $0x198] sm:$0xf] %vm589_vm0, %v23546_v3  ;;  %20917 = vmatpush3.bf16.msra.mxu0 %v22976_v10  ;;  %v2300_v1 = vshll.u32 %v2208_v60, 16  ;;  %v22981_v19 = vld [vmem:[%s27928_s6 + $0x38] sm:$0xff]  }
  0x31   : > { %695 = vst.msk [vmem:[#allocation2 + $0x1a0] sm:$0xf] %vm589_vm0, %v23546_v3  ;;  %697 = vst.msk [vmem:[#allocation2 + $0x1a8] sm:$0xf] %vm589_vm0, %v23546_v3  ;;  %20918 = vmatprep.subr.bf16.mxu0 %v22977_v11  ;;  %v2209_v2 = vld [vmem:[#allocation2 + $0x10] sm:$0xf] }
  0x32   : > { %699 = vst.msk [vmem:[#allocation2 + $0x1b0] sm:$0xf] %vm589_vm0, %v23546_v3  ;;  %701 = vst.msk [vmem:[#allocation2 + $0x1b8] sm:$0xf] %vm589_vm0, %v23546_v3  ;;  %v2288_v4 = vrot.slane %v2286_v63, 5  ;;  %v2299_v5 = vrot.slane %v2297_v0, 4 }
  0x33   : > { %703 = vst.msk [vmem:[#allocation2 + $0x1c0] sm:$0xf] %vm589_vm0, %v23546_v3  ;;  %705 = vst.msk [vmem:[#allocation2 + $0x1c8] sm:$0xf] %vm589_vm0, %v23546_v3  ;;  %v2302_v6 = vrot.slane %v2300_v1, 5  ;;  %v2311_v9 = vshrl.u32 %v2209_v2, 16 }
  0x34   : > { %707 = vst.msk [vmem:[#allocation2 + $0x1d0] sm:$0xf] %vm589_vm0, %v23546_v3  ;;  %709 = vst.msk [vmem:[#allocation2 + $0x1d8] sm:$0xf] %vm589_vm0, %v23546_v3  ;;  %20919 = vmatpush3.bf16.msra.mxu0 %v22977_v11  ;;  %v2314_v10 = vshll.u32 %v2209_v2, 16  ;;  %vm2811_vm5 = vcmask 523264  }
  0x35   : > { %618 = vst.msk [vmem:[#allocation2 + $0x6c] sm:$0x1] %vm591_vm1, %v23546_v3  ;;  %592 = vst.msk [vmem:[#allocation2 + $0x4] sm:$0x1] %vm591_vm1, %v23546_v3  ;;  %20952 = vmatprep.subr.bf16.mxu0 %v22978_v57  ;;  %v2303_v13 = vor.u32 %v2302_v6, %v2299_v5  ;;  %v2210_v15 = vld [vmem:[#allocation2 + $0x18] sm:$0xf] }
  0x36   : > { %594 = vst.msk [vmem:[#allocation2 + $0xc] sm:$0x1] %vm591_vm1, %v23546_v3  ;;  %596 = vst.msk [vmem:[#allocation2 + $0x14] sm:$0x1] %vm591_vm1, %v23546_v3  ;;  %v2316_v18 = vrot.slane %v2314_v10, 5  ;;  %v2328_v30 = vshll.u32 %v2210_v15, 16 }
  0x37   : > { %598 = vst.msk [vmem:[#allocation2 + $0x1c] sm:$0x1] %vm591_vm1, %v23546_v3  ;;  %600 = vst.msk [vmem:[#allocation2 + $0x24] sm:$0x1] %vm591_vm1, %v23546_v3  ;;  %20921 = vmatmul.mubr.bf16.vlgmr.msra.gmra.mrb[0].mxu0 %v744_v16  ;;  %vm2279_vm2 = vsmask.f32 3328 }
  0x38   : > { %602 = vst.msk [vmem:[#allocation2 + $0x2c] sm:$0x1] %vm591_vm1, %v23546_v3  ;;  %604 = vst.msk [vmem:[#allocation2 + $0x34] sm:$0x1] %vm591_vm1, %v23546_v3  ;;  %20924 = vmatprep.mubr.bf16.mxu0 %v745_v17  ;;  %20953 = vmatpush3.bf16.msra.mxu0 %v22978_v57  ;;  %v2313_v17 = vrot.slane %v2311_v9, 4  ;;  %v2330_v37 = vrot.slane %v2328_v30, 5 }
  0x39   : > { %606 = vst.msk [vmem:[#allocation2 + $0x3c] sm:$0x1] %vm591_vm1, %v23546_v3  ;;  %608 = vst.msk [vmem:[#allocation2 + $0x44] sm:$0x1] %vm591_vm1, %v23546_v3  ;;  %20954 = vmatprep.subr.bf16.mxu0 %v22979_v58  ;;  %vm2280_vm3 = vsmask.f32 7440 }
  0x3a   : > { %610 = vst.msk [vmem:[#allocation2 + $0x4c] sm:$0x1] %vm591_vm1, %v23546_v3  ;;  %612 = vst.msk [vmem:[#allocation2 + $0x54] sm:$0x1] %vm591_vm1, %v23546_v3  ;;  %v2317_v26 = vor.u32 %v2316_v18, %v2313_v17  ;;  %v2211_v38 = vld [vmem:[#allocation2 + $0x20] sm:$0xf] }
  0x3b   : > { %614 = vst.msk [vmem:[#allocation2 + $0x5c] sm:$0x1] %vm591_vm1, %v23546_v3  ;;  %616 = vst.msk [vmem:[#allocation2 + $0x64] sm:$0x1] %vm591_vm1, %v23546_v3  ;;  %v2212_v39 = vld [vmem:[#allocation2 + $0x28] sm:$0xf] }
  0x3c   : > { %620 = vst.msk [vmem:[#allocation2 + $0x74] sm:$0x1] %vm591_vm1, %v23546_v3  ;;  %622 = vst.msk [vmem:[#allocation2 + $0x7c] sm:$0x1] %vm591_vm1, %v23546_v3  ;;  %20955 = vmatpush3.bf16.msra.mxu0 %v22979_v58  ;;  %v2247_v7 = vld [vmem:[#allocation2 + $0x4] sm:$0x1] }
  0x3d   : > { %624 = vst.msk [vmem:[#allocation2 + $0x84] sm:$0x1] %vm591_vm1, %v23546_v3  ;;  %626 = vst.msk [vmem:[#allocation2 + $0x8c] sm:$0x1] %vm591_vm1, %v23546_v3  ;;  %20956 = vmatprep.subr.bf16.mxu0 %v22980_v61  ;;  %v2248_v8 = vld [vmem:[#allocation2 + $0xc] sm:$0x1] }
  0x3e   : > { %628 = vst.msk [vmem:[#allocation2 + $0x94] sm:$0x1] %vm591_vm1, %v23546_v3  ;;  %630 = vst.msk [vmem:[#allocation2 + $0x9c] sm:$0x1] %vm591_vm1, %v23546_v3  ;;  %v2292_v12 = vshll.u32 %v2247_v7, 16  ;;  %v2306_v14 = vshll.u32 %v2248_v8, 16 }
  0x3f   : > { %632 = vst.msk [vmem:[#allocation2 + $0xa4] sm:$0x1] %vm591_vm1, %v23546_v3  ;;  %634 = vst.msk [vmem:[#allocation2 + $0xac] sm:$0x1] %vm591_vm1, %v23546_v3  ;;  %20925 = vmatmul.mubr.bf16.gmra.mrb[4].mxu0 %v746_v22  ;;  %v2249_v16 = vld [vmem:[#allocation2 + $0x14] sm:$0x1] }
  0x40   : > { %636 = vst.msk [vmem:[#allocation2 + $0xb4] sm:$0x1] %vm591_vm1, %v23546_v3  ;;  %638 = vst.msk [vmem:[#allocation2 + $0xbc] sm:$0x1] %vm591_vm1, %v23546_v3  ;;  %20928 = vmatprep.mubr.bf16.mxu0 %v747_v23  ;;  %20957 = vmatpush3.bf16.msra.mxu0 %v22980_v61  ;;  %v2250_v21 = vld [vmem:[#allocation2 + $0x1c] sm:$0x1] }
  0x41   : > { %640 = vst.msk [vmem:[#allocation2 + $0xc4] sm:$0x1] %vm591_vm1, %v23546_v3  ;;  %642 = vst.msk [vmem:[#allocation2 + $0xcc] sm:$0x1] %vm591_vm1, %v23546_v3  ;;  %v2294_v22 = vrot.slane %v2292_v12, 5  ;;  %v2304_v23 = vrot.slane %v2303_v13, 4  ;;  %20958 = vmatprep.subr.bf16.mxu0 %v22981_v19 }
  0x42   : > { %644 = vst.msk [vmem:[#allocation2 + $0xd4] sm:$0x1] %vm591_vm1, %v23546_v3  ;;  %646 = vst.msk [vmem:[#allocation2 + $0xdc] sm:$0x1] %vm591_vm1, %v23546_v3  ;;  %v2308_v25 = vrot.slane %v2306_v14, 5  ;;  %v2320_v27 = vshll.u32 %v2249_v16, 16 }
  0x43   : > { %648 = vst.msk [vmem:[#allocation2 + $0xe4] sm:$0x1] %vm591_vm1, %v23546_v3  ;;  %650 = vst.msk [vmem:[#allocation2 + $0xec] sm:$0x1] %vm591_vm1, %v23546_v3  ;;  %v2334_v31 = vshll.u32 %v2250_v21, 16  ;;  %v2318_v33 = vrot.slane %v2317_v26, 4 }
  0x44   : > { %652 = vst.msk [vmem:[#allocation2 + $0xf4] sm:$0x1] %vm591_vm1, %v23546_v3  ;;  %654 = vst.msk [vmem:[#allocation2 + $0xfc] sm:$0x1] %vm591_vm1, %v23546_v3  ;;  %20959 = vmatpush3.bf16.msra.mxu0 %v22981_v19  ;;  %v2339_v42 = vshrl.u32 %v2211_v38, 16  ;;  %v2342_v43 = vshll.u32 %v2211_v38, 16 }
  0x45   : > { %656 = vst.msk [vmem:[#allocation2 + $0x104] sm:$0x1] %vm591_vm1, %v23546_v3  ;;  %658 = vst.msk [vmem:[#allocation2 + $0x10c] sm:$0x1] %vm591_vm1, %v23546_v3  ;;  %v2353_v44 = vshrl.u32 %v2212_v39, 16  ;;  %v2356_v45 = vshll.u32 %v2212_v39, 16 }
  0x46   : > { %660 = vst.msk [vmem:[#allocation2 + $0x114] sm:$0x1] %vm591_vm1, %v23546_v3  ;;  %662 = vst.msk [vmem:[#allocation2 + $0x11c] sm:$0x1] %vm591_vm1, %v23546_v3  ;;  %v2251_v48 = vld [vmem:[#allocation2 + $0x24] sm:$0x1] }
  0x47   : > { %664 = vst.msk [vmem:[#allocation2 + $0x124] sm:$0x1] %vm591_vm1, %v23546_v3  ;;  %666 = vst.msk [vmem:[#allocation2 + $0x12c] sm:$0x1] %vm591_vm1, %v23546_v3  ;;  %20929 = vmatmul.mubr.bf16.gmra.mrb[8].mxu0 %v748_v28  ;;  %v2325_v28 = vshrl.u32 %v2210_v15, 16  ;;  %v2341_v49 = vrot.slane %v2339_v42, 4 }
  0x48   : > { %668 = vst.msk [vmem:[#allocation2 + $0x134] sm:$0x1] %vm591_vm1, %v23546_v3  ;;  %670 = vst.msk [vmem:[#allocation2 + $0x13c] sm:$0x1] %vm591_vm1, %v23546_v3  ;;  %20932 = vmatprep.mubr.bf16.mxu0 %v749_v29  ;;  %v2213_v50 = vld [vmem:[#allocation2 + $0x30] sm:$0xf] }
  0x49   : > { %672 = vst.msk [vmem:[#allocation2 + $0x144] sm:$0x1] %vm591_vm1, %v23546_v3  ;;  %674 = vst.msk [vmem:[#allocation2 + $0x14c] sm:$0x1] %vm591_vm1, %v23546_v3  ;;  %v2327_v36 = vrot.slane %v2325_v28, 4  ;;  %v2355_v54 = vrot.slane %v2353_v44, 4 }
  0x4a   : > { %676 = vst.msk [vmem:[#allocation2 + $0x154] sm:$0x1] %vm591_vm1, %v23546_v3  ;;  %678 = vst.msk [vmem:[#allocation2 + $0x15c] sm:$0x1] %vm591_vm1, %v23546_v3  ;;  %v2252_v51 = vld [vmem:[#allocation2 + $0x2c] sm:$0x1] }
  0x4b   : > { %680 = vst.msk [vmem:[#allocation2 + $0x164] sm:$0x1] %vm591_vm1, %v23546_v3  ;;  %682 = vst.msk [vmem:[#allocation2 + $0x16c] sm:$0x1] %vm591_vm1, %v23546_v3  ;;  %v2358_v55 = vrot.slane %v2356_v45, 5  ;;  %v2362_v63 = vshll.u32 %v2252_v51, 16 }
  0x4c   : > { %684 = vst.msk [vmem:[#allocation2 + $0x174] sm:$0x1] %vm591_vm1, %v23546_v3  ;;  %686 = vst.msk [vmem:[#allocation2 + $0x17c] sm:$0x1] %vm591_vm1, %v23546_v3  ;;  %v2214_v57 = vld [vmem:[#allocation2 + $0x38] sm:$0xf] }
  0x4d   : > { %688 = vst.msk [vmem:[#allocation2 + $0x184] sm:$0x1] %vm591_vm1, %v23546_v3  ;;  %690 = vst.msk [vmem:[#allocation2 + $0x18c] sm:$0x1] %vm591_vm1, %v23546_v3  ;;  %v2359_v61 = vor.u32 %v2358_v55, %v2355_v54  ;;  %v2254_v0 = vld [vmem:[#allocation2 + $0x3c] sm:$0x1] }
  0x4e   : > { %692 = vst.msk [vmem:[#allocation2 + $0x194] sm:$0x1] %vm591_vm1, %v23546_v3  ;;  %694 = vst.msk [vmem:[#allocation2 + $0x19c] sm:$0x1] %vm591_vm1, %v23546_v3  ;;  %v2367_v1 = vshrl.u32 %v2213_v50, 16  ;;  %v2370_v2 = vshll.u32 %v2213_v50, 16 }
  0x4f   : > { %696 = vst.msk [vmem:[#allocation2 + $0x1a4] sm:$0x1] %vm591_vm1, %v23546_v3  ;;  %698 = vst.msk [vmem:[#allocation2 + $0x1ac] sm:$0x1] %vm591_vm1, %v23546_v3  ;;  %20933 = vmatmul.mubr.bf16.gmra.mrb[12].mxu0 %v750_v34  ;;  %v2360_v5 = vrot.slane %v2359_v61, 4  ;;  %v2381_v6 = vshrl.u32 %v2214_v57, 16 }
  0x50   : > { %700 = vst.msk [vmem:[#allocation2 + $0x1b4] sm:$0x1] %vm591_vm1, %v23546_v3  ;;  %702 = vst.msk [vmem:[#allocation2 + $0x1bc] sm:$0x1] %vm591_vm1, %v23546_v3  ;;  %20936 = vmatprep.mubr.bf16.mxu0 %v751_v35  ;;  %v2322_v35 = vrot.slane %v2320_v27, 5  ;;  %v2384_v7 = vshll.u32 %v2214_v57, 16 }
  0x51   : > { %704 = vst.msk [vmem:[#allocation2 + $0x1c4] sm:$0x1] %vm591_vm1, %v23546_v3  ;;  %706 = vst.msk [vmem:[#allocation2 + $0x1cc] sm:$0x1] %vm591_vm1, %v23546_v3  ;;  %v2364_v8 = vrot.slane %v2362_v63, 5  ;;  %v2369_v9 = vrot.slane %v2367_v1, 4 }
  0x52   : > { %708 = vst.msk [vmem:[#allocation2 + $0x1d4] sm:$0x1] %vm591_vm1, %v23546_v3  ;;  %710 = vst.msk [vmem:[#allocation2 + $0x1dc] sm:$0x1] %vm591_vm1, %v23546_v3  ;;  %v2285_v3 = vrot.slane %v2283_v62, 4  ;;  %v2372_v10 = vrot.slane %v2370_v2, 5 }
  0x53   : > { %vm23998_vm4 = vmor %vm2279_vm2, %vm2280_vm3  ;;  %v2253_v62 = vld [vmem:[#allocation2 + $0x34] sm:$0x1]  ;;  %v2383_v12 = vrot.slane %v2381_v6, 4  ;;  %v2386_v13 = vrot.slane %v2384_v7, 5  ;;  %v2390_v14 = vshll.u32 %v2254_v0, 16  ;;  %v22982_v27 = vld [vmem:[%s27928_s6 + $0x180] sm:$0xff]  }
  0x54   : > { %v2289_v11 = vor.u32 %v2288_v4, %v2285_v3  ;;  %v2309_v32 = vsel %vm23998_vm4, %v2304_v23, %v2308_v25  ;;  %v2376_v3 = vshll.u32 %v2253_v62, 16  ;;  %v2365_v15 = vsel %vm23998_vm4, %v2360_v5, %v2364_v8  ;;  %22072 = vmatprep.subr.bf16.mxu1 %v22982_v27  ;;  %v22983_v28 = vld [vmem:[%s27928_s6 + $0x188] sm:$0xff]   ;;  %v22985_v30 = vld [vmem:[%s27928_s6 + $0x198] sm:$0xff]   ;;  %v2255_v42 = vld [vmem:[#allocation2 + $0x54] sm:$0x1]  ;;  %s521_s18 = sand.u32 1, %s23528_s20  }
  0x55   : > { %v2373_v16 = vor.u32 %v2372_v10, %v2369_v9  ;;  %v2387_v19 = vor.u32 %v2386_v13, %v2383_v12  ;;  %22076 = vmatpush3.bf16.msra.mxu1 %v22982_v27  ;;  %v2263_v44 = vld [vmem:[#allocation2 + $0xa4] sm:$0x1]  ;;  %v24043_v45 = vld [vmem:[%s27926_s4] ss:$0 sm:$0xff]  ;;  %vm1494_vm6 = vsmask.f32 7938 }
  0x56   : > { %v2290_v20 = vrot.slane %v2289_v11, 4  ;;  %v2378_v17 = vrot.slane %v2376_v3, 5  ;;  %22073 = vmatprep.subr.bf16.mxu1 %v22983_v28  ;;  %v2271_v5 = vld [vmem:[#allocation2 + $0xf4] sm:$0x1]  ;;  %vm1500_vm7 = vsmask.f32 256  ;;  %vm24086_vm8 = vmand %vm589_vm0, %vm1494_vm6 }
  0x57   : > { %20937 = vmatmul.mubr.bf16.gmra.mrb[16].mxu0 %v752_v40  ;;  %v2331_v40 = vor.u32 %v2330_v37, %v2327_v36  ;;  %v2374_v21 = vrot.slane %v2373_v16, 4  ;;  %v2628_v10 = vshll.u32 %v2271_v5, 16  ;;  %v1514_v27 = vld [vmem:[#allocation2 + $0x6c] sm:$0x1]  ;;  %vm24093_vm9 = vmand %vm591_vm1, %vm1500_vm7  ;;  %v1505_v5 = vld [vmem:[#allocation2 + $0x60] sm:$0xf] }
  0x58   : > { %20940 = vmatprep.mubr.bf16.mxu0 %v753_v41  ;;  %v2295_v29 = vsel %vm23998_vm4, %v2290_v20, %v2294_v22  ;;  %v2336_v41 = vrot.slane %v2334_v31, 5  ;;  %v2392_v20 = vrot.slane %v2390_v14, 5  ;;  %v2388_v22 = vrot.slane %v2387_v19, 4  ;;  %v24037_v31 = vld [vmem:[%s27928_s6 + $0x1a0] sm:$0xff]   ;;  %s18705_s28 = sshll.u32 %s521_s18, 8  ;;  %s20319_s14 = sshll.u32 %s23536_s22, 12 }
  0x59   : > { %v18778_v34 = vcombine.low %v2295_v29, %v2309_v32  ;;  %v2379_v23 = vsel %vm23998_vm4, %v2374_v21, %v2378_v17  ;;  %22077 = vmatpush3.bf16.msra.mxu1 %v22983_v28  ;;  %v22984_v29 = vld [vmem:[%s27928_s6 + $0x190] sm:$0xff]   ;;  %v24080_v19 = vrot.slane %v2628_v10, 5  ;;  %vm3430_vm10 = vcmask 1042432   ;;  %s27747_s1 = scalar_lea.vmem [#allocation3], %s18705_s28  ;;  %s27867_s25 = scalar_lea.hbm %s27934_s12, %s20319_s14 }
  0x5a   : > { %v2393_v25 = vsel %vm23998_vm4, %v2388_v22, %v2392_v20  ;;  %22074 = vmatprep.subr.bf16.mxu1 %v22984_v29  ;;  %v2215_v32 = vld [vmem:[#allocation2 + $0x50] sm:$0xf]  ;;  %vm3431_vm11 = vcmask 1046532   ;;  %s18576_s15 = sshll.u32 %s27747_s1, 4  ;;  %s27876_s22 = scalar_lea.sflag [#allocation4], %s521_s18  ;;  %s27869_s15 = int_to_ptr.vmem [resolvable:$true] %s18576_s15 }
  0x5b   : > { %v18781_v26 = vcombine.low %v2379_v23, %v2393_v25  ;;  %vm24807_vm12 = vmor %vm3430_vm10, %vm3431_vm11  ;;  %s23547_s26 = smov [#allocation3]  }
  0x5c   : > { %s23470_s28 = sshll.u32 %s23547_s26, 4  ;;  %s23471_s28 = int_to_ptr.vmem [resolvable:$false] %s23470_s28 }
  0x5d   : > { %22078 = vmatpush3.bf16.msra.mxu1 %v22984_v29  ;;  %s23472_s14 = scalar_lea.vmem %s23471_s28, 8192  ;;  %p23473_p1 = scmp.lt.s32.totalorder %s27869_s15, %s23471_s28 }
  0x5e   : > { %22075 = vmatprep.subr.bf16.mxu1 %v22985_v30 }
  0x5f   : > { %20941 = vmatmul.mubr.bf16.gmra.mrb[20].mxu0 %v754_v46  ;;  %v2323_v46 = vsel %vm23998_vm4, %v2318_v33, %v2322_v35  ;;  %v2223_v33 = vld [vmem:[#allocation2 + $0xa0] sm:$0xf]  ;;  %v2398_v35 = vshll.u32 %v2215_v32, 16 }
  0x60   : > { %20944 = vmatprep.mubr.bf16.mxu0 %v755_v47  ;;  %v2332_v47 = vrot.slane %v2331_v40, 4  ;;  %v2507_v36 = vshrl.u32 %v2223_v33, 16  ;;  %v2510_v37 = vshll.u32 %v2223_v33, 16 }
  0x61   : > { %22079 = vmatpush3.bf16.msra.mxu1 %v22985_v30  ;;  %v2400_v39 = vrot.slane %v2398_v35, 5 }
  0x62   : > { %21472 = vmatprep.subr.bf16.mxu1 %v24037_v31  ;;  %v2509_v40 = vrot.slane %v2507_v36, 4  ;;  %v1496_v36 = vld [vmem:[#allocation2 + $0x58] sm:$0xf] }
  0x67   : > { %20945 = vmatmul.mubr.bf16.gmra.mrb[24].mxu0 %v756_v52  ;;  %v2344_v52 = vrot.slane %v2342_v43, 5  ;;  %v2404_v43 = vshll.u32 %v2255_v42, 16 }
  0x68   : > { %20948 = vmatprep.mubr.bf16.mxu0 %v757_v53  ;;  %v2348_v53 = vshll.u32 %v2251_v48, 16  ;;  %v2516_v48 = vshll.u32 %v2263_v44, 16  ;;  %v1517_v44 = vld [vmem:[#allocation2 + $0x70] sm:$0xf] }
  0x69   : > { %v2345_v59 = vor.u32 %v2344_v52, %v2341_v49  ;;  %v24048_v49 = vld [vmem:[%s27927_s5] ss:$0 sm:$0xff] }
  0x6a   : > { %v2350_v60 = vrot.slane %v2348_v53, 5  ;;  %v24051_v53 = vrot.slane %v2404_v43, 5 }
  0x6b   : > { %v2346_v4 = vrot.slane %v2345_v59, 4  ;;  %v2231_v59 = vld [vmem:[#allocation2 + $0xf0] sm:$0xf] }
  0x6c   : > { %v2619_v63 = vshrl.u32 %v2231_v59, 16  ;;  %v2622_v0 = vshll.u32 %v2231_v59, 16  ;;  %v22996_v59 = vld [vmem:[%s27928_s6 + $0x8] sm:$0xff]  }
  0x6d   : > { %v2351_v11 = vsel %vm23998_vm4, %v2346_v4, %v2350_v60 }
  0x6e   : > { %v18780_v18 = vcombine.low %v2351_v11, %v2365_v15  ;;  %v24065_v6 = vrot.slane %v2619_v63, 4  ;;  %v24067_v7 = vrot.slane %v2622_v0, 5 }
  0x6f   : > { %20949 = vmatmul.mubr.bf16.gmra.mrb[28].mxu0 %v758_v56  ;;  %v2337_v56 = vsel %vm23998_vm4, %v2332_v47, %v2336_v41  ;;  %v2512_v41 = vrot.slane %v2510_v37, 5  ;;  %v1502_v37 = vld [vmem:[#allocation2 + $0x5c] sm:$0x1] }
  0x70   : > { %20960 = vmatprep.mubr.msk.bf16.mxu0 %vm2811_vm5, %v18778_v34  ;;  %v18779_v58 = vcombine.low %v2323_v46, %v2337_v56  ;;  %v2395_v34 = vshrl.u32 %v2215_v32, 16 }
  0x71   : > { %v2513_v47 = vor.u32 %v2512_v41, %v2509_v40 }
  0x72   : > { %v2397_v38 = vrot.slane %v2395_v34, 4 }
  0x73   : > { %v24056_v57 = vrot.slane %v2513_v47, 4 }
  0x74   : > { %v2401_v46 = vor.u32 %v2400_v39, %v2397_v38 }
  0x76   : > { %v24054_v56 = vrot.slane %v2401_v46, 4 }
  0x77   : > { %20961 = vmatmul.mubr.msk.bf16.vlgmr.msra.gmra.mrb[32].mxu0 %vm2811_vm5, %v18779_v58  ;;  %v24058_v58 = vrot.slane %v2516_v48, 5 }
  0x78   : > { %20964 = vmatprep.mubr.msk.bf16.mxu0 %vm2811_vm5, %v18780_v18  ;;  %v2407_v13 = vsel %vm23998_vm4, %v24054_v56, %v24051_v53  ;;  %v2625_v18 = vor.u32 %v24067_v7, %v24065_v6 }
  0x79   : > { %v2519_v14 = vsel %vm23998_vm4, %v24056_v57, %v24058_v58 }
  0x7f   : > { %20965 = vmatmul.mubr.msk.bf16.gmra.mrb[36].mxu0 %vm2811_vm5, %v18781_v26  ;;  %v1511_v26 = vld [vmem:[#allocation2 + $0x68] sm:$0xf] }
 0x10a   : > { %v20922_v50 = vpop.f32.mrb[0].mxu0 }
 0x10b   : > { %v976_v51 = vmul.f32 %v20922_v50, %v24043_v45  ;;  %v841_v52 = vpop.f32.mrb[1].mxu0 }
 0x10c   : > { %v974_v54 = vmul.f32 %v24043_v45, %v841_v52  ;;  %v20923_v55 = vpop.f32.mrb[2].mxu0 }
 0x10d   : > { %v1014_v60 = vadd.f32 %v24048_v49, %v976_v51  ;;  %v977_v61 = vmul.f32 %v20923_v55, %v24043_v45  ;;  %v844_v62 = vpop.f32.mrb[3].mxu0  ;;  %v22993_v55 = vld [vmem:[%s27928_s6] sm:$0xff]  }
 0x10e   : > { %v1012_v1 = vadd.f32 %v24048_v49, %v974_v54  ;;  %v975_v2 = vmul.f32 %v24043_v45, %v844_v62  ;;  %v1520_v62 = vld [vmem:[#allocation2 + $0x74] sm:$0x1]  ;;  %20992 = vmatprep.subr.bf16.mxu0 %v22993_v55 }
 0x10f   : > { %v1046_v3 = vmax.f32 %v1014_v60, 0.0  ;;  %v1015_v4 = vadd.f32 %v24048_v49, %v977_v61  ;;  %20993 = vmatpush3.bf16.msra.mxu0 %v22993_v55 }
 0x110   : > { %v1044_v8 = vmax.f32 %v1012_v1, 0.0  ;;  %v1013_v9 = vadd.f32 %v24048_v49, %v975_v2  ;;  %20994 = vmatprep.subr.bf16.mxu0 %v22996_v59 }
 0x111   : > { %v20273_v11 = vpack.c.bf16 %v1046_v3, %v1046_v3  ;;  %v1047_v12 = vmax.f32 %v1015_v4, 0.0 }
 0x112   : > { %v20271_v15 = vpack.c.bf16 %v1044_v8, %v1044_v8  ;;  %v1045_v16 = vmax.f32 %v1013_v9, 0.0  ;;  %v20926_v17 = vpop.f32.mrb[4].mxu0  ;;  %v1508_v8 = vld [vmem:[#allocation2 + $0x64] sm:$0x1] }
 0x113   : > { %v1189_v20 = vshrl.u32 %v20273_v11, 16  ;;  %v1192_v21 = vshll.u32 %v20273_v11, 16  ;;  %v20274_v22 = vpack.c.bf16 %v1047_v12, %v1047_v12  ;;  %v980_v23 = vmul.f32 %v20926_v17, %v24043_v45  ;;  %v857_v25 = vpop.f32.mrb[5].mxu0  ;;  %20995 = vmatpush3.bf16.msra.mxu0 %v22996_v59 }
 0x114   : > { %v1173_v28 = vshrl.u32 %v20271_v15, 16  ;;  %v1176_v29 = vshll.u32 %v20271_v15, 16  ;;  %v20272_v30 = vpack.c.bf16 %v1045_v16, %v1045_v16  ;;  %v978_v32 = vmul.f32 %v24043_v45, %v857_v25  ;;  %v20927_v33 = vpop.f32.mrb[6].mxu0 }
 0x115   : > { %v1191_v34 = vrot.slane %v1189_v20, 7  ;;  %v1197_v38 = vshrl.u32 %v20274_v22, 16  ;;  %v1200_v39 = vshll.u32 %v20274_v22, 16  ;;  %v1018_v40 = vadd.f32 %v24048_v49, %v980_v23  ;;  %v860_v41 = vpop.f32.mrb[7].mxu0 }
 0x116   : > { %v1175_v43 = vrot.slane %v1173_v28, 7  ;;  %v1181_v46 = vshrl.u32 %v20272_v30, 16  ;;  %v1184_v47 = vshll.u32 %v20272_v30, 16  ;;  %v1016_v48 = vadd.f32 %v24048_v49, %v978_v32 }
 0x117   : > { %v1194_v50 = vor.u32 %v1192_v21, %v1191_v34  ;;  %v1195_v51 = vrot.slane %v1191_v34, 4  ;;  %v1199_v52 = vrot.slane %v1197_v38, 7  ;;  %v1050_v54 = vmax.f32 %v1018_v40, 0.0 }
 0x118   : > { %v1178_v60 = vor.u32 %v1176_v29, %v1175_v43  ;;  %v1179_v61 = vrot.slane %v1175_v43, 4  ;;  %v1183_v63 = vrot.slane %v1181_v46, 7  ;;  %v1048_v0 = vmax.f32 %v1016_v48, 0.0  ;;  %v1535_v43 = vld [vmem:[#allocation2 + $0x88] sm:$0xf] }
 0x119   : > { %v1512_v1 = vsel %vm24086_vm8, %v1194_v50, %v1511_v26  ;;  %v1515_v2 = vsel %vm24093_vm9, %v1195_v51, %v1514_v27  ;;  %v1202_v3 = vor.u32 %v1200_v39, %v1199_v52  ;;  %v1203_v4 = vrot.slane %v1199_v52, 4  ;;  %v1523_v48 = vld [vmem:[#allocation2 + $0x78] sm:$0xf]  ;;  %v1526_v50 = vld [vmem:[#allocation2 + $0x7c] sm:$0x1] }
 0x11a   : > { %1513 = vst [vmem:[#allocation2 + $0x68] sm:$0xf] %v1512_v1  ;;  %1516 = vst [vmem:[#allocation2 + $0x6c] sm:$0x1] %v1515_v2  ;;  %v1497_v9 = vsel %vm24086_vm8, %v1178_v60, %v1496_v36  ;;  %v1503_v10 = vsel %vm24093_vm9, %v1179_v61, %v1502_v37  ;;  %v1186_v11 = vor.u32 %v1184_v47, %v1183_v63  ;;  %v1187_v12 = vrot.slane %v1183_v63, 4  ;;  %v20930_v15 = vpop.f32.mrb[8].mxu0 }
 0x11b   : > { %1498 = vst [vmem:[#allocation2 + $0x58] sm:$0xf] %v1497_v9  ;;  %1504 = vst [vmem:[#allocation2 + $0x5c] sm:$0x1] %v1503_v10  ;;  %v1518_v16 = vsel %vm24086_vm8, %v1202_v3, %v1517_v44  ;;  %v1521_v17 = vsel %vm24093_vm9, %v1203_v4, %v1520_v62  ;;  %v20277_v20 = vpack.c.bf16 %v1050_v54, %v1050_v54  ;;  %v873_v22 = vpop.f32.mrb[9].mxu0  ;;  %v22998_v4 = vld [vmem:[%s27928_s6 + $0x10] sm:$0xff]  }
 0x11c   : > { %v20275_v21 = vpack.c.bf16 %v1048_v0, %v1048_v0  ;;  %1519 = vst [vmem:[#allocation2 + $0x70] sm:$0xf] %v1518_v16  ;;  %1522 = vst [vmem:[#allocation2 + $0x74] sm:$0x1] %v1521_v17  ;;  %v1506_v23 = vsel %vm24086_vm8, %v1186_v11, %v1505_v5  ;;  %v1509_v25 = vsel %vm24093_vm9, %v1187_v12, %v1508_v8  ;;  %v20931_v28 = vpop.f32.mrb[10].mxu0  ;;  %v23000_v12 = vld [vmem:[%s27928_s6 + $0x18] sm:$0xff]   ;;  %20996 = vmatprep.subr.bf16.mxu0 %v22998_v4 }
 0x11d   : > { %v981_v26 = vmul.f32 %v20927_v33, %v24043_v45  ;;  %v979_v27 = vmul.f32 %v24043_v45, %v860_v41  ;;  %1507 = vst [vmem:[#allocation2 + $0x60] sm:$0xf] %v1506_v23  ;;  %1510 = vst [vmem:[#allocation2 + $0x64] sm:$0x1] %v1509_v25  ;;  %v1221_v29 = vshrl.u32 %v20277_v20, 16  ;;  %v1224_v30 = vshll.u32 %v20277_v20, 16  ;;  %20997 = vmatpush3.bf16.msra.mxu0 %v22998_v4 }
 0x11e   : > { %v1205_v32 = vshrl.u32 %v20275_v21, 16  ;;  %v1208_v34 = vshll.u32 %v20275_v21, 16  ;;  %v876_v36 = vpop.f32.mrb[11].mxu0  ;;  %v984_v39 = vmul.f32 %v20930_v15, %v24043_v45  ;;  %v982_v40 = vmul.f32 %v24043_v45, %v873_v22  ;;  %v1538_v41 = vld [vmem:[#allocation2 + $0x8c] sm:$0x1]  ;;  %20998 = vmatprep.subr.bf16.mxu0 %v23000_v12 }
 0x11f   : > { %v1019_v37 = vadd.f32 %v24048_v49, %v981_v26  ;;  %v1017_v38 = vadd.f32 %v24048_v49, %v979_v27  ;;  %v1223_v33 = vrot.slane %v1221_v29, 7  ;;  %v985_v46 = vmul.f32 %v20931_v28, %v24043_v45  ;;  %v1541_v22 = vld [vmem:[#allocation2 + $0x90] sm:$0xf] }
 0x120   : > { %v1207_v44 = vrot.slane %v1205_v32, 7  ;;  %v983_v47 = vmul.f32 %v24043_v45, %v876_v36  ;;  %v1022_v54 = vadd.f32 %v24048_v49, %v984_v39  ;;  %v1020_v55 = vadd.f32 %v24048_v49, %v982_v40 }
 0x121   : > { %v1051_v51 = vmax.f32 %v1019_v37, 0.0  ;;  %v1049_v52 = vmax.f32 %v1017_v38, 0.0  ;;  %v1226_v60 = vor.u32 %v1224_v30, %v1223_v33  ;;  %v1227_v61 = vrot.slane %v1223_v33, 4  ;;  %v1544_v30 = vld [vmem:[#allocation2 + $0x94] sm:$0x1]  ;;  %20999 = vmatpush3.bf16.msra.mxu0 %v23000_v12 }
 0x122   : > { %v1210_v62 = vor.u32 %v1208_v34, %v1207_v44  ;;  %v1211_v59 = vrot.slane %v1207_v44, 4  ;;  %v1054_v1 = vmax.f32 %v1022_v54, 0.0  ;;  %v1052_v2 = vmax.f32 %v1020_v55, 0.0  ;;  %v20934_v3 = vpop.f32.mrb[12].mxu0  ;;  %v1529_v34 = vld [vmem:[#allocation2 + $0x80] sm:$0xf] }
 0x123   : > { %v20278_v63 = vpack.c.bf16 %v1051_v51, %v1051_v51  ;;  %v20276_v0 = vpack.c.bf16 %v1049_v52, %v1049_v52  ;;  %v1536_v5 = vsel %vm24086_vm8, %v1226_v60, %v1535_v43  ;;  %v1539_v8 = vsel %vm24093_vm9, %v1227_v61, %v1538_v41  ;;  %v889_v11 = vpop.f32.mrb[13].mxu0  ;;  %v1532_v38 = vld [vmem:[#allocation2 + $0x84] sm:$0x1]  ;;  %v1562_v51 = vld [vmem:[#allocation2 + $0xbc] sm:$0x1] }
 0x124   : > { %v1524_v9 = vsel %vm24086_vm8, %v1210_v62, %v1523_v48  ;;  %v1527_v10 = vsel %vm24093_vm9, %v1211_v59, %v1526_v50  ;;  %1537 = vst [vmem:[#allocation2 + $0x88] sm:$0xf] %v1536_v5  ;;  %1540 = vst [vmem:[#allocation2 + $0x8c] sm:$0x1] %v1539_v8  ;;  %v24144_v21 = vpop.f32.mrb[14].mxu0  ;;  %v20281_v23 = vpack.c.bf16 %v1054_v1, %v1054_v1 }
 0x125   : > { %1525 = vst [vmem:[#allocation2 + $0x78] sm:$0xf] %v1524_v9  ;;  %1528 = vst [vmem:[#allocation2 + $0x7c] sm:$0x1] %v1527_v10  ;;  %v1229_v15 = vshrl.u32 %v20278_v63, 16  ;;  %v1232_v16 = vshll.u32 %v20278_v63, 16  ;;  %v20279_v25 = vpack.c.bf16 %v1052_v2, %v1052_v2  ;;  %v1023_v26 = vadd.f32 %v24048_v49, %v985_v46 }
 0x126   : > { %v1213_v17 = vshrl.u32 %v20276_v0, 16  ;;  %v1216_v20 = vshll.u32 %v20276_v0, 16  ;;  %v1021_v27 = vadd.f32 %v24048_v49, %v983_v47  ;;  %v24148_v28 = vpop.f32.mrb[15].mxu0  ;;  %v988_v36 = vmul.f32 %v20934_v3, %v24043_v45  ;;  %v1559_v48 = vld [vmem:[#allocation2 + $0xb8] sm:$0xf] }
 0x127   : > { %v1231_v29 = vrot.slane %v1229_v15, 7  ;;  %v986_v37 = vmul.f32 %v24043_v45, %v889_v11  ;;  %v1253_v39 = vshrl.u32 %v20281_v23, 16  ;;  %v1256_v40 = vshll.u32 %v20281_v23, 16  ;;  %v1547_v63 = vld [vmem:[#allocation2 + $0xa8] sm:$0xf] }
 0x128   : > { %v1215_v32 = vrot.slane %v1213_v17, 7  ;;  %v1237_v33 = vshrl.u32 %v20279_v25, 16  ;;  %v1240_v43 = vshll.u32 %v20279_v25, 16  ;;  %v1055_v54 = vmax.f32 %v1023_v26, 0.0  ;;  %v1550_v0 = vld [vmem:[#allocation2 + $0xac] sm:$0x1] }
 0x129   : > { %v1234_v41 = vor.u32 %v1232_v16, %v1231_v29  ;;  %v1235_v44 = vrot.slane %v1231_v29, 4  ;;  %v1255_v50 = vrot.slane %v1253_v39, 7  ;;  %v1053_v55 = vmax.f32 %v1021_v27, 0.0  ;;  %v2259_v53 = vld [vmem:[#allocation2 + $0x74] sm:$0x1] }
 0x12a   : > { %v1218_v46 = vor.u32 %v1216_v20, %v1215_v32  ;;  %v1219_v47 = vrot.slane %v1215_v32, 4  ;;  %v1239_v52 = vrot.slane %v1237_v33, 7  ;;  %v20938_v1 = vpop.f32.mrb[16].mxu0  ;;  %v20282_v9 = vpack.c.bf16 %v1055_v54, %v1055_v54  ;;  %v1568_v32 = vld [vmem:[#allocation2 + $0xc4] sm:$0x1] }
 0x12b   : > { %v1542_v60 = vsel %vm24086_vm8, %v1234_v41, %v1541_v22  ;;  %v1545_v61 = vsel %vm24093_vm9, %v1235_v44, %v1544_v30  ;;  %v1258_v2 = vor.u32 %v1256_v40, %v1255_v50  ;;  %v1259_v3 = vrot.slane %v1255_v50, 4  ;;  %v905_v8 = vpop.f32.mrb[17].mxu0  ;;  %v1565_v30 = vld [vmem:[#allocation2 + $0xc0] sm:$0xf] }
 0x12c   : > { %v1530_v62 = vsel %vm24086_vm8, %v1218_v46, %v1529_v34  ;;  %v1533_v59 = vsel %vm24093_vm9, %v1219_v47, %v1532_v38  ;;  %1543 = vst [vmem:[#allocation2 + $0x90] sm:$0xf] %v1542_v60  ;;  %1546 = vst [vmem:[#allocation2 + $0x94] sm:$0x1] %v1545_v61  ;;  %v1242_v4 = vor.u32 %v1240_v43, %v1239_v52  ;;  %v1243_v5 = vrot.slane %v1239_v52, 4  ;;  %v20939_v15 = vpop.f32.mrb[18].mxu0 }
 0x12d   : > { %1531 = vst [vmem:[#allocation2 + $0x80] sm:$0xf] %v1530_v62  ;;  %1534 = vst [vmem:[#allocation2 + $0x84] sm:$0x1] %v1533_v59  ;;  %v20280_v10 = vpack.c.bf16 %v1053_v55, %v1053_v55  ;;  %v1026_v11 = vadd.f32 %v24048_v49, %v988_v36  ;;  %v1024_v12 = vadd.f32 %v24048_v49, %v986_v37  ;;  %v908_v23 = vpop.f32.mrb[19].mxu0  ;;  %v1261_v25 = vshrl.u32 %v20282_v9, 16 }
 0x12e   : > { %v1560_v16 = vsel %vm24086_vm8, %v1258_v2, %v1559_v48  ;;  %v1563_v17 = vsel %vm24093_vm9, %v1259_v3, %v1562_v51  ;;  %v1548_v20 = vsel %vm24086_vm8, %v1242_v4, %v1547_v63  ;;  %v1551_v22 = vsel %vm24093_vm9, %v1243_v5, %v1550_v0  ;;  %v1553_v34 = vld [vmem:[#allocation2 + $0xb0] sm:$0xf]  ;;  %v1556_v43 = vld [vmem:[#allocation2 + $0xb4] sm:$0x1]  ;;  %v1583_v3 = vld [vmem:[#allocation2 + $0xd8] sm:$0xf] }
 0x12f   : > { %1561 = vst [vmem:[#allocation2 + $0xb8] sm:$0xf] %v1560_v16  ;;  %1564 = vst [vmem:[#allocation2 + $0xbc] sm:$0x1] %v1563_v17  ;;  %v1264_v26 = vshll.u32 %v20282_v9, 16  ;;  %v1245_v27 = vshrl.u32 %v20280_v10, 16  ;;  %v989_v38 = vmul.f32 %v24144_v21, %v24043_v45  ;;  %v987_v39 = vmul.f32 %v24043_v45, %v24148_v28 }
 0x130   : > { %1549 = vst [vmem:[#allocation2 + $0xa8] sm:$0xf] %v1548_v20  ;;  %1552 = vst [vmem:[#allocation2 + $0xac] sm:$0x1] %v1551_v22  ;;  %v1248_v29 = vshll.u32 %v20280_v10, 16  ;;  %v1058_v36 = vmax.f32 %v1026_v11, 0.0  ;;  %v992_v41 = vmul.f32 %v20938_v1, %v24043_v45  ;;  %v990_v44 = vmul.f32 %v24043_v45, %v905_v8 }
 0x131   : > { %v1056_v37 = vmax.f32 %v1024_v12, 0.0  ;;  %v1263_v40 = vrot.slane %v1261_v25, 7  ;;  %v1247_v33 = vrot.slane %v1245_v27, 7  ;;  %v1027_v48 = vadd.f32 %v24048_v49, %v989_v38  ;;  %v1586_v12 = vld [vmem:[#allocation2 + $0xdc] sm:$0x1] }
 0x132   : > { %v20285_v46 = vpack.c.bf16 %v1058_v36, %v1058_v36  ;;  %v1025_v50 = vadd.f32 %v24048_v49, %v987_v39  ;;  %v24178_v55 = vpop.f32.mrb[20].mxu0  ;;  %v1571_v16 = vld [vmem:[#allocation2 + $0xc8] sm:$0xf]  ;;  %v1574_v17 = vld [vmem:[#allocation2 + $0xcc] sm:$0x1]  ;;  %v1030_v20 = vadd.f32 %v24048_v49, %v992_v41  ;;  %v1028_v22 = vadd.f32 %v24048_v49, %v990_v44 }
 0x133   : > { %v20283_v47 = vpack.c.bf16 %v1056_v37, %v1056_v37  ;;  %v1266_v51 = vor.u32 %v1264_v26, %v1263_v40  ;;  %v1267_v52 = vrot.slane %v1263_v40, 4  ;;  %v1250_v54 = vor.u32 %v1248_v29, %v1247_v33  ;;  %v24180_v59 = vpop.f32.mrb[21].mxu0 }
 0x134   : > { %v1251_v21 = vrot.slane %v1247_v33, 4  ;;  %v1285_v28 = vshrl.u32 %v20285_v46, 16  ;;  %v1288_v60 = vshll.u32 %v20285_v46, 16  ;;  %v24190_v4 = vpop.f32.mrb[22].mxu0  ;;  %v1059_v9 = vmax.f32 %v1027_v48, 0.0 }
 0x135   : > { %v1269_v61 = vshrl.u32 %v20283_v47, 16  ;;  %v1272_v62 = vshll.u32 %v20283_v47, 16  ;;  %v1566_v63 = vsel %vm24086_vm8, %v1266_v51, %v1565_v30  ;;  %v1569_v0 = vsel %vm24093_vm9, %v1267_v52, %v1568_v32  ;;  %v24192_v11 = vpop.f32.mrb[23].mxu0  ;;  %v1589_v48 = vld [vmem:[#allocation2 + $0xe0] sm:$0xf] }
 0x136   : > { %v1554_v1 = vsel %vm24086_vm8, %v1250_v54, %v1553_v34  ;;  %v1557_v2 = vsel %vm24093_vm9, %v1251_v21, %v1556_v43  ;;  %1567 = vst [vmem:[#allocation2 + $0xc0] sm:$0xf] %v1566_v63  ;;  %1570 = vst [vmem:[#allocation2 + $0xc4] sm:$0x1] %v1569_v0  ;;  %v1287_v5 = vrot.slane %v1285_v28, 7  ;;  %v1057_v10 = vmax.f32 %v1025_v50, 0.0 }
 0x137   : > { %1555 = vst [vmem:[#allocation2 + $0xb0] sm:$0xf] %v1554_v1  ;;  %1558 = vst [vmem:[#allocation2 + $0xb4] sm:$0x1] %v1557_v2  ;;  %v1271_v8 = vrot.slane %v1269_v61, 7  ;;  %v993_v25 = vmul.f32 %v20939_v15, %v24043_v45  ;;  %v991_v26 = vmul.f32 %v24043_v45, %v908_v23  ;;  %v20286_v34 = vpack.c.bf16 %v1059_v9, %v1059_v9 }
 0x138   : > { %v1290_v27 = vor.u32 %v1288_v60, %v1287_v5  ;;  %v1291_v29 = vrot.slane %v1287_v5, 4  ;;  %v20284_v36 = vpack.c.bf16 %v1057_v10, %v1057_v10  ;;  %v1062_v37 = vmax.f32 %v1030_v20, 0.0  ;;  %v2216_v23 = vld [vmem:[#allocation2 + $0x58] sm:$0xf]  ;;  %v1592_v50 = vld [vmem:[#allocation2 + $0xe4] sm:$0x1] }
 0x139   : > { %v1274_v30 = vor.u32 %v1272_v62, %v1271_v8  ;;  %v1275_v32 = vrot.slane %v1271_v8, 4  ;;  %v1060_v38 = vmax.f32 %v1028_v22, 0.0  ;;  %v1293_v43 = vshrl.u32 %v20286_v34, 16  ;;  %v1577_v51 = vld [vmem:[#allocation2 + $0xd0] sm:$0xf] }
 0x13a   : > { %v1584_v39 = vsel %vm24086_vm8, %v1290_v27, %v1583_v3  ;;  %v1587_v40 = vsel %vm24093_vm9, %v1291_v29, %v1586_v12  ;;  %v1296_v41 = vshll.u32 %v20286_v34, 16  ;;  %v1277_v44 = vshrl.u32 %v20284_v36, 16  ;;  %v24206_v47 = vpop.f32.mrb[24].mxu0  ;;  %v1580_v52 = vld [vmem:[#allocation2 + $0xd4] sm:$0x1] }
 0x13b   : > { %v1572_v33 = vsel %vm24086_vm8, %v1274_v30, %v1571_v16  ;;  %v1575_v15 = vsel %vm24093_vm9, %v1275_v32, %v1574_v17  ;;  %1585 = vst [vmem:[#allocation2 + $0xd8] sm:$0xf] %v1584_v39  ;;  %1588 = vst [vmem:[#allocation2 + $0xdc] sm:$0x1] %v1587_v40  ;;  %v1280_v46 = vshll.u32 %v20284_v36, 16  ;;  %v20289_v54 = vpack.c.bf16 %v1062_v37, %v1062_v37  ;;  %v24210_v61 = vpop.f32.mrb[25].mxu0 }
 0x13c   : > { %1573 = vst [vmem:[#allocation2 + $0xc8] sm:$0xf] %v1572_v33  ;;  %1576 = vst [vmem:[#allocation2 + $0xcc] sm:$0x1] %v1575_v15  ;;  %v20287_v21 = vpack.c.bf16 %v1060_v38, %v1060_v38  ;;  %v1031_v28 = vadd.f32 %v24048_v49, %v993_v25  ;;  %v1029_v60 = vadd.f32 %v24048_v49, %v991_v26  ;;  %v1295_v62 = vrot.slane %v1293_v43, 7  ;;  %v24212_v2 = vpop.f32.mrb[26].mxu0 }
 0x13d   : > { %v1279_v63 = vrot.slane %v1277_v44, 7  ;;  %v2409_v0 = vshrl.u32 %v2216_v23, 16  ;;  %v2412_v1 = vshll.u32 %v2216_v23, 16  ;;  %v1317_v3 = vshrl.u32 %v20289_v54, 16  ;;  %v24214_v10 = vpop.f32.mrb[27].mxu0 }
 0x13e   : > { %v1320_v5 = vshll.u32 %v20289_v54, 16  ;;  %v1301_v8 = vshrl.u32 %v20287_v21, 16  ;;  %v1304_v9 = vshll.u32 %v20287_v21, 16  ;;  %v1298_v12 = vor.u32 %v1296_v41, %v1295_v62  ;;  %v1607_v22 = vld [vmem:[#allocation2 + $0x108] sm:$0xf] }
 0x13f   : > { %v1299_v16 = vrot.slane %v1295_v62, 4  ;;  %v1282_v17 = vor.u32 %v1280_v46, %v1279_v63  ;;  %v1283_v20 = vrot.slane %v1279_v63, 4  ;;  %v1319_v25 = vrot.slane %v1317_v3, 7  ;;  %v1610_v26 = vld [vmem:[#allocation2 + $0x10c] sm:$0x1] }
 0x140   : > { %v1303_v27 = vrot.slane %v1301_v8, 7  ;;  %v1063_v29 = vmax.f32 %v1031_v28, 0.0  ;;  %v1061_v30 = vmax.f32 %v1029_v60, 0.0  ;;  %v1590_v32 = vsel %vm24086_vm8, %v1298_v12, %v1589_v48  ;;  %v1595_v38 = vld [vmem:[#allocation2 + $0xf8] sm:$0xf] }
 0x141   : > { %v1593_v34 = vsel %vm24093_vm9, %v1299_v16, %v1592_v50  ;;  %v1578_v36 = vsel %vm24086_vm8, %v1282_v17, %v1577_v51  ;;  %v1581_v37 = vsel %vm24093_vm9, %v1283_v20, %v1580_v52  ;;  %v1598_v39 = vld [vmem:[#allocation2 + $0xfc] sm:$0x1]  ;;  %1591 = vst [vmem:[#allocation2 + $0xe0] sm:$0xf] %v1590_v32  ;;  %v1322_v33 = vor.u32 %v1320_v5, %v1319_v25  ;;  %v2217_v50 = vld [vmem:[#allocation2 + $0x60] sm:$0xf] }
 0x142   : > { %v2256_v40 = vld [vmem:[#allocation2 + $0x5c] sm:$0x1]  ;;  %1594 = vst [vmem:[#allocation2 + $0xe4] sm:$0x1] %v1593_v34  ;;  %1579 = vst [vmem:[#allocation2 + $0xd0] sm:$0xf] %v1578_v36  ;;  %v1306_v23 = vor.u32 %v1304_v9, %v1303_v27  ;;  %v20290_v41 = vpack.c.bf16 %v1063_v29, %v1063_v29  ;;  %v20288_v44 = vpack.c.bf16 %v1061_v30, %v1061_v30 }
 0x143   : > { %1582 = vst [vmem:[#allocation2 + $0xd4] sm:$0x1] %v1581_v37  ;;  %v1323_v15 = vrot.slane %v1319_v25, 4  ;;  %v1307_v43 = vrot.slane %v1303_v27, 4  ;;  %v2411_v46 = vrot.slane %v2409_v0, 4  ;;  %v2414_v48 = vrot.slane %v2412_v1, 5 }
 0x144   : > { %v24224_v51 = vpop.f32.mrb[28].mxu0  ;;  %v1608_v52 = vsel %vm24086_vm8, %v1322_v33, %v1607_v22  ;;  %v1596_v21 = vsel %vm24086_vm8, %v1306_v23, %v1595_v38  ;;  %v24234_v60 = vld [vmem:[#allocation2 + $0x68] sm:$0xf]  ;;  %v2257_v62 = vld [vmem:[#allocation2 + $0x64] sm:$0x1]  ;;  %v1325_v0 = vshrl.u32 %v20290_v41, 16 }
 0x145   : > { %v1611_v54 = vsel %vm24093_vm9, %v1323_v15, %v1610_v26  ;;  %v1599_v28 = vsel %vm24093_vm9, %v1307_v43, %v1598_v39  ;;  %v24236_v63 = vpop.f32.mrb[29].mxu0  ;;  %1609 = vst [vmem:[#allocation2 + $0x108] sm:$0xf] %v1608_v52  ;;  %1597 = vst [vmem:[#allocation2 + $0xf8] sm:$0xf] %v1596_v21  ;;  %v1328_v1 = vshll.u32 %v20290_v41, 16  ;;  %v2415_v17 = vor.u32 %v2414_v48, %v2411_v46 }
 0x146   : > { %1612 = vst [vmem:[#allocation2 + $0x10c] sm:$0x1] %v1611_v54  ;;  %1600 = vst [vmem:[#allocation2 + $0xfc] sm:$0x1] %v1599_v28  ;;  %v1309_v3 = vshrl.u32 %v20288_v44, 16  ;;  %v1312_v5 = vshll.u32 %v20288_v44, 16 }
 0x147   : > { %v24238_v8 = vpop.f32.mrb[30].mxu0  ;;  %v1613_v9 = vld [vmem:[#allocation2 + $0x110] sm:$0xf]  ;;  %v1616_v12 = vld [vmem:[#allocation2 + $0x114] sm:$0x1]  ;;  %v2418_v20 = vshll.u32 %v2256_v40, 16 }
 0x148   : > { %v1601_v16 = vld [vmem:[#allocation2 + $0x100] sm:$0xf]  ;;  %v2423_v22 = vshrl.u32 %v2217_v50, 16  ;;  %v2426_v25 = vshll.u32 %v2217_v50, 16  ;;  %v24240_v26 = vpop.f32.mrb[31].mxu0  ;;  %v1327_v27 = vrot.slane %v1325_v0, 7 }
 0x149   : > { %v1311_v29 = vrot.slane %v1309_v3, 7  ;;  %v1604_v30 = vld [vmem:[#allocation2 + $0x104] sm:$0x1]  ;;  %v2432_v32 = vshll.u32 %v2257_v62, 16  ;;  %v2437_v34 = vshrl.u32 %v24234_v60, 16  ;;  %v2416_v36 = vrot.slane %v2415_v17, 4 }
 0x14a   : > { %v2420_v37 = vrot.slane %v2418_v20, 5  ;;  %v2258_v38 = vld [vmem:[#allocation2 + $0x6c] sm:$0x1]  ;;  %v2425_v39 = vrot.slane %v2423_v22, 4  ;;  %v2428_v33 = vrot.slane %v2426_v25, 5  ;;  %v1330_v40 = vor.u32 %v1328_v1, %v1327_v27 }
 0x14b   : > { %v22991_v15 = vld [vmem:[%s27928_s6 + $0x1a8] sm:$0xff]   ;;  %v1331_v23 = vrot.slane %v1327_v27, 4  ;;  %v1314_v43 = vor.u32 %v1312_v5, %v1311_v29  ;;  %v1315_v41 = vrot.slane %v1311_v29, 4  ;;  %v2434_v50 = vrot.slane %v2432_v32, 5  ;;  %v22988_v54 = vld [vmem:[#allocation2 + $0xd8] ss:$8 sps:$4 sm:$0xff]  }
 0x14c   : > { %v22986_v44 = vld [vmem:[#allocation2 + $0xc8] ss:$8 sps:$4 sm:$0xff]   ;;  %v2421_v46 = vsel %vm23998_vm4, %v2416_v36, %v2420_v37  ;;  %v2429_v48 = vor.u32 %v2428_v33, %v2425_v39  ;;  %v2439_v52 = vrot.slane %v2437_v34, 4  ;;  %v1614_v21 = vsel %vm24086_vm8, %v1330_v40, %v1613_v9  ;;  %v2220_v25 = vld [vmem:[#allocation2 + $0x78] sm:$0xf] }
 0x14d   : > { %v1617_v28 = vsel %vm24093_vm9, %v1331_v23, %v1616_v12  ;;  %v1602_v62 = vsel %vm24086_vm8, %v1314_v43, %v1601_v16  ;;  %v1605_v0 = vsel %vm24093_vm9, %v1315_v41, %v1604_v30  ;;  %v2219_v1 = vld [vmem:[#allocation2 + $0x70] sm:$0xf]  ;;  %21452 = vmatprep.mubr.msk.bf16.mxu1 %vm2811_vm5, %v22986_v44  ;;  %1615 = vst [vmem:[#allocation2 + $0x110] sm:$0xf] %v1614_v21  ;;  %v2440_v9 = vshll.u32 %v24234_v60, 16 }
 0x14e   : > { %1618 = vst [vmem:[#allocation2 + $0x114] sm:$0x1] %v1617_v28  ;;  %1603 = vst [vmem:[#allocation2 + $0x100] sm:$0xf] %v1602_v62  ;;  %v18782_v3 = vcombine.low %v2407_v13, %v2421_v46  ;;  %v2430_v5 = vrot.slane %v2429_v48, 4  ;;  %v2446_v12 = vshll.u32 %v2258_v38, 16  ;;  %21453 = vmatmul.mubr.msk.bf16.vlgmr.msra.gmra.mrb[0].mxu1 %vm2811_vm5, %v22988_v54  ;;  %v996_v16 = vmul.f32 %v24178_v55, %v24043_v45 }
 0x14f   : > { %1606 = vst [vmem:[#allocation2 + $0x104] sm:$0x1] %v1605_v0  ;;  %v994_v17 = vmul.f32 %v24043_v45, %v24180_v59  ;;  %v997_v20 = vmul.f32 %v24190_v4, %v24043_v45  ;;  %v995_v22 = vmul.f32 %v24043_v45, %v24192_v11  ;;  %21473 = vmatpush3.bf16.msra.mxu1 %v24037_v31  ;;  %v2442_v13 = vrot.slane %v2440_v9, 5  ;;  %v22995_v59 = vld [vmem:[%s27928_s6 + $0x1b0] sm:$0xff]   ;;  %v1634_v9 = vld [vmem:[#allocation2 + $0x12c] sm:$0x1] }
 0x150   : > { %20968 = vmatprep.mubr.msk.bf16.mxu0 %vm2811_vm5, %v18782_v3  ;;  %v2435_v56 = vsel %vm23998_vm4, %v2430_v5, %v2434_v50  ;;  %v2448_v60 = vrot.slane %v2446_v12, 5  ;;  %v2451_v55 = vshrl.u32 %v2219_v1, 16  ;;  %21474 = vmatprep.subr.bf16.mxu1 %v22991_v15  ;;  %v1034_v4 = vadd.f32 %v24048_v49, %v996_v16  ;;  %v2260_v3 = vld [vmem:[#allocation2 + $0x7c] sm:$0x1]  ;;  %v1631_v5 = vld [vmem:[#allocation2 + $0x128] sm:$0xf] }
 0x151   : > { %v1032_v45 = vadd.f32 %v24048_v49, %v994_v17  ;;  %v1035_v11 = vadd.f32 %v24048_v49, %v997_v20  ;;  %v1033_v31 = vadd.f32 %v24048_v49, %v995_v22  ;;  %v2443_v27 = vor.u32 %v2442_v13, %v2439_v52  ;;  %v23001_v49 = vld [vmem:[%s27928_s6 + $0x1b8] sm:$0xff]  }
 0x152   : > { %v2453_v29 = vrot.slane %v2451_v55, 4  ;;  %v2454_v30 = vshll.u32 %v2219_v1, 16  ;;  %v2460_v32 = vshll.u32 %v2259_v53, 16  ;;  %v1066_v34 = vmax.f32 %v1034_v4, 0.0  ;;  %v1619_v16 = vld [vmem:[#allocation2 + $0x118] sm:$0xf] }
 0x153   : > { %v1064_v36 = vmax.f32 %v1032_v45, 0.0  ;;  %v1067_v37 = vmax.f32 %v1035_v11, 0.0  ;;  %v1065_v38 = vmax.f32 %v1033_v31, 0.0  ;;  %21475 = vmatpush3.bf16.msra.mxu1 %v22991_v15  ;;  %v2444_v39 = vrot.slane %v2443_v27, 4  ;;  %v1622_v17 = vld [vmem:[#allocation2 + $0x11c] sm:$0x1] }
 0x154   : > { %v2456_v33 = vrot.slane %v2454_v30, 5  ;;  %v24283_v40 = vrot.slane %v2460_v32, 5  ;;  %v2465_v23 = vshrl.u32 %v2220_v25, 16  ;;  %21476 = vmatprep.subr.bf16.mxu1 %v22995_v59  ;;  %v20293_v43 = vpack.c.bf16 %v1066_v34, %v1066_v34  ;;  %v22990_v21 = vld [vmem:[#allocation2 + $0x108] ss:$8 sps:$4 sm:$0xff]  }
 0x155   : > { %v20291_v41 = vpack.c.bf16 %v1064_v36, %v1064_v36  ;;  %v20294_v44 = vpack.c.bf16 %v1067_v37, %v1067_v37  ;;  %v20292_v46 = vpack.c.bf16 %v1065_v38, %v1065_v38  ;;  %v22989_v48 = vld [vmem:[#allocation2 + $0xf8] ss:$8 sps:$4 sm:$0xff]   ;;  %v2449_v50 = vsel %vm23998_vm4, %v2444_v39, %v2448_v60  ;;  %v1637_v55 = vld [vmem:[#allocation2 + $0x130] sm:$0xf]  ;;  %v1640_v11 = vld [vmem:[#allocation2 + $0x134] sm:$0x1] }
 0x156   : > { %v2457_v52 = vor.u32 %v2456_v33, %v2453_v29  ;;  %v24290_v15 = vrot.slane %v2465_v23, 4  ;;  %v2468_v54 = vshll.u32 %v2220_v25, 16  ;;  %v18783_v28 = vcombine.low %v2435_v56, %v2449_v50  ;;  %21456 = vmatprep.mubr.msk.bf16.mxu1 %vm2811_vm5, %v22989_v48  ;;  %v24297_v56 = vld [vmem:[%s27928_s6 + $0x1c0] sm:$0xff]   ;;  %v24313_v48 = vld [vmem:[#allocation2 + $0x88] sm:$0xf] }
 0x157   : > { %v1349_v62 = vshrl.u32 %v20293_v43, 16  ;;  %v1352_v0 = vshll.u32 %v20293_v43, 16  ;;  %v1333_v1 = vshrl.u32 %v20291_v41, 16  ;;  %21477 = vmatpush3.bf16.msra.mxu1 %v22995_v59  ;;  %v1336_v12 = vshll.u32 %v20291_v41, 16  ;;  %v1625_v36 = vld [vmem:[#allocation2 + $0x120] sm:$0xf] }
 0x158   : > { %v1357_v20 = vshrl.u32 %v20294_v44, 16  ;;  %v1360_v22 = vshll.u32 %v20294_v44, 16  ;;  %v1341_v53 = vshrl.u32 %v20292_v46, 16  ;;  %21457 = vmatmul.mubr.msk.bf16.gmra.mrb[4].mxu1 %vm2811_vm5, %v22990_v21  ;;  %21478 = vmatprep.subr.bf16.mxu1 %v23001_v49  ;;  %v1344_v59 = vshll.u32 %v20292_v46, 16  ;;  %v1628_v37 = vld [vmem:[#allocation2 + $0x124] sm:$0x1] }
 0x159   : > { %20969 = vmatmul.mubr.msk.bf16.gmra.mrb[40].mxu0 %vm2811_vm5, %v18783_v28  ;;  %v1351_v13 = vrot.slane %v1349_v62, 7  ;;  %v1335_v60 = vrot.slane %v1333_v1, 7  ;;  %v24300_v4 = vrot.slane %v2457_v52, 4  ;;  %v2470_v25 = vrot.slane %v2468_v54, 5  ;;  %v24302_v43 = vld [vmem:[#allocation2 + $0x80] sm:$0xf] }
 0x15a   : > { %v1359_v45 = vrot.slane %v1357_v20, 7  ;;  %v1343_v31 = vrot.slane %v1341_v53, 7  ;;  %v2474_v27 = vshll.u32 %v2260_v3, 16  ;;  %v2261_v50 = vld [vmem:[#allocation2 + $0x84] sm:$0x1]  ;;  %v2496_v20 = vshll.u32 %v24313_v48, 16 }
 0x15b   : > { %v1354_v29 = vor.u32 %v1352_v0, %v1351_v13  ;;  %v1355_v30 = vrot.slane %v1351_v13, 4  ;;  %v1338_v32 = vor.u32 %v1336_v12, %v1335_v60  ;;  %v1339_v34 = vrot.slane %v1335_v60, 4  ;;  %21479 = vmatpush3.bf16.msra.mxu1 %v23001_v49  ;;  %v2262_v62 = vld [vmem:[#allocation2 + $0x8c] sm:$0x1]  ;;  %v24326_v0 = vld [vmem:[%s27928_s6 + $0x40] sm:$0xff]  }
 0x15c   : > { %v1362_v38 = vor.u32 %v1360_v22, %v1359_v45  ;;  %v1363_v39 = vrot.slane %v1359_v45, 4  ;;  %v1346_v33 = vor.u32 %v1344_v59, %v1343_v31  ;;  %v1347_v23 = vrot.slane %v1343_v31, 4  ;;  %21512 = vmatprep.subr.bf16.mxu1 %v24297_v56  ;;  %v24337_v22 = vld [vmem:[#allocation2 + $0xa8] sm:$0xf]  ;;  %21032 = vmatprep.subr.bf16.mxu0 %v24326_v0  ;;  %v2273_v6 = vld [vmem:[#allocation2 + $0x104] sm:$0x1] }
 0x15d   : > { %v1632_v41 = vsel %vm24086_vm8, %v1354_v29, %v1631_v5  ;;  %v1635_v44 = vsel %vm24093_vm9, %v1355_v30, %v1634_v9  ;;  %v1620_v46 = vsel %vm24086_vm8, %v1338_v32, %v1619_v16  ;;  %v1623_v49 = vsel %vm24093_vm9, %v1339_v34, %v1622_v17 }
 0x15e   : > { %1633 = vst [vmem:[#allocation2 + $0x128] sm:$0xf] %v1632_v41  ;;  %1636 = vst [vmem:[#allocation2 + $0x12c] sm:$0x1] %v1635_v44  ;;  %v1638_v52 = vsel %vm24086_vm8, %v1362_v38, %v1637_v55  ;;  %v1641_v54 = vsel %vm24093_vm9, %v1363_v39, %v1640_v11  ;;  %v1626_v21 = vsel %vm24086_vm8, %v1346_v33, %v1625_v36  ;;  %v2476_v5 = vrot.slane %v2474_v27, 5 }
 0x15f   : > { %1621 = vst [vmem:[#allocation2 + $0x118] sm:$0xf] %v1620_v46  ;;  %1624 = vst [vmem:[#allocation2 + $0x11c] sm:$0x1] %v1623_v49  ;;  %v1629_v28 = vsel %vm24093_vm9, %v1347_v23, %v1628_v37  ;;  %v2463_v1 = vsel %vm23998_vm4, %v24300_v4, %v24283_v40  ;;  %v2471_v3 = vor.u32 %v2470_v25, %v24290_v15  ;;  %v2479_v9 = vshrl.u32 %v24302_v43, 16 }
 0x160   : > { %1639 = vst [vmem:[#allocation2 + $0x130] sm:$0xf] %v1638_v52  ;;  %1642 = vst [vmem:[#allocation2 + $0x134] sm:$0x1] %v1641_v54  ;;  %v2482_v12 = vshll.u32 %v24302_v43, 16  ;;  %v2488_v16 = vshll.u32 %v2261_v50, 16 }
 0x161   : > { %1627 = vst [vmem:[#allocation2 + $0x120] sm:$0xf] %v1626_v21  ;;  %1630 = vst [vmem:[#allocation2 + $0x124] sm:$0x1] %v1629_v28  ;;  %v2493_v17 = vshrl.u32 %v24313_v48, 16  ;;  %v2472_v53 = vrot.slane %v2471_v3, 4 }
 0x162   : > { %v2481_v13 = vrot.slane %v2479_v9, 4  ;;  %v2502_v60 = vshll.u32 %v2262_v62, 16  ;;  %v24343_v40 = vld [vmem:[%s27926_s4] ss:$0 sm:$0xff]  ;;  %v2484_v55 = vrot.slane %v2482_v12, 5  ;;  %v2490_v59 = vrot.slane %v2488_v16, 5 }
 0x163   : > { %v1000_v15 = vmul.f32 %v24343_v40, %v24206_v47  ;;  %v2495_v4 = vrot.slane %v2493_v17, 4  ;;  %v2498_v45 = vrot.slane %v2496_v20, 5  ;;  %v2477_v11 = vsel %vm23998_vm4, %v2472_v53, %v2476_v5  ;;  %v24352_v25 = vld [vmem:[%s27927_s5] ss:$0 sm:$0xff]  ;;  %v2264_v39 = vld [vmem:[#allocation2 + $0xac] sm:$0x1] }
 0x164   : > { %v2504_v31 = vrot.slane %v2502_v60, 5  ;;  %v998_v29 = vmul.f32 %v24343_v40, %v24210_v61  ;;  %v18784_v30 = vcombine.low %v2463_v1, %v2477_v11  ;;  %v2485_v47 = vor.u32 %v2484_v55, %v2481_v13  ;;  %v24371_v62 = vld [vmem:[#allocation2 + $0xb0] sm:$0xf]  ;;  %v1655_v16 = vld [vmem:[#allocation2 + $0x158] sm:$0xf] }
 0x165   : > { %v1038_v27 = vadd.f32 %v24352_v25, %v1000_v15  ;;  %v2499_v32 = vor.u32 %v2498_v45, %v2495_v4  ;;  %v1001_v34 = vmul.f32 %v24343_v40, %v24212_v2  ;;  %v999_v38 = vmul.f32 %v24343_v40, %v24214_v10  ;;  %v1658_v15 = vld [vmem:[#allocation2 + $0x15c] sm:$0x1]  ;;  %v1643_v45 = vld [vmem:[#allocation2 + $0x148] sm:$0xf] }
 0x166   : > { %v1036_v37 = vadd.f32 %v24352_v25, %v998_v29  ;;  %v2521_v33 = vshrl.u32 %v24337_v22, 16  ;;  %20972 = vmatprep.mubr.msk.bf16.mxu0 %vm2811_vm5, %v18784_v30  ;;  %v2486_v23 = vrot.slane %v2485_v47, 4  ;;  %v2524_v44 = vshll.u32 %v24337_v22, 16 }
 0x167   : > { %v1070_v36 = vmax.f32 %v1038_v27, 0.0  ;;  %v2500_v41 = vrot.slane %v2499_v32, 4  ;;  %v1039_v61 = vadd.f32 %v24352_v25, %v1001_v34  ;;  %v1037_v2 = vadd.f32 %v24352_v25, %v999_v38  ;;  %v22994_v1 = vld [vmem:[#allocation2 + $0x128] ss:$8 sps:$4 sm:$0xff]   ;;  %v1646_v34 = vld [vmem:[#allocation2 + $0x14c] sm:$0x1] }
 0x168   : > { %v1068_v49 = vmax.f32 %v1036_v37, 0.0  ;;  %v2523_v50 = vrot.slane %v2521_v33, 4  ;;  %v22992_v52 = vld [vmem:[#allocation2 + $0x118] ss:$8 sps:$4 sm:$0xff]   ;;  %v2491_v10 = vsel %vm23998_vm4, %v2486_v23, %v2490_v59  ;;  %v2526_v28 = vrot.slane %v2524_v44, 5 }
 0x169   : > { %v20297_v46 = vpack.c.bf16 %v1070_v36, %v1070_v36  ;;  %v2505_v54 = vsel %vm23998_vm4, %v2500_v41, %v2504_v31  ;;  %v1071_v21 = vmax.f32 %v1039_v61, 0.0  ;;  %21460 = vmatprep.mubr.msk.bf16.mxu1 %vm2811_vm5, %v22992_v52  ;;  %v1069_v20 = vmax.f32 %v1037_v2, 0.0  ;;  %v1661_v38 = vld [vmem:[#allocation2 + $0x160] sm:$0xf]  ;;  %v1649_v2 = vld [vmem:[#allocation2 + $0x150] sm:$0xf] }
 0x16a   : > { %v18785_v3 = vcombine.low %v2491_v10, %v2505_v54  ;;  %v20295_v12 = vpack.c.bf16 %v1068_v49, %v1068_v49  ;;  %v2527_v53 = vor.u32 %v2526_v28, %v2523_v50  ;;  %v2530_v13 = vshll.u32 %v2264_v39, 16  ;;  %21461 = vmatmul.mubr.msk.bf16.gmra.mrb[8].mxu1 %vm2811_vm5, %v22994_v1  ;;  %v1664_v49 = vld [vmem:[#allocation2 + $0x164] sm:$0x1]  ;;  %v2265_v28 = vld [vmem:[#allocation2 + $0xb4] sm:$0x1] }
 0x16b   : > { %v1381_v5 = vshrl.u32 %v20297_v46, 16  ;;  %v1384_v9 = vshll.u32 %v20297_v46, 16  ;;  %v20298_v17 = vpack.c.bf16 %v1071_v21, %v1071_v21  ;;  %v2535_v4 = vshrl.u32 %v24371_v62, 16  ;;  %v24383_v21 = vld [vmem:[#allocation2 + $0xb8] sm:$0xf] }
 0x16c   : > { %20973 = vmatmul.mubr.msk.bf16.gmra.mrb[44].mxu0 %vm2811_vm5, %v18785_v3  ;;  %v1365_v55 = vshrl.u32 %v20295_v12, 16  ;;  %v1368_v59 = vshll.u32 %v20295_v12, 16  ;;  %v20296_v27 = vpack.c.bf16 %v1069_v20, %v1069_v20  ;;  %v2528_v29 = vrot.slane %v2527_v53, 4  ;;  %v2266_v12 = vld [vmem:[#allocation2 + $0xbc] sm:$0x1] }
 0x16d   : > { %v1383_v60 = vrot.slane %v1381_v5, 7  ;;  %v1389_v11 = vshrl.u32 %v20298_v17, 16  ;;  %v1392_v31 = vshll.u32 %v20298_v17, 16  ;;  %v2532_v36 = vrot.slane %v2530_v13, 5  ;;  %v1652_v5 = vld [vmem:[#allocation2 + $0x154] sm:$0x1] }
 0x16e   : > { %v1367_v32 = vrot.slane %v1365_v55, 7  ;;  %v1373_v39 = vshrl.u32 %v20296_v27, 16  ;;  %v1376_v33 = vshll.u32 %v20296_v27, 16  ;;  %v2537_v23 = vrot.slane %v2535_v4, 4 }
 0x16f   : > { %v1386_v30 = vor.u32 %v1384_v9, %v1383_v60  ;;  %v1387_v47 = vrot.slane %v1383_v60, 4  ;;  %v1391_v37 = vrot.slane %v1389_v11, 7  ;;  %v2533_v54 = vsel %vm23998_vm4, %v2528_v29, %v2532_v36 }
 0x170   : > { %v1370_v44 = vor.u32 %v1368_v59, %v1367_v32  ;;  %v1371_v46 = vrot.slane %v1367_v32, 4  ;;  %v1375_v10 = vrot.slane %v1373_v39, 7  ;;  %v18786_v9 = vcombine.low %v2519_v14, %v2533_v54 }
 0x171   : > { %v1656_v41 = vsel %vm24086_vm8, %v1386_v30, %v1655_v16  ;;  %v1659_v61 = vsel %vm24093_vm9, %v1387_v47, %v1658_v15  ;;  %v1394_v50 = vor.u32 %v1392_v31, %v1391_v37  ;;  %v1395_v52 = vrot.slane %v1391_v37, 4 }
 0x172   : > { %1657 = vst [vmem:[#allocation2 + $0x158] sm:$0xf] %v1656_v41  ;;  %1660 = vst [vmem:[#allocation2 + $0x15c] sm:$0x1] %v1659_v61  ;;  %v1644_v1 = vsel %vm24086_vm8, %v1370_v44, %v1643_v45  ;;  %v1647_v3 = vsel %vm24093_vm9, %v1371_v46, %v1646_v34  ;;  %v2538_v16 = vshll.u32 %v24371_v62, 16  ;;  %v1378_v53 = vor.u32 %v1376_v33, %v1375_v10 }
 0x173   : > { %1645 = vst [vmem:[#allocation2 + $0x148] sm:$0xf] %v1644_v1  ;;  %1648 = vst [vmem:[#allocation2 + $0x14c] sm:$0x1] %v1647_v3  ;;  %v1662_v17 = vsel %vm24086_vm8, %v1394_v50, %v1661_v38  ;;  %v1665_v20 = vsel %vm24093_vm9, %v1395_v52, %v1664_v49  ;;  %v1379_v13 = vrot.slane %v1375_v10, 4  ;;  %20976 = vmatprep.mubr.msk.bf16.mxu0 %vm2811_vm5, %v18786_v9  ;;  %v2544_v57 = vshll.u32 %v2265_v28, 16 }
 0x174   : > { %1663 = vst [vmem:[#allocation2 + $0x160] sm:$0xf] %v1662_v17  ;;  %1666 = vst [vmem:[#allocation2 + $0x164] sm:$0x1] %v1665_v20  ;;  %v2540_v60 = vrot.slane %v2538_v16, 5  ;;  %v2549_v58 = vshrl.u32 %v24383_v21, 16  ;;  %v1650_v15 = vsel %vm24086_vm8, %v1378_v53, %v1649_v2  ;;  %v1004_v4 = vmul.f32 %v24343_v40, %v24224_v51 }
 0x175   : > { %v2552_v14 = vshll.u32 %v24383_v21, 16  ;;  %v1653_v55 = vsel %vm24093_vm9, %v1379_v13, %v1652_v5  ;;  %v2558_v59 = vshll.u32 %v2266_v12, 16  ;;  %v24408_v45 = vld [vmem:[#allocation2 + $0xc0] sm:$0xf]  ;;  %1651 = vst [vmem:[#allocation2 + $0x150] sm:$0xf] %v1650_v15  ;;  %v1002_v32 = vmul.f32 %v24343_v40, %v24236_v63 }
 0x176   : > { %1654 = vst [vmem:[#allocation2 + $0x154] sm:$0x1] %v1653_v55  ;;  %v2541_v11 = vor.u32 %v2540_v60, %v2537_v23  ;;  %v2546_v31 = vrot.slane %v2544_v57, 5  ;;  %v2551_v27 = vrot.slane %v2549_v58, 4  ;;  %v1042_v47 = vadd.f32 %v24352_v25, %v1004_v4  ;;  %v24420_v41 = vld [vmem:[#allocation2 + $0xc8] sm:$0xf] }
 0x177   : > { %v2554_v29 = vrot.slane %v2552_v14, 5  ;;  %v2560_v30 = vrot.slane %v2558_v59, 5  ;;  %v1005_v34 = vmul.f32 %v24343_v40, %v24238_v8  ;;  %v1003_v51 = vmul.f32 %v24343_v40, %v24240_v26  ;;  %v2267_v61 = vld [vmem:[#allocation2 + $0xc4] sm:$0x1]  ;;  %v1679_v16 = vld [vmem:[#allocation2 + $0x178] sm:$0xf] }
 0x178   : > { %v2542_v36 = vrot.slane %v2541_v11, 4  ;;  %v2563_v38 = vshrl.u32 %v24408_v45, 16  ;;  %v1074_v39 = vmax.f32 %v1042_v47, 0.0  ;;  %v1040_v33 = vadd.f32 %v24352_v25, %v1002_v32  ;;  %v1682_v17 = vld [vmem:[#allocation2 + $0x17c] sm:$0x1] }
 0x179   : > { %v2555_v37 = vor.u32 %v2554_v29, %v2551_v27  ;;  %v1043_v23 = vadd.f32 %v24352_v25, %v1005_v34  ;;  %v2566_v63 = vshll.u32 %v24408_v45, 16  ;;  %v1041_v46 = vadd.f32 %v24352_v25, %v1003_v51  ;;  %v2268_v15 = vld [vmem:[#allocation2 + $0xcc] sm:$0x1]  ;;  %v1667_v59 = vld [vmem:[#allocation2 + $0x168] sm:$0xf] }
 0x17a   : > { %v2547_v8 = vsel %vm23998_vm4, %v2542_v36, %v2546_v31  ;;  %v2565_v49 = vrot.slane %v2563_v38, 4  ;;  %v20301_v26 = vpack.c.bf16 %v1074_v39, %v1074_v39  ;;  %v1072_v40 = vmax.f32 %v1040_v33, 0.0  ;;  %v1670_v4 = vld [vmem:[#allocation2 + $0x16c] sm:$0x1]  ;;  %v1685_v34 = vld [vmem:[#allocation2 + $0x180] sm:$0xf] }
 0x17b   : > { %v2556_v44 = vrot.slane %v2555_v37, 4  ;;  %v1075_v2 = vmax.f32 %v1043_v23, 0.0  ;;  %v2568_v50 = vrot.slane %v2566_v63, 5  ;;  %v1073_v10 = vmax.f32 %v1041_v46, 0.0  ;;  %v22999_v60 = vld [vmem:[#allocation2 + $0x158] ss:$8 sps:$4 sm:$0xff]  }
 0x17c   : > { %v2572_v54 = vshll.u32 %v2267_v61, 16  ;;  %v2577_v28 = vshrl.u32 %v24420_v41, 16  ;;  %v1413_v3 = vshrl.u32 %v20301_v26, 16  ;;  %v1416_v5 = vshll.u32 %v20301_v26, 16  ;;  %v22997_v12 = vld [vmem:[#allocation2 + $0x148] ss:$8 sps:$4 sm:$0xff]  }
 0x17d   : > { %v2561_v52 = vsel %vm23998_vm4, %v2556_v44, %v2560_v30  ;;  %v20299_v9 = vpack.c.bf16 %v1072_v40, %v1072_v40  ;;  %v20302_v25 = vpack.c.bf16 %v1075_v2, %v1075_v2  ;;  %v20300_v20 = vpack.c.bf16 %v1073_v10, %v1073_v10  ;;  %21464 = vmatprep.mubr.msk.bf16.mxu1 %vm2811_vm5, %v22997_v12  ;;  %v1688_v51 = vld [vmem:[#allocation2 + $0x184] sm:$0x1]  ;;  %v1673_v44 = vld [vmem:[#allocation2 + $0x170] sm:$0xf]  ;;  %v1676_v46 = vld [vmem:[#allocation2 + $0x174] sm:$0x1] }
 0x17e   : > { %v18787_v1 = vcombine.low %v2547_v8, %v2561_v52  ;;  %v2569_v53 = vor.u32 %v2568_v50, %v2565_v49  ;;  %v24429_v13 = vrot.slane %v2572_v54, 5  ;;  %v1415_v57 = vrot.slane %v1413_v3, 7  ;;  %21465 = vmatmul.mubr.msk.bf16.gmra.mrb[12].mxu1 %vm2811_vm5, %v22999_v60  ;;  %v24439_v50 = vld [vmem:[#allocation2 + $0xd0] sm:$0xf]  ;;  %v24441_v52 = vld [vmem:[#allocation2 + $0xd8] sm:$0xf] }
 0x17f   : > { %v1397_v58 = vshrl.u32 %v20299_v9, 16  ;;  %v1400_v14 = vshll.u32 %v20299_v9, 16  ;;  %v2579_v55 = vrot.slane %v2577_v28, 4  ;;  %v1421_v11 = vshrl.u32 %v20302_v25, 16  ;;  %v2269_v3 = vld [vmem:[#allocation2 + $0xd4] sm:$0x1] }
 0x180   : > { %20977 = vmatmul.mubr.msk.bf16.gmra.mrb[48].mxu0 %vm2811_vm5, %v18787_v1  ;;  %v1424_v31 = vshll.u32 %v20302_v25, 16  ;;  %v1405_v27 = vshrl.u32 %v20300_v20, 16  ;;  %v1408_v29 = vshll.u32 %v20300_v20, 16  ;;  %v1418_v30 = vor.u32 %v1416_v5, %v1415_v57  ;;  %v2270_v5 = vld [vmem:[#allocation2 + $0xdc] sm:$0x1] }
 0x181   : > { %v1419_v47 = vrot.slane %v1415_v57, 4  ;;  %v1399_v32 = vrot.slane %v1397_v58, 7  ;;  %v2570_v36 = vrot.slane %v2569_v53, 4  ;;  %v1423_v37 = vrot.slane %v1421_v11, 7 }
 0x182   : > { %v1407_v38 = vrot.slane %v1405_v27, 7  ;;  %v2580_v39 = vshll.u32 %v24420_v41, 16  ;;  %v2586_v33 = vshll.u32 %v2268_v15, 16  ;;  %v1680_v23 = vsel %vm24086_vm8, %v1418_v30, %v1679_v16  ;;  %v24469_v30 = vld [vmem:[#allocation2 + $0x100] sm:$0xf] }
 0x183   : > { %v1683_v61 = vsel %vm24093_vm9, %v1419_v47, %v1682_v17  ;;  %v1402_v63 = vor.u32 %v1400_v14, %v1399_v32  ;;  %v1403_v8 = vrot.slane %v1399_v32, 4  ;;  %1681 = vst [vmem:[#allocation2 + $0x178] sm:$0xf] %v1680_v23  ;;  %v1426_v49 = vor.u32 %v1424_v31, %v1423_v37  ;;  %v24462_v14 = vld [vmem:[#allocation2 + $0xf8] sm:$0xf] }
 0x184   : > { %1684 = vst [vmem:[#allocation2 + $0x17c] sm:$0x1] %v1683_v61  ;;  %v1427_v26 = vrot.slane %v1423_v37, 4  ;;  %v1410_v40 = vor.u32 %v1408_v29, %v1407_v38  ;;  %v1411_v2 = vrot.slane %v1407_v38, 4  ;;  %v2575_v28 = vsel %vm23998_vm4, %v2570_v36, %v24429_v13  ;;  %v24479_v38 = vld [vmem:[#allocation2 + $0x108] sm:$0xf] }
 0x185   : > { %v1668_v10 = vsel %vm24086_vm8, %v1402_v63, %v1667_v59  ;;  %v1671_v54 = vsel %vm24093_vm9, %v1403_v8, %v1670_v4  ;;  %v2582_v1 = vrot.slane %v2580_v39, 5  ;;  %v1686_v9 = vsel %vm24086_vm8, %v1426_v49, %v1685_v34  ;;  %v2272_v4 = vld [vmem:[#allocation2 + $0xfc] sm:$0x1]  ;;  %v2274_v39 = vld [vmem:[#allocation2 + $0x10c] sm:$0x1] }
 0x186   : > { %1669 = vst [vmem:[#allocation2 + $0x168] sm:$0xf] %v1668_v10  ;;  %1672 = vst [vmem:[#allocation2 + $0x16c] sm:$0x1] %v1671_v54  ;;  %v1689_v12 = vsel %vm24093_vm9, %v1427_v26, %v1688_v51  ;;  %v1674_v16 = vsel %vm24086_vm8, %v1410_v40, %v1673_v44  ;;  %v1677_v17 = vsel %vm24093_vm9, %v1411_v2, %v1676_v46  ;;  %v2588_v20 = vrot.slane %v2586_v33, 5 }
 0x187   : > { %1687 = vst [vmem:[#allocation2 + $0x180] sm:$0xf] %v1686_v9  ;;  %1690 = vst [vmem:[#allocation2 + $0x184] sm:$0x1] %v1689_v12  ;;  %v2583_v25 = vor.u32 %v2582_v1, %v2579_v55  ;;  %v2591_v53 = vshrl.u32 %v24439_v50, 16  ;;  %v2594_v13 = vshll.u32 %v24439_v50, 16 }
 0x188   : > { %1675 = vst [vmem:[#allocation2 + $0x170] sm:$0xf] %v1674_v16  ;;  %1678 = vst [vmem:[#allocation2 + $0x174] sm:$0x1] %v1677_v17  ;;  %v2600_v60 = vshll.u32 %v2269_v3, 16  ;;  %v2605_v57 = vshrl.u32 %v24441_v52, 16 }
 0x189   : > { %v2608_v58 = vshll.u32 %v24441_v52, 16  ;;  %v2614_v35 = vshll.u32 %v2270_v5, 16  ;;  %v2584_v42 = vrot.slane %v2583_v25, 4  ;;  %v2593_v15 = vrot.slane %v2591_v53, 4  ;;  %v24483_v8 = vld [vmem:[#allocation2 + $0x110] sm:$0xf] }
 0x18a   : > { %v2596_v59 = vrot.slane %v2594_v13, 5  ;;  %v24467_v55 = vrot.slane %v2625_v18, 4  ;;  %v2602_v11 = vrot.slane %v2600_v60, 5  ;;  %v2607_v31 = vrot.slane %v2605_v57, 4  ;;  %v24486_v26 = vld [vmem:[#allocation2 + $0x118] sm:$0xf] }
 0x18b   : > { %v2610_v27 = vrot.slane %v2608_v58, 5  ;;  %v2616_v29 = vrot.slane %v2614_v35, 5  ;;  %v2589_v47 = vsel %vm23998_vm4, %v2584_v42, %v2588_v20  ;;  %v2633_v36 = vshrl.u32 %v24462_v14, 16  ;;  %v2275_v40 = vld [vmem:[#allocation2 + $0x114] sm:$0x1] }
 0x18c   : > { %v2597_v32 = vor.u32 %v2596_v59, %v2593_v15  ;;  %v2631_v34 = vsel %vm23998_vm4, %v24467_v55, %v24080_v19  ;;  %v18788_v7 = vcombine.low %v2575_v28, %v2589_v47  ;;  %v2636_v37 = vshll.u32 %v24462_v14, 16  ;;  %v2276_v57 = vld [vmem:[#allocation2 + $0x11c] sm:$0x1]  ;;  %v24500_v55 = vld [vmem:[#allocation2 + $0x120] sm:$0xf] }
 0x18d   : > { %v2611_v18 = vor.u32 %v2610_v27, %v2607_v31  ;;  %v2642_v51 = vshll.u32 %v2272_v4, 16  ;;  %v2635_v23 = vrot.slane %v2633_v36, 4  ;;  %v2647_v61 = vshrl.u32 %v24469_v30, 16  ;;  %v24504_v47 = vld [vmem:[#allocation2 + $0x128] sm:$0xf] }
 0x18e   : > { %v2598_v33 = vrot.slane %v2597_v32, 4  ;;  %v2650_v63 = vshll.u32 %v24469_v30, 16  ;;  %20980 = vmatprep.mubr.msk.bf16.mxu0 %vm2811_vm5, %v18788_v7  ;;  %v2638_v44 = vrot.slane %v2636_v37, 5  ;;  %v2656_v49 = vshll.u32 %v2273_v6, 16  ;;  %v23005_v16 = vld [vmem:[#allocation2 + $0x178] ss:$8 sps:$4 sm:$0xff]  }
 0x18f   : > { %v2612_v19 = vrot.slane %v2611_v18, 4  ;;  %v2644_v46 = vrot.slane %v2642_v51, 5  ;;  %v2649_v10 = vrot.slane %v2647_v61, 4  ;;  %v2661_v28 = vshrl.u32 %v24479_v38, 16  ;;  %v23003_v1 = vld [vmem:[#allocation2 + $0x168] ss:$8 sps:$4 sm:$0xff]  }
 0x190   : > { %v2603_v2 = vsel %vm23998_vm4, %v2598_v33, %v2602_v11  ;;  %v2652_v54 = vrot.slane %v2650_v63, 5  ;;  %v2639_v5 = vor.u32 %v2638_v44, %v2635_v23  ;;  %v2658_v9 = vrot.slane %v2656_v49, 5  ;;  %21468 = vmatprep.mubr.msk.bf16.mxu1 %vm2811_vm5, %v23003_v1  ;;  %v2277_v32 = vld [vmem:[#allocation2 + $0x124] sm:$0x1]  ;;  %v9570_v1 = vld [vmem:[#allocation2 + $0x58] sm:$0xf] }
 0x191   : > { %v2617_v3 = vsel %vm23998_vm4, %v2612_v19, %v2616_v29  ;;  %v2664_v12 = vshll.u32 %v24479_v38, 16  ;;  %v2663_v20 = vrot.slane %v2661_v28, 4  ;;  %v2670_v53 = vshll.u32 %v2274_v39, 16  ;;  %21469 = vmatmul.mubr.msk.bf16.gmra.mrb[16].mxu1 %vm2811_vm5, %v23005_v16  ;;  %v9571_v16 = vld [vmem:[#allocation2 + $0x5c] sm:$0x1] }
 0x192   : > { %v18789_v17 = vcombine.low %v2603_v2, %v2617_v3  ;;  %v2653_v25 = vor.u32 %v2652_v54, %v2649_v10  ;;  %v2640_v13 = vrot.slane %v2639_v5, 4  ;;  %v2675_v58 = vshrl.u32 %v24483_v8, 16 }
 0x193   : > { %v2666_v60 = vrot.slane %v2664_v12, 5  ;;  %v2678_v35 = vshll.u32 %v24483_v8, 16  ;;  %v2672_v15 = vrot.slane %v2670_v53, 5  ;;  %v2684_v59 = vshll.u32 %v2275_v40, 16  ;;  %v2278_v40 = vld [vmem:[#allocation2 + $0x12c] sm:$0x1] }
 0x194   : > { %20981 = vmatmul.mubr.msk.bf16.gmra.mrb[52].mxu0 %vm2811_vm5, %v18789_v17  ;;  %v2654_v42 = vrot.slane %v2653_v25, 4  ;;  %v2689_v4 = vshrl.u32 %v24486_v26, 16  ;;  %v2645_v11 = vsel %vm23998_vm4, %v2640_v13, %v2644_v46  ;;  %v2677_v27 = vrot.slane %v2675_v58, 4  ;;  %v9572_v17 = vld [vmem:[#allocation2 + $0x60] sm:$0xf] }
 0x195   : > { %v2667_v31 = vor.u32 %v2666_v60, %v2663_v20  ;;  %v2680_v29 = vrot.slane %v2678_v35, 5  ;;  %v18790_v36 = vcombine.low %v2631_v34, %v2645_v11  ;;  %v2686_v7 = vrot.slane %v2684_v59, 5  ;;  %v24519_v53 = vld [vmem:[#allocation2] sm:$0xf]  ;;  %v23237_v13 = vld [vmem:[#allocation2 + $0x8] sm:$0xf] }
 0x196   : > { %v2659_v6 = vsel %vm23998_vm4, %v2654_v42, %v2658_v9  ;;  %v2691_v18 = vrot.slane %v2689_v4, 4  ;;  %v2692_v39 = vshll.u32 %v24486_v26, 16  ;;  %v2698_v33 = vshll.u32 %v2276_v57, 16  ;;  %v24522_v57 = vld [vmem:[#allocation2 + $0x10] sm:$0xf] }
 0x197   : > { %v2668_v37 = vrot.slane %v2667_v31, 4  ;;  %v2681_v51 = vor.u32 %v2680_v29, %v2677_v27  ;;  %20984 = vmatprep.mubr.msk.bf16.mxu0 %vm2811_vm5, %v18790_v36  ;;  %v2703_v23 = vshrl.u32 %v24500_v55, 16  ;;  %v2706_v61 = vshll.u32 %v24500_v55, 16  ;;  %v24524_v58 = vld [vmem:[#allocation2 + $0x18] sm:$0xf] }
 0x198   : > { %v2712_v63 = vshll.u32 %v2277_v32, 16  ;;  %v2717_v19 = vshrl.u32 %v24504_v47, 16  ;;  %v2694_v46 = vrot.slane %v2692_v39, 5  ;;  %v2700_v49 = vrot.slane %v2698_v33, 5  ;;  %v24528_v27 = vld [vmem:[#allocation2 + $0x64] sm:$0x1] }
 0x199   : > { %v2673_v34 = vsel %vm23998_vm4, %v2668_v37, %v2672_v15  ;;  %v2682_v44 = vrot.slane %v2681_v51, 4  ;;  %v2705_v10 = vrot.slane %v2703_v23, 4  ;;  %v2708_v54 = vrot.slane %v2706_v61, 5  ;;  %v9574_v37 = vld [vmem:[#allocation2 + $0x68] sm:$0xf] }
 0x19a   : > { %v18791_v2 = vcombine.low %v2659_v6, %v2673_v34  ;;  %v2714_v28 = vrot.slane %v2712_v63, 5  ;;  %v2695_v5 = vor.u32 %v2694_v46, %v2691_v18  ;;  %v2719_v9 = vrot.slane %v2717_v19, 4  ;;  %v24536_v46 = vld [vmem:[#allocation2 + $0x20] sm:$0xf] }
 0x19b   : > { %v2687_v3 = vsel %vm23998_vm4, %v2682_v44, %v2686_v7  ;;  %v2720_v12 = vshll.u32 %v24504_v47, 16  ;;  %v2709_v25 = vor.u32 %v2708_v54, %v2705_v10  ;;  %v2726_v20 = vshll.u32 %v2278_v40, 16  ;;  %v9575_v44 = vld [vmem:[#allocation2 + $0x6c] sm:$0x1]  ;;  %v24544_v10 = vld [vmem:[#allocation2 + $0x38] sm:$0xf] }
 0x19c   : > { %20985 = vmatmul.mubr.msk.bf16.gmra.mrb[56].mxu0 %vm2811_vm5, %v18791_v2  ;;  %v18814_v60 = vcombine.low %v24519_v53, %v23237_v13  ;;  %v18815_v35 = vcombine.low %v24522_v57, %v24524_v58  ;;  %v2696_v42 = vrot.slane %v2695_v5, 4  ;;  %v9635_v59 = vshrl.u32 %v9570_v1, 16  ;;  %v24542_v2 = vld [vmem:[#allocation2 + $0x30] sm:$0xf]  ;;  %v24591_v58 = vld [vmem:[#allocation2 + $0xac] sm:$0x1] }
 0x19d   : > { %v2722_v15 = vrot.slane %v2720_v12, 5  ;;  %v9638_v4 = vshll.u32 %v9570_v1, 16  ;;  %v2710_v11 = vrot.slane %v2709_v25, 4  ;;  %v2728_v31 = vrot.slane %v2726_v20, 5 }
 0x19e   : > { %v9644_v29 = vshll.u32 %v9571_v16, 16  ;;  %v9649_v32 = vshrl.u32 %v9572_v17, 16  ;;  %v2701_v36 = vsel %vm23998_vm4, %v2696_v42, %v2700_v49  ;;  %v9637_v7 = vrot.slane %v9635_v59, 4  ;;  %v24538_v49 = vld [vmem:[#allocation2 + $0x28] sm:$0xf] }
 0x19f   : > { %v2723_v6 = vor.u32 %v2722_v15, %v2719_v9  ;;  %v9640_v18 = vrot.slane %v9638_v4, 5  ;;  %v18792_v51 = vcombine.low %v2687_v3, %v2701_v36  ;;  %v2715_v39 = vsel %vm23998_vm4, %v2710_v11, %v2714_v28  ;;  %v9576_v28 = vld [vmem:[#allocation2 + $0x70] sm:$0xf]  ;;  %v9578_v42 = vld [vmem:[#allocation2 + $0x78] sm:$0xf] }
 0x1a0   : > { %v9646_v33 = vrot.slane %v9644_v29, 5  ;;  %v9651_v23 = vrot.slane %v9649_v32, 4  ;;  %v9652_v19 = vshll.u32 %v9572_v17, 16  ;;  %v9658_v34 = vshll.u32 %v24528_v27, 16  ;;  %v9577_v17 = vld [vmem:[#allocation2 + $0x74] sm:$0x1] }
 0x1a1   : > { %v2724_v61 = vrot.slane %v2723_v6, 4  ;;  %v9641_v63 = vor.u32 %v9640_v18, %v9637_v7  ;;  %20988 = vmatprep.mubr.msk.bf16.mxu0 %vm2811_vm5, %v18792_v51  ;;  %v18816_v40 = vcombine.low %v24536_v46, %v24538_v49  ;;  %v18817_v54 = vcombine.low %v24542_v2, %v24544_v10  ;;  %v9579_v29 = vld [vmem:[#allocation2 + $0x7c] sm:$0x1]  ;;  %v24553_v6 = vld [vmem:[#allocation2 + $0x50] sm:$0xf] }
 0x1a2   : > { %v9663_v1 = vshrl.u32 %v9574_v37, 16  ;;  %v9666_v3 = vshll.u32 %v9574_v37, 16  ;;  %v9654_v12 = vrot.slane %v9652_v19, 5  ;;  %v9660_v16 = vrot.slane %v9658_v34, 5  ;;  %v24555_v7 = vld [vmem:[#allocation2 + $0x58] sm:$0xf] }
 0x1a3   : > { %v2729_v5 = vsel %vm23998_vm4, %v2724_v61, %v2728_v31  ;;  %v9642_v9 = vrot.slane %v9641_v63, 4  ;;  %v9672_v13 = vshll.u32 %v9575_v44, 16  ;;  %v9677_v4 = vshrl.u32 %v9576_v28, 16  ;;  %v9580_v37 = vld [vmem:[#allocation2 + $0x80] sm:$0xf] }
 0x1a4   : > { %v18793_v25 = vcombine.low %v2715_v39, %v2729_v5  ;;  %v9665_v20 = vrot.slane %v9663_v1, 4  ;;  %v9668_v53 = vrot.slane %v9666_v3, 5  ;;  %v9655_v59 = vor.u32 %v9654_v12, %v9651_v23  ;;  %v9581_v19 = vld [vmem:[#allocation2 + $0x84] sm:$0x1]  ;;  %v24599_v46 = vld [vmem:[#allocation2 + $0x70] sm:$0xf] }
 0x1a5   : > { %v9647_v15 = vsel %vm23998_vm4, %v9642_v9, %v9646_v33  ;;  %v9680_v11 = vshll.u32 %v9576_v28, 16  ;;  %v9674_v31 = vrot.slane %v9672_v13, 5  ;;  %v9686_v36 = vshll.u32 %v9577_v17, 16  ;;  %v9582_v9 = vld [vmem:[#allocation2 + $0x88] sm:$0xf] }
 0x1a6   : > { %20989 = vmatmul.mubr.msk.bf16.gmra.mrb[60].mxu0 %vm2811_vm5, %v18793_v25  ;;  %v9669_v32 = vor.u32 %v9668_v53, %v9665_v20  ;;  %v18818_v18 = vcombine.low %v24553_v6, %v24555_v7  ;;  %v9656_v51 = vrot.slane %v9655_v59, 4  ;;  %v9679_v39 = vrot.slane %v9677_v4, 4  ;;  %v9583_v20 = vld [vmem:[#allocation2 + $0x8c] sm:$0x1]  ;;  %v24601_v49 = vld [vmem:[#allocation2 + $0x78] sm:$0xf] }
 0x1a7   : > { %21000 = vmatprep.mubr.msk.bf16.mxu0 %vm2811_vm5, %v18814_v60  ;;  %v9682_v33 = vrot.slane %v9680_v11, 5  ;;  %v9691_v23 = vshrl.u32 %v9578_v42, 16  ;;  %v9688_v63 = vrot.slane %v9686_v36, 5  ;;  %v9694_v34 = vshll.u32 %v9578_v42, 16  ;;  %v24569_v11 = vld [vmem:[#allocation2 + $0x68] sm:$0xf] }
 0x1a8   : > { %v9670_v61 = vrot.slane %v9669_v32, 4  ;;  %v9700_v44 = vshll.u32 %v9579_v29, 16  ;;  %v9661_v28 = vsel %vm23998_vm4, %v9656_v51, %v9660_v16  ;;  %v9705_v5 = vshrl.u32 %v9580_v37, 16  ;;  %v24567_v16 = vld [vmem:[#allocation2 + $0x60] sm:$0xf]  ;;  %v23023_v36 = vld [vmem:[%s27928_s6 + $0x48] sm:$0xff]  }
 0x1a9   : > { %v9683_v1 = vor.u32 %v9682_v33, %v9679_v39  ;;  %v9693_v3 = vrot.slane %v9691_v23, 4  ;;  %v19470_v12 = vcombine.low %v9647_v15, %v9661_v28  ;;  %v9696_v17 = vrot.slane %v9694_v34, 5  ;;  %v9584_v29 = vld [vmem:[#allocation2 + $0x90] sm:$0xf]  ;;  %v24578_v33 = vld [vmem:[#allocation2 + $0x94] sm:$0x1] }
 0x1aa   : > { %v9675_v60 = vsel %vm23998_vm4, %v9670_v61, %v9674_v31  ;;  %v24564_v25 = vrot.slane %v9700_v44, 5  ;;  %v9707_v13 = vrot.slane %v9705_v5, 4  ;;  %v9708_v59 = vshll.u32 %v9580_v37, 16  ;;  %v9586_v28 = vld [vmem:[#allocation2 + $0xa8] sm:$0xf] }
 0x1ab   : > { %v9684_v53 = vrot.slane %v9683_v1, 4  ;;  %v9714_v42 = vshll.u32 %v9581_v19, 16  ;;  %21480 = vmatprep.mubr.msk.bf16.mxu1 %vm2811_vm5, %v19470_v12  ;;  %v9697_v4 = vor.u32 %v9696_v17, %v9693_v3  ;;  %v18819_v15 = vcombine.low %v24567_v16, %v24569_v11  ;;  %v23012_v1 = vld [vmem:[%s27928_s6 + $0x1c8] sm:$0xff]   ;;  %v24687_v11 = vld [vmem:[#allocation2 + $0xe4] sm:$0x1] }
 0x1ac   : > { %v9719_v32 = vshrl.u32 %v9582_v9, 16  ;;  %v9722_v31 = vshll.u32 %v9582_v9, 16  ;;  %v9710_v51 = vrot.slane %v9708_v59, 5  ;;  %v9728_v23 = vshll.u32 %v9583_v20, 16 }
 0x1ad   : > { %v9689_v37 = vsel %vm23998_vm4, %v9684_v53, %v9688_v63  ;;  %v9716_v39 = vrot.slane %v9714_v42, 5  ;;  %v9698_v19 = vrot.slane %v9697_v4, 4  ;;  %v9733_v5 = vshrl.u32 %v9584_v29, 16  ;;  %v24609_v42 = vld [vmem:[#allocation2 + $0xb4] sm:$0x1] }
 0x1ae   : > { %21001 = vmatmul.mubr.msk.bf16.vlgmr.msra.gmra.mrb[32].mxu0 %vm2811_vm5, %v18815_v35  ;;  %v19471_v61 = vcombine.low %v9675_v60, %v9689_v37  ;;  %v9721_v34 = vrot.slane %v9719_v32, 4  ;;  %v9724_v44 = vrot.slane %v9722_v31, 5  ;;  %v9711_v63 = vor.u32 %v9710_v51, %v9707_v13  ;;  %v9588_v60 = vld [vmem:[#allocation2 + $0xb0] sm:$0xf] }
 0x1af   : > { %21004 = vmatprep.mubr.msk.bf16.mxu0 %vm2811_vm5, %v18816_v40  ;;  %v9730_v3 = vrot.slane %v9728_v23, 5  ;;  %v9736_v57 = vshll.u32 %v9584_v29, 16  ;;  %21033 = vmatpush3.bf16.msra.mxu0 %v24326_v0  ;;  %v9703_v35 = vsel %vm23998_vm4, %v9698_v19, %v24564_v25  ;;  %v9742_v12 = vshll.u32 %v24578_v33, 16  ;;  %v23026_v0 = vld [vmem:[%s27928_s6 + $0x50] sm:$0xff]   ;;  %v9590_v23 = vld [vmem:[#allocation2 + $0xb8] sm:$0xf] }
 0x1b0   : > { %21481 = vmatmul.mubr.msk.bf16.vlgmr.msra.gmra.mrb[20].mxu1 %vm2811_vm5, %v19471_v61  ;;  %v9725_v9 = vor.u32 %v9724_v44, %v9721_v34  ;;  %v18820_v40 = vcombine.low %v24599_v46, %v24601_v49  ;;  %21034 = vmatprep.subr.bf16.mxu0 %v23023_v36  ;;  %v9712_v17 = vrot.slane %v9711_v63, 4  ;;  %v9735_v25 = vrot.slane %v9733_v5, 4  ;;  %v9592_v63 = vld [vmem:[#allocation2 + $0xc0] sm:$0xf] }
 0x1b1   : > { %21513 = vmatpush3.bf16.msra.mxu1 %v24297_v56  ;;  %v9738_v20 = vrot.slane %v9736_v57, 5  ;;  %v9747_v53 = vshrl.u32 %v9586_v28, 16  ;;  %v9744_v59 = vrot.slane %v9742_v12, 5  ;;  %v9750_v4 = vshll.u32 %v9586_v28, 16  ;;  %v23017_v56 = vld [vmem:[%s27928_s6 + $0x1d0] sm:$0xff]  }
 0x1b2   : > { %v9726_v13 = vrot.slane %v9725_v9, 4  ;;  %v9756_v29 = vshll.u32 %v24591_v58, 16  ;;  %21514 = vmatprep.subr.bf16.mxu1 %v23012_v1  ;;  %v9717_v32 = vsel %vm23998_vm4, %v9712_v17, %v9716_v39  ;;  %v9761_v51 = vshrl.u32 %v9588_v60, 16  ;;  %v24621_v28 = vld [vmem:[#allocation2 + $0xbc] sm:$0x1] }
 0x1b3   : > { %v9739_v31 = vor.u32 %v9738_v20, %v9735_v25  ;;  %v9749_v37 = vrot.slane %v9747_v53, 4  ;;  %21035 = vmatpush3.bf16.msra.mxu0 %v23023_v36  ;;  %v19472_v61 = vcombine.low %v9703_v35, %v9717_v32  ;;  %v9752_v34 = vrot.slane %v9750_v4, 5  ;;  %v23027_v36 = vld [vmem:[%s27928_s6 + $0x58] sm:$0xff]   ;;  %v24634_v12 = vld [vmem:[#allocation2 + $0xc4] sm:$0x1] }
 0x1b4   : > { %v9731_v19 = vsel %vm23998_vm4, %v9726_v13, %v9730_v3  ;;  %v24619_v44 = vrot.slane %v9756_v29, 5  ;;  %21036 = vmatprep.subr.bf16.mxu0 %v23026_v0  ;;  %v9763_v5 = vrot.slane %v9761_v51, 4  ;;  %v9764_v57 = vshll.u32 %v9588_v60, 16  ;;  %v9594_v20 = vld [vmem:[#allocation2 + $0xc8] sm:$0xf] }
 0x1b5   : > { %v9740_v39 = vrot.slane %v9739_v31, 4  ;;  %v9770_v9 = vshll.u32 %v24609_v42, 16  ;;  %21515 = vmatpush3.bf16.msra.mxu1 %v23012_v1  ;;  %21484 = vmatprep.mubr.msk.bf16.mxu1 %vm2811_vm5, %v19472_v61  ;;  %v9753_v3 = vor.u32 %v9752_v34, %v9749_v37  ;;  %v18821_v35 = vcombine.low %v24302_v43, %v24313_v48  ;;  %v23024_v1 = vld [vmem:[%s27928_s6 + $0x1d8] sm:$0xff]   ;;  %v24646_v32 = vld [vmem:[#allocation2 + $0xcc] sm:$0x1] }
 0x1b6   : > { %21005 = vmatmul.mubr.msk.bf16.gmra.mrb[36].mxu0 %vm2811_vm5, %v18817_v54  ;;  %v9775_v60 = vshrl.u32 %v9590_v23, 16  ;;  %v9778_v17 = vshll.u32 %v9590_v23, 16  ;;  %v9766_v10 = vrot.slane %v9764_v57, 5  ;;  %v9784_v25 = vshll.u32 %v24621_v28, 16  ;;  %21516 = vmatprep.subr.bf16.mxu1 %v23017_v56  ;;  %v9596_v37 = vld [vmem:[#allocation2 + $0xd0] sm:$0xf] }
 0x1b7   : > { %21008 = vmatprep.mubr.msk.bf16.mxu0 %vm2811_vm5, %v18818_v18  ;;  %v9745_v2 = vsel %vm23998_vm4, %v9740_v39, %v9744_v59  ;;  %v9772_v54 = vrot.slane %v9770_v9, 5  ;;  %v9754_v13 = vrot.slane %v9753_v3, 4  ;;  %21037 = vmatpush3.bf16.msra.mxu0 %v23026_v0  ;;  %v9789_v7 = vshrl.u32 %v9592_v63, 16  ;;  %v24651_v59 = vld [vmem:[%s27928_s6 + $0x60] sm:$0xff]   ;;  %v24667_v9 = vld [vmem:[#allocation2 + $0xd4] sm:$0x1] }
 0x1b8   : > { %v19473_v53 = vcombine.low %v9731_v19, %v9745_v2  ;;  %v9777_v4 = vrot.slane %v9775_v60, 4  ;;  %v9780_v29 = vrot.slane %v9778_v17, 5  ;;  %v9767_v31 = vor.u32 %v9766_v10, %v9763_v5  ;;  %21038 = vmatprep.subr.bf16.mxu0 %v23027_v36  ;;  %v24658_v61 = vld [vmem:[#allocation2 + $0xa0] sm:$0xf]  ;;  %v24716_v43 = vld [vmem:[#allocation2 + $0x10c] sm:$0x1] }
 0x1b9   : > { %v9786_v6 = vrot.slane %v9784_v25, 5  ;;  %v9792_v18 = vshll.u32 %v9592_v63, 16  ;;  %21517 = vmatpush3.bf16.msra.mxu1 %v23017_v56  ;;  %v9759_v51 = vsel %vm23998_vm4, %v9754_v13, %v24619_v44  ;;  %v9798_v0 = vshll.u32 %v24634_v12, 16  ;;  %v24665_v19 = vld [vmem:[%s27928_s6 + $0x1e0] sm:$0xff]   ;;  %v24672_v13 = vld [vmem:[#allocation2 + $0xdc] sm:$0x1] }
 0x1ba   : > { %21485 = vmatmul.mubr.msk.bf16.gmra.mrb[24].mxu1 %vm2811_vm5, %v19473_v53  ;;  %v9781_v23 = vor.u32 %v9780_v29, %v9777_v4  ;;  %v18822_v56 = vcombine.low %v24658_v61, %v24337_v22  ;;  %21518 = vmatprep.subr.bf16.mxu1 %v23024_v1  ;;  %v9768_v34 = vrot.slane %v9767_v31, 4  ;;  %v9791_v63 = vrot.slane %v9789_v7, 4  ;;  %v9598_v53 = vld [vmem:[#allocation2 + $0xd8] sm:$0xf]  ;;  %v9600_v29 = vld [vmem:[#allocation2 + $0xe0] sm:$0xf] }
 0x1bb   : > { %v9794_v39 = vrot.slane %v9792_v18, 5  ;;  %v9803_v5 = vshrl.u32 %v9594_v20, 16  ;;  %v9800_v44 = vrot.slane %v9798_v0, 5  ;;  %v9806_v3 = vshll.u32 %v9594_v20, 16  ;;  %21039 = vmatpush3.bf16.msra.mxu0 %v23027_v36  ;;  %v24695_v0 = vld [vmem:[#allocation2 + $0xfc] sm:$0x1] }
 0x1bc   : > { %v9782_v57 = vrot.slane %v9781_v23, 4  ;;  %v9812_v60 = vshll.u32 %v24646_v32, 16  ;;  %v9773_v17 = vsel %vm23998_vm4, %v9768_v34, %v9772_v54  ;;  %v9817_v25 = vshrl.u32 %v9596_v37, 16  ;;  %21072 = vmatprep.subr.bf16.mxu0 %v24651_v59  ;;  %v9602_v23 = vld [vmem:[#allocation2 + $0xf8] sm:$0xf] }
 0x1bd   : > { %v9795_v2 = vor.u32 %v9794_v39, %v9791_v63  ;;  %v9805_v10 = vrot.slane %v9803_v5, 4  ;;  %21519 = vmatpush3.bf16.msra.mxu1 %v23024_v1  ;;  %v19474_v20 = vcombine.low %v9759_v51, %v9773_v17  ;;  %v9808_v4 = vrot.slane %v9806_v3, 5 }
 0x1be   : > { %21009 = vmatmul.mubr.msk.bf16.gmra.mrb[40].mxu0 %vm2811_vm5, %v18819_v15  ;;  %v9787_v36 = vsel %vm23998_vm4, %v9782_v57, %v9786_v6  ;;  %v9814_v54 = vrot.slane %v9812_v60, 5  ;;  %21552 = vmatprep.subr.bf16.mxu1 %v24665_v19  ;;  %v9819_v31 = vrot.slane %v9817_v25, 4  ;;  %v9820_v7 = vshll.u32 %v9596_v37, 16  ;;  %v9604_v57 = vld [vmem:[#allocation2 + $0x100] sm:$0xf] }
 0x1bf   : > { %21012 = vmatprep.mubr.msk.bf16.mxu0 %vm2811_vm5, %v18820_v40  ;;  %v9796_v1 = vrot.slane %v9795_v2, 4  ;;  %v9826_v16 = vshll.u32 %v24667_v9, 16  ;;  %21488 = vmatprep.mubr.msk.bf16.mxu1 %vm2811_vm5, %v19474_v20  ;;  %v9809_v15 = vor.u32 %v9808_v4, %v9805_v10  ;;  %v18823_v6 = vcombine.low %v24371_v62, %v24383_v21  ;;  %v24703_v20 = vld [vmem:[#allocation2 + $0x104] sm:$0x1] }
 0x1c0   : > { %v9831_v18 = vshrl.u32 %v9598_v53, 16  ;;  %v9834_v51 = vshll.u32 %v9598_v53, 16  ;;  %v9822_v49 = vrot.slane %v9820_v7, 5  ;;  %v9840_v37 = vshll.u32 %v24672_v13, 16 }
 0x1c1   : > { %v9801_v46 = vsel %vm23998_vm4, %v9796_v1, %v9800_v44  ;;  %v9828_v40 = vrot.slane %v9826_v16, 5  ;;  %v9810_v63 = vrot.slane %v9809_v15, 4  ;;  %v9845_v17 = vshrl.u32 %v9600_v29, 16  ;;  %v9606_v15 = vld [vmem:[#allocation2 + $0x108] sm:$0xf] }
 0x1c2   : > { %v19475_v34 = vcombine.low %v9787_v36, %v9801_v46  ;;  %v9833_v39 = vrot.slane %v9831_v18, 4  ;;  %v9836_v5 = vrot.slane %v9834_v51, 5  ;;  %v9823_v3 = vor.u32 %v9822_v49, %v9819_v31  ;;  %v9608_v49 = vld [vmem:[#allocation2 + $0x110] sm:$0xf] }
 0x1c3   : > { %v9842_v60 = vrot.slane %v9840_v37, 5  ;;  %v9848_v2 = vshll.u32 %v9600_v29, 16  ;;  %v9815_v44 = vsel %vm23998_vm4, %v9810_v63, %v9814_v54  ;;  %v9854_v25 = vshll.u32 %v24687_v11, 16 }
 0x1c4   : > { %21489 = vmatmul.mubr.msk.bf16.gmra.mrb[28].mxu1 %vm2811_vm5, %v19475_v34  ;;  %v9837_v10 = vor.u32 %v9836_v5, %v9833_v39  ;;  %v18824_v53 = vcombine.low %v24408_v45, %v24420_v41  ;;  %v9824_v36 = vrot.slane %v9823_v3, 4  ;;  %v9847_v4 = vrot.slane %v9845_v17, 4  ;;  %v9610_v3 = vld [vmem:[#allocation2 + $0x118] sm:$0xf] }
 0x1c5   : > { %v9850_v1 = vrot.slane %v9848_v2, 5  ;;  %v9859_v31 = vshrl.u32 %v9602_v23, 16  ;;  %v9856_v7 = vrot.slane %v9854_v25, 5  ;;  %v9862_v54 = vshll.u32 %v9602_v23, 16 }
 0x1c6   : > { %21013 = vmatmul.mubr.msk.bf16.gmra.mrb[44].mxu0 %vm2811_vm5, %v18821_v35  ;;  %v9838_v29 = vrot.slane %v9837_v10, 4  ;;  %v9868_v16 = vshll.u32 %v24695_v0, 16  ;;  %v9829_v45 = vsel %vm23998_vm4, %v9824_v36, %v9828_v40  ;;  %v9873_v51 = vshrl.u32 %v9604_v57, 16 }
 0x1c7   : > { %21016 = vmatprep.mubr.msk.bf16.mxu0 %vm2811_vm5, %v18822_v56  ;;  %v9851_v41 = vor.u32 %v9850_v1, %v9847_v4  ;;  %v9861_v18 = vrot.slane %v9859_v31, 4  ;;  %v19476_v48 = vcombine.low %v9815_v44, %v9829_v45  ;;  %v9864_v23 = vrot.slane %v9862_v54, 5  ;;  %v24721_v56 = vld [vmem:[#allocation2 + $0x114] sm:$0x1]  ;;  %v24729_v44 = vld [vmem:[#allocation2 + $0x11c] sm:$0x1] }
 0x1c8   : > { %v9843_v35 = vsel %vm23998_vm4, %v9838_v29, %v9842_v60  ;;  %v9870_v46 = vrot.slane %v9868_v16, 5  ;;  %v9875_v34 = vrot.slane %v9873_v51, 4  ;;  %v9876_v22 = vshll.u32 %v9604_v57, 16  ;;  %v9612_v1 = vld [vmem:[#allocation2 + $0x120] sm:$0xf] }
 0x1c9   : > { %v9852_v37 = vrot.slane %v9851_v41, 4  ;;  %v9882_v61 = vshll.u32 %v24703_v20, 16  ;;  %21492 = vmatprep.mubr.msk.bf16.mxu1 %vm2811_vm5, %v19476_v48  ;;  %v9865_v40 = vor.u32 %v9864_v23, %v9861_v18  ;;  %v18825_v63 = vcombine.low %v24439_v50, %v24441_v52  ;;  %v24740_v41 = vld [vmem:[#allocation2 + $0x124] sm:$0x1] }
 0x1ca   : > { %v9887_v39 = vshrl.u32 %v9606_v15, 16  ;;  %v9890_v5 = vshll.u32 %v9606_v15, 16  ;;  %v9878_v17 = vrot.slane %v9876_v22, 5  ;;  %v9896_v57 = vshll.u32 %v24716_v43, 16  ;;  %v23251_v15 = vld [vmem:[#allocation2 + $0xf0] sm:$0xf] }
 0x1cb   : > { %v9857_v60 = vsel %vm23998_vm4, %v9852_v37, %v9856_v7  ;;  %v9884_v2 = vrot.slane %v9882_v61, 5  ;;  %v9866_v25 = vrot.slane %v9865_v40, 4  ;;  %v9901_v50 = vshrl.u32 %v9608_v49, 16 }
 0x1cc   : > { %v19477_v10 = vcombine.low %v9843_v35, %v9857_v60  ;;  %v9889_v36 = vrot.slane %v9887_v39, 4  ;;  %v9892_v4 = vrot.slane %v9890_v5, 5  ;;  %v9879_v31 = vor.u32 %v9878_v17, %v9875_v34  ;;  %v9616_v5 = vld [vmem:[#allocation2 + $0x130] sm:$0xf] }
 0x1cd   : > { %v9898_v29 = vrot.slane %v9896_v57, 5  ;;  %v9904_v52 = vshll.u32 %v9608_v49, 16  ;;  %v9871_v7 = vsel %vm23998_vm4, %v9866_v25, %v9870_v46  ;;  %v9910_v16 = vshll.u32 %v24721_v56, 16  ;;  %v24744_v49 = vld [vmem:[#allocation2 + $0x12c] sm:$0x1] }
 0x1ce   : > { %21017 = vmatmul.mubr.msk.bf16.gmra.mrb[48].mxu0 %vm2811_vm5, %v18823_v6  ;;  %21493 = vmatmul.mubr.msk.bf16.gmra.mrb[0].mxu1 %vm2811_vm5, %v19477_v10  ;;  %v9893_v54 = vor.u32 %v9892_v4, %v9889_v36  ;;  %v18826_v45 = vcombine.low %v23251_v15, %v24462_v14  ;;  %v9880_v18 = vrot.slane %v9879_v31, 4  ;;  %v9903_v51 = vrot.slane %v9901_v50, 4  ;;  %v9614_v6 = vld [vmem:[#allocation2 + $0x128] sm:$0xf]  ;;  %v24751_v10 = vld [vmem:[#allocation2 + $0x134] sm:$0x1] }
 0x1cf   : > { %21020 = vmatprep.mubr.msk.bf16.mxu0 %vm2811_vm5, %v18824_v53  ;;  %v9906_v62 = vrot.slane %v9904_v52, 5  ;;  %v9915_v21 = vshrl.u32 %v9610_v3, 16  ;;  %v9912_v35 = vrot.slane %v9910_v16, 5  ;;  %v9918_v23 = vshll.u32 %v9610_v3, 16  ;;  %v9618_v31 = vld [vmem:[#allocation2 + $0x148] sm:$0xf] }
 0x1d0   : > { %v9894_v48 = vrot.slane %v9893_v54, 4  ;;  %v9924_v46 = vshll.u32 %v24729_v44, 16  ;;  %v9885_v37 = vsel %vm23998_vm4, %v9880_v18, %v9884_v2  ;;  %v9929_v22 = vshrl.u32 %v9612_v1, 16  ;;  %v24760_v18 = vld [vmem:[#allocation2 + $0x14c] sm:$0x1] }
 0x1d1   : > { %v9907_v14 = vor.u32 %v9906_v62, %v9903_v51  ;;  %v9917_v34 = vrot.slane %v9915_v21, 4  ;;  %v19478_v61 = vcombine.low %v9871_v7, %v9885_v37  ;;  %v9920_v40 = vrot.slane %v9918_v23, 5 }
 0x1d2   : > { %v9899_v53 = vsel %vm23998_vm4, %v9894_v48, %v9898_v29  ;;  %v9926_v39 = vrot.slane %v9924_v46, 5  ;;  %v9931_v17 = vrot.slane %v9929_v22, 4  ;;  %v9932_v3 = vshll.u32 %v9612_v1, 16 }
 0x1d3   : > { %v9908_v60 = vrot.slane %v9907_v14, 4  ;;  %v9938_v57 = vshll.u32 %v24740_v41, 16  ;;  %21496 = vmatprep.mubr.msk.bf16.mxu1 %vm2811_vm5, %v19478_v61  ;;  %v9921_v2 = vor.u32 %v9920_v40, %v9917_v34  ;;  %v18827_v25 = vcombine.low %v24469_v30, %v24479_v38  ;;  %v9622_v14 = vld [vmem:[#allocation2 + $0x158] sm:$0xf]  ;;  %v24769_v61 = vld [vmem:[#allocation2 + $0x154] sm:$0x1] }
 0x1d4   : > { %v9943_v36 = vshrl.u32 %v9614_v6, 16  ;;  %v9946_v4 = vshll.u32 %v9614_v6, 16  ;;  %v9934_v50 = vrot.slane %v9932_v3, 5  ;;  %v9952_v1 = vshll.u32 %v24744_v49, 16 }
 0x1d5   : > { %v9913_v29 = vsel %vm23998_vm4, %v9908_v60, %v9912_v35  ;;  %v9940_v52 = vrot.slane %v9938_v57, 5  ;;  %v9922_v54 = vrot.slane %v9921_v2, 4  ;;  %v9957_v51 = vshrl.u32 %v9616_v5, 16  ;;  %v9620_v35 = vld [vmem:[#allocation2 + $0x150] sm:$0xf] }
 0x1d6   : > { %21021 = vmatmul.mubr.msk.bf16.gmra.mrb[52].mxu0 %vm2811_vm5, %v18825_v63  ;;  %v19479_v7 = vcombine.low %v9899_v53, %v9913_v29  ;;  %v9945_v16 = vrot.slane %v9943_v36, 4  ;;  %v9948_v15 = vrot.slane %v9946_v4, 5  ;;  %v9935_v30 = vor.u32 %v9934_v50, %v9931_v17  ;;  %v24776_v2 = vld [vmem:[#allocation2 + $0x15c] sm:$0x1]  ;;  %v9624_v36 = vld [vmem:[#allocation2 + $0x160] sm:$0xf] }
 0x1d7   : > { %21024 = vmatprep.mubr.msk.bf16.mxu0 %vm2811_vm5, %v18826_v45  ;;  %v9954_v38 = vrot.slane %v9952_v1, 5  ;;  %v9960_v62 = vshll.u32 %v9616_v5, 16  ;;  %v9927_v21 = vsel %vm23998_vm4, %v9922_v54, %v9926_v39  ;;  %v9966_v63 = vshll.u32 %v24751_v10, 16  ;;  %v24779_v1 = vld [vmem:[#allocation2 + $0x164] sm:$0x1] }
 0x1d8   : > { %21497 = vmatmul.mubr.msk.bf16.gmra.mrb[4].mxu1 %vm2811_vm5, %v19479_v7  ;;  %v9949_v6 = vor.u32 %v9948_v15, %v9945_v16  ;;  %v18828_v48 = vcombine.low %v24483_v8, %v24486_v26  ;;  %v9936_v23 = vrot.slane %v9935_v30, 4  ;;  %v9959_v46 = vrot.slane %v9957_v51, 4  ;;  %v9626_v15 = vld [vmem:[#allocation2 + $0x168] sm:$0xf] }
 0x1d9   : > { %v9962_v37 = vrot.slane %v9960_v62, 5  ;;  %v9971_v45 = vshrl.u32 %v9618_v31, 16  ;;  %v9968_v22 = vrot.slane %v9966_v63, 5  ;;  %v9974_v53 = vshll.u32 %v9618_v31, 16 }
 0x1da   : > { %v9950_v34 = vrot.slane %v9949_v6, 4  ;;  %v9980_v40 = vshll.u32 %v24760_v18, 16  ;;  %v9941_v39 = vsel %vm23998_vm4, %v9936_v23, %v9940_v52  ;;  %v9985_v17 = vshrl.u32 %v9620_v35, 16 }
 0x1db   : > { %v9963_v5 = vor.u32 %v9962_v37, %v9959_v46  ;;  %v9973_v60 = vrot.slane %v9971_v45, 4  ;;  %v19480_v8 = vcombine.low %v9927_v21, %v9941_v39  ;;  %v9976_v3 = vrot.slane %v9974_v53, 5  ;;  %v24789_v21 = vld [vmem:[#allocation2 + $0x16c] sm:$0x1]  ;;  %v9628_v37 = vld [vmem:[#allocation2 + $0x170] sm:$0xf] }
 0x1dc   : > { %v9955_v26 = vsel %vm23998_vm4, %v9950_v34, %v9954_v38  ;;  %v9982_v57 = vrot.slane %v9980_v40, 5  ;;  %v9987_v29 = vrot.slane %v9985_v17, 4  ;;  %v9988_v31 = vshll.u32 %v9620_v35, 16  ;;  %v24795_v17 = vld [vmem:[#allocation2 + $0x174] sm:$0x1] }
 0x1dd   : > { %v9964_v4 = vrot.slane %v9963_v5, 4  ;;  %v9994_v50 = vshll.u32 %v24769_v61, 16  ;;  %21500 = vmatprep.mubr.msk.bf16.mxu1 %vm2811_vm5, %v19480_v8  ;;  %v9977_v52 = vor.u32 %v9976_v3, %v9973_v60  ;;  %v18829_v7 = vcombine.low %v24500_v55, %v24504_v47 }
 0x1de   : > { %21025 = vmatmul.mubr.msk.bf16.gmra.mrb[56].mxu0 %vm2811_vm5, %v18827_v25  ;;  %v9999_v54 = vshrl.u32 %v9622_v14, 16  ;;  %v10002_v16 = vshll.u32 %v9622_v14, 16  ;;  %v9990_v38 = vrot.slane %v9988_v31, 5  ;;  %v10008_v62 = vshll.u32 %v24776_v2, 16 }
 0x1df   : > { %v9969_v30 = vsel %vm23998_vm4, %v9964_v4, %v9968_v22  ;;  %21028 = vmatprep.mubr.msk.bf16.mxu0 %vm2811_vm5, %v18828_v48  ;;  %v9996_v51 = vrot.slane %v9994_v50, 5  ;;  %v9978_v25 = vrot.slane %v9977_v52, 4  ;;  %v10013_v47 = vshrl.u32 %v9624_v36, 16 }
 0x1e0   : > { %v19481_v6 = vcombine.low %v9955_v26, %v9969_v30  ;;  %v10001_v63 = vrot.slane %v9999_v54, 4  ;;  %v10004_v35 = vrot.slane %v10002_v16, 5  ;;  %v9991_v23 = vor.u32 %v9990_v38, %v9987_v29  ;;  %v3334_v29 = vld [vmem:[#allocation2] sm:$0xe] }
 0x1e1   : > { %v10010_v55 = vrot.slane %v10008_v62, 5  ;;  %v10016_v46 = vshll.u32 %v9624_v36, 16  ;;  %v9983_v48 = vsel %vm23998_vm4, %v9978_v25, %v9982_v57  ;;  %v10022_v14 = vshll.u32 %v24779_v1, 16  ;;  %v3335_v62 = vld [vmem:[#allocation2 + $0x8] sm:$0xe] }
 0x1e2   : > { %21501 = vmatmul.mubr.msk.bf16.gmra.mrb[8].mxu1 %vm2811_vm5, %v19481_v6  ;;  %v10005_v45 = vor.u32 %v10004_v35, %v10001_v63  ;;  %v10027_v34 = vshrl.u32 %v9626_v15, 16  ;;  %v9992_v22 = vrot.slane %v9991_v23, 4  ;;  %v10015_v53 = vrot.slane %v10013_v47, 4  ;;  %v3336_v25 = vld [vmem:[#allocation2 + $0x10] sm:$0xe] }
 0x1e3   : > { %v10018_v40 = vrot.slane %v10016_v46, 5  ;;  %v10030_v39 = vshll.u32 %v9626_v15, 16  ;;  %v10024_v60 = vrot.slane %v10022_v14, 5  ;;  %v10036_v26 = vshll.u32 %v24789_v21, 16  ;;  %v23252_v23 = vld [vmem:[#allocation2 + $0x4] sm:$0x1] }
 0x1e4   : > { %v10006_v5 = vrot.slane %v10005_v45, 4  ;;  %v10029_v8 = vrot.slane %v10027_v34, 4  ;;  %v9997_v3 = vsel %vm23998_vm4, %v9992_v22, %v9996_v51  ;;  %v10041_v4 = vshrl.u32 %v9628_v37, 16  ;;  %v3337_v47 = vld [vmem:[#allocation2 + $0x18] sm:$0xe] }
 0x1e5   : > { %v10019_v36 = vor.u32 %v10018_v40, %v10015_v53  ;;  %v10032_v57 = vrot.slane %v10030_v39, 5  ;;  %v19482_v31 = vcombine.low %v9983_v48, %v9997_v3  ;;  %v10038_v52 = vrot.slane %v10036_v26, 5  ;;  %v23253_v14 = vld [vmem:[#allocation2 + $0xc] sm:$0x1]  ;;  %v9630_v22 = vld [vmem:[#allocation2 + $0x178] sm:$0xf] }
 0x1e6   : > { %21029 = vmatmul.mubr.msk.bf16.gmra.mrb[60].mxu0 %vm2811_vm5, %v18829_v7  ;;  %v10011_v50 = vsel %vm23998_vm4, %v10006_v5, %v10010_v55  ;;  %v10044_v54 = vshll.u32 %v9628_v37, 16  ;;  %v10043_v30 = vrot.slane %v10041_v4, 4  ;;  %v10050_v38 = vshll.u32 %v24795_v17, 16  ;;  %v23254_v5 = vld [vmem:[#allocation2 + $0x14] sm:$0x1] }
 0x1e7   : > { %v10020_v16 = vrot.slane %v10019_v36, 4  ;;  %v10033_v15 = vor.u32 %v10032_v57, %v10029_v8  ;;  %21504 = vmatprep.mubr.msk.bf16.mxu1 %vm2811_vm5, %v19482_v31  ;;  %v18850_v6 = vrot.slane %v3334_v29, 9  ;;  %v3435_v55 = vrot.slane %v23252_v23, 5  ;;  %v24815_v8 = vld [vmem:[#allocation2 + $0x17c] sm:$0x1] }
 0x1e8   : > { %v10046_v51 = vrot.slane %v10044_v54, 5  ;;  %v10052_v35 = vrot.slane %v10050_v38, 5  ;;  %v18851_v45 = vrot.slane %v3335_v62, 9  ;;  %v3439_v34 = vrot.slane %v23253_v14, 5  ;;  %v9632_v26 = vld [vmem:[#allocation2 + $0x180] sm:$0xf] }
 0x1e9   : > { %v10025_v7 = vsel %vm23998_vm4, %v10020_v16, %v10024_v60  ;;  %v10034_v63 = vrot.slane %v10033_v15, 4  ;;  %v3436_v40 = vsel %vm24807_vm12, %v18850_v6, %v3435_v55  ;;  %v18852_v39 = vrot.slane %v3336_v25, 9  ;;  %v23255_v4 = vld [vmem:[#allocation2 + $0x1c] sm:$0x1]  ;;  %v10405_v6 = vld [vmem:[#allocation2 + $0x60] sm:$0xe] }
 0x1ea   : > { %v19483_v46 = vcombine.low %v10011_v50, %v10025_v7  ;;  %v10047_v37 = vor.u32 %v10046_v51, %v10043_v30  ;;  %v3443_v60 = vrot.slane %v23254_v5, 5  ;;  %v3440_v36 = vsel %vm24807_vm12, %v18851_v45, %v3439_v34  ;;  %v10404_v51 = vld [vmem:[#allocation2 + $0x58] sm:$0xe]  ;;  %v3338_v55 = vld [vmem:[#allocation2 + $0x20] sm:$0xe] }
 0x1eb   : > { %v10039_v53 = vsel %vm23998_vm4, %v10034_v63, %v10038_v52  ;;  %v18853_v57 = vrot.slane %v3337_v47, 9  ;;  %v3447_v29 = vrot.slane %v23255_v4, 5  ;;  %v18890_v31 = vcombine.low %v3436_v40, %v3440_v36  ;;  %v24822_v52 = vld [vmem:[#allocation2 + $0x184] sm:$0x1]  ;;  %v23032_v47 = vld [vmem:[%s27928_s6 + $0x68] sm:$0xff]  }
 0x1ec   : > { %21505 = vmatmul.mubr.msk.bf16.gmra.mrb[12].mxu1 %vm2811_vm5, %v19483_v46  ;;  %v10048_v3 = vrot.slane %v10047_v37, 4  ;;  %v3444_v50 = vsel %vm24807_vm12, %v18852_v39, %v3443_v60  ;;  %v10055_v54 = vshrl.u32 %v9630_v22, 16  ;;  %v10058_v16 = vshll.u32 %v9630_v22, 16  ;;  %v3339_v14 = vld [vmem:[#allocation2 + $0x28] sm:$0xe] }
 0x1ed   : > { %v3448_v30 = vsel %vm24807_vm12, %v18853_v57, %v3447_v29  ;;  %v10064_v38 = vshll.u32 %v24815_v8, 16  ;;  %v10069_v62 = vshrl.u32 %v9632_v26, 16  ;;  %21040 = vmatprep.mubr.msk.bf16.mxu0 %vm2811_vm5, %v18890_v31  ;;  %v10072_v37 = vshll.u32 %v9632_v26, 16  ;;  %v3340_v5 = vld [vmem:[#allocation2 + $0x30] sm:$0xe] }
 0x1ee   : > { %v10053_v15 = vsel %vm23998_vm4, %v10048_v3, %v10052_v35  ;;  %v18891_v7 = vcombine.low %v3444_v50, %v3448_v30  ;;  %v10057_v63 = vrot.slane %v10055_v54, 4  ;;  %v10060_v23 = vrot.slane %v10058_v16, 5  ;;  %v23257_v29 = vld [vmem:[#allocation2 + $0x24] sm:$0x1]  ;;  %v3341_v54 = vld [vmem:[#allocation2 + $0x38] sm:$0xe] }
 0x1ef   : > { %v19484_v25 = vcombine.low %v10039_v53, %v10053_v15  ;;  %v10066_v35 = vrot.slane %v10064_v38, 5  ;;  %v10071_v46 = vrot.slane %v10069_v62, 4  ;;  %v10078_v45 = vshll.u32 %v24822_v52, 16  ;;  %v23256_v53 = vld [vmem:[#allocation2 + $0x5c] sm:$0x1]  ;;  %v23034_v16 = vld [vmem:[%s27928_s6 + $0x70] sm:$0xff]  }
 0x1f0   : > { %21041 = vmatmul.mubr.msk.bf16.vlgmr.msra.gmra.mrb[32].mxu0 %vm2811_vm5, %v18891_v7  ;;  %v10061_v34 = vor.u32 %v10060_v23, %v10057_v63  ;;  %v19506_v22 = vrot.slane %v10404_v51, 9  ;;  %v10502_v40 = vrot.slane %v23256_v53, 5  ;;  %v19507_v39 = vrot.slane %v10405_v6, 9  ;;  %v23258_v30 = vld [vmem:[#allocation2 + $0x2c] sm:$0x1] }
 0x1f1   : > { %21508 = vmatprep.mubr.msk.bf16.mxu1 %vm2811_vm5, %v19484_v25  ;;  %v10074_v60 = vrot.slane %v10072_v37, 5  ;;  %v10080_v3 = vrot.slane %v10078_v45, 5  ;;  %v10506_v36 = vrot.slane %v24528_v27, 5  ;;  %v18854_v57 = vrot.slane %v3338_v55, 9  ;;  %21073 = vmatpush3.bf16.msra.mxu0 %v24651_v59  ;;  %v10406_v62 = vld [vmem:[#allocation2 + $0x68] sm:$0xe] }
 0x1f2   : > { %v10062_v26 = vrot.slane %v10061_v34, 4  ;;  %v24840_v4 = vsel %vm24807_vm12, %v19506_v22, %v10502_v40  ;;  %v3451_v31 = vrot.slane %v23257_v29, 5  ;;  %v18855_v50 = vrot.slane %v3339_v14, 9  ;;  %21074 = vmatprep.subr.bf16.mxu0 %v23032_v47  ;;  %v23259_v7 = vld [vmem:[#allocation2 + $0x34] sm:$0x1] }
 0x1f3   : > { %v10075_v15 = vor.u32 %v10074_v60, %v10071_v46  ;;  %v10507_v27 = vsel %vm24807_vm12, %v19507_v39, %v10506_v36  ;;  %v3455_v59 = vrot.slane %v23258_v30, 5  ;;  %v18856_v38 = vrot.slane %v3340_v5, 9  ;;  %v10407_v23 = vld [vmem:[#allocation2 + $0x70] sm:$0xe]  ;;  %v23260_v45 = vld [vmem:[#allocation2 + $0x3c] sm:$0x1] }
 0x1f4   : > { %v10067_v51 = vsel %vm23998_vm4, %v10062_v26, %v10066_v35  ;;  %v19546_v6 = vcombine.low %v24840_v4, %v10507_v27  ;;  %v3452_v25 = vsel %vm24807_vm12, %v18854_v57, %v3451_v31  ;;  %v3459_v63 = vrot.slane %v23259_v7, 5  ;;  %v3342_v34 = vld [vmem:[#allocation2 + $0x50] sm:$0xe]  ;;  %v23261_v40 = vld [vmem:[#allocation2 + $0x6c] sm:$0x1]  ;;  %v23035_v31 = vld [vmem:[%s27928_s6 + $0x78] sm:$0xff]  }
 0x1f5   : > { %v10076_v55 = vrot.slane %v10075_v15, 4  ;;  %v3456_v46 = vsel %vm24807_vm12, %v18855_v50, %v3455_v59  ;;  %v18857_v37 = vrot.slane %v3341_v54, 9  ;;  %v3463_v14 = vrot.slane %v23260_v45, 5  ;;  %21075 = vmatpush3.bf16.msra.mxu0 %v23032_v47  ;;  %v3343_v5 = vld [vmem:[#allocation2 + $0x58] sm:$0xe] }
 0x1f6   : > { %v18892_v22 = vcombine.low %v3452_v25, %v3456_v46  ;;  %v3460_v35 = vsel %vm24807_vm12, %v18856_v38, %v3459_v63  ;;  %v19508_v53 = vrot.slane %v10406_v62, 9  ;;  %v10510_v39 = vrot.slane %v23261_v40, 5  ;;  %v10408_v60 = vld [vmem:[#allocation2 + $0x78] sm:$0xe]  ;;  %21076 = vmatprep.subr.bf16.mxu0 %v23034_v16  ;;  %v23262_v4 = vld [vmem:[#allocation2 + $0x74] sm:$0x1] }
 0x1f7   : > { %v10081_v36 = vsel %vm23998_vm4, %v10076_v55, %v10080_v3  ;;  %v3464_v57 = vsel %vm24807_vm12, %v18857_v37, %v3463_v14  ;;  %v19509_v26 = vrot.slane %v10407_v23, 9  ;;  %v10514_v29 = vrot.slane %v23262_v4, 5  ;;  %v10409_v47 = vld [vmem:[#allocation2 + $0x80] sm:$0xe]  ;;  %v23263_v59 = vld [vmem:[#allocation2 + $0x54] sm:$0x1] }
 0x1f8   : > { %v19485_v50 = vcombine.low %v10067_v51, %v10081_v36  ;;  %21044 = vmatprep.mubr.msk.bf16.mxu0 %vm2811_vm5, %v18892_v22  ;;  %v18893_v54 = vcombine.low %v3460_v35, %v3464_v57  ;;  %v24866_v15 = vsel %vm24807_vm12, %v19508_v53, %v10510_v39  ;;  %v18858_v3 = vrot.slane %v3342_v34, 9  ;;  %v3344_v27 = vld [vmem:[#allocation2 + $0x60] sm:$0xe]  ;;  %v23264_v25 = vld [vmem:[#allocation2 + $0x5c] sm:$0x1] }
 0x1f9   : > { %v24870_v30 = vsel %vm24807_vm12, %v19509_v26, %v10514_v29  ;;  %v3467_v38 = vrot.slane %v23263_v59, 5  ;;  %v18859_v62 = vrot.slane %v3343_v5, 9  ;;  %v3471_v7 = vrot.slane %v23264_v25, 5  ;;  %v3345_v63 = vld [vmem:[#allocation2 + $0x68] sm:$0xe]  ;;  %21077 = vmatpush3.bf16.msra.mxu0 %v23034_v16  ;;  %v24879_v14 = vld [vmem:[%s27928_s6 + $0x80] sm:$0xff]  }
 0x1fa   : > { %21509 = vmatmul.mubr.msk.bf16.gmra.mrb[16].mxu1 %vm2811_vm5, %v19485_v50  ;;  %21045 = vmatmul.mubr.msk.bf16.gmra.mrb[36].mxu0 %vm2811_vm5, %v18893_v54  ;;  %v19547_v51 = vcombine.low %v24866_v15, %v24870_v30  ;;  %v19510_v23 = vrot.slane %v10408_v60, 9  ;;  %v23265_v55 = vld [vmem:[#allocation2 + $0x7c] sm:$0x1]  ;;  %v19511_v37 = vrot.slane %v10409_v47, 9  ;;  %v10410_v45 = vld [vmem:[#allocation2 + $0x88] sm:$0xe] }
 0x1fb   : > { %v10518_v46 = vrot.slane %v23265_v55, 5  ;;  %21520 = vmatprep.mubr.msk.bf16.mxu1 %vm2811_vm5, %v19546_v6  ;;  %v3468_v16 = vsel %vm24807_vm12, %v18858_v3, %v3467_v38  ;;  %v3472_v34 = vsel %vm24807_vm12, %v18859_v62, %v3471_v7  ;;  %v23266_v22 = vld [vmem:[#allocation2 + $0x84] sm:$0x1]  ;;  %v18860_v53 = vrot.slane %v3344_v27, 9  ;;  %v10411_v40 = vld [vmem:[#allocation2 + $0x90] sm:$0xe]  ;;  %21078 = vmatprep.subr.bf16.mxu0 %v23035_v31 }
 0x1fc   : > { %v10522_v35 = vrot.slane %v23266_v22, 5  ;;  %v18894_v39 = vcombine.low %v3468_v16, %v3472_v34  ;;  %v23267_v60 = vld [vmem:[#allocation2 + $0x64] sm:$0x1]  ;;  %v18861_v57 = vrot.slane %v3345_v63, 9  ;;  %v3346_v26 = vld [vmem:[#allocation2 + $0x70] sm:$0xe] }
 0x1fd   : > { %v10519_v5 = vsel %vm24807_vm12, %v19510_v23, %v10518_v46  ;;  %v3475_v36 = vrot.slane %v23267_v60, 5  ;;  %v23268_v4 = vld [vmem:[#allocation2 + $0x6c] sm:$0x1]  ;;  %v19512_v47 = vrot.slane %v10410_v45, 9  ;;  %v3347_v15 = vld [vmem:[#allocation2 + $0x78] sm:$0xe]  ;;  %21079 = vmatpush3.bf16.msra.mxu0 %v23035_v31 }
 0x1fe   : > { %v10523_v6 = vsel %vm24807_vm12, %v19511_v37, %v10522_v35  ;;  %v3479_v29 = vrot.slane %v23268_v4, 5  ;;  %v23269_v50 = vld [vmem:[#allocation2 + $0x8c] sm:$0x1]  ;;  %21048 = vmatprep.mubr.msk.bf16.mxu0 %vm2811_vm5, %v18894_v39  ;;  %v19513_v30 = vrot.slane %v10411_v40, 9  ;;  %v10530_v59 = vrot.slane %v24578_v33, 5  ;;  %21112 = vmatprep.subr.bf16.mxu0 %v24879_v14 }
 0x1ff   : > { %v10526_v54 = vrot.slane %v23269_v50, 5  ;;  %v19548_v3 = vcombine.low %v10519_v5, %v10523_v6  ;;  %v3476_v27 = vsel %vm24807_vm12, %v18860_v53, %v3475_v36  ;;  %v10412_v38 = vld [vmem:[#allocation2 + $0xa8] sm:$0xe]  ;;  %v18862_v31 = vrot.slane %v3346_v26, 9  ;;  %v23270_v7 = vld [vmem:[#allocation2 + $0x74] sm:$0x1] }
 0x200   : > { %v3480_v62 = vsel %vm24807_vm12, %v18861_v57, %v3479_v29  ;;  %v3483_v63 = vrot.slane %v23270_v7, 5  ;;  %v10413_v23 = vld [vmem:[#allocation2 + $0xb0] sm:$0xe]  ;;  %v3348_v55 = vld [vmem:[#allocation2 + $0x80] sm:$0xe]  ;;  %v24903_v37 = vsel %vm24807_vm12, %v19513_v30, %v10530_v59  ;;  %v18863_v33 = vrot.slane %v3347_v15, 9 }
 0x201   : > { %v24899_v25 = vsel %vm24807_vm12, %v19512_v47, %v10526_v54  ;;  %v18895_v46 = vcombine.low %v3476_v27, %v3480_v62  ;;  %v23271_v45 = vld [vmem:[#allocation2 + $0x7c] sm:$0x1]  ;;  %v23029_v34 = vld [vmem:[%s27928_s6 + $0x1e8] sm:$0xff]   ;;  %v19514_v40 = vrot.slane %v10412_v38, 9  ;;  %v10534_v39 = vrot.slane %v24591_v58, 5 }
 0x202   : > { %v3487_v16 = vrot.slane %v23271_v45, 5  ;;  %v3349_v22 = vld [vmem:[#allocation2 + $0x88] sm:$0xe]  ;;  %v19549_v35 = vcombine.low %v24899_v25, %v24903_v37  ;;  %v3484_v53 = vsel %vm24807_vm12, %v18862_v31, %v3483_v63  ;;  %v10414_v5 = vld [vmem:[#allocation2 + $0xb8] sm:$0xe]  ;;  %21521 = vmatmul.mubr.msk.bf16.vlgmr.msra.gmra.mrb[20].mxu1 %vm2811_vm5, %v19547_v51  ;;  %v19515_v36 = vrot.slane %v10413_v23, 9 }
 0x203   : > { %21049 = vmatmul.mubr.msk.bf16.gmra.mrb[40].mxu0 %vm2811_vm5, %v18895_v46  ;;  %v10538_v57 = vrot.slane %v24609_v42, 5  ;;  %v18864_v26 = vrot.slane %v3348_v55, 9  ;;  %v10415_v6 = vld [vmem:[#allocation2 + $0xc0] sm:$0xe]  ;;  %21553 = vmatpush3.bf16.msra.mxu1 %v24665_v19  ;;  %v10535_v58 = vsel %vm24807_vm12, %v19514_v40, %v10534_v39  ;;  %v23272_v29 = vld [vmem:[#allocation2 + $0x84] sm:$0x1] }
 0x204   : > { %v3488_v60 = vsel %vm24807_vm12, %v18863_v33, %v3487_v16  ;;  %21524 = vmatprep.mubr.msk.bf16.mxu1 %vm2811_vm5, %v19548_v3  ;;  %v3491_v51 = vrot.slane %v23272_v29, 5  ;;  %v18865_v47 = vrot.slane %v3349_v22, 9  ;;  %v3350_v50 = vld [vmem:[#allocation2 + $0xa0] sm:$0xe]  ;;  %21554 = vmatprep.subr.bf16.mxu1 %v23029_v34  ;;  %v23273_v15 = vld [vmem:[#allocation2 + $0x8c] sm:$0x1] }
 0x205   : > { %v18896_v4 = vcombine.low %v3484_v53, %v3488_v60  ;;  %v10539_v54 = vsel %vm24807_vm12, %v19515_v36, %v10538_v57  ;;  %v3495_v42 = vrot.slane %v23273_v15, 5  ;;  %v19516_v27 = vrot.slane %v10414_v5, 9  ;;  %v3351_v19 = vld [vmem:[#allocation2 + $0xa8] sm:$0xe]  ;;  %v23030_v3 = vld [vmem:[%s27928_s6 + $0x1f0] sm:$0xff]   ;;  %v23033_v57 = vld [vmem:[%s27928_s6 + $0x1f8] sm:$0xff]  }
 0x206   : > { %v10542_v30 = vrot.slane %v24621_v28, 5  ;;  %v19550_v59 = vcombine.low %v10535_v58, %v10539_v54  ;;  %v3492_v38 = vsel %vm24807_vm12, %v18864_v26, %v3491_v51  ;;  %v19517_v62 = vrot.slane %v10415_v6, 9  ;;  %v10416_v31 = vld [vmem:[#allocation2 + $0xc8] sm:$0xe]  ;;  %v23274_v23 = vld [vmem:[#allocation2 + $0xa4] sm:$0x1] }
 0x207   : > { %21052 = vmatprep.mubr.msk.bf16.mxu0 %vm2811_vm5, %v18896_v4  ;;  %v10546_v25 = vrot.slane %v24634_v12, 5  ;;  %v3496_v7 = vsel %vm24807_vm12, %v18865_v47, %v3495_v42  ;;  %v18866_v63 = vrot.slane %v3350_v50, 9  ;;  %v3499_v55 = vrot.slane %v23274_v23, 5  ;;  %v10417_v46 = vld [vmem:[#allocation2 + $0xd0] sm:$0xe]  ;;  %21555 = vmatpush3.bf16.msra.mxu1 %v23029_v34 }
 0x208   : > { %v24936_v28 = vsel %vm24807_vm12, %v19516_v27, %v10542_v30  ;;  %v3352_v37 = vld [vmem:[#allocation2 + $0xb0] sm:$0xe]  ;;  %v18897_v33 = vcombine.low %v3492_v38, %v3496_v7  ;;  %v18867_v12 = vrot.slane %v3351_v19, 9  ;;  %v23275_v16 = vld [vmem:[#allocation2 + $0xac] sm:$0x1]  ;;  %v19518_v5 = vrot.slane %v10416_v31, 9  ;;  %21556 = vmatprep.subr.bf16.mxu1 %v23030_v3 }
 0x209   : > { %v24940_v45 = vsel %vm24807_vm12, %v19517_v62, %v10546_v25  ;;  %v3503_v22 = vrot.slane %v23275_v16, 5  ;;  %v3353_v53 = vld [vmem:[#allocation2 + $0xb8] sm:$0xe]  ;;  %v3500_v39 = vsel %vm24807_vm12, %v18866_v63, %v3499_v55  ;;  %v10550_v60 = vrot.slane %v24646_v32, 5  ;;  %v10419_v58 = vld [vmem:[#allocation2 + $0xe0] sm:$0xe] }
 0x20a   : > { %v19551_v40 = vcombine.low %v24936_v28, %v24940_v45  ;;  %v10418_v36 = vld [vmem:[#allocation2 + $0xd8] sm:$0xe]  ;;  %v19519_v26 = vrot.slane %v10417_v46, 9  ;;  %v10554_v6 = vrot.slane %v24667_v9, 5  ;;  %v18868_v4 = vrot.slane %v3352_v37, 9  ;;  %21525 = vmatmul.mubr.msk.bf16.gmra.mrb[24].mxu1 %vm2811_vm5, %v19549_v35  ;;  %v24968_v31 = vld [vmem:[%s27928_s6 + $0x200] sm:$0xff]  }
 0x20b   : > { %v3504_v34 = vsel %vm24807_vm12, %v18867_v12, %v3503_v22  ;;  %21053 = vmatmul.mubr.msk.bf16.gmra.mrb[44].mxu0 %vm2811_vm5, %v18897_v33  ;;  %v10551_v32 = vsel %vm24807_vm12, %v19518_v5, %v10550_v60  ;;  %v23276_v51 = vld [vmem:[#allocation2 + $0xb4] sm:$0x1]  ;;  %v18869_v50 = vrot.slane %v3353_v53, 9  ;;  %v3354_v54 = vld [vmem:[#allocation2 + $0xc0] sm:$0xe]  ;;  %21528 = vmatprep.mubr.msk.bf16.mxu1 %vm2811_vm5, %v19550_v59  ;;  %v19520_v27 = vrot.slane %v10418_v36, 9 }
 0x20c   : > { %v18898_v29 = vcombine.low %v3500_v39, %v3504_v34  ;;  %v3507_v47 = vrot.slane %v23276_v51, 5  ;;  %v10555_v15 = vsel %vm24807_vm12, %v19519_v26, %v10554_v6  ;;  %v23277_v9 = vld [vmem:[#allocation2 + $0xbc] sm:$0x1]  ;;  %v10558_v35 = vrot.slane %v24672_v13, 5  ;;  %v3355_v30 = vld [vmem:[#allocation2 + $0xc8] sm:$0xe]  ;;  %21557 = vmatpush3.bf16.msra.mxu1 %v23030_v3 }
 0x20d   : > { %v3511_v42 = vrot.slane %v23277_v9, 5  ;;  %v19552_v19 = vcombine.low %v10551_v32, %v10555_v15  ;;  %v19521_v62 = vrot.slane %v10419_v58, 9  ;;  %v10562_v25 = vrot.slane %v24687_v11, 5  ;;  %v10420_v59 = vld [vmem:[#allocation2 + $0xf8] sm:$0xe]  ;;  %21558 = vmatprep.subr.bf16.mxu1 %v23033_v57 }
 0x20e   : > { %21056 = vmatprep.mubr.msk.bf16.mxu0 %vm2811_vm5, %v18898_v29  ;;  %v3508_v38 = vsel %vm24807_vm12, %v18868_v4, %v3507_v47  ;;  %v24974_v3 = vsel %vm24807_vm12, %v19520_v27, %v10558_v35  ;;  %v18870_v7 = vrot.slane %v3354_v54, 9  ;;  %v23278_v63 = vld [vmem:[#allocation2 + $0xc4] sm:$0x1]  ;;  %v10421_v55 = vld [vmem:[#allocation2 + $0x100] sm:$0xe]  ;;  %v18871_v33 = vrot.slane %v3355_v30, 9 }
 0x20f   : > { %v3512_v13 = vsel %vm24807_vm12, %v18869_v50, %v3511_v42  ;;  %v3515_v23 = vrot.slane %v23278_v63, 5  ;;  %v3356_v46 = vld [vmem:[#allocation2 + $0xd0] sm:$0xe]  ;;  %v24978_v37 = vsel %vm24807_vm12, %v19521_v62, %v10562_v25  ;;  %v23279_v12 = vld [vmem:[#allocation2 + $0xcc] sm:$0x1]  ;;  %v19522_v5 = vrot.slane %v10420_v59, 9 }
 0x210   : > { %v18899_v11 = vcombine.low %v3508_v38, %v3512_v13  ;;  %v3519_v16 = vrot.slane %v23279_v12, 5  ;;  %v3357_v22 = vld [vmem:[#allocation2 + $0xd8] sm:$0xe]  ;;  %v19553_v53 = vcombine.low %v24974_v3, %v24978_v37  ;;  %v10566_v60 = vrot.slane %v24695_v0, 5  ;;  %v10422_v36 = vld [vmem:[#allocation2 + $0x108] sm:$0xe]  ;;  %21559 = vmatpush3.bf16.msra.mxu1 %v23033_v57 }
 0x211   : > { %v3516_v39 = vsel %vm24807_vm12, %v18870_v7, %v3515_v23  ;;  %v19523_v26 = vrot.slane %v10421_v55, 9  ;;  %v10570_v6 = vrot.slane %v24703_v20, 5  ;;  %v18872_v4 = vrot.slane %v3356_v46, 9  ;;  %v10423_v58 = vld [vmem:[#allocation2 + $0x110] sm:$0xe]  ;;  %21592 = vmatprep.subr.bf16.mxu1 %v24968_v31 }
 0x212   : > { %v3520_v34 = vsel %vm24807_vm12, %v18871_v33, %v3519_v16  ;;  %v24991_v32 = vsel %vm24807_vm12, %v19522_v5, %v10566_v60  ;;  %v23280_v51 = vld [vmem:[#allocation2 + $0xd4] sm:$0x1]  ;;  %v18873_v0 = vrot.slane %v3357_v22, 9  ;;  %v3358_v50 = vld [vmem:[#allocation2 + $0xf0] sm:$0xe]  ;;  %21529 = vmatmul.mubr.msk.bf16.gmra.mrb[28].mxu1 %vm2811_vm5, %v19551_v40  ;;  %v19524_v15 = vrot.slane %v10422_v36, 9 }
 0x213   : > { %v18900_v29 = vcombine.low %v3516_v39, %v3520_v34  ;;  %v3523_v47 = vrot.slane %v23280_v51, 5  ;;  %21057 = vmatmul.mubr.msk.bf16.gmra.mrb[48].mxu0 %vm2811_vm5, %v18899_v11  ;;  %v10571_v20 = vsel %vm24807_vm12, %v19523_v26, %v10570_v6  ;;  %v23281_v57 = vld [vmem:[#allocation2 + $0xdc] sm:$0x1]  ;;  %v10574_v9 = vrot.slane %v24716_v43, 5  ;;  %v3359_v42 = vld [vmem:[#allocation2 + $0xf8] sm:$0xe]  ;;  %21532 = vmatprep.mubr.msk.bf16.mxu1 %vm2811_vm5, %v19552_v19 }
 0x214   : > { %v3527_v54 = vrot.slane %v23281_v57, 5  ;;  %v19554_v27 = vcombine.low %v24991_v32, %v10571_v20  ;;  %v19525_v45 = vrot.slane %v10423_v58, 9  ;;  %v10578_v40 = vrot.slane %v24721_v56, 5  ;;  %v10424_v35 = vld [vmem:[#allocation2 + $0x118] sm:$0xe] }
 0x215   : > { %21060 = vmatprep.mubr.msk.bf16.mxu0 %vm2811_vm5, %v18900_v29  ;;  %v3524_v28 = vsel %vm24807_vm12, %v18872_v4, %v3523_v47  ;;  %v25011_v43 = vsel %vm24807_vm12, %v19524_v15, %v10574_v9  ;;  %v18874_v38 = vrot.slane %v3358_v50, 9  ;;  %v23282_v19 = vld [vmem:[#allocation2 + $0xf4] sm:$0x1]  ;;  %v10425_v25 = vld [vmem:[#allocation2 + $0x120] sm:$0xe]  ;;  %v18875_v63 = vrot.slane %v3359_v42, 9 }
 0x216   : > { %v3528_v30 = vsel %vm24807_vm12, %v18873_v0, %v3527_v54  ;;  %v3531_v62 = vrot.slane %v23282_v19, 5  ;;  %v3360_v59 = vld [vmem:[#allocation2 + $0x100] sm:$0xe]  ;;  %v25015_v7 = vsel %vm24807_vm12, %v19525_v45, %v10578_v40  ;;  %v23283_v56 = vld [vmem:[#allocation2 + $0xfc] sm:$0x1]  ;;  %v19526_v33 = vrot.slane %v10424_v35, 9 }
 0x217   : > { %v18901_v13 = vcombine.low %v3524_v28, %v3528_v30  ;;  %v3535_v23 = vrot.slane %v23283_v56, 5  ;;  %v3361_v55 = vld [vmem:[#allocation2 + $0x108] sm:$0xe]  ;;  %v19555_v46 = vcombine.low %v25011_v43, %v25015_v7  ;;  %v10582_v12 = vrot.slane %v24729_v44, 5  ;;  %v10427_v36 = vld [vmem:[#allocation2 + $0x130] sm:$0xe] }
 0x218   : > { %v3532_v11 = vsel %vm24807_vm12, %v18874_v38, %v3531_v62  ;;  %v10426_v16 = vld [vmem:[#allocation2 + $0x128] sm:$0xe]  ;;  %v19527_v39 = vrot.slane %v10425_v25, 9  ;;  %v10586_v5 = vrot.slane %v24740_v41, 5  ;;  %v18876_v60 = vrot.slane %v3360_v59, 9 }
 0x219   : > { %v3536_v22 = vsel %vm24807_vm12, %v18875_v63, %v3535_v23  ;;  %v25027_v26 = vsel %vm24807_vm12, %v19526_v33, %v10582_v12  ;;  %v23284_v6 = vld [vmem:[#allocation2 + $0x104] sm:$0x1]  ;;  %v18877_v58 = vrot.slane %v3361_v55, 9  ;;  %v3362_v29 = vld [vmem:[#allocation2 + $0x110] sm:$0xe]  ;;  %v19528_v47 = vrot.slane %v10426_v16, 9 }
 0x21a   : > { %v18902_v34 = vcombine.low %v3532_v11, %v3536_v22  ;;  %v3539_v4 = vrot.slane %v23284_v6, 5  ;;  %v25031_v44 = vsel %vm24807_vm12, %v19527_v39, %v10586_v5  ;;  %v23285_v32 = vld [vmem:[#allocation2 + $0x10c] sm:$0x1]  ;;  %v10590_v41 = vrot.slane %v24744_v49, 5  ;;  %v3363_v0 = vld [vmem:[#allocation2 + $0x118] sm:$0xe]  ;;  %21533 = vmatmul.mubr.msk.bf16.gmra.mrb[0].mxu1 %vm2811_vm5, %v19553_v53 }
 0x21b   : > { %v3543_v51 = vrot.slane %v23285_v32, 5  ;;  %21061 = vmatmul.mubr.msk.bf16.gmra.mrb[52].mxu0 %vm2811_vm5, %v18901_v13  ;;  %v19556_v50 = vcombine.low %v25027_v26, %v25031_v44  ;;  %v19529_v57 = vrot.slane %v10427_v36, 9  ;;  %v10594_v54 = vrot.slane %v24751_v10, 5  ;;  %v10428_v15 = vld [vmem:[#allocation2 + $0x148] sm:$0xe]  ;;  %21536 = vmatprep.mubr.msk.bf16.mxu1 %vm2811_vm5, %v19554_v27 }
 0x21c   : > { %v3540_v20 = vsel %vm24807_vm12, %v18876_v60, %v3539_v4  ;;  %21064 = vmatprep.mubr.msk.bf16.mxu0 %vm2811_vm5, %v18902_v34  ;;  %v25050_v3 = vsel %vm24807_vm12, %v19528_v47, %v10590_v41  ;;  %v18878_v37 = vrot.slane %v3362_v29, 9  ;;  %v23286_v53 = vld [vmem:[#allocation2 + $0x114] sm:$0x1]  ;;  %v10429_v42 = vld [vmem:[#allocation2 + $0x150] sm:$0xe]  ;;  %v18879_v27 = vrot.slane %v3363_v0, 9 }
 0x21d   : > { %v3544_v49 = vsel %vm24807_vm12, %v18877_v58, %v3543_v51  ;;  %v3547_v9 = vrot.slane %v23286_v53, 5  ;;  %v3364_v28 = vld [vmem:[#allocation2 + $0x120] sm:$0xe]  ;;  %v25054_v10 = vsel %vm24807_vm12, %v19529_v57, %v10594_v54  ;;  %v23287_v40 = vld [vmem:[#allocation2 + $0x11c] sm:$0x1]  ;;  %v19530_v62 = vrot.slane %v10428_v15, 9 }
 0x21e   : > { %v18903_v45 = vcombine.low %v3540_v20, %v3544_v49  ;;  %v3551_v35 = vrot.slane %v23287_v40, 5  ;;  %v3365_v30 = vld [vmem:[#allocation2 + $0x128] sm:$0xe]  ;;  %v19557_v38 = vcombine.low %v25050_v3, %v25054_v10  ;;  %v10598_v25 = vrot.slane %v24760_v18, 5  ;;  %v10430_v59 = vld [vmem:[#allocation2 + $0x158] sm:$0xe] }
 0x21f   : > { %v3548_v19 = vsel %vm24807_vm12, %v18878_v37, %v3547_v9  ;;  %v19531_v63 = vrot.slane %v10429_v42, 9  ;;  %v10602_v56 = vrot.slane %v24769_v61, 5  ;;  %v18880_v23 = vrot.slane %v3364_v28, 9  ;;  %v10431_v55 = vld [vmem:[#allocation2 + $0x160] sm:$0xe] }
 0x220   : > { %v3552_v13 = vsel %vm24807_vm12, %v18879_v27, %v3551_v35  ;;  %v25066_v33 = vsel %vm24807_vm12, %v19530_v62, %v10598_v25  ;;  %v23288_v12 = vld [vmem:[#allocation2 + $0x124] sm:$0x1]  ;;  %v18881_v22 = vrot.slane %v3365_v30, 9  ;;  %v10432_v39 = vld [vmem:[#allocation2 + $0x168] sm:$0xe]  ;;  %v19532_v36 = vrot.slane %v10430_v59, 9 }
 0x221   : > { %v18904_v11 = vcombine.low %v3548_v19, %v3552_v13  ;;  %v3555_v16 = vrot.slane %v23288_v12, 5  ;;  %v25070_v18 = vsel %vm24807_vm12, %v19531_v63, %v10602_v56  ;;  %v23289_v5 = vld [vmem:[#allocation2 + $0x12c] sm:$0x1]  ;;  %v10606_v61 = vrot.slane %v24776_v2, 5  ;;  %v10433_v34 = vld [vmem:[#allocation2 + $0x170] sm:$0xe] }
 0x222   : > { %v3559_v60 = vrot.slane %v23289_v5, 5  ;;  %v19558_v26 = vcombine.low %v25066_v33, %v25070_v18  ;;  %v19533_v4 = vrot.slane %v10431_v55, 9  ;;  %v10610_v58 = vrot.slane %v24779_v1, 5  ;;  %v10434_v29 = vld [vmem:[#allocation2 + $0x178] sm:$0xe]  ;;  %21537 = vmatmul.mubr.msk.bf16.gmra.mrb[4].mxu1 %vm2811_vm5, %v19555_v46 }
 0x223   : > { %v3556_v6 = vsel %vm24807_vm12, %v18880_v23, %v3555_v16  ;;  %21065 = vmatmul.mubr.msk.bf16.gmra.mrb[56].mxu0 %vm2811_vm5, %v18903_v45  ;;  %v25087_v44 = vsel %vm24807_vm12, %v19532_v36, %v10606_v61  ;;  %v19534_v32 = vrot.slane %v10432_v39, 9  ;;  %v10614_v51 = vrot.slane %v24789_v21, 5  ;;  %v10435_v47 = vld [vmem:[#allocation2 + $0x180] sm:$0xe]  ;;  %v4270_v1 = vld [vmem:[#allocation2 + $0x8] sm:$0xf]  ;;  %21540 = vmatprep.mubr.msk.bf16.mxu1 %vm2811_vm5, %v19556_v50 }
 0x224   : > { %v3560_v2 = vsel %vm24807_vm12, %v18881_v22, %v3559_v60  ;;  %21068 = vmatprep.mubr.msk.bf16.mxu0 %vm2811_vm5, %v18904_v11  ;;  %v25094_v7 = vsel %vm24807_vm12, %v19533_v4, %v10610_v58  ;;  %v19535_v46 = vrot.slane %v10433_v34, 9  ;;  %v10618_v41 = vrot.slane %v24795_v17, 5  ;;  %v4271_v0 = vld [vmem:[#allocation2 + $0xc] sm:$0x1]  ;;  %v4272_v54 = vld [vmem:[#allocation2 + $0x10] sm:$0xf] }
 0x225   : > { %v18905_v43 = vcombine.low %v3556_v6, %v3560_v2  ;;  %v19559_v20 = vcombine.low %v25087_v44, %v25094_v7  ;;  %v25101_v21 = vsel %vm24807_vm12, %v19534_v32, %v10614_v51  ;;  %v19536_v57 = vrot.slane %v10434_v29, 9  ;;  %v23036_v49 = vld [vmem:[#allocation2 + $0x8] ss:$8 sps:$4 sm:$0xff]   ;;  %v4273_v53 = vld [vmem:[#allocation2 + $0x14] sm:$0x1] }
 0x226   : > { %v10622_v50 = vrot.slane %v24815_v8, 5  ;;  %v25106_v15 = vsel %vm24807_vm12, %v19535_v46, %v10618_v41  ;;  %v19537_v37 = vrot.slane %v10435_v47, 9  ;;  %v10626_v17 = vrot.slane %v24822_v52, 5  ;;  %v4274_v27 = vld [vmem:[#allocation2 + $0x18] sm:$0xf] }
 0x227   : > { %v4335_v9 = vshrl.u32 %v4270_v1, 16  ;;  %v19560_v42 = vcombine.low %v25101_v21, %v25106_v15  ;;  %v4338_v45 = vshll.u32 %v4270_v1, 16  ;;  %v4344_v8 = vshll.u32 %v4271_v0, 16  ;;  %v4275_v40 = vld [vmem:[#allocation2 + $0x1c] sm:$0x1]  ;;  %v23071_v15 = vld [vmem:[%s27928_s6 + $0x90] sm:$0xff]  }
 0x228   : > { %v25113_v28 = vsel %vm24807_vm12, %v19536_v57, %v10622_v50  ;;  %v25117_v35 = vsel %vm24807_vm12, %v19537_v37, %v10626_v17  ;;  %v4349_v19 = vshrl.u32 %v4272_v54, 16  ;;  %v4352_v52 = vshll.u32 %v4272_v54, 16  ;;  %v4276_v62 = vld [vmem:[#allocation2 + $0x20] sm:$0xf]  ;;  %v4277_v55 = vld [vmem:[#allocation2 + $0x24] sm:$0x1] }
 0x229   : > { %v4337_v30 = vrot.slane %v4335_v9, 4  ;;  %v19561_v25 = vcombine.low %v25113_v28, %v25117_v35  ;;  %v4340_v59 = vrot.slane %v4338_v45, 5  ;;  %v4346_v13 = vrot.slane %v4344_v8, 5  ;;  %v11337_v18 = vld [vmem:[#allocation2 + $0x60] sm:$0xf] }
 0x22a   : > { %v4358_v63 = vshll.u32 %v4273_v53, 16  ;;  %v4351_v56 = vrot.slane %v4349_v19, 4  ;;  %v4354_v23 = vrot.slane %v4352_v52, 5  ;;  %v4363_v11 = vshrl.u32 %v4274_v27, 16  ;;  %21541 = vmatmul.mubr.msk.bf16.gmra.mrb[8].mxu1 %vm2811_vm5, %v19557_v38  ;;  %v11338_v34 = vld [vmem:[#allocation2 + $0x64] sm:$0x1] }
 0x22b   : > { %v4366_v33 = vshll.u32 %v4274_v27, 16  ;;  %21069 = vmatmul.mubr.msk.bf16.gmra.mrb[60].mxu0 %vm2811_vm5, %v18905_v43  ;;  %v4341_v12 = vor.u32 %v4340_v59, %v4337_v30  ;;  %v4372_v22 = vshll.u32 %v4275_v40, 16  ;;  %v4377_v39 = vshrl.u32 %v4276_v62, 16  ;;  %21544 = vmatprep.mubr.msk.bf16.mxu1 %vm2811_vm5, %v19558_v26  ;;  %v23037_v6 = vld [vmem:[#allocation2 + $0x18] ss:$8 sps:$4 sm:$0xff]   ;;  %v23068_v27 = vld [vmem:[%s27928_s6 + $0x88] sm:$0xff]  }
 0x22c   : > { %v4360_v16 = vrot.slane %v4358_v63, 5  ;;  %21080 = vmatprep.mubr.msk.bf16.mxu0 %vm2811_vm5, %v23036_v49  ;;  %v4355_v5 = vor.u32 %v4354_v23, %v4351_v56  ;;  %v4365_v60 = vrot.slane %v4363_v11, 4  ;;  %v4380_v61 = vshll.u32 %v4276_v62, 16  ;;  %v23039_v58 = vld [vmem:[#allocation2 + $0x28] ss:$8 sps:$4 sm:$0xff]  }
 0x22d   : > { %v4368_v36 = vrot.slane %v4366_v33, 5  ;;  %v4342_v3 = vrot.slane %v4341_v12, 4  ;;  %v4374_v10 = vrot.slane %v4372_v22, 5  ;;  %v4379_v38 = vrot.slane %v4377_v39, 4  ;;  %v11339_v51 = vld [vmem:[#allocation2 + $0x68] sm:$0xf] }
 0x22e   : > { %v4386_v4 = vshll.u32 %v4277_v55, 16  ;;  %v4356_v29 = vrot.slane %v4355_v5, 4  ;;  %v4382_v32 = vrot.slane %v4380_v61, 5  ;;  %v11402_v47 = vshrl.u32 %v11337_v18, 16  ;;  %v11340_v43 = vld [vmem:[#allocation2 + $0x6c] sm:$0x1] }
 0x22f   : > { %v4369_v2 = vor.u32 %v4368_v36, %v4365_v60  ;;  %v4347_v26 = vsel %vm23998_vm4, %v4342_v3, %v4346_v13  ;;  %v11405_v46 = vshll.u32 %v11337_v18, 16  ;;  %v11411_v41 = vshll.u32 %v11338_v34, 16  ;;  %v4278_v49 = vld [vmem:[#allocation2 + $0x28] sm:$0xf]  ;;  %v4279_v37 = vld [vmem:[#allocation2 + $0x2c] sm:$0x1] }
 0x230   : > { %v4388_v1 = vrot.slane %v4386_v4, 5  ;;  %v4361_v0 = vsel %vm23998_vm4, %v4356_v29, %v4360_v16  ;;  %v4383_v50 = vor.u32 %v4382_v32, %v4379_v38  ;;  %v11404_v54 = vrot.slane %v11402_v47, 4  ;;  %v4280_v8 = vld [vmem:[#allocation2 + $0x30] sm:$0xf]  ;;  %v4281_v62 = vld [vmem:[#allocation2 + $0x34] sm:$0x1] }
 0x231   : > { %v4370_v57 = vrot.slane %v4369_v2, 4  ;;  %v25132_v17 = vcombine.low %v4347_v26, %v4361_v0  ;;  %v11407_v53 = vrot.slane %v11405_v46, 5  ;;  %v25134_v9 = vrot.slane %v11411_v41, 5  ;;  %v23041_v11 = vld [vmem:[#allocation2 + $0x38] ss:$8 sps:$4 sm:$0xff]  }
 0x232   : > { %v11416_v45 = vshrl.u32 %v11339_v51, 16  ;;  %v4384_v30 = vrot.slane %v4383_v50, 4  ;;  %v11419_v19 = vshll.u32 %v11339_v51, 16  ;;  %v11425_v52 = vshll.u32 %v11340_v43, 16  ;;  %21545 = vmatmul.mubr.msk.bf16.gmra.mrb[12].mxu1 %vm2811_vm5, %v19559_v20  ;;  %v4282_v20 = vld [vmem:[#allocation2 + $0x38] sm:$0xf] }
 0x233   : > { %v4375_v40 = vsel %vm23998_vm4, %v4370_v57, %v4374_v10  ;;  %21081 = vmatmul.mubr.msk.bf16.vlgmr.msra.gmra.mrb[32].mxu0 %vm2811_vm5, %v23037_v6  ;;  %v11408_v59 = vor.u32 %v11407_v53, %v11404_v54  ;;  %v4391_v63 = vshrl.u32 %v4278_v49, 16  ;;  %v4394_v56 = vshll.u32 %v4278_v49, 16  ;;  %21548 = vmatprep.mubr.msk.bf16.mxu1 %vm2811_vm5, %v19560_v42  ;;  %v4283_v21 = vld [vmem:[#allocation2 + $0x3c] sm:$0x1]  ;;  %v4284_v60 = vld [vmem:[#allocation2 + $0x40] sm:$0xf] }
 0x234   : > { %v11418_v13 = vrot.slane %v11416_v45, 4  ;;  %21084 = vmatprep.mubr.msk.bf16.mxu0 %vm2811_vm5, %v23039_v58  ;;  %v4389_v23 = vsel %vm23998_vm4, %v4384_v30, %v4388_v1  ;;  %v11421_v55 = vrot.slane %v11419_v19, 5  ;;  %v11427_v44 = vrot.slane %v11425_v52, 5  ;;  %21113 = vmatpush3.bf16.msra.mxu0 %v24879_v14  ;;  %v23038_v6 = vld [vmem:[#allocation2 + $0x60] ss:$8 sps:$4 sm:$0xff]   ;;  %v23074_v1 = vld [vmem:[%s27928_s6 + $0x98] sm:$0xff]  }
 0x235   : > { %v4400_v7 = vshll.u32 %v4279_v37, 16  ;;  %v25154_v33 = vcombine.low %v4375_v40, %v4389_v23  ;;  %v11409_v12 = vrot.slane %v11408_v59, 4  ;;  %v4393_v16 = vrot.slane %v4391_v63, 4  ;;  %21114 = vmatprep.subr.bf16.mxu0 %v23068_v27  ;;  %v23043_v3 = vld [vmem:[#allocation2 + $0x58] ss:$8 sps:$4 sm:$0xff]  }
 0x236   : > { %v4396_v22 = vrot.slane %v4394_v56, 5  ;;  %v11422_v42 = vor.u32 %v11421_v55, %v11418_v13  ;;  %v4405_v18 = vshrl.u32 %v4280_v8, 16  ;;  %v4408_v5 = vshll.u32 %v4280_v8, 16  ;;  %v11341_v29 = vld [vmem:[#allocation2 + $0x70] sm:$0xf]  ;;  %v25183_v63 = vld [vmem:[%s27928_s6 + $0xa0] sm:$0xff]  }
 0x237   : > { %v4402_v39 = vrot.slane %v4400_v7, 5  ;;  %v11414_v14 = vsel %vm23998_vm4, %v11409_v12, %v25134_v9  ;;  %v4414_v61 = vshll.u32 %v4281_v62, 16  ;;  %v4419_v34 = vshrl.u32 %v4282_v20, 16  ;;  %v4285_v51 = vld [vmem:[#allocation2 + $0x44] sm:$0x1] }
 0x238   : > { %v4397_v36 = vor.u32 %v4396_v22, %v4393_v16  ;;  %v11423_v10 = vrot.slane %v11422_v42, 4  ;;  %v4407_v38 = vrot.slane %v4405_v18, 4  ;;  %v4410_v4 = vrot.slane %v4408_v5, 5  ;;  %21115 = vmatpush3.bf16.msra.mxu0 %v23068_v27  ;;  %v11342_v57 = vld [vmem:[#allocation2 + $0x74] sm:$0x1]  ;;  %v23049_v18 = vld [vmem:[%s27928_s6 + $0x208] sm:$0xff]  }
 0x239   : > { %v4422_v58 = vshll.u32 %v4282_v20, 16  ;;  %v4416_v32 = vrot.slane %v4414_v61, 5  ;;  %v4421_v47 = vrot.slane %v4419_v34, 4  ;;  %v4428_v26 = vshll.u32 %v4283_v21, 16  ;;  %21116 = vmatprep.subr.bf16.mxu0 %v23071_v15  ;;  %v11343_v53 = vld [vmem:[#allocation2 + $0x78] sm:$0xf] }
 0x23a   : > { %v4398_v2 = vrot.slane %v4397_v36, 4  ;;  %v11428_v43 = vsel %vm23998_vm4, %v11423_v10, %v11427_v44  ;;  %v4411_v46 = vor.u32 %v4410_v4, %v4407_v38  ;;  %v4433_v0 = vshrl.u32 %v4284_v60, 16  ;;  %21549 = vmatmul.mubr.msk.bf16.gmra.mrb[16].mxu1 %vm2811_vm5, %v19561_v25  ;;  %v11344_v25 = vld [vmem:[#allocation2 + $0x7c] sm:$0x1]  ;;  %v4286_v13 = vld [vmem:[#allocation2 + $0x58] sm:$0xf] }
 0x23b   : > { %v4424_v41 = vrot.slane %v4422_v58, 5  ;;  %21085 = vmatmul.mubr.msk.bf16.gmra.mrb[36].mxu0 %vm2811_vm5, %v23041_v11  ;;  %v25172_v50 = vcombine.low %v11414_v14, %v11428_v43  ;;  %v4430_v49 = vrot.slane %v4428_v26, 5  ;;  %v4436_v37 = vshll.u32 %v4284_v60, 16  ;;  %21560 = vmatprep.mubr.msk.bf16.mxu1 %vm2811_vm5, %v23038_v6  ;;  %v23042_v56 = vld [vmem:[#allocation2 + $0x70] ss:$8 sps:$4 sm:$0xff]  }
 0x23c   : > { %v4403_v54 = vsel %vm23998_vm4, %v4398_v2, %v4402_v39  ;;  %21088 = vmatprep.mubr.msk.bf16.mxu0 %vm2811_vm5, %v23043_v3  ;;  %v4412_v9 = vrot.slane %v4411_v46, 4  ;;  %v4435_v8 = vrot.slane %v4433_v0, 4  ;;  %v4442_v28 = vshll.u32 %v4285_v51, 16  ;;  %21117 = vmatpush3.bf16.msra.mxu0 %v23071_v15  ;;  %v4287_v20 = vld [vmem:[#allocation2 + $0x5c] sm:$0x1]  ;;  %v23058_v46 = vld [vmem:[%s27928_s6 + $0x210] sm:$0xff]  }
 0x23d   : > { %v4425_v45 = vor.u32 %v4424_v41, %v4421_v47  ;;  %v4438_v35 = vrot.slane %v4436_v37, 5  ;;  %v11430_v27 = vshrl.u32 %v11341_v29, 16  ;;  %v11433_v40 = vshll.u32 %v11341_v29, 16  ;;  %21118 = vmatprep.subr.bf16.mxu0 %v23074_v1  ;;  %v4288_v11 = vld [vmem:[#allocation2 + $0x60] sm:$0xf] }
 0x23e   : > { %v11439_v30 = vshll.u32 %v11342_v57, 16  ;;  %v4417_v19 = vsel %vm23998_vm4, %v4412_v9, %v4416_v32  ;;  %v4444_v62 = vrot.slane %v4442_v28, 5  ;;  %v11444_v59 = vshrl.u32 %v11343_v53, 16  ;;  %v23044_v12 = vld [vmem:[#allocation2 + $0x80] ss:$8 sps:$4 sm:$0xff]  }
 0x23f   : > { %v4426_v52 = vrot.slane %v4425_v45, 4  ;;  %v25185_v23 = vcombine.low %v4403_v54, %v4417_v19  ;;  %v4439_v55 = vor.u32 %v4438_v35, %v4435_v8  ;;  %v11432_v44 = vrot.slane %v11430_v27, 4  ;;  %v23045_v16 = vld [vmem:[#allocation2 + $0x68] ss:$8 sps:$4 sm:$0xff]   ;;  %v23047_v39 = vld [vmem:[#allocation2 + $0x78] ss:$8 sps:$4 sm:$0xff]  }
 0x240   : > { %v11435_v7 = vrot.slane %v11433_v40, 5  ;;  %v11441_v21 = vrot.slane %v11439_v30, 5  ;;  %v11446_v15 = vrot.slane %v11444_v59, 4  ;;  %v11447_v42 = vshll.u32 %v11343_v53, 16  ;;  %21119 = vmatpush3.bf16.msra.mxu0 %v23074_v1  ;;  %v4289_v34 = vld [vmem:[#allocation2 + $0x64] sm:$0x1] }
 0x241   : > { %v4431_v22 = vsel %vm23998_vm4, %v4426_v52, %v4430_v49  ;;  %v4440_v5 = vrot.slane %v4439_v55, 4  ;;  %v11453_v14 = vshll.u32 %v11344_v25, 16  ;;  %v4447_v36 = vshrl.u32 %v4286_v13, 16  ;;  %21152 = vmatprep.subr.bf16.mxu0 %v25183_v63  ;;  %v11345_v2 = vld [vmem:[#allocation2 + $0x80] sm:$0xf] }
 0x242   : > { %v11436_v60 = vor.u32 %v11435_v7, %v11432_v44  ;;  %v11449_v61 = vrot.slane %v11447_v42, 5  ;;  %v4450_v6 = vshll.u32 %v4286_v13, 16  ;;  %v4456_v3 = vshll.u32 %v4287_v20, 16  ;;  %21561 = vmatmul.mubr.msk.bf16.vlgmr.msra.gmra.mrb[20].mxu1 %vm2811_vm5, %v23042_v56  ;;  %v11346_v1 = vld [vmem:[#allocation2 + $0x84] sm:$0x1] }
 0x243   : > { %v4461_v10 = vshrl.u32 %v4288_v11, 16  ;;  %21089 = vmatmul.mubr.msk.bf16.gmra.mrb[40].mxu0 %vm2811_vm5, %v23045_v16  ;;  %v4445_v38 = vsel %vm23998_vm4, %v4440_v5, %v4444_v62  ;;  %v11455_v58 = vrot.slane %v11453_v14, 5  ;;  %v4449_v29 = vrot.slane %v4447_v36, 4  ;;  %21593 = vmatpush3.bf16.msra.mxu1 %v24968_v31  ;;  %v11347_v43 = vld [vmem:[#allocation2 + $0x88] sm:$0xf] }
 0x244   : > { %v11437_v4 = vrot.slane %v11436_v60, 4  ;;  %21564 = vmatprep.mubr.msk.bf16.mxu1 %vm2811_vm5, %v23044_v12  ;;  %v25199_v32 = vcombine.low %v4431_v22, %v4445_v38  ;;  %v11450_v51 = vor.u32 %v11449_v61, %v11446_v15  ;;  %v4452_v47 = vrot.slane %v4450_v6, 5  ;;  %21092 = vmatprep.mubr.msk.bf16.mxu0 %vm2811_vm5, %v23047_v39  ;;  %v11348_v37 = vld [vmem:[#allocation2 + $0x8c] sm:$0x1]  ;;  %v23046_v45 = vld [vmem:[#allocation2 + $0x90] ss:$8 sps:$4 sm:$0xff]  }
 0x245   : > { %v25201_v26 = vrot.slane %v4456_v3, 5  ;;  %21594 = vmatprep.subr.bf16.mxu1 %v23049_v18  ;;  %v4463_v41 = vrot.slane %v4461_v10, 4  ;;  %v4464_v0 = vshll.u32 %v4288_v11, 16  ;;  %v4470_v57 = vshll.u32 %v4289_v34, 16  ;;  %v23050_v8 = vld [vmem:[#allocation2 + $0x88] ss:$8 sps:$4 sm:$0xff]  }
 0x246   : > { %v11442_v31 = vsel %vm23998_vm4, %v11437_v4, %v11441_v21  ;;  %v11451_v54 = vrot.slane %v11450_v51, 4  ;;  %v4453_v49 = vor.u32 %v4452_v47, %v4449_v29  ;;  %v11458_v53 = vshrl.u32 %v11345_v2, 16  ;;  %v4290_v40 = vld [vmem:[#allocation2 + $0x68] sm:$0xf]  ;;  %v23048_v30 = vld [vmem:[#allocation2 + $0xb0] ss:$8 sps:$4 sm:$0xff]  }
 0x247   : > { %v11461_v9 = vshll.u32 %v11345_v2, 16  ;;  %v4466_v28 = vrot.slane %v4464_v0, 5  ;;  %v4472_v35 = vrot.slane %v4470_v57, 5  ;;  %v11467_v25 = vshll.u32 %v11346_v1, 16  ;;  %21595 = vmatpush3.bf16.msra.mxu1 %v23049_v18  ;;  %v4291_v13 = vld [vmem:[#allocation2 + $0x6c] sm:$0x1] }
 0x248   : > { %v11472_v27 = vshrl.u32 %v11347_v43, 16  ;;  %v11456_v19 = vsel %vm23998_vm4, %v11451_v54, %v11455_v58  ;;  %v4454_v52 = vrot.slane %v4453_v49, 4  ;;  %v11460_v62 = vrot.slane %v11458_v53, 4  ;;  %v23052_v56 = vld [vmem:[#allocation2 + $0xa8] ss:$8 sps:$4 sm:$0xff]   ;;  %21596 = vmatprep.subr.bf16.mxu1 %v23058_v46  ;;  %v23069_v12 = vld [vmem:[%s27928_s6 + $0x218] sm:$0xff]  }
 0x249   : > { %v11463_v59 = vrot.slane %v11461_v9, 5  ;;  %v25211_v55 = vcombine.low %v11442_v31, %v11456_v19  ;;  %v4467_v44 = vor.u32 %v4466_v28, %v4463_v41  ;;  %v25213_v7 = vrot.slane %v11467_v25, 5  ;;  %v4292_v11 = vld [vmem:[#allocation2 + $0x70] sm:$0xf]  ;;  %v4293_v42 = vld [vmem:[#allocation2 + $0x74] sm:$0x1] }
 0x24a   : > { %v11474_v20 = vrot.slane %v11472_v27, 4  ;;  %v4459_v16 = vsel %vm23998_vm4, %v4454_v52, %v25201_v26  ;;  %v11475_v21 = vshll.u32 %v11347_v43, 16  ;;  %v11481_v15 = vshll.u32 %v11348_v37, 16  ;;  %21565 = vmatmul.mubr.msk.bf16.gmra.mrb[24].mxu1 %vm2811_vm5, %v23046_v45  ;;  %v11349_v14 = vld [vmem:[#allocation2 + $0x90] sm:$0xf]  ;;  %v25232_v2 = vld [vmem:[%s27928_s6 + $0x220] sm:$0xff]  }
 0x24b   : > { %v11464_v22 = vor.u32 %v11463_v59, %v11460_v62  ;;  %21093 = vmatmul.mubr.msk.bf16.gmra.mrb[44].mxu0 %vm2811_vm5, %v23050_v8  ;;  %v4468_v39 = vrot.slane %v4467_v44, 4  ;;  %v4475_v18 = vshrl.u32 %v4290_v40, 16  ;;  %v4478_v5 = vshll.u32 %v4290_v40, 16  ;;  %21568 = vmatprep.mubr.msk.bf16.mxu1 %vm2811_vm5, %v23048_v30  ;;  %v11350_v3 = vld [vmem:[#allocation2 + $0x94] sm:$0x1] }
 0x24c   : > { %v4484_v60 = vshll.u32 %v4291_v13, 16  ;;  %21096 = vmatprep.mubr.msk.bf16.mxu0 %vm2811_vm5, %v23052_v56  ;;  %v11477_v61 = vrot.slane %v11475_v21, 5  ;;  %v11483_v34 = vrot.slane %v11481_v15, 5  ;;  %v4489_v6 = vshrl.u32 %v4292_v11, 16  ;;  %21597 = vmatpush3.bf16.msra.mxu1 %v23058_v46  ;;  %v11351_v29 = vld [vmem:[#allocation2 + $0x98] sm:$0xf] }
 0x24d   : > { %v11465_v36 = vrot.slane %v11464_v22, 4  ;;  %v4473_v10 = vsel %vm23998_vm4, %v4468_v39, %v4472_v35  ;;  %v4477_v38 = vrot.slane %v4475_v18, 4  ;;  %v4480_v4 = vrot.slane %v4478_v5, 5  ;;  %21598 = vmatprep.subr.bf16.mxu1 %v23069_v12  ;;  %v23051_v43 = vld [vmem:[#allocation2 + $0xc0] ss:$8 sps:$4 sm:$0xff]  }
 0x24e   : > { %v25227_v58 = vrot.slane %v4484_v60, 5  ;;  %v25234_v51 = vcombine.low %v4459_v16, %v4473_v10  ;;  %v11478_v26 = vor.u32 %v11477_v61, %v11474_v20  ;;  %v4491_v1 = vrot.slane %v4489_v6, 4  ;;  %v23054_v46 = vld [vmem:[#allocation2 + $0xb8] ss:$8 sps:$4 sm:$0xff]   ;;  %v23056_v37 = vld [vmem:[#allocation2 + $0xc8] ss:$8 sps:$4 sm:$0xff]  }
 0x24f   : > { %v11470_v47 = vsel %vm23998_vm4, %v11465_v36, %v25213_v7  ;;  %v4481_v31 = vor.u32 %v4480_v4, %v4477_v38  ;;  %v4492_v41 = vshll.u32 %v4292_v11, 16  ;;  %v4498_v0 = vshll.u32 %v4293_v42, 16  ;;  %v4294_v54 = vld [vmem:[#allocation2 + $0x78] sm:$0xf]  ;;  %v4295_v28 = vld [vmem:[#allocation2 + $0x7c] sm:$0x1] }
 0x250   : > { %v11486_v57 = vshrl.u32 %v11349_v14, 16  ;;  %v23053_v49 = vld [vmem:[#allocation2 + $0xd0] ss:$8 sps:$4 sm:$0xff]   ;;  %v11479_v53 = vrot.slane %v11478_v26, 4  ;;  %v11489_v9 = vshll.u32 %v11349_v14, 16  ;;  %v11495_v45 = vshll.u32 %v11350_v3, 16  ;;  %21599 = vmatpush3.bf16.msra.mxu1 %v23069_v12 }
 0x251   : > { %v11500_v8 = vshrl.u32 %v11351_v29, 16  ;;  %v4482_v35 = vrot.slane %v4481_v31, 4  ;;  %v4494_v25 = vrot.slane %v4492_v41, 5  ;;  %v4500_v27 = vrot.slane %v4498_v0, 5  ;;  %v11352_v40 = vld [vmem:[#allocation2 + $0x9c] sm:$0x1]  ;;  %21632 = vmatprep.subr.bf16.mxu1 %v25232_v2 }
 0x252   : > { %v11488_v30 = vrot.slane %v11486_v57, 4  ;;  %v11484_v19 = vsel %vm23998_vm4, %v11479_v53, %v11483_v34  ;;  %v11491_v52 = vrot.slane %v11489_v9, 5  ;;  %v11497_v62 = vrot.slane %v11495_v45, 5  ;;  %v4296_v13 = vld [vmem:[#allocation2 + $0x80] sm:$0xf]  ;;  %21569 = vmatmul.mubr.msk.bf16.gmra.mrb[28].mxu1 %vm2811_vm5, %v23051_v43 }
 0x253   : > { %v11502_v59 = vrot.slane %v11500_v8, 4  ;;  %21097 = vmatmul.mubr.msk.bf16.gmra.mrb[48].mxu0 %vm2811_vm5, %v23054_v46  ;;  %v25244_v56 = vcombine.low %v11470_v47, %v11484_v19  ;;  %v4487_v44 = vsel %vm23998_vm4, %v4482_v35, %v25227_v58  ;;  %v4495_v7 = vor.u32 %v4494_v25, %v4491_v1  ;;  %21572 = vmatprep.mubr.msk.bf16.mxu1 %vm2811_vm5, %v23053_v49  ;;  %v4297_v42 = vld [vmem:[#allocation2 + $0x84] sm:$0x1]  ;;  %v11353_v61 = vld [vmem:[#allocation2 + $0xb0] sm:$0xf] }
 0x254   : > { %v11503_v20 = vshll.u32 %v11351_v29, 16  ;;  %21100 = vmatprep.mubr.msk.bf16.mxu0 %vm2811_vm5, %v23056_v37  ;;  %v11492_v11 = vor.u32 %v11491_v52, %v11488_v30  ;;  %v11509_v12 = vshll.u32 %v11352_v40, 16  ;;  %v4503_v16 = vshrl.u32 %v4294_v54, 16  ;;  %v23055_v34 = vld [vmem:[#allocation2 + $0xe0] ss:$8 sps:$4 sm:$0xff]  }
 0x255   : > { %v4506_v22 = vshll.u32 %v4294_v54, 16  ;;  %v4496_v21 = vrot.slane %v4495_v7, 4  ;;  %v4512_v39 = vshll.u32 %v4295_v28, 16  ;;  %v4517_v18 = vshrl.u32 %v4296_v13, 16  ;;  %v23059_v6 = vld [vmem:[#allocation2 + $0xd8] ss:$8 sps:$4 sm:$0xff]  }
 0x256   : > { %v11505_v15 = vrot.slane %v11503_v20, 5  ;;  %v11493_v5 = vrot.slane %v11492_v11, 4  ;;  %v11511_v60 = vrot.slane %v11509_v12, 5  ;;  %v4505_v14 = vrot.slane %v4503_v16, 4  ;;  %v11354_v58 = vld [vmem:[#allocation2 + $0xb4] sm:$0x1] }
 0x257   : > { %v4508_v36 = vrot.slane %v4506_v22, 5  ;;  %v4501_v3 = vsel %vm23998_vm4, %v4496_v21, %v4500_v27  ;;  %v4514_v38 = vrot.slane %v4512_v39, 5  ;;  %v4519_v4 = vrot.slane %v4517_v18, 4  ;;  %v11355_v29 = vld [vmem:[#allocation2 + $0xb8] sm:$0xf] }
 0x258   : > { %v11506_v10 = vor.u32 %v11505_v15, %v11502_v59  ;;  %v23057_v47 = vld [vmem:[#allocation2 + $0x100] ss:$8 sps:$4 sm:$0xff]   ;;  %v25253_v1 = vcombine.low %v4487_v44, %v4501_v3  ;;  %v11498_v43 = vsel %vm23998_vm4, %v11493_v5, %v11497_v62  ;;  %v4520_v31 = vshll.u32 %v4296_v13, 16  ;;  %v11356_v41 = vld [vmem:[#allocation2 + $0xbc] sm:$0x1] }
 0x259   : > { %v23061_v26 = vld [vmem:[#allocation2 + $0xf8] ss:$8 sps:$4 sm:$0xff]   ;;  %v4509_v46 = vor.u32 %v4508_v36, %v4505_v14  ;;  %v4526_v57 = vshll.u32 %v4297_v42, 16  ;;  %v11514_v54 = vshrl.u32 %v11353_v61, 16  ;;  %v11517_v49 = vshll.u32 %v11353_v61, 16 }
 0x25a   : > { %v11507_v0 = vrot.slane %v11506_v10, 4  ;;  %v4298_v37 = vld [vmem:[#allocation2 + $0x88] sm:$0xf]  ;;  %v4522_v9 = vrot.slane %v4520_v31, 5  ;;  %v11523_v45 = vshll.u32 %v11354_v58, 16  ;;  %v11528_v8 = vshrl.u32 %v11355_v29, 16  ;;  %21573 = vmatmul.mubr.msk.bf16.gmra.mrb[0].mxu1 %vm2811_vm5, %v23055_v34 }
 0x25b   : > { %v4510_v53 = vrot.slane %v4509_v46, 4  ;;  %v4299_v28 = vld [vmem:[#allocation2 + $0x8c] sm:$0x1]  ;;  %21101 = vmatmul.mubr.msk.bf16.gmra.mrb[52].mxu0 %vm2811_vm5, %v23059_v6  ;;  %v4528_v25 = vrot.slane %v4526_v57, 5  ;;  %v11516_v27 = vrot.slane %v11514_v54, 4  ;;  %v11519_v40 = vrot.slane %v11517_v49, 5  ;;  %21576 = vmatprep.mubr.msk.bf16.mxu1 %vm2811_vm5, %v23057_v47 }
 0x25c   : > { %v11512_v35 = vsel %vm23998_vm4, %v11507_v0, %v11511_v60  ;;  %21104 = vmatprep.mubr.msk.bf16.mxu0 %vm2811_vm5, %v23061_v26  ;;  %v4523_v52 = vor.u32 %v4522_v9, %v4519_v4  ;;  %v11525_v62 = vrot.slane %v11523_v45, 5  ;;  %v4300_v59 = vld [vmem:[#allocation2 + $0x90] sm:$0xf]  ;;  %v11530_v44 = vrot.slane %v11528_v8, 4  ;;  %v4301_v11 = vld [vmem:[#allocation2 + $0x94] sm:$0x1] }
 0x25d   : > { %v25263_v30 = vcombine.low %v11498_v43, %v11512_v35  ;;  %v4515_v19 = vsel %vm23998_vm4, %v4510_v53, %v4514_v38  ;;  %v11520_v13 = vor.u32 %v11519_v40, %v11516_v27  ;;  %v11531_v7 = vshll.u32 %v11355_v29, 16  ;;  %v11357_v15 = vld [vmem:[#allocation2 + $0xc0] sm:$0xf]  ;;  %v23060_v42 = vld [vmem:[#allocation2 + $0x110] ss:$8 sps:$4 sm:$0xff]  }
 0x25e   : > { %v11537_v20 = vshll.u32 %v11356_v41, 16  ;;  %v4524_v12 = vrot.slane %v4523_v52, 4  ;;  %v4531_v16 = vshrl.u32 %v4298_v37, 16  ;;  %v4534_v22 = vshll.u32 %v4298_v37, 16  ;;  %v11358_v14 = vld [vmem:[#allocation2 + $0xc4] sm:$0x1] }
 0x25f   : > { %v4540_v21 = vshll.u32 %v4299_v28, 16  ;;  %v11521_v39 = vrot.slane %v11520_v13, 4  ;;  %v11533_v18 = vrot.slane %v11531_v7, 5  ;;  %v4545_v60 = vshrl.u32 %v4300_v59, 16  ;;  %v23062_v36 = vld [vmem:[#allocation2 + $0x120] ss:$8 sps:$4 sm:$0xff]  }
 0x260   : > { %v11539_v5 = vrot.slane %v11537_v20, 5  ;;  %v4529_v61 = vsel %vm23998_vm4, %v4524_v12, %v4528_v25  ;;  %v4533_v34 = vrot.slane %v4531_v16, 4  ;;  %v4536_v6 = vrot.slane %v4534_v22, 5  ;;  %v11359_v10 = vld [vmem:[#allocation2 + $0xc8] sm:$0xf] }
 0x261   : > { %v4542_v3 = vrot.slane %v4540_v21, 5  ;;  %v23063_v38 = vld [vmem:[#allocation2 + $0x108] ss:$8 sps:$4 sm:$0xff]   ;;  %v23066_v4 = vld [vmem:[#allocation2 + $0x118] ss:$8 sps:$4 sm:$0xff]   ;;  %v25269_v58 = vcombine.low %v4515_v19, %v4529_v61  ;;  %v11526_v29 = vsel %vm23998_vm4, %v11521_v39, %v11525_v62  ;;  %v11534_v47 = vor.u32 %v11533_v18, %v11530_v44 }
 0x262   : > { %v4547_v26 = vrot.slane %v4545_v60, 4  ;;  %v4537_v43 = vor.u32 %v4536_v6, %v4533_v34  ;;  %v4548_v46 = vshll.u32 %v4300_v59, 16  ;;  %v4554_v31 = vshll.u32 %v4301_v11, 16  ;;  %v11360_v41 = vld [vmem:[#allocation2 + $0xcc] sm:$0x1]  ;;  %21577 = vmatmul.mubr.msk.bf16.gmra.mrb[4].mxu1 %vm2811_vm5, %v23060_v42 }
 0x263   : > { %v11542_v0 = vshrl.u32 %v11357_v15, 16  ;;  %21105 = vmatmul.mubr.msk.bf16.gmra.mrb[56].mxu0 %vm2811_vm5, %v23063_v38  ;;  %v11535_v57 = vrot.slane %v11534_v47, 4  ;;  %v11545_v54 = vshll.u32 %v11357_v15, 16  ;;  %v11551_v49 = vshll.u32 %v11358_v14, 16  ;;  %v4302_v53 = vld [vmem:[#allocation2 + $0xa8] sm:$0xf]  ;;  %21580 = vmatprep.mubr.msk.bf16.mxu1 %vm2811_vm5, %v23062_v36 }
 0x264   : > { %v11556_v37 = vshrl.u32 %v11359_v10, 16  ;;  %21108 = vmatprep.mubr.msk.bf16.mxu0 %vm2811_vm5, %v23066_v4  ;;  %v4538_v9 = vrot.slane %v4537_v43, 4  ;;  %v4550_v45 = vrot.slane %v4548_v46, 5  ;;  %v4556_v8 = vrot.slane %v4554_v31, 5  ;;  %v4303_v35 = vld [vmem:[#allocation2 + $0xac] sm:$0x1] }
 0x265   : > { %v11544_v28 = vrot.slane %v11542_v0, 4  ;;  %v11540_v25 = vsel %vm23998_vm4, %v11535_v57, %v11539_v5  ;;  %v11547_v27 = vrot.slane %v11545_v54, 5  ;;  %v11553_v40 = vrot.slane %v11551_v49, 5  ;;  %v4304_v52 = vld [vmem:[#allocation2 + $0xb0] sm:$0xf] }
 0x266   : > { %v11558_v19 = vrot.slane %v11556_v37, 4  ;;  %v25279_v62 = vcombine.low %v11526_v29, %v11540_v25  ;;  %v4543_v59 = vsel %vm23998_vm4, %v4538_v9, %v4542_v3  ;;  %v4551_v13 = vor.u32 %v4550_v45, %v4547_v26  ;;  %v23065_v7 = vld [vmem:[#allocation2 + $0x130] ss:$8 sps:$4 sm:$0xff]   ;;  %v4305_v39 = vld [vmem:[#allocation2 + $0xb4] sm:$0x1] }
 0x267   : > { %v11559_v44 = vshll.u32 %v11359_v10, 16  ;;  %v23070_v20 = vld [vmem:[#allocation2 + $0x128] ss:$8 sps:$4 sm:$0xff]   ;;  %v11548_v11 = vor.u32 %v11547_v27, %v11544_v28  ;;  %v11565_v12 = vshll.u32 %v11360_v41, 16  ;;  %v4559_v16 = vshrl.u32 %v4302_v53, 16 }
 0x268   : > { %v4562_v22 = vshll.u32 %v4302_v53, 16  ;;  %v23067_v21 = vld [vmem:[#allocation2 + $0x150] ss:$8 sps:$4 sm:$0xff]   ;;  %v4552_v15 = vrot.slane %v4551_v13, 4  ;;  %v4568_v18 = vshll.u32 %v4303_v35, 16  ;;  %v4573_v5 = vshrl.u32 %v4304_v52, 16 }
 0x269   : > { %v11561_v42 = vrot.slane %v11559_v44, 5  ;;  %v11549_v60 = vrot.slane %v11548_v11, 4  ;;  %v11567_v14 = vrot.slane %v11565_v12, 5  ;;  %v4561_v36 = vrot.slane %v4559_v16, 4  ;;  %v11361_v34 = vld [vmem:[#allocation2 + $0xd0] sm:$0xf] }
 0x26a   : > { %v4564_v61 = vrot.slane %v4562_v22, 5  ;;  %v4557_v6 = vsel %vm23998_vm4, %v4552_v15, %v4556_v8  ;;  %v4570_v10 = vrot.slane %v4568_v18, 5  ;;  %v4575_v38 = vrot.slane %v4573_v5, 4  ;;  %v11362_v4 = vld [vmem:[#allocation2 + $0xd4] sm:$0x1]  ;;  %21581 = vmatmul.mubr.msk.bf16.gmra.mrb[8].mxu1 %vm2811_vm5, %v23065_v7 }
 0x26b   : > { %v11562_v3 = vor.u32 %v11561_v42, %v11558_v19  ;;  %v11363_v29 = vld [vmem:[#allocation2 + $0xd8] sm:$0xf]  ;;  %21109 = vmatmul.mubr.msk.bf16.gmra.mrb[60].mxu0 %vm2811_vm5, %v23070_v20  ;;  %v25287_v47 = vcombine.low %v4543_v59, %v4557_v6  ;;  %v11554_v26 = vsel %vm23998_vm4, %v11549_v60, %v11553_v40  ;;  %v4576_v46 = vshll.u32 %v4304_v52, 16  ;;  %21584 = vmatprep.mubr.msk.bf16.mxu1 %vm2811_vm5, %v23067_v21  ;;  %v11364_v0 = vld [vmem:[#allocation2 + $0xdc] sm:$0x1] }
 0x26c   : > { %v4565_v43 = vor.u32 %v4564_v61, %v4561_v36  ;;  %21120 = vmatprep.mubr.msk.bf16.mxu0 %vm2811_vm5, %v25132_v17  ;;  %v4582_v41 = vshll.u32 %v4305_v39, 16  ;;  %v11570_v57 = vshrl.u32 %v11361_v34, 16  ;;  %v11573_v54 = vshll.u32 %v11361_v34, 16  ;;  %v4306_v45 = vld [vmem:[#allocation2 + $0xb8] sm:$0xf]  ;;  %v23080_v61 = vld [vmem:[%s27928_s6 + $0xa8] sm:$0xff]  }
 0x26d   : > { %v11563_v31 = vrot.slane %v11562_v3, 4  ;;  %v4578_v37 = vrot.slane %v4576_v46, 5  ;;  %v11579_v53 = vshll.u32 %v11362_v4, 16  ;;  %v11584_v9 = vshrl.u32 %v11363_v29, 16  ;;  %v4307_v27 = vld [vmem:[#allocation2 + $0xbc] sm:$0x1] }
 0x26e   : > { %v4566_v49 = vrot.slane %v4565_v43, 4  ;;  %v4584_v28 = vrot.slane %v4582_v41, 5  ;;  %v11572_v35 = vrot.slane %v11570_v57, 4  ;;  %v11575_v25 = vrot.slane %v11573_v54, 5  ;;  %v23072_v40 = vld [vmem:[#allocation2 + $0x160] ss:$8 sps:$4 sm:$0xff]  }
 0x26f   : > { %v11568_v8 = vsel %vm23998_vm4, %v11563_v31, %v11567_v14  ;;  %v4579_v52 = vor.u32 %v4578_v37, %v4575_v38  ;;  %v11581_v59 = vrot.slane %v11579_v53, 5  ;;  %v4308_v13 = vld [vmem:[#allocation2 + $0xc0] sm:$0xf]  ;;  %v23073_v44 = vld [vmem:[#allocation2 + $0x170] ss:$8 sps:$4 sm:$0xff]   ;;  %v11586_v20 = vrot.slane %v11584_v9, 4 }
 0x270   : > { %v25296_v19 = vcombine.low %v11554_v26, %v11568_v8  ;;  %v4571_v17 = vsel %vm23998_vm4, %v4566_v49, %v4570_v10  ;;  %v11576_v7 = vor.u32 %v11575_v25, %v11572_v35  ;;  %v11587_v11 = vshll.u32 %v11363_v29, 16  ;;  %v4309_v16 = vld [vmem:[#allocation2 + $0xc4] sm:$0x1]  ;;  %v11365_v22 = vld [vmem:[#allocation2 + $0xe0] sm:$0xf] }
 0x271   : > { %v11593_v12 = vshll.u32 %v11364_v0, 16  ;;  %v4580_v21 = vrot.slane %v4579_v52, 4  ;;  %v4587_v15 = vshrl.u32 %v4306_v45, 16  ;;  %v4590_v42 = vshll.u32 %v4306_v45, 16  ;;  %v11366_v18 = vld [vmem:[#allocation2 + $0xe4] sm:$0x1] }
 0x272   : > { %v4596_v39 = vshll.u32 %v4307_v27, 16  ;;  %v11577_v5 = vrot.slane %v11576_v7, 4  ;;  %v11589_v60 = vrot.slane %v11587_v11, 5  ;;  %v4601_v36 = vshrl.u32 %v4308_v13, 16  ;;  %21585 = vmatmul.mubr.msk.bf16.gmra.mrb[12].mxu1 %vm2811_vm5, %v23072_v40  ;;  %v11367_v38 = vld [vmem:[#allocation2 + $0xe8] sm:$0xf] }
 0x273   : > { %v11595_v14 = vrot.slane %v11593_v12, 5  ;;  %21121 = vmatmul.mubr.msk.bf16.vlgmr.msra.gmra.mrb[32].mxu0 %vm2811_vm5, %v25154_v33  ;;  %v4585_v34 = vsel %vm23998_vm4, %v4580_v21, %v4584_v28  ;;  %v4589_v6 = vrot.slane %v4587_v15, 4  ;;  %v4592_v3 = vrot.slane %v4590_v42, 5  ;;  %21588 = vmatprep.mubr.msk.bf16.mxu1 %vm2811_vm5, %v23073_v44  ;;  %v4310_v0 = vld [vmem:[#allocation2 + $0xc8] sm:$0xf]  ;;  %v23083_v21 = vld [vmem:[%s27928_s6 + $0xb8] sm:$0xff]  }
 0x274   : > { %v25308_v10 = vrot.slane %v4596_v39, 5  ;;  %21124 = vmatprep.mubr.msk.bf16.mxu0 %vm2811_vm5, %v25185_v23  ;;  %v25313_v4 = vcombine.low %v4571_v17, %v4585_v34  ;;  %v11582_v29 = vsel %vm23998_vm4, %v11577_v5, %v11581_v59  ;;  %v11590_v26 = vor.u32 %v11589_v60, %v11586_v20  ;;  %21153 = vmatpush3.bf16.msra.mxu0 %v25183_v63  ;;  %v23082_v23 = vld [vmem:[%s27928_s6 + $0xb0] sm:$0xff]   ;;  %v4311_v28 = vld [vmem:[#allocation2 + $0xcc] sm:$0x1]  ;;  %v23075_v17 = vld [vmem:[#allocation2 + $0x180] ss:$8 sps:$4 sm:$0xff]  }
 0x275   : > { %v4603_v33 = vrot.slane %v4601_v36, 4  ;;  %v4593_v43 = vor.u32 %v4592_v3, %v4589_v6  ;;  %v4604_v46 = vshll.u32 %v4308_v13, 16  ;;  %v4610_v31 = vshll.u32 %v4309_v16, 16  ;;  %21154 = vmatprep.subr.bf16.mxu0 %v23080_v61  ;;  %v4312_v40 = vld [vmem:[#allocation2 + $0xd0] sm:$0xf] }
 0x276   : > { %v11598_v41 = vshrl.u32 %v11365_v22, 16  ;;  %v11591_v57 = vrot.slane %v11590_v26, 4  ;;  %v11601_v54 = vshll.u32 %v11365_v22, 16  ;;  %v11607_v49 = vshll.u32 %v11366_v18, 16  ;;  %v11368_v44 = vld [vmem:[#allocation2 + $0xec] sm:$0x1] }
 0x277   : > { %v11612_v37 = vshrl.u32 %v11367_v38, 16  ;;  %v4594_v53 = vrot.slane %v4593_v43, 4  ;;  %v4606_v9 = vrot.slane %v4604_v46, 5  ;;  %v4612_v45 = vrot.slane %v4610_v31, 5  ;;  %v4313_v12 = vld [vmem:[#allocation2 + $0xd4] sm:$0x1] }
 0x278   : > { %v11600_v8 = vrot.slane %v11598_v41, 4  ;;  %v11596_v35 = vsel %vm23998_vm4, %v11591_v57, %v11595_v14  ;;  %v11603_v25 = vrot.slane %v11601_v54, 5  ;;  %v11609_v27 = vrot.slane %v11607_v49, 5  ;;  %21155 = vmatpush3.bf16.msra.mxu0 %v23080_v61  ;;  %v11369_v61 = vld [vmem:[#allocation2 + $0x100] sm:$0xf] }
 0x279   : > { %v11614_v63 = vrot.slane %v11612_v37, 4  ;;  %v25323_v52 = vcombine.low %v11582_v29, %v11596_v35  ;;  %v4599_v59 = vsel %vm23998_vm4, %v4594_v53, %v25308_v10  ;;  %v4607_v13 = vor.u32 %v4606_v9, %v4603_v33  ;;  %21156 = vmatprep.subr.bf16.mxu0 %v23082_v23  ;;  %v11370_v10 = vld [vmem:[#allocation2 + $0x104] sm:$0x1]  ;;  %v11372_v33 = vld [vmem:[#allocation2 + $0x10c] sm:$0x1] }
 0x27a   : > { %v11615_v7 = vshll.u32 %v11367_v38, 16  ;;  %v11604_v20 = vor.u32 %v11603_v25, %v11600_v8  ;;  %v11621_v11 = vshll.u32 %v11368_v44, 16  ;;  %v4615_v16 = vshrl.u32 %v4310_v0, 16  ;;  %21589 = vmatmul.mubr.msk.bf16.gmra.mrb[16].mxu1 %vm2811_vm5, %v23075_v17  ;;  %v11371_v38 = vld [vmem:[#allocation2 + $0x108] sm:$0xf]  ;;  %v25347_v43 = vld [vmem:[%s27928_s6 + $0xc0] sm:$0xff]  }
 0x27b   : > { %v4618_v22 = vshll.u32 %v4310_v0, 16  ;;  %21125 = vmatmul.mubr.msk.bf16.gmra.mrb[36].mxu0 %vm2811_vm5, %v25199_v32  ;;  %v4608_v15 = vrot.slane %v4607_v13, 4  ;;  %v4624_v39 = vshll.u32 %v4311_v28, 16  ;;  %v4629_v18 = vshrl.u32 %v4312_v40, 16  ;;  %21600 = vmatprep.mubr.msk.bf16.mxu1 %vm2811_vm5, %v25172_v50  ;;  %v23077_v53 = vld [vmem:[%s27928_s6 + $0x228] sm:$0xff]  }
 0x27c   : > { %v11617_v42 = vrot.slane %v11615_v7, 5  ;;  %21128 = vmatprep.mubr.msk.bf16.mxu0 %vm2811_vm5, %v25234_v51  ;;  %v11605_v5 = vrot.slane %v11604_v20, 4  ;;  %v11623_v60 = vrot.slane %v11621_v11, 5  ;;  %v4617_v14 = vrot.slane %v4615_v16, 4  ;;  %21157 = vmatpush3.bf16.msra.mxu0 %v23082_v23  ;;  %v4314_v23 = vld [vmem:[#allocation2 + $0xd8] sm:$0xf] }
 0x27d   : > { %v4620_v36 = vrot.slane %v4618_v22, 5  ;;  %v4613_v34 = vsel %vm23998_vm4, %v4608_v15, %v4612_v45  ;;  %v4626_v32 = vrot.slane %v4624_v39, 5  ;;  %v4631_v3 = vrot.slane %v4629_v18, 4  ;;  %21158 = vmatprep.subr.bf16.mxu0 %v23083_v21  ;;  %v4315_v35 = vld [vmem:[#allocation2 + $0xdc] sm:$0x1]  ;;  %v23078_v16 = vld [vmem:[%s27928_s6 + $0x230] sm:$0xff]  }
 0x27e   : > { %v11618_v6 = vor.u32 %v11617_v42, %v11614_v63  ;;  %v25340_v29 = vcombine.low %v4599_v59, %v4613_v34  ;;  %v11610_v50 = vsel %vm23998_vm4, %v11605_v5, %v11609_v27  ;;  %v4632_v26 = vshll.u32 %v4312_v40, 16  ;;  %v4316_v17 = vld [vmem:[#allocation2 + $0xe0] sm:$0xf]  ;;  %v4317_v20 = vld [vmem:[#allocation2 + $0xe4] sm:$0x1] }
 0x27f   : > { %v4621_v51 = vor.u32 %v4620_v36, %v4617_v14  ;;  %v4638_v31 = vshll.u32 %v4313_v12, 16  ;;  %v11626_v41 = vshrl.u32 %v11369_v61, 16  ;;  %v11629_v0 = vshll.u32 %v11369_v61, 16  ;;  %v11373_v11 = vld [vmem:[#allocation2 + $0x110] sm:$0xf] }
 0x280   : > { %v11619_v46 = vrot.slane %v11618_v6, 4  ;;  %v4634_v54 = vrot.slane %v4632_v26, 5  ;;  %v11635_v49 = vshll.u32 %v11370_v10, 16  ;;  %v11640_v37 = vshrl.u32 %v11371_v38, 16  ;;  %21159 = vmatpush3.bf16.msra.mxu0 %v23083_v21  ;;  %v11375_v18 = vld [vmem:[#allocation2 + $0x118] sm:$0xf] }
 0x281   : > { %v4622_v57 = vrot.slane %v4621_v51, 4  ;;  %v4640_v45 = vrot.slane %v4638_v31, 5  ;;  %v11628_v8 = vrot.slane %v11626_v41, 4  ;;  %v11631_v28 = vrot.slane %v11629_v0, 5  ;;  %21192 = vmatprep.subr.bf16.mxu0 %v25347_v43  ;;  %v11376_v10 = vld [vmem:[#allocation2 + $0x11c] sm:$0x1] }
 0x282   : > { %v11624_v9 = vsel %vm23998_vm4, %v11619_v46, %v11623_v60  ;;  %v4635_v63 = vor.u32 %v4634_v54, %v4631_v3  ;;  %v11637_v40 = vrot.slane %v11635_v49, 5  ;;  %21601 = vmatmul.mubr.msk.bf16.vlgmr.msra.gmra.mrb[20].mxu1 %vm2811_vm5, %v25211_v55  ;;  %v11642_v13 = vrot.slane %v11640_v37, 4  ;;  %v4319_v31 = vld [vmem:[#allocation2 + $0xfc] sm:$0x1] }
 0x283   : > { %v25354_v25 = vcombine.low %v11610_v50, %v11624_v9  ;;  %v4627_v27 = vsel %vm23998_vm4, %v4622_v57, %v4626_v32  ;;  %21129 = vmatmul.mubr.msk.bf16.gmra.mrb[40].mxu0 %vm2811_vm5, %v25253_v1  ;;  %v11632_v59 = vor.u32 %v11631_v28, %v11628_v8  ;;  %v11643_v44 = vshll.u32 %v11371_v38, 16  ;;  %21633 = vmatpush3.bf16.msra.mxu1 %v25232_v2  ;;  %v11374_v1 = vld [vmem:[#allocation2 + $0x114] sm:$0x1]  ;;  %v4318_v50 = vld [vmem:[#allocation2 + $0xf8] sm:$0xf] }
 0x284   : > { %v11649_v7 = vshll.u32 %v11372_v33, 16  ;;  %21604 = vmatprep.mubr.msk.bf16.mxu1 %vm2811_vm5, %v25244_v56  ;;  %v4636_v12 = vrot.slane %v4635_v63, 4  ;;  %v4643_v55 = vshrl.u32 %v4314_v23, 16  ;;  %v4646_v22 = vshll.u32 %v4314_v23, 16  ;;  %21132 = vmatprep.mubr.msk.bf16.mxu0 %vm2811_vm5, %v25269_v58  ;;  %v23081_v49 = vld [vmem:[%s27928_s6 + $0x238] sm:$0xff]  }
 0x285   : > { %v4652_v21 = vshll.u32 %v4315_v35, 16  ;;  %21634 = vmatprep.subr.bf16.mxu1 %v23077_v53  ;;  %v11633_v15 = vrot.slane %v11632_v59, 4  ;;  %v11645_v42 = vrot.slane %v11643_v44, 5  ;;  %v4657_v2 = vshrl.u32 %v4316_v17, 16  ;;  %v4321_v63 = vld [vmem:[#allocation2 + $0x104] sm:$0x1] }
 0x286   : > { %v11651_v39 = vrot.slane %v11649_v7, 5  ;;  %v4641_v56 = vsel %vm23998_vm4, %v4636_v12, %v4640_v45  ;;  %v4645_v5 = vrot.slane %v4643_v55, 4  ;;  %v4648_v60 = vrot.slane %v4646_v22, 5  ;;  %v4320_v45 = vld [vmem:[#allocation2 + $0x100] sm:$0xf] }
 0x287   : > { %v4654_v14 = vrot.slane %v4652_v21, 5  ;;  %v25373_v36 = vcombine.low %v4627_v27, %v4641_v56  ;;  %v11638_v61 = vsel %vm23998_vm4, %v11633_v15, %v11637_v40  ;;  %v11646_v34 = vor.u32 %v11645_v42, %v11642_v13  ;;  %21635 = vmatpush3.bf16.msra.mxu1 %v23077_v53  ;;  %v11377_v59 = vld [vmem:[#allocation2 + $0x120] sm:$0xf]  ;;  %v11379_v42 = vld [vmem:[#allocation2 + $0x128] sm:$0xf] }
 0x288   : > { %v4659_v6 = vrot.slane %v4657_v2, 4  ;;  %v4649_v58 = vor.u32 %v4648_v60, %v4645_v5  ;;  %v4660_v32 = vshll.u32 %v4316_v17, 16  ;;  %v4666_v3 = vshll.u32 %v4317_v20, 16  ;;  %21636 = vmatprep.subr.bf16.mxu1 %v23078_v16  ;;  %v11378_v20 = vld [vmem:[#allocation2 + $0x124] sm:$0x1] }
 0x289   : > { %v11654_v38 = vshrl.u32 %v11373_v11, 16  ;;  %v11647_v51 = vrot.slane %v11646_v34, 4  ;;  %v11657_v26 = vshll.u32 %v11373_v11, 16  ;;  %v11663_v33 = vshll.u32 %v11374_v1, 16  ;;  %v11380_v5 = vld [vmem:[#allocation2 + $0x12c] sm:$0x1] }
 0x28a   : > { %v11668_v46 = vshrl.u32 %v11375_v18, 16  ;;  %v4650_v41 = vrot.slane %v4649_v58, 4  ;;  %v4662_v0 = vrot.slane %v4660_v32, 5  ;;  %v4668_v57 = vrot.slane %v4666_v3, 5  ;;  %21605 = vmatmul.mubr.msk.bf16.gmra.mrb[24].mxu1 %vm2811_vm5, %v25263_v30  ;;  %v25403_v58 = vld [vmem:[#allocation2 + $0x10c] sm:$0x1] }
 0x28b   : > { %v11656_v54 = vrot.slane %v11654_v38, 4  ;;  %21133 = vmatmul.mubr.msk.bf16.gmra.mrb[44].mxu0 %vm2811_vm5, %v25287_v47  ;;  %v11652_v37 = vsel %vm23998_vm4, %v11647_v51, %v11651_v39  ;;  %v11659_v23 = vrot.slane %v11657_v26, 5  ;;  %v11665_v53 = vrot.slane %v11663_v33, 5  ;;  %21608 = vmatprep.mubr.msk.bf16.mxu1 %vm2811_vm5, %v25279_v62  ;;  %v25397_v62 = vld [vmem:[%s27928_s6 + $0x240] sm:$0xff]  }
 0x28c   : > { %v11670_v9 = vrot.slane %v11668_v46, 4  ;;  %21136 = vmatprep.mubr.msk.bf16.mxu0 %vm2811_vm5, %v25313_v4  ;;  %v25390_v8 = vcombine.low %v11638_v61, %v11652_v37  ;;  %v4655_v30 = vsel %vm23998_vm4, %v4650_v41, %v4654_v14  ;;  %v4663_v28 = vor.u32 %v4662_v0, %v4659_v6  ;;  %21637 = vmatpush3.bf16.msra.mxu1 %v23078_v16  ;;  %v4322_v6 = vld [vmem:[#allocation2 + $0x108] sm:$0xf] }
 0x28d   : > { %v11671_v47 = vshll.u32 %v11375_v18, 16  ;;  %v11660_v35 = vor.u32 %v11659_v23, %v11656_v54  ;;  %v11677_v27 = vshll.u32 %v11376_v10, 16  ;;  %v4671_v40 = vshrl.u32 %v4318_v50, 16  ;;  %21638 = vmatprep.subr.bf16.mxu1 %v23081_v49 }
 0x28e   : > { %v4674_v17 = vshll.u32 %v4318_v50, 16  ;;  %v4664_v4 = vrot.slane %v4663_v28, 4  ;;  %v4680_v44 = vshll.u32 %v4319_v31, 16  ;;  %v4685_v7 = vshrl.u32 %v4320_v45, 16 }
 0x28f   : > { %v11673_v13 = vrot.slane %v11671_v47, 5  ;;  %v11661_v11 = vrot.slane %v11660_v35, 4  ;;  %v11679_v12 = vrot.slane %v11677_v27, 5  ;;  %v4673_v55 = vrot.slane %v4671_v40, 4  ;;  %v11383_v27 = vld [vmem:[#allocation2 + $0x138] sm:$0xf] }
 0x290   : > { %v4676_v22 = vrot.slane %v4674_v17, 5  ;;  %v4669_v16 = vsel %vm23998_vm4, %v4664_v4, %v4668_v57  ;;  %v4682_v1 = vrot.slane %v4680_v44, 5  ;;  %v4687_v15 = vrot.slane %v4685_v7, 4  ;;  %21639 = vmatpush3.bf16.msra.mxu1 %v23081_v49  ;;  %v25420_v49 = vld [vmem:[#allocation2 + $0x114] sm:$0x1] }
 0x291   : > { %v11674_v21 = vor.u32 %v11673_v13, %v11670_v9  ;;  %v18989_v39 = vcombine.low %v4655_v30, %v4669_v16  ;;  %v11666_v2 = vsel %vm23998_vm4, %v11661_v11, %v11665_v53  ;;  %v4688_v56 = vshll.u32 %v4320_v45, 16  ;;  %21672 = vmatprep.subr.bf16.mxu1 %v25397_v62  ;;  %v25423_v45 = vld [vmem:[#allocation2 + $0x134] sm:$0x1] }
 0x292   : > { %v4677_v18 = vor.u32 %v4676_v22, %v4673_v55  ;;  %v4694_v14 = vshll.u32 %v4321_v63, 16  ;;  %v11682_v61 = vshrl.u32 %v11377_v59, 16  ;;  %v11685_v34 = vshll.u32 %v11377_v59, 16  ;;  %21609 = vmatmul.mubr.msk.bf16.gmra.mrb[28].mxu1 %vm2811_vm5, %v25296_v19  ;;  %v4324_v19 = vld [vmem:[#allocation2 + $0x110] sm:$0xf] }
 0x293   : > { %v11675_v60 = vrot.slane %v11674_v21, 4  ;;  %21137 = vmatmul.mubr.msk.bf16.gmra.mrb[48].mxu0 %vm2811_vm5, %v25340_v29  ;;  %v4690_v3 = vrot.slane %v4688_v56, 5  ;;  %v11691_v10 = vshll.u32 %v11378_v20, 16  ;;  %v11696_v38 = vshrl.u32 %v11379_v42, 16  ;;  %21612 = vmatprep.mubr.msk.bf16.mxu1 %vm2811_vm5, %v25323_v52  ;;  %v4326_v22 = vld [vmem:[#allocation2 + $0x118] sm:$0xf] }
 0x294   : > { %v4678_v32 = vrot.slane %v4677_v18, 4  ;;  %21140 = vmatprep.mubr.msk.bf16.mxu0 %vm2811_vm5, %v25373_v36  ;;  %v4696_v51 = vrot.slane %v4694_v14, 5  ;;  %v11684_v26 = vrot.slane %v11682_v61, 4  ;;  %v11687_v33 = vrot.slane %v11685_v34, 5  ;;  %v11381_v36 = vld [vmem:[#allocation2 + $0x130] sm:$0xf] }
 0x295   : > { %v11680_v50 = vsel %vm23998_vm4, %v11675_v60, %v11679_v12  ;;  %v4691_v31 = vor.u32 %v4690_v3, %v4687_v15  ;;  %v11693_v41 = vrot.slane %v11691_v10, 5  ;;  %v11698_v57 = vrot.slane %v11696_v38, 4 }
 0x296   : > { %v25416_v46 = vcombine.low %v11666_v2, %v11680_v50  ;;  %v4683_v29 = vsel %vm23998_vm4, %v4678_v32, %v4682_v1  ;;  %v11688_v0 = vor.u32 %v11687_v33, %v11684_v26  ;;  %v11699_v52 = vshll.u32 %v11379_v42, 16  ;;  %v25437_v42 = vld [vmem:[#allocation2 + $0x11c] sm:$0x1]  ;;  %v25446_v50 = vld [vmem:[#allocation2 + $0x124] sm:$0x1] }
 0x297   : > { %v11705_v54 = vshll.u32 %v11380_v5, 16  ;;  %v4692_v37 = vrot.slane %v4691_v31, 4  ;;  %v4699_v23 = vshrl.u32 %v4322_v6, 16  ;;  %v4702_v53 = vshll.u32 %v4322_v6, 16  ;;  %v25443_v32 = vld [vmem:[#allocation2 + $0x13c] sm:$0x1] }
 0x298   : > { %v4708_v9 = vshll.u32 %v25403_v58, 16  ;;  %v11689_v30 = vrot.slane %v11688_v0, 4  ;;  %v11701_v28 = vrot.slane %v11699_v52, 5  ;;  %v4713_v35 = vshrl.u32 %v4324_v19, 16  ;;  %v11387_v0 = vld [vmem:[#allocation2 + $0x158] sm:$0xf] }
 0x299   : > { %v11707_v47 = vrot.slane %v11705_v54, 5  ;;  %v4697_v63 = vsel %vm23998_vm4, %v4692_v37, %v4696_v51  ;;  %v4701_v40 = vrot.slane %v4699_v23, 4  ;;  %v4704_v17 = vrot.slane %v4702_v53, 5 }
 0x29a   : > { %v4710_v59 = vrot.slane %v4708_v9, 5  ;;  %v18990_v4 = vcombine.low %v4683_v29, %v4697_v63  ;;  %v11694_v13 = vsel %vm23998_vm4, %v11689_v30, %v11693_v41  ;;  %v11702_v44 = vor.u32 %v11701_v28, %v11698_v57  ;;  %21613 = vmatmul.mubr.msk.bf16.gmra.mrb[0].mxu1 %vm2811_vm5, %v25354_v25  ;;  %v4328_v25 = vld [vmem:[#allocation2 + $0x120] sm:$0xf]  ;;  %v11385_v41 = vld [vmem:[#allocation2 + $0x150] sm:$0xf] }
 0x29b   : > { %v4715_v7 = vrot.slane %v4713_v35, 4  ;;  %21141 = vmatmul.mubr.msk.bf16.gmra.mrb[52].mxu0 %vm2811_vm5, %v18989_v39  ;;  %v4705_v20 = vor.u32 %v4704_v17, %v4701_v40  ;;  %v4716_v11 = vshll.u32 %v4324_v19, 16  ;;  %v4722_v12 = vshll.u32 %v25420_v49, 16  ;;  %21616 = vmatprep.mubr.msk.bf16.mxu1 %vm2811_vm5, %v25390_v8  ;;  %v25453_v30 = vld [vmem:[#allocation2 + $0x154] sm:$0x1] }
 0x29c   : > { %v11710_v55 = vshrl.u32 %v11381_v36, 16  ;;  %21144 = vmatprep.mubr.msk.bf16.mxu0 %vm2811_vm5, %v18990_v4  ;;  %v11703_v16 = vrot.slane %v11702_v44, 4  ;;  %v11713_v21 = vshll.u32 %v11381_v36, 16  ;;  %v11719_v1 = vshll.u32 %v25423_v45, 16  ;;  %v25458_v63 = vld [vmem:[#allocation2 + $0x15c] sm:$0x1] }
 0x29d   : > { %v11724_v15 = vshrl.u32 %v11383_v27, 16  ;;  %v4706_v39 = vrot.slane %v4705_v20, 4  ;;  %v4718_v2 = vrot.slane %v4716_v11, 5  ;;  %v4724_v18 = vrot.slane %v4722_v12, 5  ;;  %v4330_v4 = vld [vmem:[#allocation2 + $0x128] sm:$0xf] }
 0x29e   : > { %v11712_v56 = vrot.slane %v11710_v55, 4  ;;  %v11708_v5 = vsel %vm23998_vm4, %v11703_v16, %v11707_v47  ;;  %v11715_v60 = vrot.slane %v11713_v21, 5  ;;  %v11721_v14 = vrot.slane %v11719_v1, 5 }
 0x29f   : > { %v11726_v8 = vrot.slane %v11724_v15, 4  ;;  %v19644_v61 = vcombine.low %v11694_v13, %v11708_v5  ;;  %v4711_v34 = vsel %vm23998_vm4, %v4706_v39, %v4710_v59  ;;  %v4719_v6 = vor.u32 %v4718_v2, %v4715_v7  ;;  %v25461_v13 = vld [vmem:[#allocation2 + $0x12c] sm:$0x1]  ;;  %v4332_v39 = vld [vmem:[#allocation2 + $0x130] sm:$0xf] }
 0x2a0   : > { %v11727_v3 = vshll.u32 %v11383_v27, 16  ;;  %v11716_v10 = vor.u32 %v11715_v60, %v11712_v56  ;;  %v11733_v38 = vshll.u32 %v25443_v32, 16  ;;  %v4727_v51 = vshrl.u32 %v4326_v22, 16  ;;  %v25470_v60 = vld [vmem:[#allocation2 + $0x134] sm:$0x1] }
 0x2a1   : > { %v4730_v26 = vshll.u32 %v4326_v22, 16  ;;  %v4720_v33 = vrot.slane %v4719_v6, 4  ;;  %v4736_v29 = vshll.u32 %v25437_v42, 16  ;;  %v4741_v31 = vshrl.u32 %v4328_v25, 16  ;;  %v11389_v6 = vld [vmem:[#allocation2 + $0x160] sm:$0xf] }
 0x2a2   : > { %v11729_v19 = vrot.slane %v11727_v3, 5  ;;  %v11717_v57 = vrot.slane %v11716_v10, 4  ;;  %v11735_v52 = vrot.slane %v11733_v38, 5  ;;  %v4729_v54 = vrot.slane %v4727_v51, 4  ;;  %21617 = vmatmul.mubr.msk.bf16.gmra.mrb[4].mxu1 %vm2811_vm5, %v25416_v46 }
 0x2a3   : > { %v4732_v36 = vrot.slane %v4730_v26, 5  ;;  %v4725_v37 = vsel %vm23998_vm4, %v4720_v33, %v4724_v18  ;;  %v4738_v53 = vrot.slane %v4736_v29, 5  ;;  %v4743_v9 = vrot.slane %v4741_v31, 4  ;;  %21620 = vmatprep.mubr.msk.bf16.mxu1 %vm2811_vm5, %v19644_v61  ;;  %v25474_v26 = vld [vmem:[#allocation2 + $0x164] sm:$0x1] }
 0x2a4   : > { %v11730_v23 = vor.u32 %v11729_v19, %v11726_v8  ;;  %v18991_v28 = vcombine.low %v4711_v34, %v4725_v37  ;;  %v11722_v47 = vsel %vm23998_vm4, %v11717_v57, %v11721_v14  ;;  %v4744_v27 = vshll.u32 %v4328_v25, 16 }
 0x2a5   : > { %v4733_v35 = vor.u32 %v4732_v36, %v4729_v54  ;;  %v4750_v46 = vshll.u32 %v25446_v50, 16  ;;  %v11738_v17 = vshrl.u32 %v11385_v41, 16  ;;  %v11741_v59 = vshll.u32 %v11385_v41, 16  ;;  %v11391_v41 = vld [vmem:[#allocation2 + $0x168] sm:$0xf] }
 0x2a6   : > { %v11731_v40 = vrot.slane %v11730_v23, 4  ;;  %21145 = vmatmul.mubr.msk.bf16.gmra.mrb[56].mxu0 %vm2811_vm5, %v18991_v28  ;;  %v4746_v7 = vrot.slane %v4744_v27, 5  ;;  %v11747_v20 = vshll.u32 %v25453_v30, 16  ;;  %v11752_v11 = vshrl.u32 %v11387_v0, 16 }
 0x2a7   : > { %v4734_v44 = vrot.slane %v4733_v35, 4  ;;  %v4752_v55 = vrot.slane %v4750_v46, 5  ;;  %v11740_v22 = vrot.slane %v11738_v17, 4  ;;  %v11743_v16 = vrot.slane %v11741_v59, 5 }
 0x2a8   : > { %v11736_v12 = vsel %vm23998_vm4, %v11731_v40, %v11735_v52  ;;  %v4747_v15 = vor.u32 %v4746_v7, %v4743_v9  ;;  %v11749_v25 = vrot.slane %v11747_v20, 5  ;;  %v11754_v18 = vrot.slane %v11752_v11, 4  ;;  %v11395_v40 = vld [vmem:[#allocation2 + $0x178] sm:$0xf] }
 0x2a9   : > { %v19645_v21 = vcombine.low %v11722_v47, %v11736_v12  ;;  %v4739_v1 = vsel %vm23998_vm4, %v4734_v44, %v4738_v53  ;;  %v11744_v2 = vor.u32 %v11743_v16, %v11740_v22  ;;  %v11755_v56 = vshll.u32 %v11387_v0, 16  ;;  %v25481_v53 = vld [vmem:[#allocation2 + $0x16c] sm:$0x1]  ;;  %v11393_v44 = vld [vmem:[#allocation2 + $0x170] sm:$0xf] }
 0x2aa   : > { %v11761_v5 = vshll.u32 %v25458_v63, 16  ;;  %v4748_v14 = vrot.slane %v4747_v15, 4  ;;  %v4755_v8 = vshrl.u32 %v4330_v4, 16  ;;  %v4758_v61 = vshll.u32 %v4330_v4, 16 }
 0x2ab   : > { %v4764_v34 = vshll.u32 %v25461_v13, 16  ;;  %21621 = vmatmul.mubr.msk.bf16.gmra.mrb[8].mxu1 %vm2811_vm5, %v19645_v21  ;;  %v11745_v3 = vrot.slane %v11744_v2, 4  ;;  %v11757_v10 = vrot.slane %v11755_v56, 5  ;;  %v4769_v51 = vshrl.u32 %v4332_v39, 16 }
 0x2ac   : > { %v11763_v38 = vrot.slane %v11761_v5, 5  ;;  %v4753_v33 = vsel %vm23998_vm4, %v4748_v14, %v4752_v55  ;;  %v4757_v19 = vrot.slane %v4755_v8, 4  ;;  %v4760_v29 = vrot.slane %v4758_v61, 5  ;;  %v25487_v55 = vld [vmem:[#allocation2 + $0x174] sm:$0x1] }
 0x2ad   : > { %v4766_v31 = vrot.slane %v4764_v34, 5  ;;  %v18992_v0 = vcombine.low %v4739_v1, %v4753_v33  ;;  %v11750_v57 = vsel %vm23998_vm4, %v11745_v3, %v11749_v25  ;;  %v11758_v52 = vor.u32 %v11757_v10, %v11754_v18  ;;  %v25493_v5 = vld [vmem:[#allocation2 + $0x17c] sm:$0x1]  ;;  %v5104_v10 = vld [vmem:[#allocation2 + $0x8] sm:$0xe] }
 0x2ae   : > { %v4771_v54 = vrot.slane %v4769_v51, 4  ;;  %v4761_v36 = vor.u32 %v4760_v29, %v4757_v19  ;;  %v4772_v37 = vshll.u32 %v4332_v39, 16  ;;  %v4778_v23 = vshll.u32 %v25470_v60, 16  ;;  %v5105_v29 = vld [vmem:[#allocation2 + $0x10] sm:$0xe] }
 0x2af   : > { %v11766_v9 = vshrl.u32 %v11389_v6, 16  ;;  %21148 = vmatprep.mubr.msk.bf16.mxu0 %vm2811_vm5, %v18992_v0  ;;  %v11759_v28 = vrot.slane %v11758_v52, 4  ;;  %v11769_v47 = vshll.u32 %v11389_v6, 16  ;;  %v11775_v35 = vshll.u32 %v25474_v26, 16  ;;  %v5106_v52 = vld [vmem:[#allocation2 + $0x18] sm:$0xe] }
 0x2b0   : > { %v11780_v27 = vshrl.u32 %v11391_v41, 16  ;;  %v4762_v46 = vrot.slane %v4761_v36, 4  ;;  %v4774_v17 = vrot.slane %v4772_v37, 5  ;;  %v4780_v59 = vrot.slane %v4778_v23, 5  ;;  %v23290_v23 = vld [vmem:[#allocation2 + $0xc] sm:$0x1] }
 0x2b1   : > { %v11768_v4 = vrot.slane %v11766_v9, 4  ;;  %v11764_v7 = vsel %vm23998_vm4, %v11759_v28, %v11763_v38  ;;  %v11771_v20 = vrot.slane %v11769_v47, 5  ;;  %v11777_v11 = vrot.slane %v11775_v35, 5 }
 0x2b2   : > { %v11782_v12 = vrot.slane %v11780_v27, 4  ;;  %v19646_v22 = vcombine.low %v11750_v57, %v11764_v7  ;;  %v4767_v16 = vsel %vm23998_vm4, %v4762_v46, %v4766_v31  ;;  %v4775_v21 = vor.u32 %v4774_v17, %v4771_v54  ;;  %v23291_v27 = vld [vmem:[#allocation2 + $0x14] sm:$0x1]  ;;  %v5107_v17 = vld [vmem:[#allocation2 + $0x20] sm:$0xe] }
 0x2b3   : > { %v11783_v1 = vshll.u32 %v11391_v41, 16  ;;  %v11772_v15 = vor.u32 %v11771_v20, %v11768_v4  ;;  %v11789_v25 = vshll.u32 %v25481_v53, 16  ;;  %v11794_v39 = vshrl.u32 %v11393_v44, 16  ;;  %v11397_v7 = vld [vmem:[#allocation2 + $0x180] sm:$0xf] }
 0x2b4   : > { %v11797_v2 = vshll.u32 %v11393_v44, 16  ;;  %21624 = vmatprep.mubr.msk.bf16.mxu1 %vm2811_vm5, %v19646_v22  ;;  %v4776_v18 = vrot.slane %v4775_v21, 4  ;;  %v11803_v14 = vshll.u32 %v25487_v55, 16  ;;  %v11808_v8 = vshrl.u32 %v11395_v40, 16  ;;  %v25506_v20 = vld [vmem:[#allocation2 + $0x184] sm:$0x1] }
 0x2b5   : > { %v11785_v56 = vrot.slane %v11783_v1, 5  ;;  %v11773_v61 = vrot.slane %v11772_v15, 4  ;;  %v11791_v34 = vrot.slane %v11789_v25, 5  ;;  %v11796_v6 = vrot.slane %v11794_v39, 4  ;;  %v11399_v21 = vld [vmem:[#allocation2 + $0x188] sm:$0xf] }
 0x2b6   : > { %v11799_v3 = vrot.slane %v11797_v2, 5  ;;  %v4781_v38 = vsel %vm23998_vm4, %v4776_v18, %v4780_v59  ;;  %v11805_v33 = vrot.slane %v11803_v14, 5  ;;  %v11810_v19 = vrot.slane %v11808_v8, 4  ;;  %v23292_v15 = vld [vmem:[#allocation2 + $0x1c] sm:$0x1] }
 0x2b7   : > { %v11786_v51 = vor.u32 %v11785_v56, %v11782_v12  ;;  %v18993_v31 = vcombine.low %v4767_v16, %v4781_v38  ;;  %v11778_v41 = vsel %vm23998_vm4, %v11773_v61, %v11777_v11  ;;  %v11811_v57 = vshll.u32 %v11395_v40, 16  ;;  %v23293_v2 = vld [vmem:[#allocation2 + $0x24] sm:$0x1]  ;;  %v12171_v38 = vld [vmem:[#allocation2 + $0x60] sm:$0xe] }
 0x2b8   : > { %v11800_v0 = vor.u32 %v11799_v3, %v11796_v6  ;;  %v11817_v36 = vshll.u32 %v25493_v5, 16  ;;  %v19014_v37 = vrot.slane %v5104_v10, 9  ;;  %v5202_v9 = vrot.slane %v23290_v23, 5 }
 0x2b9   : > { %v11787_v54 = vrot.slane %v11786_v51, 4  ;;  %21149 = vmatmul.mubr.msk.bf16.gmra.mrb[60].mxu0 %vm2811_vm5, %v18993_v31  ;;  %v11813_v47 = vrot.slane %v11811_v57, 5  ;;  %v19015_v35 = vrot.slane %v5105_v29, 9  ;;  %v5206_v46 = vrot.slane %v23291_v27, 5  ;;  %v12172_v51 = vld [vmem:[#allocation2 + $0x68] sm:$0xe] }
 0x2ba   : > { %v11801_v28 = vrot.slane %v11800_v0, 4  ;;  %v11819_v4 = vrot.slane %v11817_v36, 5  ;;  %v5203_v40 = vsel %vm24807_vm12, %v19014_v37, %v5202_v9  ;;  %v19016_v44 = vrot.slane %v5106_v52, 9  ;;  %v23088_v0 = vld [vmem:[%s27928_s6 + $0xc8] sm:$0xff]   ;;  %v5109_v27 = vld [vmem:[#allocation2 + $0x30] sm:$0xe] }
 0x2bb   : > { %v11792_v59 = vsel %vm23998_vm4, %v11787_v54, %v11791_v34  ;;  %v11814_v22 = vor.u32 %v11813_v47, %v11810_v19  ;;  %v5207_v16 = vsel %vm24807_vm12, %v19015_v35, %v5206_v46  ;;  %v5210_v25 = vrot.slane %v23292_v15, 5  ;;  %v25524_v52 = vld [vmem:[#allocation2 + $0x18c] sm:$0x1]  ;;  %v23294_v47 = vld [vmem:[#allocation2 + $0x64] sm:$0x1] }
 0x2bc   : > { %v19647_v11 = vcombine.low %v11778_v41, %v11792_v59  ;;  %v11806_v12 = vsel %vm23998_vm4, %v11801_v28, %v11805_v33  ;;  %v19054_v1 = vcombine.low %v5203_v40, %v5207_v16  ;;  %v19017_v39 = vrot.slane %v5107_v17, 9  ;;  %v5108_v41 = vld [vmem:[#allocation2 + $0x28] sm:$0xe]  ;;  %v23295_v59 = vld [vmem:[#allocation2 + $0x6c] sm:$0x1] }
 0x2bd   : > { %v5214_v18 = vrot.slane %v23293_v2, 5  ;;  %v11815_v56 = vrot.slane %v11814_v22, 4  ;;  %v11822_v14 = vshrl.u32 %v11397_v7, 16  ;;  %v11825_v8 = vshll.u32 %v11397_v7, 16  ;;  %v23296_v22 = vld [vmem:[#allocation2 + $0x2c] sm:$0x1] }
 0x2be   : > { %21625 = vmatmul.mubr.msk.bf16.gmra.mrb[12].mxu1 %vm2811_vm5, %v19647_v11  ;;  %v11831_v61 = vshll.u32 %v25506_v20, 16  ;;  %21160 = vmatprep.mubr.msk.bf16.mxu0 %vm2811_vm5, %v19054_v1  ;;  %v5211_v34 = vsel %vm24807_vm12, %v19016_v44, %v5210_v25  ;;  %v11836_v3 = vshrl.u32 %v11399_v21, 16  ;;  %v11839_v10 = vshll.u32 %v11399_v21, 16  ;;  %v5110_v44 = vld [vmem:[#allocation2 + $0x38] sm:$0xe]  ;;  %v23090_v1 = vld [vmem:[%s27928_s6 + $0xd0] sm:$0xff]  }
 0x2bf   : > { %v5215_v6 = vsel %vm24807_vm12, %v19017_v39, %v5214_v18  ;;  %v11820_v33 = vsel %vm23998_vm4, %v11815_v56, %v11819_v4  ;;  %v11824_v29 = vrot.slane %v11822_v14, 4  ;;  %v11827_v31 = vrot.slane %v11825_v8, 5  ;;  %v5111_v21 = vld [vmem:[#allocation2 + $0x40] sm:$0xe]  ;;  %v23297_v2 = vld [vmem:[#allocation2 + $0x34] sm:$0x1] }
 0x2c0   : > { %v19055_v19 = vcombine.low %v5211_v34, %v5215_v6  ;;  %v19648_v57 = vcombine.low %v11806_v12, %v11820_v33  ;;  %v11833_v54 = vrot.slane %v11831_v61, 5  ;;  %v11838_v36 = vrot.slane %v11836_v3, 4  ;;  %v12173_v18 = vld [vmem:[#allocation2 + $0x70] sm:$0xe]  ;;  %v12174_v34 = vld [vmem:[#allocation2 + $0x78] sm:$0xe] }
 0x2c1   : > { %v11841_v37 = vrot.slane %v11839_v10, 5  ;;  %v11828_v23 = vor.u32 %v11827_v31, %v11824_v29  ;;  %v11845_v9 = vshll.u32 %v25524_v52, 16  ;;  %v19670_v28 = vrot.slane %v12171_v38, 9  ;;  %v23298_v10 = vld [vmem:[#allocation2 + $0x3c] sm:$0x1] }
 0x2c2   : > { %21161 = vmatmul.mubr.msk.bf16.vlgmr.msra.gmra.mrb[32].mxu0 %vm2811_vm5, %v19055_v19  ;;  %v12269_v35 = vrot.slane %v23294_v47, 5  ;;  %21628 = vmatprep.mubr.msk.bf16.mxu1 %vm2811_vm5, %v19648_v57  ;;  %v19671_v17 = vrot.slane %v12172_v51, 9  ;;  %v12273_v4 = vrot.slane %v23295_v59, 5  ;;  %v19018_v40 = vrot.slane %v5108_v41, 9  ;;  %v5112_v33 = vld [vmem:[#allocation2 + $0x58] sm:$0xe] }
 0x2c3   : > { %v11842_v46 = vor.u32 %v11841_v37, %v11838_v36  ;;  %21193 = vmatpush3.bf16.msra.mxu0 %v25347_v43  ;;  %v11829_v7 = vrot.slane %v11828_v23, 4  ;;  %v11847_v11 = vrot.slane %v11845_v9, 5  ;;  %v5218_v16 = vrot.slane %v23296_v22, 5  ;;  %v5113_v19 = vld [vmem:[#allocation2 + $0x60] sm:$0xe]  ;;  %v23091_v37 = vld [vmem:[%s27928_s6 + $0xd8] sm:$0xff]  }
 0x2c4   : > { %v12270_v12 = vsel %vm24807_vm12, %v19670_v28, %v12269_v35  ;;  %21194 = vmatprep.subr.bf16.mxu0 %v23088_v0  ;;  %v12274_v25 = vsel %vm24807_vm12, %v19671_v17, %v12273_v4  ;;  %v19019_v39 = vrot.slane %v5109_v27, 9  ;;  %v5222_v43 = vrot.slane %v23297_v2, 5  ;;  %v23299_v41 = vld [vmem:[#allocation2 + $0x44] sm:$0x1]  ;;  %v5114_v36 = vld [vmem:[#allocation2 + $0x68] sm:$0xe] }
 0x2c5   : > { %v11843_v15 = vrot.slane %v11842_v46, 4  ;;  %v11834_v56 = vsel %vm23998_vm4, %v11829_v7, %v11833_v54  ;;  %v19710_v14 = vcombine.low %v12270_v12, %v12274_v25  ;;  %v5219_v8 = vsel %vm24807_vm12, %v19018_v40, %v5218_v16  ;;  %v23300_v9 = vld [vmem:[#allocation2 + $0x74] sm:$0x1]  ;;  %v23301_v35 = vld [vmem:[#allocation2 + $0x7c] sm:$0x1] }
 0x2c6   : > { %v19020_v61 = vrot.slane %v5110_v44, 9  ;;  %v5223_v3 = vsel %vm24807_vm12, %v19019_v39, %v5222_v43  ;;  %v5226_v38 = vrot.slane %v23298_v10, 5  ;;  %v19021_v51 = vrot.slane %v5111_v21, 9  ;;  %v23302_v59 = vld [vmem:[#allocation2 + $0x5c] sm:$0x1] }
 0x2c7   : > { %v11848_v6 = vsel %vm23998_vm4, %v11843_v15, %v11847_v11  ;;  %21195 = vmatpush3.bf16.msra.mxu0 %v23088_v0  ;;  %v19056_v31 = vcombine.low %v5219_v8, %v5223_v3  ;;  %v5230_v57 = vrot.slane %v23299_v41, 5  ;;  %v19672_v54 = vrot.slane %v12173_v18, 9  ;;  %v12175_v0 = vld [vmem:[#allocation2 + $0x80] sm:$0xe]  ;;  %v12176_v44 = vld [vmem:[#allocation2 + $0x88] sm:$0xe] }
 0x2c8   : > { %v19649_v29 = vcombine.low %v11834_v56, %v11848_v6  ;;  %21196 = vmatprep.subr.bf16.mxu0 %v23090_v1  ;;  %v5227_v23 = vsel %vm24807_vm12, %v19020_v61, %v5226_v38  ;;  %v12277_v28 = vrot.slane %v23300_v9, 5  ;;  %v19673_v47 = vrot.slane %v12174_v34, 9  ;;  %v23303_v22 = vld [vmem:[#allocation2 + $0x64] sm:$0x1]  ;;  %v5115_v21 = vld [vmem:[#allocation2 + $0x70] sm:$0xe] }
 0x2c9   : > { %v12281_v27 = vrot.slane %v23301_v35, 5  ;;  %21164 = vmatprep.mubr.msk.bf16.mxu0 %vm2811_vm5, %v19056_v31  ;;  %v5231_v46 = vsel %vm24807_vm12, %v19021_v51, %v5230_v57  ;;  %v19022_v17 = vrot.slane %v5112_v33, 9  ;;  %v5234_v4 = vrot.slane %v23302_v59, 5  ;;  %v23304_v2 = vld [vmem:[#allocation2 + $0x84] sm:$0x1] }
 0x2ca   : > { %21629 = vmatmul.mubr.msk.bf16.gmra.mrb[16].mxu1 %vm2811_vm5, %v19649_v29  ;;  %v19023_v40 = vrot.slane %v5113_v19, 9  ;;  %v19057_v7 = vcombine.low %v5227_v23, %v5231_v46  ;;  %v12278_v11 = vsel %vm24807_vm12, %v19672_v54, %v12277_v28  ;;  %v5238_v16 = vrot.slane %v23303_v22, 5  ;;  %v12177_v18 = vld [vmem:[#allocation2 + $0x90] sm:$0xe]  ;;  %v25564_v56 = vld [vmem:[%s27928_s6 + $0xe0] sm:$0xff]   ;;  %v23085_v46 = vld [vmem:[%s27928_s6 + $0x248] sm:$0xff]  }
 0x2cb   : > { %21640 = vmatprep.mubr.msk.bf16.mxu1 %vm2811_vm5, %v19710_v14  ;;  %v12282_v12 = vsel %vm24807_vm12, %v19673_v47, %v12281_v27  ;;  %21197 = vmatpush3.bf16.msra.mxu0 %v23090_v1  ;;  %v5235_v25 = vsel %vm24807_vm12, %v19022_v17, %v5234_v4  ;;  %v19674_v39 = vrot.slane %v12175_v0, 9  ;;  %v12285_v43 = vrot.slane %v23304_v2, 5  ;;  %v23305_v8 = vld [vmem:[#allocation2 + $0x8c] sm:$0x1]  ;;  %v12178_v6 = vld [vmem:[#allocation2 + $0x98] sm:$0xe] }
 0x2cc   : > { %v19711_v15 = vcombine.low %v12278_v11, %v12282_v12  ;;  %21198 = vmatprep.subr.bf16.mxu0 %v23091_v37  ;;  %21165 = vmatmul.mubr.msk.bf16.gmra.mrb[36].mxu0 %vm2811_vm5, %v19057_v7  ;;  %v5239_v14 = vsel %vm24807_vm12, %v19023_v40, %v5238_v16  ;;  %v19675_v1 = vrot.slane %v12176_v44, 9  ;;  %v12289_v61 = vrot.slane %v23305_v8, 5  ;;  %v23306_v38 = vld [vmem:[#allocation2 + $0x6c] sm:$0x1]  ;;  %v5116_v19 = vld [vmem:[#allocation2 + $0x78] sm:$0xe] }
 0x2cd   : > { %v19024_v34 = vrot.slane %v5114_v36, 9  ;;  %v19058_v3 = vcombine.low %v5235_v25, %v5239_v14  ;;  %v12286_v10 = vsel %vm24807_vm12, %v19674_v39, %v12285_v43  ;;  %v5242_v51 = vrot.slane %v23306_v38, 5  ;;  %v23307_v31 = vld [vmem:[#allocation2 + $0x74] sm:$0x1]  ;;  %v5117_v9 = vld [vmem:[#allocation2 + $0x80] sm:$0xe] }
 0x2ce   : > { %v19025_v33 = vrot.slane %v5115_v21, 9  ;;  %v12290_v29 = vsel %vm24807_vm12, %v19675_v1, %v12289_v61  ;;  %v5246_v41 = vrot.slane %v23307_v31, 5  ;;  %v19676_v57 = vrot.slane %v12177_v18, 9  ;;  %v23308_v54 = vld [vmem:[#allocation2 + $0x94] sm:$0x1] }
 0x2cf   : > { %v12293_v23 = vrot.slane %v23308_v54, 5  ;;  %21199 = vmatpush3.bf16.msra.mxu0 %v23091_v37  ;;  %21168 = vmatprep.mubr.msk.bf16.mxu0 %vm2811_vm5, %v19058_v3  ;;  %v19712_v36 = vcombine.low %v12286_v10, %v12290_v29  ;;  %v5243_v28 = vsel %vm24807_vm12, %v19024_v34, %v5242_v51  ;;  %v19677_v47 = vrot.slane %v12178_v6, 9  ;;  %v23309_v35 = vld [vmem:[#allocation2 + $0x9c] sm:$0x1]  ;;  %v12179_v0 = vld [vmem:[#allocation2 + $0xb0] sm:$0xe] }
 0x2d0   : > { %v12297_v27 = vrot.slane %v23309_v35, 5  ;;  %21232 = vmatprep.subr.bf16.mxu0 %v25564_v56  ;;  %v5247_v17 = vsel %vm24807_vm12, %v19025_v33, %v5246_v41  ;;  %v19026_v59 = vrot.slane %v5116_v19, 9  ;;  %v23310_v4 = vld [vmem:[#allocation2 + $0x7c] sm:$0x1]  ;;  %v12180_v44 = vld [vmem:[#allocation2 + $0xb8] sm:$0xe] }
 0x2d1   : > { %v25584_v37 = vsel %vm24807_vm12, %v19676_v57, %v12293_v23  ;;  %v5250_v40 = vrot.slane %v23310_v4, 5  ;;  %v5118_v7 = vld [vmem:[#allocation2 + $0x88] sm:$0xe]  ;;  %v19059_v11 = vcombine.low %v5243_v28, %v5247_v17  ;;  %v19027_v22 = vrot.slane %v5117_v9, 9  ;;  %v23311_v16 = vld [vmem:[#allocation2 + $0x84] sm:$0x1] }
 0x2d2   : > { %21641 = vmatmul.mubr.msk.bf16.vlgmr.msra.gmra.mrb[20].mxu1 %vm2811_vm5, %v19711_v15  ;;  %v12298_v12 = vsel %vm24807_vm12, %v19677_v47, %v12297_v27  ;;  %v5254_v21 = vrot.slane %v23311_v16, 5  ;;  %v5119_v25 = vld [vmem:[#allocation2 + $0x90] sm:$0xe]  ;;  %v19678_v43 = vrot.slane %v12179_v0, 9  ;;  %v23312_v18 = vld [vmem:[#allocation2 + $0xb4] sm:$0x1] }
 0x2d3   : > { %21673 = vmatpush3.bf16.msra.mxu1 %v25397_v62  ;;  %21644 = vmatprep.mubr.msk.bf16.mxu1 %vm2811_vm5, %v19712_v36  ;;  %v19713_v39 = vcombine.low %v25584_v37, %v12298_v12  ;;  %v5251_v2 = vsel %vm24807_vm12, %v19026_v59, %v5250_v40  ;;  %v12301_v15 = vrot.slane %v23312_v18, 5  ;;  %v12181_v14 = vld [vmem:[#allocation2 + $0xc0] sm:$0xe]  ;;  %v19679_v8 = vrot.slane %v12180_v44, 9  ;;  %v23313_v61 = vld [vmem:[#allocation2 + $0xbc] sm:$0x1] }
 0x2d4   : > { %v5255_v1 = vsel %vm24807_vm12, %v19027_v22, %v5254_v21  ;;  %v12305_v34 = vrot.slane %v23313_v61, 5  ;;  %21674 = vmatprep.subr.bf16.mxu1 %v23085_v46  ;;  %v19028_v6 = vrot.slane %v5118_v7, 9  ;;  %v12182_v62 = vld [vmem:[#allocation2 + $0xc8] sm:$0xe]  ;;  %v23086_v3 = vld [vmem:[%s27928_s6 + $0x250] sm:$0xff]   ;;  %21169 = vmatmul.mubr.msk.bf16.gmra.mrb[40].mxu0 %vm2811_vm5, %v19059_v11  ;;  %v19029_v19 = vrot.slane %v5119_v25, 9 }
 0x2d5   : > { %v19060_v10 = vcombine.low %v5251_v2, %v5255_v1  ;;  %v12302_v38 = vsel %vm24807_vm12, %v19678_v43, %v12301_v15  ;;  %v23314_v51 = vld [vmem:[#allocation2 + $0x8c] sm:$0x1]  ;;  %v5120_v29 = vld [vmem:[#allocation2 + $0xa8] sm:$0xe]  ;;  %v23315_v41 = vld [vmem:[#allocation2 + $0x94] sm:$0x1] }
 0x2d6   : > { %v5258_v33 = vrot.slane %v23314_v51, 5  ;;  %v12306_v31 = vsel %vm24807_vm12, %v19679_v8, %v12305_v34  ;;  %v5262_v57 = vrot.slane %v23315_v41, 5  ;;  %v19680_v54 = vrot.slane %v12181_v14, 9  ;;  %v23316_v23 = vld [vmem:[#allocation2 + $0xc4] sm:$0x1]  ;;  %v23089_v12 = vld [vmem:[%s27928_s6 + $0x258] sm:$0xff]  }
 0x2d7   : > { %v12309_v9 = vrot.slane %v23316_v23, 5  ;;  %v5121_v36 = vld [vmem:[#allocation2 + $0xb0] sm:$0xe]  ;;  %21172 = vmatprep.mubr.msk.bf16.mxu0 %vm2811_vm5, %v19060_v10  ;;  %v19714_v28 = vcombine.low %v12302_v38, %v12306_v31  ;;  %v19681_v35 = vrot.slane %v12182_v62, 9  ;;  %v23317_v27 = vld [vmem:[#allocation2 + $0xcc] sm:$0x1]  ;;  %21675 = vmatpush3.bf16.msra.mxu1 %v23085_v46 }
 0x2d8   : > { %v5259_v47 = vsel %vm24807_vm12, %v19028_v6, %v5258_v33  ;;  %v12313_v0 = vrot.slane %v23317_v27, 5  ;;  %v12183_v17 = vld [vmem:[#allocation2 + $0xd0] sm:$0xe]  ;;  %v5122_v37 = vld [vmem:[#allocation2 + $0xb8] sm:$0xe]  ;;  %v5263_v59 = vsel %vm24807_vm12, %v19029_v19, %v5262_v57  ;;  %v19030_v40 = vrot.slane %v5120_v29, 9  ;;  %21676 = vmatprep.subr.bf16.mxu1 %v23086_v3 }
 0x2d9   : > { %v25611_v4 = vsel %vm24807_vm12, %v19680_v54, %v12309_v9  ;;  %v23318_v44 = vld [vmem:[#allocation2 + $0xac] sm:$0x1]  ;;  %v12184_v11 = vld [vmem:[#allocation2 + $0xd8] sm:$0xe]  ;;  %v19061_v22 = vcombine.low %v5259_v47, %v5263_v59  ;;  %v19031_v16 = vrot.slane %v5121_v36, 9  ;;  %v19682_v15 = vrot.slane %v12183_v17, 9 }
 0x2da   : > { %v5266_v7 = vrot.slane %v23318_v44, 5  ;;  %v25618_v46 = vsel %vm24807_vm12, %v19681_v35, %v12313_v0  ;;  %v23319_v21 = vld [vmem:[#allocation2 + $0xb4] sm:$0x1]  ;;  %v5123_v2 = vld [vmem:[#allocation2 + $0xc0] sm:$0xe]  ;;  %21645 = vmatmul.mubr.msk.bf16.gmra.mrb[24].mxu1 %vm2811_vm5, %v19713_v39  ;;  %v19683_v34 = vrot.slane %v12184_v11, 9 }
 0x2db   : > { %v5270_v25 = vrot.slane %v23319_v21, 5  ;;  %v19715_v43 = vcombine.low %v25611_v4, %v25618_v46  ;;  %v23320_v14 = vld [vmem:[#allocation2 + $0xd4] sm:$0x1]  ;;  %v12185_v8 = vld [vmem:[#allocation2 + $0xe0] sm:$0xe]  ;;  %21648 = vmatprep.mubr.msk.bf16.mxu1 %vm2811_vm5, %v19714_v28  ;;  %v19032_v10 = vrot.slane %v5122_v37, 9  ;;  %21677 = vmatpush3.bf16.msra.mxu1 %v23086_v3 }
 0x2dc   : > { %v5267_v18 = vsel %vm24807_vm12, %v19030_v40, %v5266_v7  ;;  %v12317_v1 = vrot.slane %v23320_v14, 5  ;;  %v23321_v6 = vld [vmem:[#allocation2 + $0xdc] sm:$0x1]  ;;  %v12186_v39 = vld [vmem:[#allocation2 + $0xe8] sm:$0xe]  ;;  %v19033_v29 = vrot.slane %v5123_v2, 9  ;;  %21678 = vmatprep.subr.bf16.mxu1 %v23089_v12  ;;  %21173 = vmatmul.mubr.msk.bf16.gmra.mrb[44].mxu0 %vm2811_vm5, %v19061_v22 }
 0x2dd   : > { %v5271_v61 = vsel %vm24807_vm12, %v19031_v16, %v5270_v25  ;;  %v12321_v62 = vrot.slane %v23321_v6, 5  ;;  %v23322_v33 = vld [vmem:[#allocation2 + $0xbc] sm:$0x1]  ;;  %v5124_v31 = vld [vmem:[#allocation2 + $0xc8] sm:$0xe]  ;;  %v25633_v41 = vld [vmem:[%s27928_s6 + $0x260] sm:$0xff]  }
 0x2de   : > { %v19062_v38 = vcombine.low %v5267_v18, %v5271_v61  ;;  %v12318_v51 = vsel %vm24807_vm12, %v19682_v15, %v12317_v1  ;;  %v5274_v19 = vrot.slane %v23322_v33, 5  ;;  %v23323_v3 = vld [vmem:[#allocation2 + $0xc4] sm:$0x1]  ;;  %v19684_v23 = vrot.slane %v12185_v8, 9  ;;  %v5125_v28 = vld [vmem:[#allocation2 + $0xd0] sm:$0xe] }
 0x2df   : > { %v12322_v57 = vsel %vm24807_vm12, %v19683_v34, %v12321_v62  ;;  %v5278_v54 = vrot.slane %v23323_v3, 5  ;;  %v23324_v9 = vld [vmem:[#allocation2 + $0xe4] sm:$0x1]  ;;  %v19685_v27 = vrot.slane %v12186_v39, 9  ;;  %v23325_v0 = vld [vmem:[#allocation2 + $0xec] sm:$0x1]  ;;  %21679 = vmatpush3.bf16.msra.mxu1 %v23089_v12 }
 0x2e0   : > { %v12325_v36 = vrot.slane %v23324_v9, 5  ;;  %21176 = vmatprep.mubr.msk.bf16.mxu0 %vm2811_vm5, %v19062_v38  ;;  %v19716_v47 = vcombine.low %v12318_v51, %v12322_v57  ;;  %v5275_v35 = vsel %vm24807_vm12, %v19032_v10, %v5274_v19  ;;  %v12329_v17 = vrot.slane %v23325_v0, 5  ;;  %v12187_v37 = vld [vmem:[#allocation2 + $0x100] sm:$0xe]  ;;  %v23326_v44 = vld [vmem:[#allocation2 + $0xcc] sm:$0x1]  ;;  %21712 = vmatprep.subr.bf16.mxu1 %v25633_v41 }
 0x2e1   : > { %v5279_v59 = vsel %vm24807_vm12, %v19033_v29, %v5278_v54  ;;  %v19034_v40 = vrot.slane %v5124_v31, 9  ;;  %v5282_v7 = vrot.slane %v23326_v44, 5  ;;  %v12188_v11 = vld [vmem:[#allocation2 + $0x108] sm:$0xe]  ;;  %v5126_v22 = vld [vmem:[#allocation2 + $0xd8] sm:$0xe] }
 0x2e2   : > { %v25645_v4 = vsel %vm24807_vm12, %v19684_v23, %v12325_v36  ;;  %v19063_v46 = vcombine.low %v5275_v35, %v5279_v59  ;;  %v25649_v16 = vsel %vm24807_vm12, %v19685_v27, %v12329_v17  ;;  %v19035_v21 = vrot.slane %v5125_v28, 9  ;;  %v23327_v25 = vld [vmem:[#allocation2 + $0xd4] sm:$0x1]  ;;  %v5127_v18 = vld [vmem:[#allocation2 + $0xe0] sm:$0xe]  ;;  %21649 = vmatmul.mubr.msk.bf16.gmra.mrb[28].mxu1 %vm2811_vm5, %v19715_v43 }
 0x2e3   : > { %v5286_v2 = vrot.slane %v23327_v25, 5  ;;  %v19717_v15 = vcombine.low %v25645_v4, %v25649_v16  ;;  %v5283_v14 = vsel %vm24807_vm12, %v19034_v40, %v5282_v7  ;;  %v19686_v1 = vrot.slane %v12187_v37, 9  ;;  %v23328_v8 = vld [vmem:[#allocation2 + $0x104] sm:$0x1]  ;;  %v12189_v61 = vld [vmem:[#allocation2 + $0x110] sm:$0xe]  ;;  %21652 = vmatprep.mubr.msk.bf16.mxu1 %vm2811_vm5, %v19716_v47 }
 0x2e4   : > { %v12333_v12 = vrot.slane %v23328_v8, 5  ;;  %v19687_v6 = vrot.slane %v12188_v11, 9  ;;  %v23329_v62 = vld [vmem:[#allocation2 + $0x10c] sm:$0x1]  ;;  %v19036_v39 = vrot.slane %v5126_v22, 9  ;;  %v19037_v31 = vrot.slane %v5127_v18, 9  ;;  %21177 = vmatmul.mubr.msk.bf16.gmra.mrb[48].mxu0 %vm2811_vm5, %v19063_v46 }
 0x2e5   : > { %v5287_v34 = vsel %vm24807_vm12, %v19035_v21, %v5286_v2  ;;  %v12337_v10 = vrot.slane %v23329_v62, 5  ;;  %v12190_v38 = vld [vmem:[#allocation2 + $0x118] sm:$0xe]  ;;  %v23330_v19 = vld [vmem:[#allocation2 + $0xdc] sm:$0x1]  ;;  %v19688_v23 = vrot.slane %v12189_v61, 9 }
 0x2e6   : > { %v19064_v51 = vcombine.low %v5283_v14, %v5287_v34  ;;  %v12334_v33 = vsel %vm24807_vm12, %v19686_v1, %v12333_v12  ;;  %v5290_v29 = vrot.slane %v23330_v19, 5  ;;  %v5128_v57 = vld [vmem:[#allocation2 + $0xf8] sm:$0xe]  ;;  %v23331_v3 = vld [vmem:[#allocation2 + $0xe4] sm:$0x1]  ;;  %v19689_v27 = vrot.slane %v12190_v38, 9 }
 0x2e7   : > { %v12338_v43 = vsel %vm24807_vm12, %v19687_v6, %v12337_v10  ;;  %v5294_v54 = vrot.slane %v23331_v3, 5  ;;  %v23332_v9 = vld [vmem:[#allocation2 + $0x114] sm:$0x1]  ;;  %v5129_v28 = vld [vmem:[#allocation2 + $0x100] sm:$0xe]  ;;  %v19038_v40 = vrot.slane %v5128_v57, 9 }
 0x2e8   : > { %v12341_v36 = vrot.slane %v23332_v9, 5  ;;  %v19718_v47 = vcombine.low %v12334_v33, %v12338_v43  ;;  %v5291_v35 = vsel %vm24807_vm12, %v19036_v39, %v5290_v29  ;;  %v23333_v0 = vld [vmem:[#allocation2 + $0x11c] sm:$0x1]  ;;  %v12191_v37 = vld [vmem:[#allocation2 + $0x120] sm:$0xe]  ;;  %21180 = vmatprep.mubr.msk.bf16.mxu0 %vm2811_vm5, %v19064_v51  ;;  %v19039_v21 = vrot.slane %v5129_v28, 9 }
 0x2e9   : > { %v12345_v17 = vrot.slane %v23333_v0, 5  ;;  %v5295_v59 = vsel %vm24807_vm12, %v19037_v31, %v5294_v54  ;;  %v23334_v44 = vld [vmem:[#allocation2 + $0xfc] sm:$0x1]  ;;  %v12192_v11 = vld [vmem:[#allocation2 + $0x128] sm:$0xe]  ;;  %v19690_v8 = vrot.slane %v12191_v37, 9 }
 0x2ea   : > { %v25672_v4 = vsel %vm24807_vm12, %v19688_v23, %v12341_v36  ;;  %v5298_v7 = vrot.slane %v23334_v44, 5  ;;  %v5130_v22 = vld [vmem:[#allocation2 + $0x108] sm:$0xe]  ;;  %v19065_v46 = vcombine.low %v5291_v35, %v5295_v59  ;;  %v23335_v25 = vld [vmem:[#allocation2 + $0x104] sm:$0x1]  ;;  %v19691_v62 = vrot.slane %v12192_v11, 9  ;;  %21653 = vmatmul.mubr.msk.bf16.gmra.mrb[0].mxu1 %vm2811_vm5, %v19717_v15 }
 0x2eb   : > { %v25676_v16 = vsel %vm24807_vm12, %v19689_v27, %v12345_v17  ;;  %v5302_v2 = vrot.slane %v23335_v25, 5  ;;  %v5131_v18 = vld [vmem:[#allocation2 + $0x110] sm:$0xe]  ;;  %v23336_v12 = vld [vmem:[#allocation2 + $0x124] sm:$0x1]  ;;  %v19040_v38 = vrot.slane %v5130_v22, 9  ;;  %21656 = vmatprep.mubr.msk.bf16.mxu1 %vm2811_vm5, %v19718_v47 }
 0x2ec   : > { %v19719_v14 = vcombine.low %v25672_v4, %v25676_v16  ;;  %v5299_v1 = vsel %vm24807_vm12, %v19038_v40, %v5298_v7  ;;  %v12349_v61 = vrot.slane %v23336_v12, 5  ;;  %v12193_v34 = vld [vmem:[#allocation2 + $0x130] sm:$0xe]  ;;  %v23337_v10 = vld [vmem:[#allocation2 + $0x12c] sm:$0x1]  ;;  %v5306_v29 = vrot.slane %v25403_v58, 5  ;;  %21181 = vmatmul.mubr.msk.bf16.gmra.mrb[52].mxu0 %vm2811_vm5, %v19065_v46 }
 0x2ed   : > { %v5303_v6 = vsel %vm24807_vm12, %v19039_v21, %v5302_v2  ;;  %v12353_v39 = vrot.slane %v23337_v10, 5  ;;  %v12194_v51 = vld [vmem:[#allocation2 + $0x138] sm:$0xe]  ;;  %v19041_v31 = vrot.slane %v5131_v18, 9  ;;  %v5310_v3 = vrot.slane %v25420_v49, 5 }
 0x2ee   : > { %v19066_v33 = vcombine.low %v5299_v1, %v5303_v6  ;;  %v12350_v19 = vsel %vm24807_vm12, %v19690_v8, %v12349_v61  ;;  %v5132_v57 = vld [vmem:[#allocation2 + $0x118] sm:$0xe]  ;;  %v19692_v54 = vrot.slane %v12193_v34, 9  ;;  %v12357_v23 = vrot.slane %v25423_v45, 5  ;;  %v5133_v9 = vld [vmem:[#allocation2 + $0x120] sm:$0xe] }
 0x2ef   : > { %v12354_v43 = vsel %vm24807_vm12, %v19691_v62, %v12353_v39  ;;  %v5307_v36 = vsel %vm24807_vm12, %v19040_v38, %v5306_v29  ;;  %v19693_v28 = vrot.slane %v12194_v51, 9  ;;  %v12361_v58 = vrot.slane %v25443_v32, 5  ;;  %v12195_v35 = vld [vmem:[#allocation2 + $0x150] sm:$0xe]  ;;  %v12196_v0 = vld [vmem:[#allocation2 + $0x158] sm:$0xe] }
 0x2f0   : > { %v19720_v15 = vcombine.low %v12350_v19, %v12354_v43  ;;  %v5311_v47 = vsel %vm24807_vm12, %v19041_v31, %v5310_v3  ;;  %v25701_v49 = vsel %vm24807_vm12, %v19692_v54, %v12357_v23  ;;  %v19042_v27 = vrot.slane %v5132_v57, 9  ;;  %v5134_v17 = vld [vmem:[#allocation2 + $0x128] sm:$0xe]  ;;  %21184 = vmatprep.mubr.msk.bf16.mxu0 %vm2811_vm5, %v19066_v33  ;;  %v5135_v40 = vld [vmem:[#allocation2 + $0x130] sm:$0xe] }
 0x2f1   : > { %v5314_v45 = vrot.slane %v25437_v42, 5  ;;  %v19067_v37 = vcombine.low %v5307_v36, %v5311_v47  ;;  %v25707_v32 = vsel %vm24807_vm12, %v19693_v28, %v12361_v58  ;;  %v19043_v59 = vrot.slane %v5133_v9, 9  ;;  %v12197_v44 = vld [vmem:[#allocation2 + $0x160] sm:$0xe]  ;;  %v12198_v46 = vld [vmem:[#allocation2 + $0x168] sm:$0xe] }
 0x2f2   : > { %v5318_v4 = vrot.slane %v25446_v50, 5  ;;  %v19721_v7 = vcombine.low %v25701_v49, %v25707_v32  ;;  %v19694_v11 = vrot.slane %v12195_v35, 9  ;;  %v12365_v22 = vrot.slane %v25453_v30, 5  ;;  %v12199_v16 = vld [vmem:[#allocation2 + $0x170] sm:$0xe]  ;;  %21657 = vmatmul.mubr.msk.bf16.gmra.mrb[4].mxu1 %vm2811_vm5, %v19719_v14 }
 0x2f3   : > { %v5315_v42 = vsel %vm24807_vm12, %v19042_v27, %v5314_v45  ;;  %v19695_v25 = vrot.slane %v12196_v0, 9  ;;  %v12369_v2 = vrot.slane %v25458_v63, 5  ;;  %v19044_v50 = vrot.slane %v5134_v17, 9  ;;  %v12200_v18 = vld [vmem:[#allocation2 + $0x178] sm:$0xe]  ;;  %21660 = vmatprep.mubr.msk.bf16.mxu1 %vm2811_vm5, %v19720_v15 }
 0x2f4   : > { %v5319_v21 = vsel %vm24807_vm12, %v19043_v59, %v5318_v4  ;;  %v12366_v8 = vsel %vm24807_vm12, %v19694_v11, %v12365_v22  ;;  %v5322_v12 = vrot.slane %v25461_v13, 5  ;;  %v19045_v61 = vrot.slane %v5135_v40, 9  ;;  %v12201_v34 = vld [vmem:[#allocation2 + $0x180] sm:$0xe]  ;;  %v12202_v10 = vld [vmem:[#allocation2 + $0x188] sm:$0xe]  ;;  %21185 = vmatmul.mubr.msk.bf16.gmra.mrb[56].mxu0 %vm2811_vm5, %v19067_v37 }
 0x2f5   : > { %v19068_v1 = vcombine.low %v5315_v42, %v5319_v21  ;;  %v12370_v30 = vsel %vm24807_vm12, %v19695_v25, %v12369_v2  ;;  %v5326_v6 = vrot.slane %v25470_v60, 5  ;;  %v19696_v62 = vrot.slane %v12197_v44, 9  ;;  %v6037_v33 = vld [vmem:[#allocation2 + $0x10] sm:$0xf]  ;;  %v6038_v14 = vld [vmem:[#allocation2 + $0x14] sm:$0x1] }
 0x2f6   : > { %v12373_v63 = vrot.slane %v25474_v26, 5  ;;  %v19722_v39 = vcombine.low %v12366_v8, %v12370_v30  ;;  %v5323_v38 = vsel %vm24807_vm12, %v19044_v50, %v5322_v12  ;;  %v19697_v13 = vrot.slane %v12198_v46, 9  ;;  %v6039_v31 = vld [vmem:[#allocation2 + $0x18] sm:$0xf]  ;;  %v6041_v45 = vld [vmem:[#allocation2 + $0x20] sm:$0xf] }
 0x2f7   : > { %v12377_v51 = vrot.slane %v25481_v53, 5  ;;  %v5327_v19 = vsel %vm24807_vm12, %v19045_v61, %v5326_v6  ;;  %v19698_v26 = vrot.slane %v12199_v16, 9  ;;  %v12381_v29 = vrot.slane %v25487_v55, 5  ;;  %21188 = vmatprep.mubr.msk.bf16.mxu0 %vm2811_vm5, %v19068_v1  ;;  %v6043_v32 = vld [vmem:[#allocation2 + $0x28] sm:$0xf] }
 0x2f8   : > { %v25734_v60 = vsel %vm24807_vm12, %v19696_v62, %v12373_v63  ;;  %v19069_v57 = vcombine.low %v5323_v38, %v5327_v19  ;;  %v19699_v53 = vrot.slane %v12200_v18, 9  ;;  %v12385_v3 = vrot.slane %v25493_v5, 5  ;;  %v6040_v5 = vld [vmem:[#allocation2 + $0x1c] sm:$0x1]  ;;  %v23092_v59 = vld [vmem:[#allocation2 + $0x10] ss:$8 sps:$4 sm:$0xff]  }
 0x2f9   : > { %v25740_v43 = vsel %vm24807_vm12, %v19697_v13, %v12377_v51  ;;  %v25748_v23 = vsel %vm24807_vm12, %v19698_v26, %v12381_v29  ;;  %v19700_v55 = vrot.slane %v12201_v34, 9  ;;  %v12389_v9 = vrot.slane %v25506_v20, 5  ;;  %v6042_v20 = vld [vmem:[#allocation2 + $0x24] sm:$0x1]  ;;  %v6044_v46 = vld [vmem:[#allocation2 + $0x2c] sm:$0x1] }
 0x2fa   : > { %v19723_v54 = vcombine.low %v25734_v60, %v25740_v43  ;;  %v25753_v15 = vsel %vm24807_vm12, %v19699_v53, %v12385_v3  ;;  %v19701_v36 = vrot.slane %v12202_v10, 9  ;;  %v12393_v28 = vrot.slane %v25524_v52, 5  ;;  %21661 = vmatmul.mubr.msk.bf16.gmra.mrb[8].mxu1 %vm2811_vm5, %v19721_v7  ;;  %v13104_v1 = vld [vmem:[#allocation2 + $0xa0] sm:$0xf]  ;;  %v13105_v34 = vld [vmem:[#allocation2 + $0xa4] sm:$0x1] }
 0x2fb   : > { %v6102_v58 = vshrl.u32 %v6037_v33, 16  ;;  %v19724_v35 = vcombine.low %v25748_v23, %v25753_v15  ;;  %v25760_v47 = vsel %vm24807_vm12, %v19700_v55, %v12389_v9  ;;  %v6105_v49 = vshll.u32 %v6037_v33, 16  ;;  %21664 = vmatprep.mubr.msk.bf16.mxu1 %vm2811_vm5, %v19722_v39  ;;  %v13106_v30 = vld [vmem:[#allocation2 + $0xa8] sm:$0xf]  ;;  %v13107_v29 = vld [vmem:[#allocation2 + $0xac] sm:$0x1] }
 0x2fc   : > { %v6111_v27 = vshll.u32 %v6038_v14, 16  ;;  %v25764_v0 = vsel %vm24807_vm12, %v19701_v36, %v12393_v28  ;;  %v6116_v37 = vshrl.u32 %v6039_v31, 16  ;;  %v6119_v52 = vshll.u32 %v6039_v31, 16  ;;  %21189 = vmatmul.mubr.msk.bf16.gmra.mrb[60].mxu0 %vm2811_vm5, %v19069_v57  ;;  %v23093_v39 = vld [vmem:[#allocation2 + $0x20] ss:$8 sps:$4 sm:$0xff]  }
 0x2fd   : > { %v6104_v17 = vrot.slane %v6102_v58, 4  ;;  %v19725_v4 = vcombine.low %v25760_v47, %v25764_v0  ;;  %v6107_v40 = vrot.slane %v6105_v49, 5  ;;  %v6125_v42 = vshll.u32 %v6040_v5, 16  ;;  %21200 = vmatprep.mubr.msk.bf16.mxu0 %vm2811_vm5, %v23092_v59  ;;  %v23095_v14 = vld [vmem:[#allocation2 + $0x30] ss:$8 sps:$4 sm:$0xff]  }
 0x2fe   : > { %v6113_v44 = vrot.slane %v6111_v27, 5  ;;  %v6118_v11 = vrot.slane %v6116_v37, 4  ;;  %v6121_v22 = vrot.slane %v6119_v52, 5  ;;  %v6130_v16 = vshrl.u32 %v6041_v45, 16  ;;  %v6045_v36 = vld [vmem:[#allocation2 + $0x30] sm:$0xf] }
 0x2ff   : > { %v6133_v21 = vshll.u32 %v6041_v45, 16  ;;  %v6108_v25 = vor.u32 %v6107_v40, %v6104_v17  ;;  %v6127_v2 = vrot.slane %v6125_v42, 5  ;;  %v6139_v50 = vshll.u32 %v6042_v20, 16  ;;  %v6046_v28 = vld [vmem:[#allocation2 + $0x34] sm:$0x1]  ;;  %v23123_v20 = vld [vmem:[%s27928_s6 + $0xe8] sm:$0xff]  }
 0x300   : > { %v6144_v18 = vshrl.u32 %v6043_v32, 16  ;;  %v6122_v7 = vor.u32 %v6121_v22, %v6118_v11  ;;  %v6132_v8 = vrot.slane %v6130_v16, 4  ;;  %v6147_v61 = vshll.u32 %v6043_v32, 16  ;;  %v6047_v45 = vld [vmem:[#allocation2 + $0x38] sm:$0xf] }
 0x301   : > { %v6135_v12 = vrot.slane %v6133_v21, 5  ;;  %v6109_v6 = vrot.slane %v6108_v25, 4  ;;  %v6141_v62 = vrot.slane %v6139_v50, 5  ;;  %v6153_v10 = vshll.u32 %v6044_v46, 16  ;;  %v6048_v37 = vld [vmem:[#allocation2 + $0x3c] sm:$0x1] }
 0x302   : > { %v6146_v63 = vrot.slane %v6144_v18, 4  ;;  %v6123_v38 = vrot.slane %v6122_v7, 4  ;;  %v6149_v51 = vrot.slane %v6147_v61, 5  ;;  %v13169_v33 = vshrl.u32 %v13104_v1, 16  ;;  %21665 = vmatmul.mubr.msk.bf16.gmra.mrb[12].mxu1 %vm2811_vm5, %v19723_v54  ;;  %v6049_v52 = vld [vmem:[#allocation2 + $0x40] sm:$0xf] }
 0x303   : > { %v6136_v13 = vor.u32 %v6135_v12, %v6132_v8  ;;  %v6114_v19 = vsel %vm23998_vm4, %v6109_v6, %v6113_v44  ;;  %v6155_v26 = vrot.slane %v6153_v10, 5  ;;  %v13172_v31 = vshll.u32 %v13104_v1, 16  ;;  %21668 = vmatprep.mubr.msk.bf16.mxu1 %vm2811_vm5, %v19724_v35  ;;  %v6050_v11 = vld [vmem:[#allocation2 + $0x44] sm:$0x1]  ;;  %v23094_v25 = vld [vmem:[#allocation2 + $0xa0] ss:$8 sps:$4 sm:$0xff]  }
 0x304   : > { %v13178_v57 = vshll.u32 %v13105_v34, 16  ;;  %v6128_v53 = vsel %vm23998_vm4, %v6123_v38, %v6127_v2  ;;  %v6150_v55 = vor.u32 %v6149_v51, %v6146_v63  ;;  %v13171_v9 = vrot.slane %v13169_v33, 4  ;;  %21201 = vmatmul.mubr.msk.bf16.vlgmr.msra.gmra.mrb[32].mxu0 %vm2811_vm5, %v23093_v39  ;;  %v23097_v2 = vld [vmem:[#allocation2 + $0x40] ss:$8 sps:$4 sm:$0xff]   ;;  %v23127_v50 = vld [vmem:[%s27928_s6 + $0xf0] sm:$0xff]  }
 0x305   : > { %v6137_v3 = vrot.slane %v6136_v13, 4  ;;  %v25780_v5 = vcombine.low %v6114_v19, %v6128_v53  ;;  %v13174_v58 = vrot.slane %v13172_v31, 5  ;;  %v13183_v27 = vshrl.u32 %v13106_v30, 16  ;;  %21204 = vmatprep.mubr.msk.bf16.mxu0 %vm2811_vm5, %v23095_v14  ;;  %21233 = vmatpush3.bf16.msra.mxu0 %v25564_v56  ;;  %v6051_v34 = vld [vmem:[#allocation2 + $0x48] sm:$0xf]  ;;  %v23129_v19 = vld [vmem:[%s27928_s6 + $0xf8] sm:$0xff]  }
 0x306   : > { %v13180_v49 = vrot.slane %v13178_v57, 5  ;;  %v6151_v43 = vrot.slane %v6150_v55, 4  ;;  %v13186_v54 = vshll.u32 %v13106_v30, 16  ;;  %v13192_v17 = vshll.u32 %v13107_v29, 16  ;;  %21234 = vmatprep.subr.bf16.mxu0 %v23123_v20  ;;  %v13108_v39 = vld [vmem:[#allocation2 + $0xb0] sm:$0xf] }
 0x307   : > { %v6142_v60 = vsel %vm23998_vm4, %v6137_v3, %v6141_v62  ;;  %v13175_v32 = vor.u32 %v13174_v58, %v13171_v9  ;;  %v13185_v59 = vrot.slane %v13183_v27, 4  ;;  %v6158_v40 = vshrl.u32 %v6045_v36, 16  ;;  %v6052_v51 = vld [vmem:[#allocation2 + $0x4c] sm:$0x1]  ;;  %v23099_v31 = vld [vmem:[#allocation2 + $0x60] ss:$8 sps:$4 sm:$0xff]  }
 0x308   : > { %v6161_v44 = vshll.u32 %v6045_v36, 16  ;;  %v6156_v23 = vsel %vm23998_vm4, %v6151_v43, %v6155_v26  ;;  %v13188_v15 = vrot.slane %v13186_v54, 5  ;;  %v13194_v35 = vrot.slane %v13192_v17, 5  ;;  %v13110_v9 = vld [vmem:[#allocation2 + $0xb8] sm:$0xf] }
 0x309   : > { %v6167_v42 = vshll.u32 %v6046_v28, 16  ;;  %v25796_v22 = vcombine.low %v6142_v60, %v6156_v23  ;;  %v13176_v46 = vrot.slane %v13175_v32, 4  ;;  %v6160_v16 = vrot.slane %v6158_v40, 4  ;;  %21235 = vmatpush3.bf16.msra.mxu0 %v23123_v20  ;;  %v13111_v27 = vld [vmem:[#allocation2 + $0xbc] sm:$0x1] }
 0x30a   : > { %v6163_v21 = vrot.slane %v6161_v44, 5  ;;  %v13189_v18 = vor.u32 %v13188_v15, %v13185_v59  ;;  %v6172_v7 = vshrl.u32 %v6047_v45, 16  ;;  %v6175_v8 = vshll.u32 %v6047_v45, 16  ;;  %21669 = vmatmul.mubr.msk.bf16.gmra.mrb[16].mxu1 %vm2811_vm5, %v19725_v4  ;;  %21236 = vmatprep.subr.bf16.mxu0 %v23127_v50  ;;  %v13109_v4 = vld [vmem:[#allocation2 + $0xb4] sm:$0x1]  ;;  %v23105_v44 = vld [vmem:[%s27928_s6 + $0x268] sm:$0xff]  }
 0x30b   : > { %v6169_v1 = vrot.slane %v6167_v42, 5  ;;  %v13181_v12 = vsel %vm23998_vm4, %v13176_v46, %v13180_v49  ;;  %v6181_v61 = vshll.u32 %v6048_v37, 16  ;;  %v6186_v30 = vshrl.u32 %v6049_v52, 16  ;;  %21680 = vmatprep.mubr.msk.bf16.mxu1 %vm2811_vm5, %v23094_v25  ;;  %v23098_v45 = vld [vmem:[#allocation2 + $0xb0] ss:$8 sps:$4 sm:$0xff]   ;;  %v25829_v46 = vld [vmem:[%s27928_s6 + $0x100] sm:$0xff]  }
 0x30c   : > { %v6164_v56 = vor.u32 %v6163_v21, %v6160_v16  ;;  %v13190_v6 = vrot.slane %v13189_v18, 4  ;;  %v6174_v62 = vrot.slane %v6172_v7, 4  ;;  %v6177_v63 = vrot.slane %v6175_v8, 5  ;;  %21205 = vmatmul.mubr.msk.bf16.gmra.mrb[36].mxu0 %vm2811_vm5, %v23097_v2  ;;  %v6053_v17 = vld [vmem:[#allocation2 + $0x60] sm:$0xf] }
 0x30d   : > { %v6189_v10 = vshll.u32 %v6049_v52, 16  ;;  %v6183_v13 = vrot.slane %v6181_v61, 5  ;;  %v6188_v33 = vrot.slane %v6186_v30, 4  ;;  %v6195_v14 = vshll.u32 %v6050_v11, 16  ;;  %21208 = vmatprep.mubr.msk.bf16.mxu0 %vm2811_vm5, %v23099_v31  ;;  %21237 = vmatpush3.bf16.msra.mxu0 %v23127_v50  ;;  %v6054_v40 = vld [vmem:[#allocation2 + $0x64] sm:$0x1] }
 0x30e   : > { %v6165_v38 = vrot.slane %v6164_v56, 4  ;;  %v13195_v26 = vsel %vm23998_vm4, %v13190_v6, %v13194_v35  ;;  %v6178_v29 = vor.u32 %v6177_v63, %v6174_v62  ;;  %v6200_v0 = vshrl.u32 %v6051_v34, 16  ;;  %21238 = vmatprep.subr.bf16.mxu0 %v23129_v19  ;;  %v6055_v11 = vld [vmem:[#allocation2 + $0x68] sm:$0xf]  ;;  %v23101_v21 = vld [vmem:[#allocation2 + $0x70] ss:$8 sps:$4 sm:$0xff]  }
 0x30f   : > { %v6191_v47 = vrot.slane %v6189_v10, 5  ;;  %v25813_v57 = vcombine.low %v13181_v12, %v13195_v26  ;;  %v6197_v3 = vrot.slane %v6195_v14, 5  ;;  %v6203_v55 = vshll.u32 %v6051_v34, 16  ;;  %v23100_v16 = vld [vmem:[#allocation2 + $0xc0] ss:$8 sps:$4 sm:$0xff]   ;;  %v23114_v63 = vld [vmem:[%s27928_s6 + $0x270] sm:$0xff]  }
 0x310   : > { %v6170_v53 = vsel %vm23998_vm4, %v6165_v38, %v6169_v1  ;;  %v6179_v36 = vrot.slane %v6178_v29, 4  ;;  %v6202_v58 = vrot.slane %v6200_v0, 4  ;;  %v6209_v49 = vshll.u32 %v6052_v51, 16  ;;  %v23103_v1 = vld [vmem:[#allocation2 + $0x80] ss:$8 sps:$4 sm:$0xff]  }
 0x311   : > { %v6192_v28 = vor.u32 %v6191_v47, %v6188_v33  ;;  %v6205_v20 = vrot.slane %v6203_v55, 5  ;;  %v13197_v60 = vshrl.u32 %v13108_v39, 16  ;;  %v13200_v43 = vshll.u32 %v13108_v39, 16  ;;  %21239 = vmatpush3.bf16.msra.mxu0 %v23129_v19  ;;  %v6056_v34 = vld [vmem:[#allocation2 + $0x6c] sm:$0x1] }
 0x312   : > { %v13206_v54 = vshll.u32 %v13109_v4, 16  ;;  %v6184_v37 = vsel %vm23998_vm4, %v6179_v36, %v6183_v13  ;;  %v6211_v32 = vrot.slane %v6209_v49, 5  ;;  %v13211_v59 = vshrl.u32 %v13110_v9, 16  ;;  %21681 = vmatmul.mubr.msk.bf16.vlgmr.msra.gmra.mrb[20].mxu1 %vm2811_vm5, %v23098_v45  ;;  %v13112_v51 = vld [vmem:[#allocation2 + $0xc0] sm:$0xf]  ;;  %21272 = vmatprep.subr.bf16.mxu0 %v25829_v46 }
 0x313   : > { %v6193_v52 = vrot.slane %v6192_v28, 4  ;;  %v25824_v23 = vcombine.low %v6170_v53, %v6184_v37  ;;  %v6206_v15 = vor.u32 %v6205_v20, %v6202_v58  ;;  %v13199_v35 = vrot.slane %v13197_v60, 4  ;;  %21713 = vmatpush3.bf16.msra.mxu1 %v25633_v41  ;;  %21684 = vmatprep.mubr.msk.bf16.mxu1 %vm2811_vm5, %v23100_v16  ;;  %v13113_v26 = vld [vmem:[#allocation2 + $0xc4] sm:$0x1]  ;;  %v13114_v29 = vld [vmem:[#allocation2 + $0xc8] sm:$0xf] }
 0x314   : > { %v13202_v42 = vrot.slane %v13200_v43, 5  ;;  %v13208_v2 = vrot.slane %v13206_v54, 5  ;;  %v13213_v50 = vrot.slane %v13211_v59, 4  ;;  %v13214_v18 = vshll.u32 %v13110_v9, 16  ;;  %21714 = vmatprep.subr.bf16.mxu1 %v23105_v44  ;;  %21209 = vmatmul.mubr.msk.bf16.gmra.mrb[40].mxu0 %vm2811_vm5, %v23101_v21  ;;  %v23102_v47 = vld [vmem:[#allocation2 + $0xd0] ss:$8 sps:$4 sm:$0xff]  }
 0x315   : > { %v6198_v25 = vsel %vm23998_vm4, %v6193_v52, %v6197_v3  ;;  %v6207_v7 = vrot.slane %v6206_v15, 4  ;;  %v13220_v12 = vshll.u32 %v13111_v27, 16  ;;  %v6214_v56 = vshrl.u32 %v6053_v17, 16  ;;  %21212 = vmatprep.mubr.msk.bf16.mxu0 %vm2811_vm5, %v23103_v1  ;;  %v13115_v3 = vld [vmem:[#allocation2 + $0xcc] sm:$0x1]  ;;  %v23125_v27 = vld [vmem:[%s27928_s6 + $0x278] sm:$0xff]  }
 0x316   : > { %v13203_v8 = vor.u32 %v13202_v42, %v13199_v35  ;;  %v13216_v61 = vrot.slane %v13214_v18, 5  ;;  %v6217_v30 = vshll.u32 %v6053_v17, 16  ;;  %v6223_v6 = vshll.u32 %v6054_v40, 16  ;;  %v23104_v55 = vld [vmem:[#allocation2 + $0xf0] ss:$8 sps:$4 sm:$0xff]   ;;  %v25865_v1 = vld [vmem:[%s27928_s6 + $0x280] sm:$0xff]  }
 0x317   : > { %v6228_v62 = vshrl.u32 %v6055_v11, 16  ;;  %v6212_v10 = vsel %vm23998_vm4, %v6207_v7, %v6211_v32  ;;  %v13222_v38 = vrot.slane %v13220_v12, 5  ;;  %v6216_v13 = vrot.slane %v6214_v56, 4  ;;  %21715 = vmatpush3.bf16.msra.mxu1 %v23105_v44  ;;  %v6057_v49 = vld [vmem:[#allocation2 + $0x70] sm:$0xf] }
 0x318   : > { %v13204_v39 = vrot.slane %v13203_v8, 4  ;;  %v25843_v41 = vcombine.low %v6198_v25, %v6212_v10  ;;  %v13217_v33 = vor.u32 %v13216_v61, %v13213_v50  ;;  %v6219_v14 = vrot.slane %v6217_v30, 5  ;;  %21716 = vmatprep.subr.bf16.mxu1 %v23114_v63  ;;  %v23106_v54 = vld [vmem:[#allocation2 + $0x90] ss:$8 sps:$4 sm:$0xff]   ;;  %v6058_v59 = vld [vmem:[#allocation2 + $0x74] sm:$0x1] }
 0x319   : > { %v25845_v19 = vrot.slane %v6223_v6, 5  ;;  %v6230_v4 = vrot.slane %v6228_v62, 4  ;;  %v6231_v31 = vshll.u32 %v6055_v11, 16  ;;  %v6237_v53 = vshll.u32 %v6056_v34, 16  ;;  %v23108_v40 = vld [vmem:[#allocation2 + $0xb0] ss:$8 sps:$4 sm:$0xff]  }
 0x31a   : > { %v13209_v0 = vsel %vm23998_vm4, %v13204_v39, %v13208_v2  ;;  %v13218_v9 = vrot.slane %v13217_v33, 4  ;;  %v6220_v36 = vor.u32 %v6219_v14, %v6216_v13  ;;  %v13225_v28 = vshrl.u32 %v13112_v51, 16  ;;  %21685 = vmatmul.mubr.msk.bf16.gmra.mrb[24].mxu1 %vm2811_vm5, %v23102_v47  ;;  %v6059_v11 = vld [vmem:[#allocation2 + $0x78] sm:$0xf]  ;;  %v6060_v50 = vld [vmem:[#allocation2 + $0x7c] sm:$0x1] }
 0x31b   : > { %v13228_v58 = vshll.u32 %v13112_v51, 16  ;;  %v6233_v45 = vrot.slane %v6231_v31, 5  ;;  %v6239_v20 = vrot.slane %v6237_v53, 5  ;;  %v13234_v60 = vshll.u32 %v13113_v26, 16  ;;  %21688 = vmatprep.mubr.msk.bf16.mxu1 %vm2811_vm5, %v23104_v55  ;;  %21717 = vmatpush3.bf16.msra.mxu1 %v23114_v63  ;;  %v13116_v18 = vld [vmem:[#allocation2 + $0xd0] sm:$0xf] }
 0x31c   : > { %v13239_v43 = vshrl.u32 %v13114_v29, 16  ;;  %v13223_v17 = vsel %vm23998_vm4, %v13218_v9, %v13222_v38  ;;  %v6221_v37 = vrot.slane %v6220_v36, 4  ;;  %v13227_v52 = vrot.slane %v13225_v28, 4  ;;  %21718 = vmatprep.subr.bf16.mxu1 %v23125_v27  ;;  %21213 = vmatmul.mubr.msk.bf16.gmra.mrb[44].mxu0 %vm2811_vm5, %v23106_v54  ;;  %v13117_v62 = vld [vmem:[#allocation2 + $0xd4] sm:$0x1] }
 0x31d   : > { %v13230_v32 = vrot.slane %v13228_v58, 5  ;;  %v25856_v44 = vcombine.low %v13209_v0, %v13223_v17  ;;  %v6234_v15 = vor.u32 %v6233_v45, %v6230_v4  ;;  %v13236_v35 = vrot.slane %v13234_v60, 5  ;;  %21216 = vmatprep.mubr.msk.bf16.mxu0 %vm2811_vm5, %v23108_v40  ;;  %v13118_v13 = vld [vmem:[#allocation2 + $0xd8] sm:$0xf]  ;;  %v23107_v51 = vld [vmem:[#allocation2 + $0x100] ss:$8 sps:$4 sm:$0xff]  }
 0x31e   : > { %v13241_v42 = vrot.slane %v13239_v43, 4  ;;  %v6226_v16 = vsel %vm23998_vm4, %v6221_v37, %v25845_v19  ;;  %v13242_v25 = vshll.u32 %v13114_v29, 16  ;;  %v13248_v2 = vshll.u32 %v13115_v3, 16  ;;  %v23109_v33 = vld [vmem:[#allocation2 + $0x110] ss:$8 sps:$4 sm:$0xff]  }
 0x31f   : > { %v13231_v21 = vor.u32 %v13230_v32, %v13227_v52  ;;  %v6235_v7 = vrot.slane %v6234_v15, 4  ;;  %v6242_v8 = vshrl.u32 %v6057_v49, 16  ;;  %v6245_v12 = vshll.u32 %v6057_v49, 16  ;;  %21719 = vmatpush3.bf16.msra.mxu1 %v23125_v27  ;;  %v13119_v31 = vld [vmem:[#allocation2 + $0xdc] sm:$0x1] }
 0x320   : > { %v6251_v56 = vshll.u32 %v6058_v59, 16  ;;  %v13244_v34 = vrot.slane %v13242_v25, 5  ;;  %v13250_v30 = vrot.slane %v13248_v2, 5  ;;  %v6256_v6 = vshrl.u32 %v6059_v11, 16  ;;  %21752 = vmatprep.subr.bf16.mxu1 %v25865_v1  ;;  %v6061_v3 = vld [vmem:[#allocation2 + $0x80] sm:$0xf] }
 0x321   : > { %v13232_v61 = vrot.slane %v13231_v21, 4  ;;  %v6240_v63 = vsel %vm23998_vm4, %v6235_v7, %v6239_v20  ;;  %v6244_v10 = vrot.slane %v6242_v8, 4  ;;  %v6247_v39 = vrot.slane %v6245_v12, 5  ;;  %v23110_v55 = vld [vmem:[#allocation2 + $0xc0] ss:$8 sps:$4 sm:$0xff]  }
 0x322   : > { %v25871_v38 = vrot.slane %v6251_v56, 5  ;;  %v25873_v14 = vcombine.low %v6226_v16, %v6240_v63  ;;  %v13245_v26 = vor.u32 %v13244_v34, %v13241_v42  ;;  %v6258_v29 = vrot.slane %v6256_v6, 4  ;;  %v6062_v49 = vld [vmem:[#allocation2 + $0x84] sm:$0x1]  ;;  %21689 = vmatmul.mubr.msk.bf16.gmra.mrb[28].mxu1 %vm2811_vm5, %v23107_v51  ;;  %v6063_v52 = vld [vmem:[#allocation2 + $0x88] sm:$0xf] }
 0x323   : > { %v13237_v19 = vsel %vm23998_vm4, %v13232_v61, %v13236_v35  ;;  %v6248_v47 = vor.u32 %v6247_v39, %v6244_v10  ;;  %v6259_v0 = vshll.u32 %v6059_v11, 16  ;;  %v6265_v4 = vshll.u32 %v6060_v50, 16  ;;  %21692 = vmatprep.mubr.msk.bf16.mxu1 %vm2811_vm5, %v23109_v33  ;;  %v23112_v32 = vld [vmem:[#allocation2 + $0xd0] ss:$8 sps:$4 sm:$0xff]   ;;  %v23111_v25 = vld [vmem:[#allocation2 + $0x120] ss:$8 sps:$4 sm:$0xff]  }
 0x324   : > { %v13253_v53 = vshrl.u32 %v13116_v18, 16  ;;  %v13246_v9 = vrot.slane %v13245_v26, 4  ;;  %v13256_v36 = vshll.u32 %v13116_v18, 16  ;;  %v13262_v28 = vshll.u32 %v13117_v62, 16  ;;  %21217 = vmatmul.mubr.msk.bf16.gmra.mrb[48].mxu0 %vm2811_vm5, %v23110_v55  ;;  %v6064_v18 = vld [vmem:[#allocation2 + $0x8c] sm:$0x1] }
 0x325   : > { %v13267_v58 = vshrl.u32 %v13118_v13, 16  ;;  %v6249_v27 = vrot.slane %v6248_v47, 4  ;;  %v6261_v45 = vrot.slane %v6259_v0, 5  ;;  %v6267_v20 = vrot.slane %v6265_v4, 5  ;;  %21220 = vmatprep.mubr.msk.bf16.mxu0 %vm2811_vm5, %v23112_v32  ;;  %v23113_v6 = vld [vmem:[#allocation2 + $0x140] ss:$8 sps:$4 sm:$0xff]  }
 0x326   : > { %v13255_v60 = vrot.slane %v13253_v53, 4  ;;  %v13251_v43 = vsel %vm23998_vm4, %v13246_v9, %v13250_v30  ;;  %v13258_v54 = vrot.slane %v13256_v36, 5  ;;  %v13264_v17 = vrot.slane %v13262_v28, 5  ;;  %v13120_v30 = vld [vmem:[#allocation2 + $0xf0] sm:$0xf] }
 0x327   : > { %v13269_v37 = vrot.slane %v13267_v58, 4  ;;  %v25882_v59 = vcombine.low %v13237_v19, %v13251_v43  ;;  %v6254_v40 = vsel %vm23998_vm4, %v6249_v27, %v25871_v38  ;;  %v6262_v15 = vor.u32 %v6261_v45, %v6258_v29  ;;  %v13122_v38 = vld [vmem:[#allocation2 + $0xf8] sm:$0xf]  ;;  %v13121_v29 = vld [vmem:[#allocation2 + $0xf4] sm:$0x1] }
 0x328   : > { %v13270_v35 = vshll.u32 %v13118_v13, 16  ;;  %v13259_v42 = vor.u32 %v13258_v54, %v13255_v60  ;;  %v13276_v11 = vshll.u32 %v13119_v31, 16  ;;  %v6270_v16 = vshrl.u32 %v6061_v3, 16  ;;  %v23115_v13 = vld [vmem:[#allocation2 + $0xe0] ss:$8 sps:$4 sm:$0xff]  }
 0x329   : > { %v6273_v21 = vshll.u32 %v6061_v3, 16  ;;  %v6263_v2 = vrot.slane %v6262_v15, 4  ;;  %v6279_v7 = vshll.u32 %v6062_v49, 16  ;;  %v6284_v8 = vshrl.u32 %v6063_v52, 16  ;;  %v23117_v47 = vld [vmem:[#allocation2 + $0x100] ss:$8 sps:$4 sm:$0xff]  }
 0x32a   : > { %v13272_v50 = vrot.slane %v13270_v35, 5  ;;  %v13260_v12 = vrot.slane %v13259_v42, 4  ;;  %v13278_v56 = vrot.slane %v13276_v11, 5  ;;  %v6272_v61 = vrot.slane %v6270_v16, 4  ;;  %21693 = vmatmul.mubr.msk.bf16.gmra.mrb[0].mxu1 %vm2811_vm5, %v23111_v25  ;;  %v13123_v31 = vld [vmem:[#allocation2 + $0xfc] sm:$0x1] }
 0x32b   : > { %v6275_v34 = vrot.slane %v6273_v21, 5  ;;  %v6268_v62 = vsel %vm23998_vm4, %v6263_v2, %v6267_v20  ;;  %v6281_v10 = vrot.slane %v6279_v7, 5  ;;  %v6286_v39 = vrot.slane %v6284_v8, 4  ;;  %21696 = vmatprep.mubr.msk.bf16.mxu1 %vm2811_vm5, %v23113_v6  ;;  %v6065_v58 = vld [vmem:[#allocation2 + $0x90] sm:$0xf] }
 0x32c   : > { %v13273_v63 = vor.u32 %v13272_v50, %v13269_v37  ;;  %v25891_v51 = vcombine.low %v6254_v40, %v6268_v62  ;;  %v13265_v33 = vsel %vm23998_vm4, %v13260_v12, %v13264_v17  ;;  %v6287_v26 = vshll.u32 %v6063_v52, 16  ;;  %v6066_v60 = vld [vmem:[#allocation2 + $0x94] sm:$0x1]  ;;  %21221 = vmatmul.mubr.msk.bf16.gmra.mrb[52].mxu0 %vm2811_vm5, %v23115_v13  ;;  %v6067_v52 = vld [vmem:[#allocation2 + $0x98] sm:$0xf] }
 0x32d   : > { %v6276_v19 = vor.u32 %v6275_v34, %v6272_v61  ;;  %v6293_v4 = vshll.u32 %v6064_v18, 16  ;;  %v13281_v53 = vshrl.u32 %v13120_v30, 16  ;;  %v13284_v3 = vshll.u32 %v13120_v30, 16  ;;  %v23116_v32 = vld [vmem:[#allocation2 + $0x150] ss:$8 sps:$4 sm:$0xff]   ;;  %21224 = vmatprep.mubr.msk.bf16.mxu0 %vm2811_vm5, %v23117_v47 }
 0x32e   : > { %v13274_v0 = vrot.slane %v13273_v63, 4  ;;  %v6289_v9 = vrot.slane %v6287_v26, 5  ;;  %v13290_v36 = vshll.u32 %v13121_v29, 16  ;;  %v13295_v28 = vshrl.u32 %v13122_v38, 16  ;;  %v23118_v11 = vld [vmem:[#allocation2 + $0x160] ss:$8 sps:$4 sm:$0xff]  }
 0x32f   : > { %v6277_v55 = vrot.slane %v6276_v19, 4  ;;  %v6295_v27 = vrot.slane %v6293_v4, 5  ;;  %v13283_v45 = vrot.slane %v13281_v53, 4  ;;  %v13286_v20 = vrot.slane %v13284_v3, 5  ;;  %v13124_v50 = vld [vmem:[#allocation2 + $0x100] sm:$0xf] }
 0x330   : > { %v13279_v49 = vsel %vm23998_vm4, %v13274_v0, %v13278_v56  ;;  %v6290_v17 = vor.u32 %v6289_v9, %v6286_v39  ;;  %v13292_v37 = vrot.slane %v13290_v36, 5  ;;  %v13297_v15 = vrot.slane %v13295_v28, 4  ;;  %v13125_v56 = vld [vmem:[#allocation2 + $0x104] sm:$0x1]  ;;  %v23119_v61 = vld [vmem:[#allocation2 + $0x110] ss:$8 sps:$4 sm:$0xff]  }
 0x331   : > { %v25900_v43 = vcombine.low %v13265_v33, %v13279_v49  ;;  %v6282_v54 = vsel %vm23998_vm4, %v6277_v55, %v6281_v10  ;;  %v13287_v40 = vor.u32 %v13286_v20, %v13283_v45  ;;  %v13298_v35 = vshll.u32 %v13122_v38, 16  ;;  %v13126_v63 = vld [vmem:[#allocation2 + $0x108] sm:$0xf]  ;;  %v6068_v33 = vld [vmem:[#allocation2 + $0x9c] sm:$0x1] }
 0x332   : > { %v13304_v42 = vshll.u32 %v13123_v31, 16  ;;  %v6291_v16 = vrot.slane %v6290_v17, 4  ;;  %v6298_v21 = vshrl.u32 %v6065_v58, 16  ;;  %v6301_v25 = vshll.u32 %v6065_v58, 16  ;;  %21697 = vmatmul.mubr.msk.bf16.gmra.mrb[4].mxu1 %vm2811_vm5, %v23116_v32  ;;  %v23122_v10 = vld [vmem:[#allocation2 + $0x120] ss:$8 sps:$4 sm:$0xff]  }
 0x333   : > { %v6307_v2 = vshll.u32 %v6066_v60, 16  ;;  %v13288_v18 = vrot.slane %v13287_v40, 4  ;;  %v13300_v7 = vrot.slane %v13298_v35, 5  ;;  %v6312_v12 = vshrl.u32 %v6067_v52, 16  ;;  %21700 = vmatprep.mubr.msk.bf16.mxu1 %vm2811_vm5, %v23118_v11  ;;  %v13127_v0 = vld [vmem:[#allocation2 + $0x10c] sm:$0x1] }
 0x334   : > { %v13306_v8 = vrot.slane %v13304_v42, 5  ;;  %v6296_v34 = vsel %vm23998_vm4, %v6291_v16, %v6295_v27  ;;  %v6300_v30 = vrot.slane %v6298_v21, 4  ;;  %v6303_v6 = vrot.slane %v6301_v25, 5  ;;  %v6069_v9 = vld [vmem:[#allocation2 + $0xb0] sm:$0xf]  ;;  %21225 = vmatmul.mubr.msk.bf16.gmra.mrb[56].mxu0 %vm2811_vm5, %v23119_v61 }
 0x335   : > { %v25907_v62 = vrot.slane %v6307_v2, 5  ;;  %v25910_v39 = vcombine.low %v6282_v54, %v6296_v34  ;;  %v13293_v38 = vsel %vm23998_vm4, %v13288_v18, %v13292_v37  ;;  %v13301_v13 = vor.u32 %v13300_v7, %v13297_v15  ;;  %v6070_v27 = vld [vmem:[#allocation2 + $0xb4] sm:$0x1]  ;;  %21228 = vmatprep.mubr.msk.bf16.mxu0 %vm2811_vm5, %v23122_v10  ;;  %v6071_v17 = vld [vmem:[#allocation2 + $0xb8] sm:$0xf] }
 0x336   : > { %v6314_v19 = vrot.slane %v6312_v12, 4  ;;  %v6304_v26 = vor.u32 %v6303_v6, %v6300_v30  ;;  %v6315_v29 = vshll.u32 %v6067_v52, 16  ;;  %v6321_v47 = vshll.u32 %v6068_v33, 16  ;;  %v23124_v37 = vld [vmem:[#allocation2 + $0x190] ss:$8 sps:$4 sm:$0xff]  }
 0x337   : > { %v13309_v4 = vshrl.u32 %v13124_v50, 16  ;;  %v13302_v31 = vrot.slane %v13301_v13, 4  ;;  %v13312_v53 = vshll.u32 %v13124_v50, 16  ;;  %v13318_v3 = vshll.u32 %v13125_v56, 16  ;;  %v23121_v35 = vld [vmem:[#allocation2 + $0x170] ss:$8 sps:$4 sm:$0xff]  }
 0x338   : > { %v13323_v55 = vshrl.u32 %v13126_v63, 16  ;;  %v6305_v36 = vrot.slane %v6304_v26, 4  ;;  %v6317_v28 = vrot.slane %v6315_v29, 5  ;;  %v6323_v58 = vrot.slane %v6321_v47, 5  ;;  %v23126_v25 = vld [vmem:[#allocation2 + $0x130] ss:$8 sps:$4 sm:$0xff]  }
 0x339   : > { %v13311_v49 = vrot.slane %v13309_v4, 4  ;;  %v13307_v45 = vsel %vm23998_vm4, %v13302_v31, %v13306_v8  ;;  %v13314_v20 = vrot.slane %v13312_v53, 5  ;;  %v13320_v60 = vrot.slane %v13318_v3, 5  ;;  %v6072_v18 = vld [vmem:[#allocation2 + $0xbc] sm:$0x1] }
 0x33a   : > { %v13325_v54 = vrot.slane %v13323_v55, 4  ;;  %v25919_v52 = vcombine.low %v13293_v38, %v13307_v45  ;;  %v6310_v32 = vsel %vm23998_vm4, %v6305_v36, %v25907_v62  ;;  %v6318_v40 = vor.u32 %v6317_v28, %v6314_v19  ;;  %21701 = vmatmul.mubr.msk.bf16.gmra.mrb[8].mxu1 %vm2811_vm5, %v23121_v35  ;;  %v13128_v30 = vld [vmem:[#allocation2 + $0x110] sm:$0xf]  ;;  %v13129_v38 = vld [vmem:[#allocation2 + $0x114] sm:$0x1] }
 0x33b   : > { %v13326_v15 = vshll.u32 %v13126_v63, 16  ;;  %v13315_v42 = vor.u32 %v13314_v20, %v13311_v49  ;;  %v13332_v11 = vshll.u32 %v13127_v0, 16  ;;  %v6326_v16 = vshrl.u32 %v6069_v9, 16  ;;  %21704 = vmatprep.mubr.msk.bf16.mxu1 %vm2811_vm5, %v23124_v37  ;;  %v13130_v13 = vld [vmem:[#allocation2 + $0x118] sm:$0xf] }
 0x33c   : > { %v6329_v21 = vshll.u32 %v6069_v9, 16  ;;  %v6319_v2 = vrot.slane %v6318_v40, 4  ;;  %v6335_v7 = vshll.u32 %v6070_v27, 16  ;;  %v6340_v8 = vshrl.u32 %v6071_v17, 16  ;;  %v23128_v33 = vld [vmem:[#allocation2 + $0x1a0] ss:$8 sps:$4 sm:$0xff]   ;;  %21229 = vmatmul.mubr.msk.bf16.gmra.mrb[60].mxu0 %vm2811_vm5, %v23126_v25 }
 0x33d   : > { %v13328_v50 = vrot.slane %v13326_v15, 5  ;;  %v13316_v12 = vrot.slane %v13315_v42, 4  ;;  %v13334_v56 = vrot.slane %v13332_v11, 5  ;;  %v6328_v61 = vrot.slane %v6326_v16, 4  ;;  %v23130_v0 = vld [vmem:[#allocation2 + $0x1b0] ss:$8 sps:$4 sm:$0xff]   ;;  %21240 = vmatprep.mubr.msk.bf16.mxu0 %vm2811_vm5, %v25780_v5 }
 0x33e   : > { %v6331_v34 = vrot.slane %v6329_v21, 5  ;;  %v6324_v6 = vsel %vm23998_vm4, %v6319_v2, %v6323_v58  ;;  %v6337_v63 = vrot.slane %v6335_v7, 5  ;;  %v6342_v10 = vrot.slane %v6340_v8, 4  ;;  %v13131_v53 = vld [vmem:[#allocation2 + $0x11c] sm:$0x1] }
 0x33f   : > { %v13329_v62 = vor.u32 %v13328_v50, %v13325_v54  ;;  %v25928_v19 = vcombine.low %v6310_v32, %v6324_v6  ;;  %v13321_v26 = vsel %vm23998_vm4, %v13316_v12, %v13320_v60  ;;  %v6343_v47 = vshll.u32 %v6071_v17, 16  ;;  %v6073_v49 = vld [vmem:[#allocation2 + $0xc0] sm:$0xf]  ;;  %v6074_v54 = vld [vmem:[#allocation2 + $0xc4] sm:$0x1] }
 0x340   : > { %v6332_v29 = vor.u32 %v6331_v34, %v6328_v61  ;;  %v6349_v31 = vshll.u32 %v6072_v18, 16  ;;  %v13337_v3 = vshrl.u32 %v13128_v30, 16  ;;  %v13340_v55 = vshll.u32 %v13128_v30, 16  ;;  %v6075_v5 = vld [vmem:[#allocation2 + $0xc8] sm:$0xf] }
 0x341   : > { %v13330_v4 = vrot.slane %v13329_v62, 4  ;;  %v6345_v36 = vrot.slane %v6343_v47, 5  ;;  %v13346_v28 = vshll.u32 %v13129_v38, 16  ;;  %v13351_v58 = vshrl.u32 %v13130_v13, 16  ;;  %v6076_v16 = vld [vmem:[#allocation2 + $0xcc] sm:$0x1] }
 0x342   : > { %v6333_v9 = vrot.slane %v6332_v29, 4  ;;  %v6351_v45 = vrot.slane %v6349_v31, 5  ;;  %v13339_v20 = vrot.slane %v13337_v3, 4  ;;  %v13342_v60 = vrot.slane %v13340_v55, 5  ;;  %v13132_v21 = vld [vmem:[#allocation2 + $0x120] sm:$0xf]  ;;  %21705 = vmatmul.mubr.msk.bf16.gmra.mrb[12].mxu1 %vm2811_vm5, %v23128_v33 }
 0x343   : > { %v13335_v27 = vsel %vm23998_vm4, %v13330_v4, %v13334_v56  ;;  %v6346_v32 = vor.u32 %v6345_v36, %v6342_v10  ;;  %v13348_v40 = vrot.slane %v13346_v28, 5  ;;  %v13353_v35 = vrot.slane %v13351_v58, 4  ;;  %v13133_v7 = vld [vmem:[#allocation2 + $0x124] sm:$0x1]  ;;  %21708 = vmatprep.mubr.msk.bf16.mxu1 %vm2811_vm5, %v23130_v0  ;;  %v23136_v34 = vld [vmem:[%s27928_s6 + $0x108] sm:$0xff]   ;;  %v23138_v28 = vld [vmem:[%s27928_s6 + $0x110] sm:$0xff]  }
 0x344   : > { %v25937_v17 = vcombine.low %v13321_v26, %v13335_v27  ;;  %v6338_v37 = vsel %vm23998_vm4, %v6333_v9, %v6337_v63  ;;  %v13343_v15 = vor.u32 %v13342_v60, %v13339_v20  ;;  %v13354_v42 = vshll.u32 %v13130_v13, 16  ;;  %v13134_v10 = vld [vmem:[#allocation2 + $0x128] sm:$0xf]  ;;  %21241 = vmatmul.mubr.msk.bf16.vlgmr.msra.gmra.mrb[32].mxu0 %vm2811_vm5, %v25796_v22  ;;  %v13135_v31 = vld [vmem:[#allocation2 + $0x12c] sm:$0x1] }
 0x345   : > { %v13360_v11 = vshll.u32 %v13131_v53, 16  ;;  %v6347_v25 = vrot.slane %v6346_v32, 4  ;;  %v6354_v2 = vshrl.u32 %v6073_v49, 16  ;;  %v6357_v50 = vshll.u32 %v6073_v49, 16  ;;  %v23131_v38 = vld [vmem:[#allocation2 + $0x1c0] ss:$8 sps:$4 sm:$0xff]   ;;  %21244 = vmatprep.mubr.msk.bf16.mxu0 %vm2811_vm5, %v25824_v23  ;;  %21273 = vmatpush3.bf16.msra.mxu0 %v25829_v46 }
 0x346   : > { %v6363_v18 = vshll.u32 %v6074_v54, 16  ;;  %v13344_v8 = vrot.slane %v13343_v15, 4  ;;  %v13356_v12 = vrot.slane %v13354_v42, 5  ;;  %v6368_v61 = vshrl.u32 %v6075_v5, 16  ;;  %v6077_v3 = vld [vmem:[#allocation2 + $0xd0] sm:$0xf]  ;;  %21274 = vmatprep.subr.bf16.mxu0 %v23136_v34 }
 0x347   : > { %v13362_v56 = vrot.slane %v13360_v11, 5  ;;  %v6352_v30 = vsel %vm23998_vm4, %v6347_v25, %v6351_v45  ;;  %v6356_v6 = vrot.slane %v6354_v2, 4  ;;  %v6359_v62 = vrot.slane %v6357_v50, 5  ;;  %v6078_v45 = vld [vmem:[#allocation2 + $0xd4] sm:$0x1]  ;;  %v23139_v25 = vld [vmem:[%s27928_s6 + $0x118] sm:$0xff]  }
 0x348   : > { %v25948_v63 = vrot.slane %v6363_v18, 5  ;;  %v25952_v13 = vcombine.low %v6338_v37, %v6352_v30  ;;  %v13349_v33 = vsel %vm23998_vm4, %v13344_v8, %v13348_v40  ;;  %v13357_v26 = vor.u32 %v13356_v12, %v13353_v35  ;;  %v6079_v37 = vld [vmem:[#allocation2 + $0xd8] sm:$0xf]  ;;  %v6080_v11 = vld [vmem:[#allocation2 + $0xdc] sm:$0x1] }
 0x349   : > { %v6370_v29 = vrot.slane %v6368_v61, 4  ;;  %v6360_v47 = vor.u32 %v6359_v62, %v6356_v6  ;;  %v6371_v0 = vshll.u32 %v6075_v5, 16  ;;  %v6377_v4 = vshll.u32 %v6076_v16, 16  ;;  %21275 = vmatpush3.bf16.msra.mxu0 %v23136_v34  ;;  %v13136_v61 = vld [vmem:[#allocation2 + $0x140] sm:$0xf]  ;;  %v23133_v34 = vld [vmem:[%s27928_s6 + $0x288] sm:$0xff]  }
 0x34a   : > { %v13365_v53 = vshrl.u32 %v13132_v21, 16  ;;  %v13358_v22 = vrot.slane %v13357_v26, 4  ;;  %v13368_v55 = vshll.u32 %v13132_v21, 16  ;;  %v13374_v9 = vshll.u32 %v13133_v7, 16  ;;  %21709 = vmatmul.mubr.msk.bf16.gmra.mrb[16].mxu1 %vm2811_vm5, %v23131_v38  ;;  %21276 = vmatprep.subr.bf16.mxu0 %v23138_v28 }
 0x34b   : > { %v13379_v36 = vshrl.u32 %v13134_v10, 16  ;;  %v6361_v58 = vrot.slane %v6360_v47, 4  ;;  %v6373_v49 = vrot.slane %v6371_v0, 5  ;;  %v6379_v23 = vrot.slane %v6377_v4, 5  ;;  %21720 = vmatprep.mubr.msk.bf16.mxu1 %vm2811_vm5, %v25813_v57  ;;  %v25991_v47 = vld [vmem:[%s27928_s6 + $0x120] sm:$0xff]  }
 0x34c   : > { %v13367_v27 = vrot.slane %v13365_v53, 4  ;;  %v13363_v20 = vsel %vm23998_vm4, %v13358_v22, %v13362_v56  ;;  %v13370_v60 = vrot.slane %v13368_v55, 5  ;;  %v13376_v54 = vrot.slane %v13374_v9, 5  ;;  %21245 = vmatmul.mubr.msk.bf16.gmra.mrb[36].mxu0 %vm2811_vm5, %v25843_v41  ;;  %v13138_v41 = vld [vmem:[#allocation2 + $0x148] sm:$0xf] }
 0x34d   : > { %v13381_v46 = vrot.slane %v13379_v36, 4  ;;  %v25965_v32 = vcombine.low %v13349_v33, %v13363_v20  ;;  %v6366_v40 = vsel %vm23998_vm4, %v6361_v58, %v25948_v63  ;;  %v6374_v5 = vor.u32 %v6373_v49, %v6370_v29  ;;  %21248 = vmatprep.mubr.msk.bf16.mxu0 %vm2811_vm5, %v25873_v14  ;;  %21277 = vmatpush3.bf16.msra.mxu0 %v23138_v28  ;;  %v13139_v29 = vld [vmem:[#allocation2 + $0x14c] sm:$0x1] }
 0x34e   : > { %v13382_v15 = vshll.u32 %v13134_v10, 16  ;;  %v13371_v35 = vor.u32 %v13370_v60, %v13367_v27  ;;  %v13388_v42 = vshll.u32 %v13135_v31, 16  ;;  %v6382_v16 = vshrl.u32 %v6077_v3, 16  ;;  %v13137_v10 = vld [vmem:[#allocation2 + $0x144] sm:$0x1]  ;;  %21278 = vmatprep.subr.bf16.mxu0 %v23139_v25 }
 0x34f   : > { %v6385_v21 = vshll.u32 %v6077_v3, 16  ;;  %v6375_v2 = vrot.slane %v6374_v5, 4  ;;  %v6391_v18 = vshll.u32 %v6078_v45, 16  ;;  %v6396_v7 = vshrl.u32 %v6079_v37, 16  ;;  %v6081_v3 = vld [vmem:[#allocation2 + $0xe0] sm:$0xf] }
 0x350   : > { %v13384_v50 = vrot.slane %v13382_v15, 5  ;;  %v13372_v8 = vrot.slane %v13371_v35, 4  ;;  %v13390_v12 = vrot.slane %v13388_v42, 5  ;;  %v6384_v57 = vrot.slane %v6382_v16, 4  ;;  %v6082_v27 = vld [vmem:[#allocation2 + $0xe4] sm:$0x1] }
 0x351   : > { %v6387_v56 = vrot.slane %v6385_v21, 5  ;;  %v6380_v30 = vsel %vm23998_vm4, %v6375_v2, %v6379_v23  ;;  %v6393_v62 = vrot.slane %v6391_v18, 5  ;;  %v6398_v63 = vrot.slane %v6396_v7, 4  ;;  %21279 = vmatpush3.bf16.msra.mxu0 %v23139_v25  ;;  %v13140_v15 = vld [vmem:[#allocation2 + $0x150] sm:$0xf] }
 0x352   : > { %v13385_v6 = vor.u32 %v13384_v50, %v13381_v46  ;;  %v25984_v38 = vcombine.low %v6366_v40, %v6380_v30  ;;  %v13377_v33 = vsel %vm23998_vm4, %v13372_v8, %v13376_v54  ;;  %v6399_v14 = vshll.u32 %v6079_v37, 16  ;;  %21721 = vmatmul.mubr.msk.bf16.vlgmr.msra.gmra.mrb[20].mxu1 %vm2811_vm5, %v25856_v44  ;;  %v6083_v54 = vld [vmem:[#allocation2 + $0xe8] sm:$0xf]  ;;  %21312 = vmatprep.subr.bf16.mxu0 %v25991_v47  ;;  %v13141_v16 = vld [vmem:[#allocation2 + $0x154] sm:$0x1] }
 0x353   : > { %v6388_v26 = vor.u32 %v6387_v56, %v6384_v57  ;;  %v6405_v4 = vshll.u32 %v6080_v11, 16  ;;  %v13393_v31 = vshrl.u32 %v13136_v61, 16  ;;  %v13396_v53 = vshll.u32 %v13136_v61, 16  ;;  %21753 = vmatpush3.bf16.msra.mxu1 %v25865_v1  ;;  %21724 = vmatprep.mubr.msk.bf16.mxu1 %vm2811_vm5, %v25882_v59  ;;  %v23134_v1 = vld [vmem:[%s27928_s6 + $0x290] sm:$0xff]   ;;  %v13142_v18 = vld [vmem:[#allocation2 + $0x158] sm:$0xf] }
 0x354   : > { %v13386_v0 = vrot.slane %v13385_v6, 4  ;;  %v6401_v55 = vrot.slane %v6399_v14, 5  ;;  %v13402_v9 = vshll.u32 %v13137_v10, 16  ;;  %v13407_v36 = vshrl.u32 %v13138_v41, 16  ;;  %21754 = vmatprep.subr.bf16.mxu1 %v23133_v34  ;;  %21249 = vmatmul.mubr.msk.bf16.gmra.mrb[40].mxu0 %vm2811_vm5, %v25891_v51 }
 0x355   : > { %v6389_v22 = vrot.slane %v6388_v26, 4  ;;  %v6407_v58 = vrot.slane %v6405_v4, 5  ;;  %v13395_v49 = vrot.slane %v13393_v31, 4  ;;  %v13398_v23 = vrot.slane %v13396_v53, 5  ;;  %21252 = vmatprep.mubr.msk.bf16.mxu0 %vm2811_vm5, %v25910_v39  ;;  %v6084_v39 = vld [vmem:[#allocation2 + $0xec] sm:$0x1] }
 0x356   : > { %v13391_v28 = vsel %vm23998_vm4, %v13386_v0, %v13390_v12  ;;  %v6402_v60 = vor.u32 %v6401_v55, %v6398_v63  ;;  %v13404_v44 = vrot.slane %v13402_v9, 5  ;;  %v13409_v37 = vrot.slane %v13407_v36, 4  ;;  %v6086_v0 = vld [vmem:[#allocation2 + $0x104] sm:$0x1]  ;;  %v6087_v4 = vld [vmem:[#allocation2 + $0x108] sm:$0xf] }
 0x357   : > { %v26000_v45 = vcombine.low %v13377_v33, %v13391_v28  ;;  %v6394_v20 = vsel %vm23998_vm4, %v6389_v22, %v6393_v62  ;;  %v13399_v46 = vor.u32 %v13398_v23, %v13395_v49  ;;  %v13410_v40 = vshll.u32 %v13138_v41, 16  ;;  %21755 = vmatpush3.bf16.msra.mxu1 %v23133_v34  ;;  %v23137_v34 = vld [vmem:[%s27928_s6 + $0x298] sm:$0xff]   ;;  %v6085_v41 = vld [vmem:[#allocation2 + $0x100] sm:$0xf] }
 0x358   : > { %v13416_v5 = vshll.u32 %v13139_v29, 16  ;;  %v6403_v59 = vrot.slane %v6402_v60, 4  ;;  %v6410_v35 = vshrl.u32 %v6081_v3, 16  ;;  %v6413_v42 = vshll.u32 %v6081_v3, 16  ;;  %21756 = vmatprep.subr.bf16.mxu1 %v23134_v1  ;;  %v13143_v22 = vld [vmem:[#allocation2 + $0x15c] sm:$0x1] }
 0x359   : > { %v6419_v11 = vshll.u32 %v6082_v27, 16  ;;  %v13400_v21 = vrot.slane %v13399_v46, 4  ;;  %v13412_v25 = vrot.slane %v13410_v40, 5  ;;  %v6424_v50 = vshrl.u32 %v6083_v54, 16 }
 0x35a   : > { %v13418_v2 = vrot.slane %v13416_v5, 5  ;;  %v6408_v7 = vsel %vm23998_vm4, %v6403_v59, %v6407_v58  ;;  %v6412_v8 = vrot.slane %v6410_v35, 4  ;;  %v6415_v12 = vrot.slane %v6413_v42, 5  ;;  %21725 = vmatmul.mubr.msk.bf16.gmra.mrb[24].mxu1 %vm2811_vm5, %v25900_v43  ;;  %v26032_v58 = vld [vmem:[%s27928_s6 + $0x2a0] sm:$0xff]  }
 0x35b   : > { %v26014_v51 = vrot.slane %v6419_v11, 5  ;;  %v26016_v57 = vcombine.low %v6394_v20, %v6408_v7  ;;  %v13405_v56 = vsel %vm23998_vm4, %v13400_v21, %v13404_v44  ;;  %v13413_v61 = vor.u32 %v13412_v25, %v13409_v37  ;;  %21728 = vmatprep.mubr.msk.bf16.mxu1 %vm2811_vm5, %v25919_v52  ;;  %21757 = vmatpush3.bf16.msra.mxu1 %v23134_v1  ;;  %v6088_v44 = vld [vmem:[#allocation2 + $0x10c] sm:$0x1]  ;;  %v13144_v37 = vld [vmem:[#allocation2 + $0x160] sm:$0xf] }
 0x35c   : > { %v6426_v30 = vrot.slane %v6424_v50, 4  ;;  %v6416_v6 = vor.u32 %v6415_v12, %v6412_v8  ;;  %v6427_v62 = vshll.u32 %v6083_v54, 16  ;;  %v6433_v63 = vshll.u32 %v6084_v39, 16  ;;  %21758 = vmatprep.subr.bf16.mxu1 %v23137_v34  ;;  %21253 = vmatmul.mubr.msk.bf16.gmra.mrb[44].mxu0 %vm2811_vm5, %v25928_v19 }
 0x35d   : > { %v13421_v10 = vshrl.u32 %v13140_v15, 16  ;;  %v13414_v33 = vrot.slane %v13413_v61, 4  ;;  %v13424_v26 = vshll.u32 %v13140_v15, 16  ;;  %v13430_v14 = vshll.u32 %v13141_v16, 16  ;;  %21256 = vmatprep.mubr.msk.bf16.mxu0 %vm2811_vm5, %v25952_v13  ;;  %v13145_v15 = vld [vmem:[#allocation2 + $0x164] sm:$0x1] }
 0x35e   : > { %v13435_v29 = vshrl.u32 %v13142_v18, 16  ;;  %v6417_v31 = vrot.slane %v6416_v6, 4  ;;  %v6429_v53 = vrot.slane %v6427_v62, 5  ;;  %v6435_v3 = vrot.slane %v6433_v63, 5 }
 0x35f   : > { %v13423_v55 = vrot.slane %v13421_v10, 4  ;;  %v13419_v9 = vsel %vm23998_vm4, %v13414_v33, %v13418_v2  ;;  %v13426_v36 = vrot.slane %v13424_v26, 5  ;;  %v13432_v43 = vrot.slane %v13430_v14, 5  ;;  %21759 = vmatpush3.bf16.msra.mxu1 %v23137_v34  ;;  %v13146_v2 = vld [vmem:[#allocation2 + $0x168] sm:$0xf] }
 0x360   : > { %v13437_v28 = vrot.slane %v13435_v29, 4  ;;  %v26036_v52 = vcombine.low %v13405_v56, %v13419_v9  ;;  %v6422_v49 = vsel %vm23998_vm4, %v6417_v31, %v26014_v51  ;;  %v6430_v23 = vor.u32 %v6429_v53, %v6426_v30  ;;  %21792 = vmatprep.subr.bf16.mxu1 %v26032_v58  ;;  %v26052_v56 = vld [vmem:[#allocation2 + $0x16c] sm:$0x1]  ;;  %v6089_v30 = vld [vmem:[#allocation2 + $0x110] sm:$0xf] }
 0x361   : > { %v13438_v27 = vshll.u32 %v13142_v18, 16  ;;  %v13427_v20 = vor.u32 %v13426_v36, %v13423_v55  ;;  %v13444_v60 = vshll.u32 %v13143_v22, 16  ;;  %v6438_v54 = vshrl.u32 %v6085_v41, 16  ;;  %v26054_v34 = vld [vmem:[#allocation2 + $0x114] sm:$0x1] }
 0x362   : > { %v6441_v46 = vshll.u32 %v6085_v41, 16  ;;  %v6431_v40 = vrot.slane %v6430_v23, 4  ;;  %v6447_v19 = vshll.u32 %v6086_v0, 16  ;;  %v6452_v1 = vshrl.u32 %v6087_v4, 16  ;;  %21729 = vmatmul.mubr.msk.bf16.gmra.mrb[28].mxu1 %vm2811_vm5, %v25937_v17  ;;  %v26067_v22 = vld [vmem:[#allocation2 + $0x11c] sm:$0x1] }
 0x363   : > { %v13440_v5 = vrot.slane %v13438_v27, 5  ;;  %v13428_v59 = vrot.slane %v13427_v20, 4  ;;  %v13446_v35 = vrot.slane %v13444_v60, 5  ;;  %v6440_v42 = vrot.slane %v6438_v54, 4  ;;  %21732 = vmatprep.mubr.msk.bf16.mxu1 %vm2811_vm5, %v25965_v32  ;;  %v13148_v55 = vld [vmem:[#allocation2 + $0x170] sm:$0xf] }
 0x364   : > { %v6443_v11 = vrot.slane %v6441_v46, 5  ;;  %v6436_v13 = vsel %vm23998_vm4, %v6431_v40, %v6435_v3  ;;  %v6449_v21 = vrot.slane %v6447_v19, 5  ;;  %v6454_v25 = vrot.slane %v6452_v1, 4  ;;  %21257 = vmatmul.mubr.msk.bf16.gmra.mrb[48].mxu0 %vm2811_vm5, %v25984_v38 }
 0x365   : > { %v13441_v16 = vor.u32 %v13440_v5, %v13437_v28  ;;  %v19153_v50 = vcombine.low %v6422_v49, %v6436_v13  ;;  %v13433_v18 = vsel %vm23998_vm4, %v13428_v59, %v13432_v43  ;;  %v6455_v8 = vshll.u32 %v6087_v4, 16  ;;  %21260 = vmatprep.mubr.msk.bf16.mxu0 %vm2811_vm5, %v26016_v57  ;;  %v6091_v4 = vld [vmem:[#allocation2 + $0x118] sm:$0xf]  ;;  %v26070_v28 = vld [vmem:[#allocation2 + $0x174] sm:$0x1] }
 0x366   : > { %v6444_v7 = vor.u32 %v6443_v11, %v6440_v42  ;;  %v6461_v51 = vshll.u32 %v6088_v44, 16  ;;  %v13449_v61 = vshrl.u32 %v13144_v37, 16  ;;  %v13452_v39 = vshll.u32 %v13144_v37, 16  ;;  %v13150_v49 = vld [vmem:[#allocation2 + $0x178] sm:$0xf] }
 0x367   : > { %v13442_v12 = vrot.slane %v13441_v16, 4  ;;  %v6457_v17 = vrot.slane %v6455_v8, 5  ;;  %v13458_v62 = vshll.u32 %v13145_v15, 16  ;;  %v13463_v63 = vshrl.u32 %v13146_v2, 16  ;;  %v6093_v42 = vld [vmem:[#allocation2 + $0x120] sm:$0xf] }
 0x368   : > { %v6445_v6 = vrot.slane %v6444_v7, 4  ;;  %v6463_v32 = vrot.slane %v6461_v51, 5  ;;  %v13451_v41 = vrot.slane %v13449_v61, 4  ;;  %v13454_v33 = vrot.slane %v13452_v39, 5  ;;  %v26082_v13 = vld [vmem:[#allocation2 + $0x17c] sm:$0x1] }
 0x369   : > { %v13447_v10 = vsel %vm23998_vm4, %v13442_v12, %v13446_v35  ;;  %v6458_v29 = vor.u32 %v6457_v17, %v6454_v25  ;;  %v13460_v0 = vrot.slane %v13458_v62, 5  ;;  %v13465_v53 = vrot.slane %v13463_v63, 4  ;;  %v6095_v25 = vld [vmem:[#allocation2 + $0x128] sm:$0xf]  ;;  %v26088_v39 = vld [vmem:[#allocation2 + $0x124] sm:$0x1] }
 0x36a   : > { %v26062_v26 = vcombine.low %v13433_v18, %v13447_v10  ;;  %v6450_v14 = vsel %vm23998_vm4, %v6445_v6, %v6449_v21  ;;  %v13455_v31 = vor.u32 %v13454_v33, %v13451_v41  ;;  %v13466_v38 = vshll.u32 %v13146_v2, 16  ;;  %21733 = vmatmul.mubr.msk.bf16.gmra.mrb[0].mxu1 %vm2811_vm5, %v26000_v45 }
 0x36b   : > { %v13472_v3 = vshll.u32 %v26052_v56, 16  ;;  %v6459_v9 = vrot.slane %v6458_v29, 4  ;;  %v6466_v36 = vshrl.u32 %v6089_v30, 16  ;;  %v6469_v43 = vshll.u32 %v6089_v30, 16  ;;  %21736 = vmatprep.mubr.msk.bf16.mxu1 %vm2811_vm5, %v26036_v52 }
 0x36c   : > { %v6475_v57 = vshll.u32 %v26054_v34, 16  ;;  %v13456_v23 = vrot.slane %v13455_v31, 4  ;;  %v13468_v27 = vrot.slane %v13466_v38, 5  ;;  %v6480_v60 = vshrl.u32 %v6091_v4, 16  ;;  %21261 = vmatmul.mubr.msk.bf16.gmra.mrb[52].mxu0 %vm2811_vm5, %v19153_v50 }
 0x36d   : > { %v13474_v20 = vrot.slane %v13472_v3, 5  ;;  %v6464_v44 = vsel %vm23998_vm4, %v6459_v9, %v6463_v32  ;;  %v6468_v54 = vrot.slane %v6466_v36, 4  ;;  %v6471_v46 = vrot.slane %v6469_v43, 5  ;;  %v26093_v32 = vld [vmem:[#allocation2 + $0x12c] sm:$0x1] }
 0x36e   : > { %v6477_v37 = vrot.slane %v6475_v57, 5  ;;  %v19154_v40 = vcombine.low %v6450_v14, %v6464_v44  ;;  %v13461_v5 = vsel %vm23998_vm4, %v13456_v23, %v13460_v0  ;;  %v13469_v19 = vor.u32 %v13468_v27, %v13465_v53  ;;  %v13152_v14 = vld [vmem:[#allocation2 + $0x190] sm:$0xf]  ;;  %v26098_v53 = vld [vmem:[#allocation2 + $0x194] sm:$0x1] }
 0x36f   : > { %v6482_v1 = vrot.slane %v6480_v60, 4  ;;  %v6472_v15 = vor.u32 %v6471_v46, %v6468_v54  ;;  %v6483_v59 = vshll.u32 %v6091_v4, 16  ;;  %v6489_v35 = vshll.u32 %v26067_v22, 16  ;;  %v26105_v44 = vld [vmem:[#allocation2 + $0x19c] sm:$0x1] }
 0x370   : > { %v13477_v45 = vshrl.u32 %v13148_v55, 16  ;;  %v13470_v11 = vrot.slane %v13469_v19, 4  ;;  %v13480_v16 = vshll.u32 %v13148_v55, 16  ;;  %v13486_v52 = vshll.u32 %v26070_v28, 16  ;;  %21264 = vmatprep.mubr.msk.bf16.mxu0 %vm2811_vm5, %v19154_v40  ;;  %v26108_v19 = vld [vmem:[#allocation2 + $0x134] sm:$0x1] }
 0x371   : > { %v13491_v21 = vshrl.u32 %v13150_v49, 16  ;;  %v6473_v2 = vrot.slane %v6472_v15, 4  ;;  %v6485_v18 = vrot.slane %v6483_v59, 5  ;;  %v6491_v7 = vrot.slane %v6489_v35, 5 }
 0x372   : > { %v13479_v8 = vrot.slane %v13477_v45, 4  ;;  %v13475_v12 = vsel %vm23998_vm4, %v13470_v11, %v13474_v20  ;;  %v13482_v51 = vrot.slane %v13480_v16, 5  ;;  %v13488_v61 = vrot.slane %v13486_v52, 5  ;;  %21737 = vmatmul.mubr.msk.bf16.gmra.mrb[4].mxu1 %vm2811_vm5, %v26062_v26  ;;  %v13154_v26 = vld [vmem:[#allocation2 + $0x198] sm:$0xf] }
 0x373   : > { %v13493_v50 = vrot.slane %v13491_v21, 4  ;;  %v19808_v30 = vcombine.low %v13461_v5, %v13475_v12  ;;  %v6478_v6 = vsel %vm23998_vm4, %v6473_v2, %v6477_v37  ;;  %v6486_v17 = vor.u32 %v6485_v18, %v6482_v1  ;;  %v6097_v5 = vld [vmem:[#allocation2 + $0x130] sm:$0xf]  ;;  %v6099_v52 = vld [vmem:[#allocation2 + $0x138] sm:$0xf] }
 0x374   : > { %v13494_v62 = vshll.u32 %v13150_v49, 16  ;;  %v13483_v63 = vor.u32 %v13482_v51, %v13479_v8  ;;  %v13500_v10 = vshll.u32 %v26082_v13, 16  ;;  %v6494_v41 = vshrl.u32 %v6093_v42, 16 }
 0x375   : > { %v6497_v33 = vshll.u32 %v6093_v42, 16  ;;  %v6487_v29 = vrot.slane %v6486_v17, 4  ;;  %v6503_v4 = vshll.u32 %v26088_v39, 16  ;;  %v6508_v31 = vshrl.u32 %v6095_v25, 16  ;;  %21740 = vmatprep.mubr.msk.bf16.mxu1 %vm2811_vm5, %v19808_v30  ;;  %v13156_v17 = vld [vmem:[#allocation2 + $0x1a0] sm:$0xf] }
 0x376   : > { %v13496_v0 = vrot.slane %v13494_v62, 5  ;;  %v13484_v38 = vrot.slane %v13483_v63, 4  ;;  %v13502_v3 = vrot.slane %v13500_v10, 5  ;;  %v6496_v55 = vrot.slane %v6494_v41, 4 }
 0x377   : > { %v6499_v9 = vrot.slane %v6497_v33, 5  ;;  %v6492_v36 = vsel %vm23998_vm4, %v6487_v29, %v6491_v7  ;;  %v6505_v57 = vrot.slane %v6503_v4, 5  ;;  %v6510_v49 = vrot.slane %v6508_v31, 4  ;;  %v26119_v33 = vld [vmem:[#allocation2 + $0x1a4] sm:$0x1] }
 0x378   : > { %v13497_v43 = vor.u32 %v13496_v0, %v13493_v50  ;;  %v19155_v23 = vcombine.low %v6478_v6, %v6492_v36  ;;  %v13489_v27 = vsel %vm23998_vm4, %v13484_v38, %v13488_v61  ;;  %v6511_v60 = vshll.u32 %v6095_v25, 16  ;;  %v13158_v31 = vld [vmem:[#allocation2 + $0x1a8] sm:$0xf] }
 0x379   : > { %v6500_v20 = vor.u32 %v6499_v9, %v6496_v55  ;;  %v6517_v46 = vshll.u32 %v26093_v32, 16  ;;  %v13505_v37 = vshrl.u32 %v13152_v14, 16  ;;  %v13508_v40 = vshll.u32 %v13152_v14, 16  ;;  %v26125_v9 = vld [vmem:[#allocation2 + $0x13c] sm:$0x1] }
 0x37a   : > { %v13498_v54 = vrot.slane %v13497_v43, 4  ;;  %21265 = vmatmul.mubr.msk.bf16.gmra.mrb[56].mxu0 %vm2811_vm5, %v19155_v23  ;;  %v6513_v15 = vrot.slane %v6511_v60, 5  ;;  %v13514_v59 = vshll.u32 %v26098_v53, 16  ;;  %v13519_v35 = vshrl.u32 %v13154_v26, 16 }
 0x37b   : > { %v6501_v1 = vrot.slane %v6500_v20, 4  ;;  %v6519_v42 = vrot.slane %v6517_v46, 5  ;;  %v13507_v11 = vrot.slane %v13505_v37, 4  ;;  %v13510_v16 = vrot.slane %v13508_v40, 5 }
 0x37c   : > { %v13503_v45 = vsel %vm23998_vm4, %v13498_v54, %v13502_v3  ;;  %v6514_v2 = vor.u32 %v6513_v15, %v6510_v49  ;;  %v13516_v18 = vrot.slane %v13514_v59, 5  ;;  %v13521_v8 = vrot.slane %v13519_v35, 4 }
 0x37d   : > { %v19809_v21 = vcombine.low %v13489_v27, %v13503_v45  ;;  %v6506_v25 = vsel %vm23998_vm4, %v6501_v1, %v6505_v57  ;;  %v13511_v7 = vor.u32 %v13510_v16, %v13507_v11  ;;  %v13522_v12 = vshll.u32 %v13154_v26, 16  ;;  %v26129_v27 = vld [vmem:[#allocation2 + $0x1ac] sm:$0x1]  ;;  %v6871_v1 = vld [vmem:[#allocation2 + $0x10] sm:$0xe] }
 0x37e   : > { %v13528_v51 = vshll.u32 %v26105_v44, 16  ;;  %v6515_v61 = vrot.slane %v6514_v2, 4  ;;  %v6522_v50 = vshrl.u32 %v6097_v5, 16  ;;  %v6525_v30 = vshll.u32 %v6097_v5, 16 }
 0x37f   : > { %21741 = vmatmul.mubr.msk.bf16.gmra.mrb[8].mxu1 %vm2811_vm5, %v19809_v21  ;;  %v6531_v6 = vshll.u32 %v26108_v19, 16  ;;  %v13512_v62 = vrot.slane %v13511_v7, 4  ;;  %v13524_v63 = vrot.slane %v13522_v12, 5  ;;  %v6536_v41 = vshrl.u32 %v6099_v52, 16 }
 0x380   : > { %v13530_v10 = vrot.slane %v13528_v51, 5  ;;  %v6520_v14 = vsel %vm23998_vm4, %v6515_v61, %v6519_v42  ;;  %v6524_v29 = vrot.slane %v6522_v50, 4  ;;  %v6527_v0 = vrot.slane %v6525_v30, 5  ;;  %v6872_v42 = vld [vmem:[#allocation2 + $0x18] sm:$0xe] }
 0x381   : > { %v6533_v4 = vrot.slane %v6531_v6, 5  ;;  %v19156_v38 = vcombine.low %v6506_v25, %v6520_v14  ;;  %v13517_v3 = vsel %vm23998_vm4, %v13512_v62, %v13516_v18  ;;  %v13525_v55 = vor.u32 %v13524_v63, %v13521_v8  ;;  %v13160_v25 = vld [vmem:[#allocation2 + $0x1b0] sm:$0xf]  ;;  %v23338_v8 = vld [vmem:[#allocation2 + $0x14] sm:$0x1] }
 0x382   : > { %v6538_v36 = vrot.slane %v6536_v41, 4  ;;  %v6528_v43 = vor.u32 %v6527_v0, %v6524_v29  ;;  %v6539_v57 = vshll.u32 %v6099_v52, 16  ;;  %v6545_v49 = vshll.u32 %v26125_v9, 16  ;;  %v23339_v30 = vld [vmem:[#allocation2 + $0x1c] sm:$0x1] }
 0x383   : > { %v13533_v26 = vshrl.u32 %v13156_v17, 16  ;;  %21268 = vmatprep.mubr.msk.bf16.mxu0 %vm2811_vm5, %v19156_v38  ;;  %v13526_v23 = vrot.slane %v13525_v55, 4  ;;  %v13536_v20 = vshll.u32 %v13156_v17, 16  ;;  %v13542_v60 = vshll.u32 %v26119_v33, 16  ;;  %v26138_v17 = vld [vmem:[#allocation2 + $0x1b4] sm:$0x1] }
 0x384   : > { %v13547_v54 = vshrl.u32 %v13158_v31, 16  ;;  %v6529_v46 = vrot.slane %v6528_v43, 4  ;;  %v6541_v37 = vrot.slane %v6539_v57, 5  ;;  %v6547_v40 = vrot.slane %v6545_v49, 5  ;;  %v13162_v41 = vld [vmem:[#allocation2 + $0x1b8] sm:$0xf] }
 0x385   : > { %v13535_v5 = vrot.slane %v13533_v26, 4  ;;  %v13531_v15 = vsel %vm23998_vm4, %v13526_v23, %v13530_v10  ;;  %v13538_v59 = vrot.slane %v13536_v20, 5  ;;  %v13544_v35 = vrot.slane %v13542_v60, 5  ;;  %v6874_v60 = vld [vmem:[#allocation2 + $0x28] sm:$0xe] }
 0x386   : > { %v13549_v45 = vrot.slane %v13547_v54, 4  ;;  %v19810_v11 = vcombine.low %v13517_v3, %v13531_v15  ;;  %v6534_v16 = vsel %vm23998_vm4, %v6529_v46, %v6533_v4  ;;  %v6542_v52 = vor.u32 %v6541_v37, %v6538_v36  ;;  %v6873_v3 = vld [vmem:[#allocation2 + $0x20] sm:$0xe] }
 0x387   : > { %v13550_v21 = vshll.u32 %v13158_v31, 16  ;;  %v13539_v2 = vor.u32 %v13538_v59, %v13535_v5  ;;  %v13556_v18 = vshll.u32 %v26129_v27, 16  ;;  %v19178_v7 = vrot.slane %v6871_v1, 9  ;;  %v26146_v31 = vld [vmem:[#allocation2 + $0x1bc] sm:$0x1] }
 0x388   : > { %v6969_v12 = vrot.slane %v23338_v8, 5  ;;  %21744 = vmatprep.mubr.msk.bf16.mxu1 %vm2811_vm5, %v19810_v11  ;;  %v6543_v51 = vrot.slane %v6542_v52, 4  ;;  %v19179_v50 = vrot.slane %v6872_v42, 9  ;;  %v6973_v6 = vrot.slane %v23339_v30, 5  ;;  %v13164_v1 = vld [vmem:[#allocation2 + $0x1c0] sm:$0xf] }
 0x389   : > { %v13552_v61 = vrot.slane %v13550_v21, 5  ;;  %v13540_v62 = vrot.slane %v13539_v2, 4  ;;  %v13558_v63 = vrot.slane %v13556_v18, 5  ;;  %v13561_v14 = vshrl.u32 %v13160_v25, 16  ;;  %v26156_v42 = vld [vmem:[#allocation2 + $0x1c4] sm:$0x1] }
 0x38a   : > { %v6970_v10 = vsel %vm24807_vm12, %v19178_v7, %v6969_v12  ;;  %v6548_v29 = vsel %vm23998_vm4, %v6543_v51, %v6547_v40  ;;  %v6974_v4 = vsel %vm24807_vm12, %v19179_v50, %v6973_v6  ;;  %v13564_v38 = vshll.u32 %v13160_v25, 16  ;;  %v23340_v40 = vld [vmem:[#allocation2 + $0x24] sm:$0x1]  ;;  %v13166_v11 = vld [vmem:[#allocation2 + $0x1c8] sm:$0xf] }
 0x38b   : > { %v13553_v0 = vor.u32 %v13552_v61, %v13549_v45  ;;  %v19157_v55 = vcombine.low %v6534_v16, %v6548_v29  ;;  %v13545_v36 = vsel %vm23998_vm4, %v13540_v62, %v13544_v35  ;;  %v19218_v43 = vcombine.low %v6970_v10, %v6974_v4  ;;  %v23341_v7 = vld [vmem:[#allocation2 + $0x2c] sm:$0x1]  ;;  %v13938_v51 = vld [vmem:[#allocation2 + $0xa0] sm:$0xe]  ;;  %v13939_v29 = vld [vmem:[#allocation2 + $0xa8] sm:$0xe] }
 0x38c   : > { %v13563_v57 = vrot.slane %v13561_v14, 4  ;;  %v13566_v26 = vrot.slane %v13564_v38, 5  ;;  %v13570_v23 = vshll.u32 %v26138_v17, 16  ;;  %v13575_v20 = vshrl.u32 %v13162_v41, 16  ;;  %v26161_v50 = vld [vmem:[#allocation2 + $0x1cc] sm:$0x1] }
 0x38d   : > { %v13554_v49 = vrot.slane %v13553_v0, 4  ;;  %21269 = vmatmul.mubr.msk.bf16.gmra.mrb[60].mxu0 %vm2811_vm5, %v19157_v55  ;;  %v13578_v54 = vshll.u32 %v13162_v41, 16  ;;  %v13584_v46 = vshll.u32 %v26146_v31, 16  ;;  %v19180_v37 = vrot.slane %v6873_v3, 9  ;;  %v23144_v55 = vld [vmem:[%s27928_s6 + $0x128] sm:$0xff]  }
 0x38e   : > { %v6977_v5 = vrot.slane %v23340_v40, 5  ;;  %21280 = vmatprep.mubr.msk.bf16.mxu0 %vm2811_vm5, %v19218_v43  ;;  %v13567_v59 = vor.u32 %v13566_v26, %v13563_v57  ;;  %v13572_v35 = vrot.slane %v13570_v23, 5  ;;  %v13577_v45 = vrot.slane %v13575_v20, 4  ;;  %v6875_v26 = vld [vmem:[#allocation2 + $0x30] sm:$0xe] }
 0x38f   : > { %v13559_v15 = vsel %vm23998_vm4, %v13554_v49, %v13558_v63  ;;  %v13580_v52 = vrot.slane %v13578_v54, 5  ;;  %v13586_v21 = vrot.slane %v13584_v46, 5  ;;  %v19181_v18 = vrot.slane %v6874_v60, 9  ;;  %v23342_v60 = vld [vmem:[#allocation2 + $0xa4] sm:$0x1] }
 0x390   : > { %v19811_v16 = vcombine.low %v13545_v36, %v13559_v15  ;;  %v6978_v25 = vsel %vm24807_vm12, %v19180_v37, %v6977_v5  ;;  %v13568_v2 = vrot.slane %v13567_v59, 4  ;;  %v6981_v8 = vrot.slane %v23341_v7, 5  ;;  %v6876_v37 = vld [vmem:[#allocation2 + $0x38] sm:$0xe]  ;;  %v23343_v15 = vld [vmem:[#allocation2 + $0xac] sm:$0x1] }
 0x391   : > { %v13589_v12 = vshrl.u32 %v13164_v1, 16  ;;  %v13581_v61 = vor.u32 %v13580_v52, %v13577_v45  ;;  %v13592_v30 = vshll.u32 %v13164_v1, 16  ;;  %v13598_v6 = vshll.u32 %v26156_v42, 16  ;;  %v23344_v52 = vld [vmem:[#allocation2 + $0x34] sm:$0x1] }
 0x392   : > { %21745 = vmatmul.mubr.msk.bf16.gmra.mrb[12].mxu1 %vm2811_vm5, %v19811_v16  ;;  %v13603_v62 = vshrl.u32 %v13166_v11, 16  ;;  %v13573_v63 = vsel %vm23998_vm4, %v13568_v2, %v13572_v35  ;;  %v6982_v10 = vsel %vm24807_vm12, %v19181_v18, %v6981_v8  ;;  %v13606_v14 = vshll.u32 %v13166_v11, 16  ;;  %v6877_v35 = vld [vmem:[#allocation2 + $0x40] sm:$0xe]  ;;  %v23146_v2 = vld [vmem:[%s27928_s6 + $0x130] sm:$0xff]  }
 0x393   : > { %v13591_v41 = vrot.slane %v13589_v12, 4  ;;  %v13582_v0 = vrot.slane %v13581_v61, 4  ;;  %v19219_v4 = vcombine.low %v6978_v25, %v6982_v10  ;;  %v13594_v38 = vrot.slane %v13592_v30, 5  ;;  %v6878_v25 = vld [vmem:[#allocation2 + $0x48] sm:$0xe] }
 0x394   : > { %v13600_v3 = vrot.slane %v13598_v6, 5  ;;  %v13605_v36 = vrot.slane %v13603_v62, 4  ;;  %v13608_v43 = vrot.slane %v13606_v14, 5  ;;  %v13612_v57 = vshll.u32 %v26161_v50, 16  ;;  %v23345_v8 = vld [vmem:[#allocation2 + $0x3c] sm:$0x1] }
 0x395   : > { %v19834_v49 = vrot.slane %v13938_v51, 9  ;;  %v13587_v23 = vsel %vm23998_vm4, %v13582_v0, %v13586_v21  ;;  %21281 = vmatmul.mubr.msk.bf16.vlgmr.msra.gmra.mrb[32].mxu0 %vm2811_vm5, %v19219_v4  ;;  %v13595_v20 = vor.u32 %v13594_v38, %v13591_v41  ;;  %v14036_v54 = vrot.slane %v23342_v60, 5  ;;  %v13940_v51 = vld [vmem:[#allocation2 + $0xb0] sm:$0xe]  ;;  %v23346_v14 = vld [vmem:[#allocation2 + $0x44] sm:$0x1] }
 0x396   : > { %v19835_v46 = vrot.slane %v13939_v29, 9  ;;  %v19812_v40 = vcombine.low %v13573_v63, %v13587_v23  ;;  %v13609_v5 = vor.u32 %v13608_v43, %v13605_v36  ;;  %v13614_v1 = vrot.slane %v13612_v57, 5  ;;  %21313 = vmatpush3.bf16.msra.mxu0 %v25991_v47  ;;  %v13941_v63 = vld [vmem:[#allocation2 + $0xb8] sm:$0xe]  ;;  %v6879_v4 = vld [vmem:[#allocation2 + $0x60] sm:$0xe] }
 0x397   : > { %v14040_v59 = vrot.slane %v23343_v15, 5  ;;  %v13596_v45 = vrot.slane %v13595_v20, 4  ;;  %v14037_v11 = vsel %vm24807_vm12, %v19834_v49, %v14036_v54  ;;  %v19182_v16 = vrot.slane %v6875_v26, 9  ;;  %21314 = vmatprep.subr.bf16.mxu0 %v23144_v55  ;;  %v6880_v38 = vld [vmem:[#allocation2 + $0x68] sm:$0xe]  ;;  %v23148_v23 = vld [vmem:[%s27928_s6 + $0x138] sm:$0xff]  }
 0x398   : > { %v6985_v21 = vrot.slane %v23344_v52, 5  ;;  %21748 = vmatprep.mubr.msk.bf16.mxu1 %vm2811_vm5, %v19812_v40  ;;  %v13610_v18 = vrot.slane %v13609_v5, 4  ;;  %v19183_v47 = vrot.slane %v6876_v37, 9  ;;  %v6989_v12 = vrot.slane %v23345_v8, 5  ;;  %v23347_v43 = vld [vmem:[#allocation2 + $0x4c] sm:$0x1] }
 0x399   : > { %v14041_v7 = vsel %vm24807_vm12, %v19835_v46, %v14040_v59  ;;  %v13601_v61 = vsel %vm23998_vm4, %v13596_v45, %v13600_v3  ;;  %v19184_v62 = vrot.slane %v6877_v35, 9  ;;  %v6993_v29 = vrot.slane %v23346_v14, 5  ;;  %v6881_v26 = vld [vmem:[#allocation2 + $0x70] sm:$0xe]  ;;  %v23348_v60 = vld [vmem:[#allocation2 + $0xb4] sm:$0x1] }
 0x39a   : > { %v19874_v30 = vcombine.low %v14037_v11, %v14041_v7  ;;  %v6986_v6 = vsel %vm24807_vm12, %v19182_v16, %v6985_v21  ;;  %v13615_v10 = vsel %vm23998_vm4, %v13610_v18, %v13614_v1  ;;  %v6990_v41 = vsel %vm24807_vm12, %v19183_v47, %v6989_v12  ;;  %21315 = vmatpush3.bf16.msra.mxu0 %v23144_v55  ;;  %v23349_v37 = vld [vmem:[#allocation2 + $0xbc] sm:$0x1]  ;;  %v13942_v55 = vld [vmem:[#allocation2 + $0xc0] sm:$0xe]  ;;  %v23350_v15 = vld [vmem:[#allocation2 + $0x64] sm:$0x1] }
 0x39b   : > { %v19185_v0 = vrot.slane %v6878_v25, 9  ;;  %v19813_v36 = vcombine.low %v13601_v61, %v13615_v10  ;;  %v19220_v3 = vcombine.low %v6986_v6, %v6990_v41  ;;  %v6997_v57 = vrot.slane %v23347_v43, 5  ;;  %21316 = vmatprep.subr.bf16.mxu0 %v23146_v2  ;;  %v13943_v45 = vld [vmem:[#allocation2 + $0xc8] sm:$0xe]  ;;  %v23351_v21 = vld [vmem:[#allocation2 + $0x6c] sm:$0x1] }
 0x39c   : > { %v19836_v49 = vrot.slane %v13940_v51, 9  ;;  %v6994_v20 = vsel %vm24807_vm12, %v19184_v62, %v6993_v29  ;;  %v14044_v54 = vrot.slane %v23348_v60, 5  ;;  %v19837_v46 = vrot.slane %v13941_v63, 9  ;;  %v6882_v18 = vld [vmem:[#allocation2 + $0x78] sm:$0xe] }
 0x39d   : > { %v14048_v40 = vrot.slane %v23349_v37, 5  ;;  %21749 = vmatmul.mubr.msk.bf16.gmra.mrb[16].mxu1 %vm2811_vm5, %v19813_v36  ;;  %21284 = vmatprep.mubr.msk.bf16.mxu0 %vm2811_vm5, %v19220_v3  ;;  %v6998_v5 = vsel %vm24807_vm12, %v19185_v0, %v6997_v57  ;;  %v19186_v1 = vrot.slane %v6879_v4, 9  ;;  %v7001_v59 = vrot.slane %v23350_v15, 5  ;;  %v23352_v12 = vld [vmem:[#allocation2 + $0xc4] sm:$0x1] }
 0x39e   : > { %v19187_v35 = vrot.slane %v6880_v38, 9  ;;  %21760 = vmatprep.mubr.msk.bf16.mxu1 %vm2811_vm5, %v19874_v30  ;;  %v19221_v11 = vcombine.low %v6994_v20, %v6998_v5  ;;  %v14045_v16 = vsel %vm24807_vm12, %v19836_v49, %v14044_v54  ;;  %v7005_v25 = vrot.slane %v23351_v21, 5  ;;  %21317 = vmatpush3.bf16.msra.mxu0 %v23146_v2  ;;  %v13944_v61 = vld [vmem:[#allocation2 + $0xd0] sm:$0xe]  ;;  %v26211_v30 = vld [vmem:[%s27928_s6 + $0x140] sm:$0xff]  }
 0x39f   : > { %v14049_v52 = vsel %vm24807_vm12, %v19837_v46, %v14048_v40  ;;  %v7002_v47 = vsel %vm24807_vm12, %v19186_v1, %v7001_v59  ;;  %v19838_v8 = vrot.slane %v13942_v55, 9  ;;  %v14052_v51 = vrot.slane %v23352_v12, 5  ;;  %21318 = vmatprep.subr.bf16.mxu0 %v23148_v23  ;;  %v23353_v62 = vld [vmem:[#allocation2 + $0xcc] sm:$0x1]  ;;  %v13945_v41 = vld [vmem:[#allocation2 + $0xd8] sm:$0xe] }
 0x3a0   : > { %v19875_v7 = vcombine.low %v14045_v16, %v14049_v52  ;;  %21285 = vmatmul.mubr.msk.bf16.gmra.mrb[36].mxu0 %vm2811_vm5, %v19221_v11  ;;  %v7006_v6 = vsel %vm24807_vm12, %v19187_v35, %v7005_v25  ;;  %v19839_v2 = vrot.slane %v13943_v45, 9  ;;  %v14056_v63 = vrot.slane %v23353_v62, 5  ;;  %v23354_v0 = vld [vmem:[#allocation2 + $0x74] sm:$0x1]  ;;  %v6883_v36 = vld [vmem:[#allocation2 + $0x80] sm:$0xe] }
 0x3a1   : > { %v19188_v10 = vrot.slane %v6881_v26, 9  ;;  %v19222_v14 = vcombine.low %v7002_v47, %v7006_v6  ;;  %v14053_v29 = vsel %vm24807_vm12, %v19838_v8, %v14052_v51  ;;  %v7009_v4 = vrot.slane %v23354_v0, 5  ;;  %v23355_v43 = vld [vmem:[#allocation2 + $0x7c] sm:$0x1]  ;;  %v23356_v20 = vld [vmem:[#allocation2 + $0xd4] sm:$0x1] }
 0x3a2   : > { %v19189_v38 = vrot.slane %v6882_v18, 9  ;;  %v14057_v3 = vsel %vm24807_vm12, %v19839_v2, %v14056_v63  ;;  %v7013_v57 = vrot.slane %v23355_v43, 5  ;;  %v19840_v49 = vrot.slane %v13944_v61, 9  ;;  %v6884_v54 = vld [vmem:[#allocation2 + $0x88] sm:$0xe]  ;;  %21319 = vmatpush3.bf16.msra.mxu0 %v23148_v23 }
 0x3a3   : > { %v14060_v60 = vrot.slane %v23356_v20, 5  ;;  %21288 = vmatprep.mubr.msk.bf16.mxu0 %vm2811_vm5, %v19222_v14  ;;  %v19876_v26 = vcombine.low %v14053_v29, %v14057_v3  ;;  %v7010_v46 = vsel %vm24807_vm12, %v19188_v10, %v7009_v4  ;;  %v19841_v37 = vrot.slane %v13945_v41, 9  ;;  %v23357_v40 = vld [vmem:[#allocation2 + $0xdc] sm:$0x1]  ;;  %v13946_v5 = vld [vmem:[#allocation2 + $0xf0] sm:$0xe]  ;;  %21352 = vmatprep.subr.bf16.mxu0 %v26211_v30 }
 0x3a4   : > { %v14064_v55 = vrot.slane %v23357_v40, 5  ;;  %v23141_v1 = vld [vmem:[%s27928_s6 + $0x2a8] sm:$0xff]   ;;  %v7014_v15 = vsel %vm24807_vm12, %v19189_v38, %v7013_v57  ;;  %v19190_v59 = vrot.slane %v6883_v36, 9  ;;  %v23358_v35 = vld [vmem:[#allocation2 + $0x84] sm:$0x1]  ;;  %v19191_v25 = vrot.slane %v6884_v54, 9 }
 0x3a5   : > { %v26231_v23 = vsel %vm24807_vm12, %v19840_v49, %v14060_v60  ;;  %v7017_v45 = vrot.slane %v23358_v35, 5  ;;  %v13947_v11 = vld [vmem:[#allocation2 + $0xf8] sm:$0xe]  ;;  %v6885_v16 = vld [vmem:[#allocation2 + $0x90] sm:$0xe]  ;;  %21761 = vmatmul.mubr.msk.bf16.vlgmr.msra.gmra.mrb[20].mxu1 %vm2811_vm5, %v19875_v7  ;;  %v19223_v52 = vcombine.low %v7010_v46, %v7014_v15  ;;  %v19842_v61 = vrot.slane %v13946_v5, 9 }
 0x3a6   : > { %v14065_v21 = vsel %vm24807_vm12, %v19841_v37, %v14064_v55  ;;  %v23359_v18 = vld [vmem:[#allocation2 + $0x8c] sm:$0x1]  ;;  %v6886_v8 = vld [vmem:[#allocation2 + $0x98] sm:$0xe]  ;;  %21793 = vmatpush3.bf16.msra.mxu1 %v26032_v58  ;;  %21764 = vmatprep.mubr.msk.bf16.mxu1 %vm2811_vm5, %v19876_v26  ;;  %v23360_v6 = vld [vmem:[#allocation2 + $0xf4] sm:$0x1] }
 0x3a7   : > { %v7021_v47 = vrot.slane %v23359_v18, 5  ;;  %v19877_v12 = vcombine.low %v26231_v23, %v14065_v21  ;;  %v7018_v51 = vsel %vm24807_vm12, %v19190_v59, %v7017_v45  ;;  %v14068_v7 = vrot.slane %v23360_v6, 5  ;;  %v13948_v2 = vld [vmem:[#allocation2 + $0x100] sm:$0xe]  ;;  %v23361_v10 = vld [vmem:[#allocation2 + $0xfc] sm:$0x1]  ;;  %21794 = vmatprep.subr.bf16.mxu1 %v23141_v1 }
 0x3a8   : > { %v19843_v63 = vrot.slane %v13947_v11, 9  ;;  %v14072_v41 = vrot.slane %v23361_v10, 5  ;;  %v19192_v14 = vrot.slane %v6885_v16, 9  ;;  %v13949_v58 = vld [vmem:[#allocation2 + $0x108] sm:$0xe]  ;;  %v23142_v29 = vld [vmem:[%s27928_s6 + $0x2b0] sm:$0xff]   ;;  %21289 = vmatmul.mubr.msk.bf16.gmra.mrb[40].mxu0 %vm2811_vm5, %v19223_v52 }
 0x3a9   : > { %v7022_v62 = vsel %vm24807_vm12, %v19191_v25, %v7021_v47  ;;  %v14069_v4 = vsel %vm24807_vm12, %v19842_v61, %v14068_v7  ;;  %v23362_v38 = vld [vmem:[#allocation2 + $0x94] sm:$0x1]  ;;  %v19193_v3 = vrot.slane %v6886_v8, 9  ;;  %v6887_v43 = vld [vmem:[#allocation2 + $0xb0] sm:$0xe]  ;;  %v19844_v60 = vrot.slane %v13948_v2, 9 }
 0x3aa   : > { %v19224_v0 = vcombine.low %v7018_v51, %v7022_v62  ;;  %v7025_v36 = vrot.slane %v23362_v38, 5  ;;  %v14073_v57 = vsel %vm24807_vm12, %v19843_v63, %v14072_v41  ;;  %v23363_v49 = vld [vmem:[#allocation2 + $0x9c] sm:$0x1]  ;;  %v23364_v54 = vld [vmem:[#allocation2 + $0x104] sm:$0x1]  ;;  %v19845_v55 = vrot.slane %v13949_v58, 9  ;;  %21795 = vmatpush3.bf16.msra.mxu1 %v23141_v1 }
 0x3ab   : > { %v7029_v20 = vrot.slane %v23363_v49, 5  ;;  %v14076_v26 = vrot.slane %v23364_v54, 5  ;;  %v6888_v46 = vld [vmem:[#allocation2 + $0xb8] sm:$0xe]  ;;  %v19878_v37 = vcombine.low %v14069_v4, %v14073_v57  ;;  %v23365_v5 = vld [vmem:[#allocation2 + $0x10c] sm:$0x1]  ;;  %21796 = vmatprep.subr.bf16.mxu1 %v23142_v29 }
 0x3ac   : > { %21292 = vmatprep.mubr.msk.bf16.mxu0 %vm2811_vm5, %v19224_v0  ;;  %v7026_v40 = vsel %vm24807_vm12, %v19192_v14, %v7025_v36  ;;  %v14080_v15 = vrot.slane %v23365_v5, 5  ;;  %v13950_v23 = vld [vmem:[#allocation2 + $0x110] sm:$0xe]  ;;  %v6889_v59 = vld [vmem:[#allocation2 + $0xc0] sm:$0xe]  ;;  %v19194_v11 = vrot.slane %v6887_v43, 9 }
 0x3ad   : > { %v7030_v35 = vsel %vm24807_vm12, %v19193_v3, %v7029_v20  ;;  %v26258_v45 = vsel %vm24807_vm12, %v19844_v60, %v14076_v26  ;;  %v23366_v16 = vld [vmem:[#allocation2 + $0xb4] sm:$0x1]  ;;  %v13951_v21 = vld [vmem:[#allocation2 + $0x118] sm:$0xe]  ;;  %v19195_v47 = vrot.slane %v6888_v46, 9  ;;  %21765 = vmatmul.mubr.msk.bf16.gmra.mrb[24].mxu1 %vm2811_vm5, %v19877_v12  ;;  %v19846_v2 = vrot.slane %v13950_v23, 9 }
 0x3ae   : > { %v7033_v52 = vrot.slane %v23366_v16, 5  ;;  %v23145_v25 = vld [vmem:[%s27928_s6 + $0x2b8] sm:$0xff]   ;;  %v19225_v18 = vcombine.low %v7026_v40, %v7030_v35  ;;  %v26265_v1 = vsel %vm24807_vm12, %v19845_v55, %v14080_v15  ;;  %v6890_v61 = vld [vmem:[#allocation2 + $0xc8] sm:$0xe]  ;;  %v23368_v62 = vld [vmem:[#allocation2 + $0x114] sm:$0x1]  ;;  %21768 = vmatprep.mubr.msk.bf16.mxu1 %vm2811_vm5, %v19878_v37  ;;  %21797 = vmatpush3.bf16.msra.mxu1 %v23142_v29 }
 0x3af   : > { %v23367_v8 = vld [vmem:[#allocation2 + $0xbc] sm:$0x1]  ;;  %v19879_v6 = vcombine.low %v26258_v45, %v26265_v1  ;;  %v14084_v63 = vrot.slane %v23368_v62, 5  ;;  %v13952_v10 = vld [vmem:[#allocation2 + $0x120] sm:$0xe]  ;;  %v19847_v14 = vrot.slane %v13951_v21, 9  ;;  %21798 = vmatprep.subr.bf16.mxu1 %v23145_v25 }
 0x3b0   : > { %v7037_v51 = vrot.slane %v23367_v8, 5  ;;  %v7034_v7 = vsel %vm24807_vm12, %v19194_v11, %v7033_v52  ;;  %v23369_v58 = vld [vmem:[#allocation2 + $0x11c] sm:$0x1]  ;;  %v19196_v4 = vrot.slane %v6889_v59, 9  ;;  %v13953_v12 = vld [vmem:[#allocation2 + $0x128] sm:$0xe]  ;;  %21293 = vmatmul.mubr.msk.bf16.gmra.mrb[44].mxu0 %vm2811_vm5, %v19225_v18 }
 0x3b1   : > { %v14088_v0 = vrot.slane %v23369_v58, 5  ;;  %v14085_v36 = vsel %vm24807_vm12, %v19846_v2, %v14084_v63  ;;  %v23370_v3 = vld [vmem:[#allocation2 + $0xc4] sm:$0x1]  ;;  %v19197_v57 = vrot.slane %v6890_v61, 9  ;;  %v6891_v49 = vld [vmem:[#allocation2 + $0xd0] sm:$0xe] }
 0x3b2   : > { %v7038_v41 = vsel %vm24807_vm12, %v19195_v47, %v7037_v51  ;;  %v7041_v43 = vrot.slane %v23370_v3, 5  ;;  %v26280_v20 = vld [vmem:[%s27928_s6 + $0x2c0] sm:$0xff]   ;;  %v23371_v29 = vld [vmem:[#allocation2 + $0xcc] sm:$0x1]  ;;  %v19848_v26 = vrot.slane %v13952_v10, 9  ;;  %v19849_v15 = vrot.slane %v13953_v12, 9  ;;  %21799 = vmatpush3.bf16.msra.mxu1 %v23145_v25 }
 0x3b3   : > { %v19226_v38 = vcombine.low %v7034_v7, %v7038_v41  ;;  %v14089_v60 = vsel %vm24807_vm12, %v19847_v14, %v14088_v0  ;;  %v7045_v54 = vrot.slane %v23371_v29, 5  ;;  %v23372_v46 = vld [vmem:[#allocation2 + $0x124] sm:$0x1]  ;;  %v6892_v40 = vld [vmem:[#allocation2 + $0xd8] sm:$0xe]  ;;  %v19198_v16 = vrot.slane %v6891_v49, 9  ;;  %21832 = vmatprep.subr.bf16.mxu1 %v26280_v20 }
 0x3b4   : > { %v14092_v37 = vrot.slane %v23372_v46, 5  ;;  %v19880_v55 = vcombine.low %v14085_v36, %v14089_v60  ;;  %v7042_v5 = vsel %vm24807_vm12, %v19196_v4, %v7041_v43  ;;  %v23373_v23 = vld [vmem:[#allocation2 + $0x12c] sm:$0x1]  ;;  %v13954_v35 = vld [vmem:[#allocation2 + $0x140] sm:$0xe]  ;;  %v19199_v51 = vrot.slane %v6892_v40, 9 }
 0x3b5   : > { %21296 = vmatprep.mubr.msk.bf16.mxu0 %vm2811_vm5, %v19226_v38  ;;  %v14096_v59 = vrot.slane %v23373_v23, 5  ;;  %v7046_v45 = vsel %vm24807_vm12, %v19197_v57, %v7045_v54  ;;  %v23374_v52 = vld [vmem:[#allocation2 + $0xd4] sm:$0x1]  ;;  %v13955_v18 = vld [vmem:[#allocation2 + $0x148] sm:$0xe]  ;;  %v19850_v10 = vrot.slane %v13954_v35, 9  ;;  %21769 = vmatmul.mubr.msk.bf16.gmra.mrb[28].mxu1 %vm2811_vm5, %v19879_v6 }
 0x3b6   : > { %v26292_v11 = vsel %vm24807_vm12, %v19848_v26, %v14092_v37  ;;  %v7049_v21 = vrot.slane %v23374_v52, 5  ;;  %v6893_v1 = vld [vmem:[#allocation2 + $0xe0] sm:$0xe]  ;;  %v19227_v47 = vcombine.low %v7042_v5, %v7046_v45  ;;  %v23375_v61 = vld [vmem:[#allocation2 + $0xdc] sm:$0x1]  ;;  %v19851_v0 = vrot.slane %v13955_v18, 9  ;;  %21772 = vmatprep.mubr.msk.bf16.mxu1 %vm2811_vm5, %v19880_v55 }
 0x3b7   : > { %v26296_v8 = vsel %vm24807_vm12, %v19849_v15, %v14096_v59  ;;  %v7053_v7 = vrot.slane %v23375_v61, 5  ;;  %v6894_v2 = vld [vmem:[#allocation2 + $0xe8] sm:$0xe]  ;;  %v23376_v41 = vld [vmem:[#allocation2 + $0x144] sm:$0x1]  ;;  %v19200_v38 = vrot.slane %v6893_v1, 9 }
 0x3b8   : > { %v19881_v62 = vcombine.low %v26292_v11, %v26296_v8  ;;  %v7050_v63 = vsel %vm24807_vm12, %v19198_v16, %v7049_v21  ;;  %v14100_v25 = vrot.slane %v23376_v41, 5  ;;  %v13956_v14 = vld [vmem:[#allocation2 + $0x150] sm:$0xe]  ;;  %v23377_v4 = vld [vmem:[#allocation2 + $0x14c] sm:$0x1]  ;;  %v19201_v60 = vrot.slane %v6894_v2, 9  ;;  %21297 = vmatmul.mubr.msk.bf16.gmra.mrb[48].mxu0 %vm2811_vm5, %v19227_v47 }
 0x3b9   : > { %v7054_v58 = vsel %vm24807_vm12, %v19199_v51, %v7053_v7  ;;  %v14104_v12 = vrot.slane %v23377_v4, 5  ;;  %v13957_v36 = vld [vmem:[#allocation2 + $0x158] sm:$0xe]  ;;  %v23378_v57 = vld [vmem:[#allocation2 + $0xe4] sm:$0x1]  ;;  %v19852_v46 = vrot.slane %v13956_v14, 9 }
 0x3ba   : > { %v19228_v3 = vcombine.low %v7050_v63, %v7054_v58  ;;  %v14101_v43 = vsel %vm24807_vm12, %v19850_v10, %v14100_v25  ;;  %v7057_v49 = vrot.slane %v23378_v57, 5  ;;  %v6895_v29 = vld [vmem:[#allocation2 + $0x100] sm:$0xe]  ;;  %v23379_v54 = vld [vmem:[#allocation2 + $0xec] sm:$0x1]  ;;  %v19853_v23 = vrot.slane %v13957_v36, 9 }
 0x3bb   : > { %v14105_v6 = vsel %vm24807_vm12, %v19851_v0, %v14104_v12  ;;  %v7061_v26 = vrot.slane %v23379_v54, 5  ;;  %v23380_v37 = vld [vmem:[#allocation2 + $0x154] sm:$0x1]  ;;  %v6896_v5 = vld [vmem:[#allocation2 + $0x108] sm:$0xe]  ;;  %v19202_v52 = vrot.slane %v6895_v29, 9 }
 0x3bc   : > { %v14108_v40 = vrot.slane %v23380_v37, 5  ;;  %v19882_v55 = vcombine.low %v14101_v43, %v14105_v6  ;;  %v7058_v15 = vsel %vm24807_vm12, %v19200_v38, %v7057_v49  ;;  %v23381_v59 = vld [vmem:[#allocation2 + $0x15c] sm:$0x1]  ;;  %v13958_v45 = vld [vmem:[#allocation2 + $0x160] sm:$0xe]  ;;  %21300 = vmatprep.mubr.msk.bf16.mxu0 %vm2811_vm5, %v19228_v3  ;;  %v19203_v61 = vrot.slane %v6896_v5, 9 }
 0x3bd   : > { %v14112_v35 = vrot.slane %v23381_v59, 5  ;;  %v7062_v11 = vsel %vm24807_vm12, %v19201_v60, %v7061_v26  ;;  %v23382_v21 = vld [vmem:[#allocation2 + $0x104] sm:$0x1]  ;;  %v13959_v1 = vld [vmem:[#allocation2 + $0x168] sm:$0xe]  ;;  %v19854_v25 = vrot.slane %v13958_v45, 9  ;;  %21773 = vmatmul.mubr.msk.bf16.gmra.mrb[0].mxu1 %vm2811_vm5, %v19881_v62 }
 0x3be   : > { %v26319_v16 = vsel %vm24807_vm12, %v19852_v46, %v14108_v40  ;;  %v7065_v18 = vrot.slane %v23382_v21, 5  ;;  %v6897_v47 = vld [vmem:[#allocation2 + $0x110] sm:$0xe]  ;;  %v19229_v8 = vcombine.low %v7058_v15, %v7062_v11  ;;  %v23383_v7 = vld [vmem:[#allocation2 + $0x10c] sm:$0x1]  ;;  %v19855_v12 = vrot.slane %v13959_v1, 9  ;;  %21776 = vmatprep.mubr.msk.bf16.mxu1 %vm2811_vm5, %v19882_v55 }
 0x3bf   : > { %v14113_v51 = vsel %vm24807_vm12, %v19853_v23, %v14112_v35  ;;  %v7069_v2 = vrot.slane %v23383_v7, 5  ;;  %v6898_v63 = vld [vmem:[#allocation2 + $0x118] sm:$0xe]  ;;  %v23384_v14 = vld [vmem:[#allocation2 + $0x164] sm:$0x1]  ;;  %v14120_v38 = vrot.slane %v26052_v56, 5 }
 0x3c0   : > { %v19883_v10 = vcombine.low %v26319_v16, %v14113_v51  ;;  %v7066_v41 = vsel %vm24807_vm12, %v19202_v52, %v7065_v18  ;;  %v14116_v58 = vrot.slane %v23384_v14, 5  ;;  %v13960_v0 = vld [vmem:[#allocation2 + $0x170] sm:$0xe]  ;;  %v19204_v36 = vrot.slane %v6897_v47, 9  ;;  %v13961_v3 = vld [vmem:[#allocation2 + $0x178] sm:$0xe]  ;;  %21301 = vmatmul.mubr.msk.bf16.gmra.mrb[52].mxu0 %vm2811_vm5, %v19229_v8 }
 0x3c1   : > { %v7070_v4 = vsel %vm24807_vm12, %v19203_v61, %v7069_v2  ;;  %v7073_v49 = vrot.slane %v26054_v34, 5  ;;  %v19205_v60 = vrot.slane %v6898_v63, 9  ;;  %v6899_v29 = vld [vmem:[#allocation2 + $0x120] sm:$0xe]  ;;  %v14121_v6 = vsel %vm24807_vm12, %v19855_v12, %v14120_v38  ;;  %v6900_v46 = vld [vmem:[#allocation2 + $0x128] sm:$0xe] }
 0x3c2   : > { %v19230_v43 = vcombine.low %v7066_v41, %v7070_v4  ;;  %v14117_v57 = vsel %vm24807_vm12, %v19854_v25, %v14116_v58  ;;  %v7077_v54 = vrot.slane %v26067_v22, 5  ;;  %v19856_v56 = vrot.slane %v13960_v0, 9  ;;  %v13962_v5 = vld [vmem:[#allocation2 + $0x190] sm:$0xe]  ;;  %v13963_v23 = vld [vmem:[#allocation2 + $0x198] sm:$0xe] }
 0x3c3   : > { %v14124_v26 = vrot.slane %v26070_v28, 5  ;;  %v19884_v62 = vcombine.low %v14117_v57, %v14121_v6  ;;  %v7074_v37 = vsel %vm24807_vm12, %v19204_v36, %v7073_v49  ;;  %v19857_v40 = vrot.slane %v13961_v3, 9  ;;  %v6901_v59 = vld [vmem:[#allocation2 + $0x130] sm:$0xe]  ;;  %v6902_v16 = vld [vmem:[#allocation2 + $0x138] sm:$0xe] }
 0x3c4   : > { %v14128_v34 = vrot.slane %v26082_v13, 5  ;;  %v7078_v55 = vsel %vm24807_vm12, %v19205_v60, %v7077_v54  ;;  %v19206_v15 = vrot.slane %v6899_v29, 9  ;;  %v7081_v28 = vrot.slane %v26088_v39, 5  ;;  %21304 = vmatprep.mubr.msk.bf16.mxu0 %vm2811_vm5, %v19230_v43  ;;  %v13964_v1 = vld [vmem:[#allocation2 + $0x1a0] sm:$0xe] }
 0x3c5   : > { %v26346_v22 = vsel %vm24807_vm12, %v19856_v56, %v14124_v26  ;;  %v19231_v35 = vcombine.low %v7074_v37, %v7078_v55  ;;  %v19207_v45 = vrot.slane %v6900_v46, 9  ;;  %v7085_v11 = vrot.slane %v26093_v32, 5  ;;  %v13965_v7 = vld [vmem:[#allocation2 + $0x1a8] sm:$0xe]  ;;  %v13966_v25 = vld [vmem:[#allocation2 + $0x1b0] sm:$0xe]  ;;  %21777 = vmatmul.mubr.msk.bf16.gmra.mrb[4].mxu1 %vm2811_vm5, %v19883_v10 }
 0x3c6   : > { %v26352_v13 = vsel %vm24807_vm12, %v19857_v40, %v14128_v34  ;;  %v7082_v21 = vsel %vm24807_vm12, %v19206_v15, %v7081_v28  ;;  %v19858_v39 = vrot.slane %v13962_v5, 9  ;;  %v14132_v18 = vrot.slane %v26098_v53, 5  ;;  %v13967_v0 = vld [vmem:[#allocation2 + $0x1b8] sm:$0xe]  ;;  %21780 = vmatprep.mubr.msk.bf16.mxu1 %vm2811_vm5, %v19884_v62  ;;  %v13968_v36 = vld [vmem:[#allocation2 + $0x1c0] sm:$0xe] }
 0x3c7   : > { %v19885_v52 = vcombine.low %v26346_v22, %v26352_v13  ;;  %v7086_v47 = vsel %vm24807_vm12, %v19207_v45, %v7085_v11  ;;  %v19859_v8 = vrot.slane %v13963_v23, 9  ;;  %v14136_v51 = vrot.slane %v26105_v44, 5  ;;  %v13969_v43 = vld [vmem:[#allocation2 + $0x1c8] sm:$0xe]  ;;  %v7804_v57 = vld [vmem:[#allocation2 + $0x50] sm:$0xf] }
 0x3c8   : > { %v19208_v61 = vrot.slane %v6901_v59, 9  ;;  %v19232_v32 = vcombine.low %v7082_v21, %v7086_v47  ;;  %v14133_v2 = vsel %vm24807_vm12, %v19858_v39, %v14132_v18  ;;  %v7089_v63 = vrot.slane %v26108_v19, 5  ;;  %21305 = vmatmul.mubr.msk.bf16.gmra.mrb[56].mxu0 %vm2811_vm5, %v19231_v35  ;;  %v7805_v6 = vld [vmem:[#allocation2 + $0x54] sm:$0x1]  ;;  %v7806_v54 = vld [vmem:[#allocation2 + $0x58] sm:$0xf] }
 0x3c9   : > { %v19209_v41 = vrot.slane %v6902_v16, 9  ;;  %v14137_v53 = vsel %vm24807_vm12, %v19859_v8, %v14136_v51  ;;  %v7093_v14 = vrot.slane %v26125_v9, 5  ;;  %v19860_v58 = vrot.slane %v13964_v1, 9  ;;  %v7807_v62 = vld [vmem:[#allocation2 + $0x5c] sm:$0x1] }
 0x3ca   : > { %v14140_v44 = vrot.slane %v26119_v33, 5  ;;  %v19886_v4 = vcombine.low %v14133_v2, %v14137_v53  ;;  %v7090_v12 = vsel %vm24807_vm12, %v19208_v61, %v7089_v63  ;;  %v19861_v19 = vrot.slane %v13965_v7, 9  ;;  %21308 = vmatprep.mubr.msk.bf16.mxu0 %vm2811_vm5, %v19232_v32  ;;  %v7808_v37 = vld [vmem:[#allocation2 + $0x60] sm:$0xf]  ;;  %v7809_v55 = vld [vmem:[#allocation2 + $0x64] sm:$0x1] }
 0x3cb   : > { %v14144_v38 = vrot.slane %v26129_v27, 5  ;;  %v7094_v10 = vsel %vm24807_vm12, %v19209_v41, %v7093_v14  ;;  %v19862_v3 = vrot.slane %v13966_v25, 9  ;;  %v14148_v33 = vrot.slane %v26138_v17, 5  ;;  %v7810_v23 = vld [vmem:[#allocation2 + $0x68] sm:$0xf] }
 0x3cc   : > { %v26379_v9 = vsel %vm24807_vm12, %v19860_v58, %v14140_v44  ;;  %v19233_v49 = vcombine.low %v7090_v12, %v7094_v10  ;;  %v19863_v27 = vrot.slane %v13967_v0, 9  ;;  %v14152_v29 = vrot.slane %v26146_v31, 5  ;;  %v23147_v11 = vld [vmem:[#allocation2 + $0x50] ss:$8 sps:$4 sm:$0xff]   ;;  %v7813_v7 = vld [vmem:[#allocation2 + $0x74] sm:$0x1] }
 0x3cd   : > { %v26385_v60 = vsel %vm24807_vm12, %v19861_v19, %v14144_v38  ;;  %v26393_v17 = vsel %vm24807_vm12, %v19862_v3, %v14148_v33  ;;  %v19864_v26 = vrot.slane %v13968_v36, 9  ;;  %v14156_v46 = vrot.slane %v26156_v42, 5  ;;  %21781 = vmatmul.mubr.msk.bf16.gmra.mrb[8].mxu1 %vm2811_vm5, %v19885_v52  ;;  %v7812_v1 = vld [vmem:[#allocation2 + $0x70] sm:$0xf]  ;;  %v7814_v58 = vld [vmem:[#allocation2 + $0x78] sm:$0xf] }
 0x3ce   : > { %v19887_v56 = vcombine.low %v26379_v9, %v26385_v60  ;;  %v26398_v40 = vsel %vm24807_vm12, %v19863_v27, %v14152_v29  ;;  %v19865_v31 = vrot.slane %v13969_v43, 9  ;;  %v14160_v34 = vrot.slane %v26161_v50, 5  ;;  %v7811_v50 = vld [vmem:[#allocation2 + $0x6c] sm:$0x1]  ;;  %21784 = vmatprep.mubr.msk.bf16.mxu1 %vm2811_vm5, %v19886_v4  ;;  %v7815_v43 = vld [vmem:[#allocation2 + $0x7c] sm:$0x1] }
 0x3cf   : > { %v7869_v5 = vshrl.u32 %v7804_v57, 16  ;;  %v19888_v22 = vcombine.low %v26393_v17, %v26398_v40  ;;  %v26405_v15 = vsel %vm24807_vm12, %v19864_v26, %v14156_v46  ;;  %v7872_v28 = vshll.u32 %v7804_v57, 16  ;;  %v23149_v27 = vld [vmem:[#allocation2 + $0x60] ss:$8 sps:$4 sm:$0xff]   ;;  %v14872_v46 = vld [vmem:[#allocation2 + $0xac] sm:$0x1] }
 0x3d0   : > { %v7878_v42 = vshll.u32 %v7805_v6, 16  ;;  %v26409_v59 = vsel %vm24807_vm12, %v19865_v31, %v14160_v34  ;;  %v7883_v13 = vshrl.u32 %v7806_v54, 16  ;;  %v7886_v45 = vshll.u32 %v7806_v54, 16  ;;  %21309 = vmatmul.mubr.msk.bf16.gmra.mrb[60].mxu0 %vm2811_vm5, %v19233_v49  ;;  %v14871_v26 = vld [vmem:[#allocation2 + $0xa8] sm:$0xf] }
 0x3d1   : > { %v7871_v35 = vrot.slane %v7869_v5, 4  ;;  %v19889_v16 = vcombine.low %v26405_v15, %v26409_v59  ;;  %v7874_v21 = vrot.slane %v7872_v28, 5  ;;  %v7892_v18 = vshll.u32 %v7807_v62, 16  ;;  %21320 = vmatprep.mubr.msk.bf16.mxu0 %vm2811_vm5, %v23147_v11  ;;  %v23150_v62 = vld [vmem:[#allocation2 + $0x70] ss:$8 sps:$4 sm:$0xff]  }
 0x3d2   : > { %v7880_v39 = vrot.slane %v7878_v42, 5  ;;  %v7885_v47 = vrot.slane %v7883_v13, 4  ;;  %v7888_v8 = vrot.slane %v7886_v45, 5  ;;  %v7897_v51 = vshrl.u32 %v7808_v37, 16  ;;  %v14873_v5 = vld [vmem:[#allocation2 + $0xb0] sm:$0xf] }
 0x3d3   : > { %v7900_v61 = vshll.u32 %v7808_v37, 16  ;;  %v7875_v32 = vor.u32 %v7874_v21, %v7871_v35  ;;  %v7894_v2 = vrot.slane %v7892_v18, 5  ;;  %v7906_v63 = vshll.u32 %v7809_v55, 16  ;;  %v23179_v55 = vld [vmem:[%s27928_s6 + $0x148] sm:$0xff]   ;;  %v7817_v18 = vld [vmem:[#allocation2 + $0x84] sm:$0x1] }
 0x3d4   : > { %v7911_v41 = vshrl.u32 %v7810_v23, 16  ;;  %v7889_v52 = vor.u32 %v7888_v8, %v7885_v47  ;;  %v7899_v25 = vrot.slane %v7897_v51, 4  ;;  %v7914_v14 = vshll.u32 %v7810_v23, 16  ;;  %v7816_v23 = vld [vmem:[#allocation2 + $0x80] sm:$0xf] }
 0x3d5   : > { %v7902_v53 = vrot.slane %v7900_v61, 5  ;;  %v7876_v44 = vrot.slane %v7875_v32, 4  ;;  %v7908_v0 = vrot.slane %v7906_v63, 5  ;;  %v7920_v12 = vshll.u32 %v7811_v50, 16  ;;  %21785 = vmatmul.mubr.msk.bf16.gmra.mrb[12].mxu1 %vm2811_vm5, %v19887_v56  ;;  %v14874_v56 = vld [vmem:[#allocation2 + $0xb4] sm:$0x1] }
 0x3d6   : > { %v7913_v4 = vrot.slane %v7911_v41, 4  ;;  %v7890_v19 = vrot.slane %v7889_v52, 4  ;;  %v7916_v36 = vrot.slane %v7914_v14, 5  ;;  %v7925_v10 = vshrl.u32 %v7812_v1, 16  ;;  %21788 = vmatprep.mubr.msk.bf16.mxu1 %vm2811_vm5, %v19888_v22  ;;  %v7818_v61 = vld [vmem:[#allocation2 + $0x88] sm:$0xf] }
 0x3d7   : > { %v7903_v38 = vor.u32 %v7902_v53, %v7899_v25  ;;  %v7881_v3 = vsel %vm23998_vm4, %v7876_v44, %v7880_v39  ;;  %v7922_v33 = vrot.slane %v7920_v12, 5  ;;  %v7928_v57 = vshll.u32 %v7812_v1, 16  ;;  %v23183_v32 = vld [vmem:[%s27928_s6 + $0x150] sm:$0xff]   ;;  %v7819_v14 = vld [vmem:[#allocation2 + $0x8c] sm:$0x1] }
 0x3d8   : > { %v7934_v49 = vshll.u32 %v7813_v7, 16  ;;  %v7895_v29 = vsel %vm23998_vm4, %v7890_v19, %v7894_v2  ;;  %v7917_v54 = vor.u32 %v7916_v36, %v7913_v4  ;;  %v7927_v17 = vrot.slane %v7925_v10, 4  ;;  %21321 = vmatmul.mubr.msk.bf16.vlgmr.msra.gmra.mrb[32].mxu0 %vm2811_vm5, %v23149_v27  ;;  %v23151_v7 = vld [vmem:[#allocation2 + $0xa8] ss:$8 sps:$4 sm:$0xff]  }
 0x3d9   : > { %v7904_v6 = vrot.slane %v7903_v38, 4  ;;  %v26425_v37 = vcombine.low %v7881_v3, %v7895_v29  ;;  %v7930_v40 = vrot.slane %v7928_v57, 5  ;;  %v7939_v34 = vshrl.u32 %v7814_v58, 16  ;;  %21324 = vmatprep.mubr.msk.bf16.mxu0 %vm2811_vm5, %v23150_v62  ;;  %21353 = vmatpush3.bf16.msra.mxu0 %v26211_v30  ;;  %v23153_v44 = vld [vmem:[#allocation2 + $0x80] ss:$8 sps:$4 sm:$0xff]  }
 0x3da   : > { %v7936_v31 = vrot.slane %v7934_v49, 5  ;;  %v7918_v42 = vrot.slane %v7917_v54, 4  ;;  %v7942_v9 = vshll.u32 %v7814_v58, 16  ;;  %v7948_v60 = vshll.u32 %v7815_v43, 16  ;;  %21354 = vmatprep.subr.bf16.mxu0 %v23179_v55  ;;  %v23185_v43 = vld [vmem:[%s27928_s6 + $0x158] sm:$0xff]  }
 0x3db   : > { %v7909_v28 = vsel %vm23998_vm4, %v7904_v6, %v7908_v0  ;;  %v7931_v35 = vor.u32 %v7930_v40, %v7927_v17  ;;  %v7941_v13 = vrot.slane %v7939_v34, 4  ;;  %v14936_v45 = vshrl.u32 %v14871_v26, 16  ;;  %v23155_v27 = vld [vmem:[#allocation2 + $0xa0] ss:$8 sps:$4 sm:$0xff]  }
 0x3dc   : > { %v14939_v50 = vshll.u32 %v14871_v26, 16  ;;  %v7923_v22 = vsel %vm23998_vm4, %v7918_v42, %v7922_v33  ;;  %v7944_v11 = vrot.slane %v7942_v9, 5  ;;  %v7950_v21 = vrot.slane %v7948_v60, 5  ;;  %v14875_v33 = vld [vmem:[#allocation2 + $0xb8] sm:$0xf] }
 0x3dd   : > { %v14945_v39 = vshll.u32 %v14872_v46, 16  ;;  %v26438_v1 = vcombine.low %v7909_v28, %v7923_v22  ;;  %v7932_v47 = vrot.slane %v7931_v35, 4  ;;  %v14938_v8 = vrot.slane %v14936_v45, 4  ;;  %21789 = vmatmul.mubr.msk.bf16.gmra.mrb[16].mxu1 %vm2811_vm5, %v19889_v16  ;;  %21355 = vmatpush3.bf16.msra.mxu0 %v23179_v55  ;;  %v14876_v16 = vld [vmem:[#allocation2 + $0xbc] sm:$0x1] }
 0x3de   : > { %v14941_v51 = vrot.slane %v14939_v50, 5  ;;  %v7945_v2 = vor.u32 %v7944_v11, %v7941_v13  ;;  %v14950_v41 = vshrl.u32 %v14873_v5, 16  ;;  %v14953_v52 = vshll.u32 %v14873_v5, 16  ;;  %21800 = vmatprep.mubr.msk.bf16.mxu1 %vm2811_vm5, %v23151_v7  ;;  %21356 = vmatprep.subr.bf16.mxu0 %v23183_v32  ;;  %v14877_v26 = vld [vmem:[#allocation2 + $0xc0] sm:$0xf]  ;;  %v23161_v50 = vld [vmem:[%s27928_s6 + $0x2c8] sm:$0xff]  }
 0x3df   : > { %v14947_v63 = vrot.slane %v14945_v39, 5  ;;  %v7937_v25 = vsel %vm23998_vm4, %v7932_v47, %v7936_v31  ;;  %v14959_v53 = vshll.u32 %v14874_v56, 16  ;;  %v7953_v58 = vshrl.u32 %v7816_v23, 16  ;;  %v23154_v34 = vld [vmem:[#allocation2 + $0xb8] ss:$8 sps:$4 sm:$0xff]  }
 0x3e0   : > { %v14942_v30 = vor.u32 %v14941_v51, %v14938_v8  ;;  %v7946_v0 = vrot.slane %v7945_v2, 4  ;;  %v14952_v4 = vrot.slane %v14950_v41, 4  ;;  %v14955_v12 = vrot.slane %v14953_v52, 5  ;;  %21325 = vmatmul.mubr.msk.bf16.gmra.mrb[36].mxu0 %vm2811_vm5, %v23153_v44  ;;  %v14878_v55 = vld [vmem:[#allocation2 + $0xc4] sm:$0x1] }
 0x3e1   : > { %v7956_v19 = vshll.u32 %v7816_v23, 16  ;;  %v14961_v36 = vrot.slane %v14959_v53, 5  ;;  %v7955_v10 = vrot.slane %v7953_v58, 4  ;;  %v7962_v3 = vshll.u32 %v7817_v18, 16  ;;  %21328 = vmatprep.mubr.msk.bf16.mxu0 %vm2811_vm5, %v23155_v27  ;;  %21357 = vmatpush3.bf16.msra.mxu0 %v23183_v32  ;;  %v23156_v60 = vld [vmem:[#allocation2 + $0xc8] ss:$8 sps:$4 sm:$0xff]  }
 0x3e2   : > { %v14943_v38 = vrot.slane %v14942_v30, 4  ;;  %v7951_v57 = vsel %vm23998_vm4, %v7946_v0, %v7950_v21  ;;  %v14956_v49 = vor.u32 %v14955_v12, %v14952_v4  ;;  %v7967_v59 = vshrl.u32 %v7818_v61, 16  ;;  %21358 = vmatprep.subr.bf16.mxu0 %v23185_v43  ;;  %v7820_v45 = vld [vmem:[#allocation2 + $0xa0] sm:$0xf]  ;;  %v7822_v18 = vld [vmem:[#allocation2 + $0xa8] sm:$0xf] }
 0x3e3   : > { %v7958_v15 = vrot.slane %v7956_v19, 5  ;;  %v26455_v29 = vcombine.low %v7937_v25, %v7951_v57  ;;  %v7964_v54 = vrot.slane %v7962_v3, 5  ;;  %v7970_v17 = vshll.u32 %v7818_v61, 16  ;;  %v26471_v47 = vld [vmem:[%s27928_s6 + $0x160] sm:$0xff]   ;;  %v23157_v8 = vld [vmem:[#allocation2 + $0xb0] ss:$8 sps:$4 sm:$0xff]  }
 0x3e4   : > { %v14948_v6 = vsel %vm23998_vm4, %v14943_v38, %v14947_v63  ;;  %v14957_v46 = vrot.slane %v14956_v49, 4  ;;  %v7969_v40 = vrot.slane %v7967_v59, 4  ;;  %v7976_v31 = vshll.u32 %v7819_v14, 16  ;;  %v23159_v2 = vld [vmem:[#allocation2 + $0xc0] ss:$8 sps:$4 sm:$0xff]   ;;  %v23170_v4 = vld [vmem:[%s27928_s6 + $0x2d0] sm:$0xff]  }
 0x3e5   : > { %v7959_v62 = vor.u32 %v7958_v15, %v7955_v10  ;;  %v7972_v5 = vrot.slane %v7970_v17, 5  ;;  %v14964_v28 = vshrl.u32 %v14875_v33, 16  ;;  %v14967_v42 = vshll.u32 %v14875_v33, 16  ;;  %21801 = vmatmul.mubr.msk.bf16.vlgmr.msra.gmra.mrb[20].mxu1 %vm2811_vm5, %v23154_v34  ;;  %21359 = vmatpush3.bf16.msra.mxu0 %v23185_v43  ;;  %v7821_v25 = vld [vmem:[#allocation2 + $0xa4] sm:$0x1]  ;;  %v23181_v17 = vld [vmem:[%s27928_s6 + $0x2d8] sm:$0xff]  }
 0x3e6   : > { %v14973_v9 = vshll.u32 %v14876_v16, 16  ;;  %v14962_v56 = vsel %vm23998_vm4, %v14957_v46, %v14961_v36  ;;  %v7978_v35 = vrot.slane %v7976_v31, 5  ;;  %v14978_v13 = vshrl.u32 %v14877_v26, 16  ;;  %21833 = vmatpush3.bf16.msra.mxu1 %v26280_v20  ;;  %21804 = vmatprep.mubr.msk.bf16.mxu1 %vm2811_vm5, %v23156_v60  ;;  %v7823_v14 = vld [vmem:[#allocation2 + $0xac] sm:$0x1] }
 0x3e7   : > { %v7960_v23 = vrot.slane %v7959_v62, 4  ;;  %v26466_v22 = vcombine.low %v14948_v6, %v14962_v56  ;;  %v7973_v11 = vor.u32 %v7972_v5, %v7969_v40  ;;  %v14966_v21 = vrot.slane %v14964_v28, 4  ;;  %21834 = vmatprep.subr.bf16.mxu1 %v23161_v50  ;;  %v14879_v10 = vld [vmem:[#allocation2 + $0xc8] sm:$0xf]  ;;  %21392 = vmatprep.subr.bf16.mxu0 %v26471_v47  ;;  %v14880_v57 = vld [vmem:[#allocation2 + $0xcc] sm:$0x1] }
 0x3e8   : > { %v14969_v39 = vrot.slane %v14967_v42, 5  ;;  %v14975_v61 = vrot.slane %v14973_v9, 5  ;;  %v14980_v7 = vrot.slane %v14978_v13, 4  ;;  %v14981_v32 = vshll.u32 %v14877_v26, 16  ;;  %21329 = vmatmul.mubr.msk.bf16.gmra.mrb[40].mxu0 %vm2811_vm5, %v23157_v8  ;;  %v14881_v49 = vld [vmem:[#allocation2 + $0xd0] sm:$0xf] }
 0x3e9   : > { %v7965_v51 = vsel %vm23998_vm4, %v7960_v23, %v7964_v54  ;;  %v7974_v63 = vrot.slane %v7973_v11, 4  ;;  %v14987_v52 = vshll.u32 %v14878_v55, 16  ;;  %v7981_v30 = vshrl.u32 %v7820_v45, 16  ;;  %v23158_v15 = vld [vmem:[#allocation2 + $0xd8] ss:$8 sps:$4 sm:$0xff]   ;;  %21332 = vmatprep.mubr.msk.bf16.mxu0 %vm2811_vm5, %v23159_v2 }
 0x3ea   : > { %v14970_v41 = vor.u32 %v14969_v39, %v14966_v21  ;;  %v14983_v53 = vrot.slane %v14981_v32, 5  ;;  %v7984_v58 = vshll.u32 %v7820_v45, 16  ;;  %v7990_v44 = vshll.u32 %v7821_v25, 16  ;;  %v23160_v54 = vld [vmem:[#allocation2 + $0xf8] ss:$8 sps:$4 sm:$0xff]   ;;  %21835 = vmatpush3.bf16.msra.mxu1 %v23161_v50 }
 0x3eb   : > { %v7995_v0 = vshrl.u32 %v7822_v18, 16  ;;  %v7979_v12 = vsel %vm23998_vm4, %v7974_v63, %v7978_v35  ;;  %v14989_v38 = vrot.slane %v14987_v52, 5  ;;  %v7983_v36 = vrot.slane %v7981_v30, 4  ;;  %v14882_v62 = vld [vmem:[#allocation2 + $0xd4] sm:$0x1]  ;;  %21836 = vmatprep.subr.bf16.mxu1 %v23170_v4  ;;  %v26504_v8 = vld [vmem:[%s27928_s6 + $0x2e0] sm:$0xff]  }
 0x3ec   : > { %v14971_v19 = vrot.slane %v14970_v41, 4  ;;  %v26485_v20 = vcombine.low %v7965_v51, %v7979_v12  ;;  %v14984_v3 = vor.u32 %v14983_v53, %v14980_v7  ;;  %v7986_v33 = vrot.slane %v7984_v58, 5  ;;  %v7824_v42 = vld [vmem:[#allocation2 + $0xb0] sm:$0xf]  ;;  %v7825_v13 = vld [vmem:[#allocation2 + $0xb4] sm:$0x1] }
 0x3ed   : > { %v26487_v43 = vrot.slane %v7990_v44, 5  ;;  %v7997_v16 = vrot.slane %v7995_v0, 4  ;;  %v7998_v27 = vshll.u32 %v7822_v18, 16  ;;  %v8004_v6 = vshll.u32 %v7823_v14, 16  ;;  %v23162_v9 = vld [vmem:[#allocation2 + $0xd0] ss:$8 sps:$4 sm:$0xff]   ;;  %21805 = vmatmul.mubr.msk.bf16.gmra.mrb[24].mxu1 %vm2811_vm5, %v23158_v15 }
 0x3ee   : > { %v14976_v59 = vsel %vm23998_vm4, %v14971_v19, %v14975_v61  ;;  %v14985_v26 = vrot.slane %v14984_v3, 4  ;;  %v7987_v46 = vor.u32 %v7986_v33, %v7983_v36  ;;  %v14992_v40 = vshrl.u32 %v14879_v10, 16  ;;  %v23164_v45 = vld [vmem:[#allocation2 + $0xf0] ss:$8 sps:$4 sm:$0xff]   ;;  %21808 = vmatprep.mubr.msk.bf16.mxu1 %vm2811_vm5, %v23160_v54  ;;  %21837 = vmatpush3.bf16.msra.mxu1 %v23170_v4  ;;  %v7827_v2 = vld [vmem:[#allocation2 + $0xbc] sm:$0x1] }
 0x3ef   : > { %v14995_v31 = vshll.u32 %v14879_v10, 16  ;;  %v8000_v34 = vrot.slane %v7998_v27, 5  ;;  %v8006_v5 = vrot.slane %v8004_v6, 5  ;;  %v15001_v55 = vshll.u32 %v14880_v57, 16  ;;  %v7826_v18 = vld [vmem:[#allocation2 + $0xb8] sm:$0xf]  ;;  %21838 = vmatprep.subr.bf16.mxu1 %v23181_v17 }
 0x3f0   : > { %v15006_v28 = vshrl.u32 %v14881_v49, 16  ;;  %v14990_v60 = vsel %vm23998_vm4, %v14985_v26, %v14989_v38  ;;  %v7988_v56 = vrot.slane %v7987_v46, 4  ;;  %v14994_v23 = vrot.slane %v14992_v40, 4  ;;  %v14883_v30 = vld [vmem:[#allocation2 + $0xd8] sm:$0xf]  ;;  %21333 = vmatmul.mubr.msk.bf16.gmra.mrb[44].mxu0 %vm2811_vm5, %v23162_v9 }
 0x3f1   : > { %v14997_v35 = vrot.slane %v14995_v31, 5  ;;  %v26498_v50 = vcombine.low %v14976_v59, %v14990_v60  ;;  %v8001_v11 = vor.u32 %v8000_v34, %v7997_v16  ;;  %v15003_v21 = vrot.slane %v15001_v55, 5  ;;  %v14884_v0 = vld [vmem:[#allocation2 + $0xdc] sm:$0x1]  ;;  %21336 = vmatprep.mubr.msk.bf16.mxu0 %vm2811_vm5, %v23164_v45  ;;  %v14885_v36 = vld [vmem:[#allocation2 + $0xe0] sm:$0xf] }
 0x3f2   : > { %v15008_v39 = vrot.slane %v15006_v28, 4  ;;  %v7993_v51 = vsel %vm23998_vm4, %v7988_v56, %v26487_v43  ;;  %v15009_v7 = vshll.u32 %v14881_v49, 16  ;;  %v15015_v32 = vshll.u32 %v14882_v62, 16  ;;  %v23163_v10 = vld [vmem:[#allocation2 + $0x108] ss:$8 sps:$4 sm:$0xff]   ;;  %21839 = vmatpush3.bf16.msra.mxu1 %v23181_v17 }
 0x3f3   : > { %v14998_v61 = vor.u32 %v14997_v35, %v14994_v23  ;;  %v8002_v63 = vrot.slane %v8001_v11, 4  ;;  %v8009_v41 = vshrl.u32 %v7824_v42, 16  ;;  %v8012_v52 = vshll.u32 %v7824_v42, 16  ;;  %v23165_v3 = vld [vmem:[#allocation2 + $0x118] ss:$8 sps:$4 sm:$0xff]   ;;  %21872 = vmatprep.subr.bf16.mxu1 %v26504_v8 }
 0x3f4   : > { %v8018_v25 = vshll.u32 %v7825_v13, 16  ;;  %v15011_v14 = vrot.slane %v15009_v7, 5  ;;  %v15017_v58 = vrot.slane %v15015_v32, 5  ;;  %v8023_v44 = vshrl.u32 %v7826_v18, 16  ;;  %v14886_v27 = vld [vmem:[#allocation2 + $0xe4] sm:$0x1] }
 0x3f5   : > { %v14999_v53 = vrot.slane %v14998_v61, 4  ;;  %v8007_v4 = vsel %vm23998_vm4, %v8002_v63, %v8006_v5  ;;  %v8011_v12 = vrot.slane %v8009_v41, 4  ;;  %v8014_v19 = vrot.slane %v8012_v52, 5  ;;  %v23166_v54 = vld [vmem:[#allocation2 + $0x100] ss:$8 sps:$4 sm:$0xff]   ;;  %21809 = vmatmul.mubr.msk.bf16.gmra.mrb[28].mxu1 %vm2811_vm5, %v23163_v10 }
 0x3f6   : > { %v26513_v38 = vrot.slane %v8018_v25, 5  ;;  %v26515_v33 = vcombine.low %v7993_v51, %v8007_v4  ;;  %v15012_v57 = vor.u32 %v15011_v14, %v15008_v39  ;;  %v8025_v49 = vrot.slane %v8023_v44, 4  ;;  %v7828_v17 = vld [vmem:[#allocation2 + $0xc0] sm:$0xf]  ;;  %v7829_v28 = vld [vmem:[#allocation2 + $0xc4] sm:$0x1]  ;;  %21812 = vmatprep.mubr.msk.bf16.mxu1 %vm2811_vm5, %v23165_v3 }
 0x3f7   : > { %v15004_v43 = vsel %vm23998_vm4, %v14999_v53, %v15003_v21  ;;  %v8015_v15 = vor.u32 %v8014_v19, %v8011_v12  ;;  %v8026_v59 = vshll.u32 %v7826_v18, 16  ;;  %v8032_v16 = vshll.u32 %v7827_v2, 16  ;;  %v7830_v23 = vld [vmem:[#allocation2 + $0xc8] sm:$0xf]  ;;  %v23168_v35 = vld [vmem:[#allocation2 + $0x110] ss:$8 sps:$4 sm:$0xff]  }
 0x3f8   : > { %v15020_v6 = vshrl.u32 %v14883_v30, 16  ;;  %v15013_v26 = vrot.slane %v15012_v57, 4  ;;  %v15023_v46 = vshll.u32 %v14883_v30, 16  ;;  %v15029_v62 = vshll.u32 %v14884_v0, 16  ;;  %21337 = vmatmul.mubr.msk.bf16.gmra.mrb[48].mxu0 %vm2811_vm5, %v23166_v54  ;;  %v23167_v7 = vld [vmem:[#allocation2 + $0x128] ss:$8 sps:$4 sm:$0xff]  }
 0x3f9   : > { %v15034_v40 = vshrl.u32 %v14885_v36, 16  ;;  %v8016_v31 = vrot.slane %v8015_v15, 4  ;;  %v8028_v34 = vrot.slane %v8026_v59, 5  ;;  %v8034_v5 = vrot.slane %v8032_v16, 5  ;;  %21340 = vmatprep.mubr.msk.bf16.mxu0 %vm2811_vm5, %v23168_v35  ;;  %v7831_v63 = vld [vmem:[#allocation2 + $0xcc] sm:$0x1] }
 0x3fa   : > { %v15022_v55 = vrot.slane %v15020_v6, 4  ;;  %v15018_v42 = vsel %vm23998_vm4, %v15013_v26, %v15017_v58  ;;  %v15025_v9 = vrot.slane %v15023_v46, 5  ;;  %v15031_v60 = vrot.slane %v15029_v62, 5  ;;  %v23169_v25 = vld [vmem:[#allocation2 + $0x148] ss:$8 sps:$4 sm:$0xff]  }
 0x3fb   : > { %v15036_v56 = vrot.slane %v15034_v40, 4  ;;  %v26524_v13 = vcombine.low %v15004_v43, %v15018_v42  ;;  %v8021_v45 = vsel %vm23998_vm4, %v8016_v31, %v26513_v38  ;;  %v8029_v11 = vor.u32 %v8028_v34, %v8025_v49  ;;  %v14887_v44 = vld [vmem:[#allocation2 + $0xf8] sm:$0xf]  ;;  %v14888_v38 = vld [vmem:[#allocation2 + $0xfc] sm:$0x1] }
 0x3fc   : > { %v15037_v21 = vshll.u32 %v14885_v36, 16  ;;  %v15026_v39 = vor.u32 %v15025_v9, %v15022_v55  ;;  %v15043_v18 = vshll.u32 %v14886_v27, 16  ;;  %v8037_v51 = vshrl.u32 %v7828_v17, 16  ;;  %v14889_v36 = vld [vmem:[#allocation2 + $0x100] sm:$0xf] }
 0x3fd   : > { %v8040_v61 = vshll.u32 %v7828_v17, 16  ;;  %v8030_v32 = vrot.slane %v8029_v11, 4  ;;  %v8046_v41 = vshll.u32 %v7829_v28, 16  ;;  %v8051_v52 = vshrl.u32 %v7830_v23, 16  ;;  %v23171_v10 = vld [vmem:[#allocation2 + $0x120] ss:$8 sps:$4 sm:$0xff]   ;;  %21813 = vmatmul.mubr.msk.bf16.gmra.mrb[0].mxu1 %vm2811_vm5, %v23167_v7 }
 0x3fe   : > { %v15039_v2 = vrot.slane %v15037_v21, 5  ;;  %v15027_v30 = vrot.slane %v15026_v39, 4  ;;  %v15045_v53 = vrot.slane %v15043_v18, 5  ;;  %v8039_v14 = vrot.slane %v8037_v51, 4  ;;  %v23173_v15 = vld [vmem:[#allocation2 + $0x140] ss:$8 sps:$4 sm:$0xff]   ;;  %21816 = vmatprep.mubr.msk.bf16.mxu1 %vm2811_vm5, %v23169_v25 }
 0x3ff   : > { %v8042_v58 = vrot.slane %v8040_v61, 5  ;;  %v8035_v0 = vsel %vm23998_vm4, %v8030_v32, %v8034_v5  ;;  %v8048_v12 = vrot.slane %v8046_v41, 5  ;;  %v8053_v19 = vrot.slane %v8051_v52, 4  ;;  %v14890_v27 = vld [vmem:[#allocation2 + $0x104] sm:$0x1] }
 0x400   : > { %v15040_v4 = vor.u32 %v15039_v2, %v15036_v56  ;;  %v26533_v3 = vcombine.low %v8021_v45, %v8035_v0  ;;  %v15032_v43 = vsel %vm23998_vm4, %v15027_v30, %v15031_v60  ;;  %v8054_v49 = vshll.u32 %v7830_v23, 16  ;;  %v7832_v17 = vld [vmem:[#allocation2 + $0xd0] sm:$0xf]  ;;  %v7833_v28 = vld [vmem:[#allocation2 + $0xd4] sm:$0x1]  ;;  %21341 = vmatmul.mubr.msk.bf16.gmra.mrb[52].mxu0 %vm2811_vm5, %v23171_v10 }
 0x401   : > { %v8043_v57 = vor.u32 %v8042_v58, %v8039_v14  ;;  %v8060_v16 = vshll.u32 %v7831_v63, 16  ;;  %v15048_v6 = vshrl.u32 %v14887_v44, 16  ;;  %v15051_v54 = vshll.u32 %v14887_v44, 16  ;;  %v7834_v23 = vld [vmem:[#allocation2 + $0xd8] sm:$0xf]  ;;  %21344 = vmatprep.mubr.msk.bf16.mxu0 %vm2811_vm5, %v23173_v15 }
 0x402   : > { %v15041_v59 = vrot.slane %v15040_v4, 4  ;;  %v8056_v46 = vrot.slane %v8054_v49, 5  ;;  %v15057_v62 = vshll.u32 %v14888_v38, 16  ;;  %v15062_v40 = vshrl.u32 %v14889_v36, 16  ;;  %v23172_v35 = vld [vmem:[#allocation2 + $0x158] ss:$8 sps:$4 sm:$0xff]  }
 0x403   : > { %v8044_v26 = vrot.slane %v8043_v57, 4  ;;  %v8062_v34 = vrot.slane %v8060_v16, 5  ;;  %v15050_v5 = vrot.slane %v15048_v6, 4  ;;  %v15053_v55 = vrot.slane %v15051_v54, 5  ;;  %v7835_v18 = vld [vmem:[#allocation2 + $0xdc] sm:$0x1] }
 0x404   : > { %v15046_v31 = vsel %vm23998_vm4, %v15041_v59, %v15045_v53  ;;  %v8057_v60 = vor.u32 %v8056_v46, %v8053_v19  ;;  %v15059_v56 = vrot.slane %v15057_v62, 5  ;;  %v15064_v11 = vrot.slane %v15062_v40, 4  ;;  %v23174_v51 = vld [vmem:[#allocation2 + $0x168] ss:$8 sps:$4 sm:$0xff]   ;;  %v14892_v53 = vld [vmem:[#allocation2 + $0x10c] sm:$0x1] }
 0x405   : > { %v26542_v42 = vcombine.low %v15032_v43, %v15046_v31  ;;  %v8049_v9 = vsel %vm23998_vm4, %v8044_v26, %v8048_v12  ;;  %v15054_v45 = vor.u32 %v15053_v55, %v15050_v5  ;;  %v15065_v21 = vshll.u32 %v14889_v36, 16  ;;  %v14891_v63 = vld [vmem:[#allocation2 + $0x108] sm:$0xf]  ;;  %v14893_v4 = vld [vmem:[#allocation2 + $0x110] sm:$0xf]  ;;  %21817 = vmatmul.mubr.msk.bf16.gmra.mrb[4].mxu1 %vm2811_vm5, %v23172_v35 }
 0x406   : > { %v15071_v39 = vshll.u32 %v14890_v27, 16  ;;  %v8058_v61 = vrot.slane %v8057_v60, 4  ;;  %v8065_v7 = vshrl.u32 %v7832_v17, 16  ;;  %v8068_v32 = vshll.u32 %v7832_v17, 16  ;;  %v23175_v12 = vld [vmem:[#allocation2 + $0x150] ss:$8 sps:$4 sm:$0xff]   ;;  %21820 = vmatprep.mubr.msk.bf16.mxu1 %vm2811_vm5, %v23174_v51 }
 0x407   : > { %v8074_v2 = vshll.u32 %v7833_v28, 16  ;;  %v15055_v41 = vrot.slane %v15054_v45, 4  ;;  %v15067_v52 = vrot.slane %v15065_v21, 5  ;;  %v8079_v30 = vshrl.u32 %v7834_v23, 16  ;;  %v23178_v43 = vld [vmem:[#allocation2 + $0x160] ss:$8 sps:$4 sm:$0xff]  }
 0x408   : > { %v15073_v25 = vrot.slane %v15071_v39, 5  ;;  %v8063_v14 = vsel %vm23998_vm4, %v8058_v61, %v8062_v34  ;;  %v8067_v58 = vrot.slane %v8065_v7, 4  ;;  %v8070_v44 = vrot.slane %v8068_v32, 5  ;;  %v14894_v27 = vld [vmem:[#allocation2 + $0x114] sm:$0x1]  ;;  %21345 = vmatmul.mubr.msk.bf16.gmra.mrb[56].mxu0 %vm2811_vm5, %v23175_v12 }
 0x409   : > { %v26549_v0 = vrot.slane %v8074_v2, 5  ;;  %v26552_v19 = vcombine.low %v8049_v9, %v8063_v14  ;;  %v15060_v38 = vsel %vm23998_vm4, %v15055_v41, %v15059_v56  ;;  %v15068_v36 = vor.u32 %v15067_v52, %v15064_v11  ;;  %v23180_v46 = vld [vmem:[#allocation2 + $0x198] ss:$8 sps:$4 sm:$0xff]   ;;  %v7836_v34 = vld [vmem:[#allocation2 + $0xf0] sm:$0xf]  ;;  %21348 = vmatprep.mubr.msk.bf16.mxu0 %vm2811_vm5, %v23178_v43 }
 0x40a   : > { %v8081_v10 = vrot.slane %v8079_v30, 4  ;;  %v8071_v57 = vor.u32 %v8070_v44, %v8067_v58  ;;  %v8082_v49 = vshll.u32 %v7834_v23, 16  ;;  %v8088_v15 = vshll.u32 %v7835_v18, 16  ;;  %v23177_v5 = vld [vmem:[#allocation2 + $0x178] ss:$8 sps:$4 sm:$0xff]  }
 0x40b   : > { %v15076_v59 = vshrl.u32 %v14891_v63, 16  ;;  %v15069_v16 = vrot.slane %v15068_v36, 4  ;;  %v15079_v6 = vshll.u32 %v14891_v63, 16  ;;  %v15085_v54 = vshll.u32 %v14892_v53, 16  ;;  %v7838_v56 = vld [vmem:[#allocation2 + $0xf8] sm:$0xf] }
 0x40c   : > { %v15090_v26 = vshrl.u32 %v14893_v4, 16  ;;  %v8072_v62 = vrot.slane %v8071_v57, 4  ;;  %v8084_v40 = vrot.slane %v8082_v49, 5  ;;  %v8090_v17 = vrot.slane %v8088_v15, 5  ;;  %v7837_v21 = vld [vmem:[#allocation2 + $0xf4] sm:$0x1] }
 0x40d   : > { %v15078_v31 = vrot.slane %v15076_v59, 4  ;;  %v15074_v55 = vsel %vm23998_vm4, %v15069_v16, %v15073_v25  ;;  %v15081_v28 = vrot.slane %v15079_v6, 5  ;;  %v15087_v9 = vrot.slane %v15085_v54, 5  ;;  %v7839_v51 = vld [vmem:[#allocation2 + $0xfc] sm:$0x1]  ;;  %21821 = vmatmul.mubr.msk.bf16.gmra.mrb[8].mxu1 %vm2811_vm5, %v23177_v5 }
 0x40e   : > { %v15092_v60 = vrot.slane %v15090_v26, 4  ;;  %v26561_v23 = vcombine.low %v15060_v38, %v15074_v55  ;;  %v8077_v35 = vsel %vm23998_vm4, %v8072_v62, %v26549_v0  ;;  %v8085_v45 = vor.u32 %v8084_v40, %v8081_v10  ;;  %v23182_v32 = vld [vmem:[#allocation2 + $0x170] ss:$8 sps:$4 sm:$0xff]   ;;  %21824 = vmatprep.mubr.msk.bf16.mxu1 %vm2811_vm5, %v23180_v46  ;;  %v14896_v38 = vld [vmem:[#allocation2 + $0x11c] sm:$0x1] }
 0x40f   : > { %v15093_v11 = vshll.u32 %v14893_v4, 16  ;;  %v15082_v39 = vor.u32 %v15081_v28, %v15078_v31  ;;  %v15099_v18 = vshll.u32 %v14894_v27, 16  ;;  %v8093_v61 = vshrl.u32 %v7836_v34, 16  ;;  %v14895_v58 = vld [vmem:[#allocation2 + $0x118] sm:$0xf] }
 0x410   : > { %v8096_v7 = vshll.u32 %v7836_v34, 16  ;;  %v8086_v2 = vrot.slane %v8085_v45, 4  ;;  %v8102_v41 = vshll.u32 %v7837_v21, 16  ;;  %v8107_v52 = vshrl.u32 %v7838_v56, 16  ;;  %v14897_v36 = vld [vmem:[#allocation2 + $0x120] sm:$0xf]  ;;  %21349 = vmatmul.mubr.msk.bf16.gmra.mrb[60].mxu0 %vm2811_vm5, %v23182_v32 }
 0x411   : > { %v15095_v63 = vrot.slane %v15093_v11, 5  ;;  %v15083_v25 = vrot.slane %v15082_v39, 4  ;;  %v15101_v30 = vrot.slane %v15099_v18, 5  ;;  %v8095_v53 = vrot.slane %v8093_v61, 4  ;;  %v23184_v10 = vld [vmem:[#allocation2 + $0x1a8] ss:$8 sps:$4 sm:$0xff]   ;;  %21360 = vmatprep.mubr.msk.bf16.mxu0 %vm2811_vm5, %v26425_v37 }
 0x412   : > { %v8098_v14 = vrot.slane %v8096_v7, 5  ;;  %v8091_v44 = vsel %vm23998_vm4, %v8086_v2, %v8090_v17  ;;  %v8104_v4 = vrot.slane %v8102_v41, 5  ;;  %v8109_v12 = vrot.slane %v8107_v52, 4  ;;  %v23186_v59 = vld [vmem:[#allocation2 + $0x1b8] ss:$8 sps:$4 sm:$0xff]  }
 0x413   : > { %v15096_v0 = vor.u32 %v15095_v63, %v15092_v60  ;;  %v26570_v43 = vcombine.low %v8077_v35, %v8091_v44  ;;  %v15088_v57 = vsel %vm23998_vm4, %v15083_v25, %v15087_v9  ;;  %v8110_v15 = vshll.u32 %v7838_v56, 16  ;;  %v14898_v6 = vld [vmem:[#allocation2 + $0x124] sm:$0x1]  ;;  %v7840_v31 = vld [vmem:[#allocation2 + $0x100] sm:$0xf] }
 0x414   : > { %v8099_v49 = vor.u32 %v8098_v14, %v8095_v53  ;;  %v8116_v27 = vshll.u32 %v7839_v51, 16  ;;  %v15104_v54 = vshrl.u32 %v14895_v58, 16  ;;  %v15107_v26 = vshll.u32 %v14895_v58, 16  ;;  %v7841_v9 = vld [vmem:[#allocation2 + $0x104] sm:$0x1]  ;;  %v23192_v14 = vld [vmem:[%s27928_s6 + $0x168] sm:$0xff]  }
 0x415   : > { %v15097_v16 = vrot.slane %v15096_v0, 4  ;;  %v8112_v62 = vrot.slane %v8110_v15, 5  ;;  %v15113_v40 = vshll.u32 %v14896_v38, 16  ;;  %v15118_v17 = vshrl.u32 %v14897_v36, 16  ;;  %v7842_v37 = vld [vmem:[#allocation2 + $0x108] sm:$0xf]  ;;  %21825 = vmatmul.mubr.msk.bf16.gmra.mrb[12].mxu1 %vm2811_vm5, %v23184_v10 }
 0x416   : > { %v8100_v46 = vrot.slane %v8099_v49, 4  ;;  %v8118_v5 = vrot.slane %v8116_v27, 5  ;;  %v15106_v55 = vrot.slane %v15104_v54, 4  ;;  %v15109_v28 = vrot.slane %v15107_v26, 5  ;;  %v7843_v51 = vld [vmem:[#allocation2 + $0x10c] sm:$0x1]  ;;  %21828 = vmatprep.mubr.msk.bf16.mxu1 %vm2811_vm5, %v23186_v59 }
 0x417   : > { %v15102_v34 = vsel %vm23998_vm4, %v15097_v16, %v15101_v30  ;;  %v8113_v35 = vor.u32 %v8112_v62, %v8109_v12  ;;  %v15115_v45 = vrot.slane %v15113_v40, 5  ;;  %v15120_v21 = vrot.slane %v15118_v17, 4  ;;  %v14899_v61 = vld [vmem:[#allocation2 + $0x128] sm:$0xf]  ;;  %v14900_v41 = vld [vmem:[#allocation2 + $0x12c] sm:$0x1] }
 0x418   : > { %v26579_v60 = vcombine.low %v15088_v57, %v15102_v34  ;;  %v8105_v56 = vsel %vm23998_vm4, %v8100_v46, %v8104_v4  ;;  %v15110_v11 = vor.u32 %v15109_v28, %v15106_v55  ;;  %v15121_v39 = vshll.u32 %v14897_v36, 16  ;;  %v14901_v12 = vld [vmem:[#allocation2 + $0x130] sm:$0xf]  ;;  %21361 = vmatmul.mubr.msk.bf16.vlgmr.msra.gmra.mrb[32].mxu0 %vm2811_vm5, %v26438_v1  ;;  %v14902_v27 = vld [vmem:[#allocation2 + $0x134] sm:$0x1] }
 0x419   : > { %v15127_v18 = vshll.u32 %v14898_v6, 16  ;;  %v8114_v7 = vrot.slane %v8113_v35, 4  ;;  %v8121_v32 = vshrl.u32 %v7840_v31, 16  ;;  %v8124_v2 = vshll.u32 %v7840_v31, 16  ;;  %v23187_v38 = vld [vmem:[#allocation2 + $0x1c8] ss:$8 sps:$4 sm:$0xff]   ;;  %21364 = vmatprep.mubr.msk.bf16.mxu0 %vm2811_vm5, %v26455_v29  ;;  %21393 = vmatpush3.bf16.msra.mxu0 %v26471_v47 }
 0x41a   : > { %v8130_v63 = vshll.u32 %v7841_v9, 16  ;;  %v15111_v52 = vrot.slane %v15110_v11, 4  ;;  %v15123_v25 = vrot.slane %v15121_v39, 5  ;;  %v8135_v53 = vshrl.u32 %v7842_v37, 16  ;;  %v7844_v54 = vld [vmem:[#allocation2 + $0x110] sm:$0xf]  ;;  %21394 = vmatprep.subr.bf16.mxu0 %v23192_v14 }
 0x41b   : > { %v15129_v30 = vrot.slane %v15127_v18, 5  ;;  %v8119_v58 = vsel %vm23998_vm4, %v8114_v7, %v8118_v5  ;;  %v8123_v44 = vrot.slane %v8121_v32, 4  ;;  %v8126_v0 = vrot.slane %v8124_v2, 5  ;;  %v7845_v40 = vld [vmem:[#allocation2 + $0x114] sm:$0x1]  ;;  %v23195_v7 = vld [vmem:[%s27928_s6 + $0x178] sm:$0xff]  }
 0x41c   : > { %v26590_v4 = vrot.slane %v8130_v63, 5  ;;  %v26594_v36 = vcombine.low %v8105_v56, %v8119_v58  ;;  %v15116_v10 = vsel %vm23998_vm4, %v15111_v52, %v15115_v45  ;;  %v15124_v57 = vor.u32 %v15123_v25, %v15120_v21  ;;  %v23194_v17 = vld [vmem:[%s27928_s6 + $0x170] sm:$0xff]   ;;  %v7846_v55 = vld [vmem:[#allocation2 + $0x118] sm:$0xf]  ;;  %v7847_v18 = vld [vmem:[#allocation2 + $0x11c] sm:$0x1] }
 0x41d   : > { %v8137_v49 = vrot.slane %v8135_v53, 4  ;;  %v8127_v15 = vor.u32 %v8126_v0, %v8123_v44  ;;  %v8138_v59 = vshll.u32 %v7842_v37, 16  ;;  %v8144_v16 = vshll.u32 %v7843_v51, 16  ;;  %21829 = vmatmul.mubr.msk.bf16.gmra.mrb[16].mxu1 %vm2811_vm5, %v23187_v38  ;;  %21395 = vmatpush3.bf16.msra.mxu0 %v23192_v14  ;;  %v14903_v52 = vld [vmem:[#allocation2 + $0x148] sm:$0xf] }
 0x41e   : > { %v15132_v6 = vshrl.u32 %v14899_v61, 16  ;;  %v15125_v1 = vrot.slane %v15124_v57, 4  ;;  %v15135_v26 = vshll.u32 %v14899_v61, 16  ;;  %v15141_v46 = vshll.u32 %v14900_v41, 16  ;;  %21840 = vmatprep.mubr.msk.bf16.mxu1 %vm2811_vm5, %v26466_v22  ;;  %21396 = vmatprep.subr.bf16.mxu0 %v23194_v17  ;;  %v14904_v14 = vld [vmem:[#allocation2 + $0x14c] sm:$0x1] }
 0x41f   : > { %v15146_v62 = vshrl.u32 %v14901_v12, 16  ;;  %v8128_v31 = vrot.slane %v8127_v15, 4  ;;  %v8140_v29 = vrot.slane %v8138_v59, 5  ;;  %v8146_v34 = vrot.slane %v8144_v16, 5 }
 0x420   : > { %v15134_v5 = vrot.slane %v15132_v6, 4  ;;  %v15130_v28 = vsel %vm23998_vm4, %v15125_v1, %v15129_v30  ;;  %v15137_v9 = vrot.slane %v15135_v26, 5  ;;  %v15143_v47 = vrot.slane %v15141_v46, 5  ;;  %21365 = vmatmul.mubr.msk.bf16.gmra.mrb[36].mxu0 %vm2811_vm5, %v26485_v20  ;;  %v23189_v20 = vld [vmem:[%s27928_s6 + $0x2e8] sm:$0xff]   ;;  %v7848_v46 = vld [vmem:[#allocation2 + $0x120] sm:$0xf] }
 0x421   : > { %v15148_v56 = vrot.slane %v15146_v62, 4  ;;  %v26607_v35 = vcombine.low %v15116_v10, %v15130_v28  ;;  %v8133_v45 = vsel %vm23998_vm4, %v8128_v31, %v26590_v4  ;;  %v8141_v37 = vor.u32 %v8140_v29, %v8137_v49  ;;  %21368 = vmatprep.mubr.msk.bf16.mxu0 %vm2811_vm5, %v26515_v33  ;;  %21397 = vmatpush3.bf16.msra.mxu0 %v23194_v17  ;;  %v14906_v33 = vld [vmem:[#allocation2 + $0x154] sm:$0x1]  ;;  %v7849_v29 = vld [vmem:[#allocation2 + $0x124] sm:$0x1] }
 0x422   : > { %v15149_v11 = vshll.u32 %v14901_v12, 16  ;;  %v15138_v21 = vor.u32 %v15137_v9, %v15134_v5  ;;  %v15155_v39 = vshll.u32 %v14902_v27, 16  ;;  %v8149_v51 = vshrl.u32 %v7844_v54, 16  ;;  %v14905_v12 = vld [vmem:[#allocation2 + $0x150] sm:$0xf]  ;;  %21398 = vmatprep.subr.bf16.mxu0 %v23195_v7 }
 0x423   : > { %v8152_v61 = vshll.u32 %v7844_v54, 16  ;;  %v8142_v32 = vrot.slane %v8141_v37, 4  ;;  %v8158_v63 = vshll.u32 %v7845_v40, 16  ;;  %v8163_v41 = vshrl.u32 %v7846_v55, 16  ;;  %v7850_v28 = vld [vmem:[#allocation2 + $0x128] sm:$0xf] }
 0x424   : > { %v15151_v2 = vrot.slane %v15149_v11, 5  ;;  %v15139_v25 = vrot.slane %v15138_v21, 4  ;;  %v15157_v22 = vrot.slane %v15155_v39, 5  ;;  %v8151_v30 = vrot.slane %v8149_v51, 4  ;;  %v7851_v37 = vld [vmem:[#allocation2 + $0x12c] sm:$0x1] }
 0x425   : > { %v8154_v53 = vrot.slane %v8152_v61, 5  ;;  %v8147_v58 = vsel %vm23998_vm4, %v8142_v32, %v8146_v34  ;;  %v8160_v0 = vrot.slane %v8158_v63, 5  ;;  %v8165_v4 = vrot.slane %v8163_v41, 4  ;;  %21841 = vmatmul.mubr.msk.bf16.vlgmr.msra.gmra.mrb[20].mxu1 %vm2811_vm5, %v26498_v50  ;;  %21399 = vmatpush3.bf16.msra.mxu0 %v23195_v7  ;;  %v14907_v51 = vld [vmem:[#allocation2 + $0x158] sm:$0xf] }
 0x426   : > { %v15152_v44 = vor.u32 %v15151_v2, %v15148_v56  ;;  %v26626_v38 = vcombine.low %v8133_v45, %v8147_v58  ;;  %v15144_v10 = vsel %vm23998_vm4, %v15139_v25, %v15143_v47  ;;  %v8166_v49 = vshll.u32 %v7846_v55, 16  ;;  %21873 = vmatpush3.bf16.msra.mxu1 %v26504_v8  ;;  %21844 = vmatprep.mubr.msk.bf16.mxu1 %vm2811_vm5, %v26524_v13  ;;  %v23190_v8 = vld [vmem:[%s27928_s6 + $0x2f0] sm:$0xff]   ;;  %v26647_v13 = vld [vmem:[%s27928_s6 + $0x180] sm:$0xff]   ;;  %v14908_v63 = vld [vmem:[#allocation2 + $0x15c] sm:$0x1] }
 0x427   : > { %v8155_v57 = vor.u32 %v8154_v53, %v8151_v30  ;;  %v8172_v59 = vshll.u32 %v7847_v18, 16  ;;  %v15160_v16 = vshrl.u32 %v14903_v52, 16  ;;  %v15163_v27 = vshll.u32 %v14903_v52, 16  ;;  %21874 = vmatprep.subr.bf16.mxu1 %v23189_v20  ;;  %21432 = vmatprep.subr.bf16.mxu0 %v26647_v13  ;;  %v23193_v58 = vld [vmem:[%s27928_s6 + $0x2f8] sm:$0xff]  }
 0x428   : > { %v15153_v15 = vrot.slane %v15152_v44, 4  ;;  %v8168_v54 = vrot.slane %v8166_v49, 5  ;;  %v15169_v1 = vshll.u32 %v14904_v14, 16  ;;  %v15174_v26 = vshrl.u32 %v14905_v12, 16  ;;  %21369 = vmatmul.mubr.msk.bf16.gmra.mrb[40].mxu0 %vm2811_vm5, %v26533_v3 }
 0x429   : > { %v8156_v6 = vrot.slane %v8155_v57, 4  ;;  %v8174_v40 = vrot.slane %v8172_v59, 5  ;;  %v15162_v17 = vrot.slane %v15160_v16, 4  ;;  %v15165_v31 = vrot.slane %v15163_v27, 5  ;;  %21372 = vmatprep.mubr.msk.bf16.mxu0 %vm2811_vm5, %v26552_v19 }
 0x42a   : > { %v15158_v62 = vsel %vm23998_vm4, %v15153_v15, %v15157_v22  ;;  %v8169_v55 = vor.u32 %v8168_v54, %v8165_v4  ;;  %v15171_v50 = vrot.slane %v15169_v1, 5  ;;  %v15176_v47 = vrot.slane %v15174_v26, 4  ;;  %21875 = vmatpush3.bf16.msra.mxu1 %v23189_v20  ;;  %v14909_v22 = vld [vmem:[#allocation2 + $0x160] sm:$0xf] }
 0x42b   : > { %v26637_v34 = vcombine.low %v15144_v10, %v15158_v62  ;;  %v8161_v5 = vsel %vm23998_vm4, %v8156_v6, %v8160_v0  ;;  %v15166_v9 = vor.u32 %v15165_v31, %v15162_v17  ;;  %v15177_v56 = vshll.u32 %v14905_v12, 16  ;;  %21876 = vmatprep.subr.bf16.mxu1 %v23190_v8  ;;  %v14910_v12 = vld [vmem:[#allocation2 + $0x164] sm:$0x1]  ;;  %v7852_v6 = vld [vmem:[#allocation2 + $0x140] sm:$0xf] }
 0x42c   : > { %v15183_v45 = vshll.u32 %v14906_v33, 16  ;;  %v8170_v11 = vrot.slane %v8169_v55, 4  ;;  %v8177_v21 = vshrl.u32 %v7848_v46, 16  ;;  %v8180_v39 = vshll.u32 %v7848_v46, 16  ;;  %v7854_v62 = vld [vmem:[#allocation2 + $0x148] sm:$0xf] }
 0x42d   : > { %v8186_v18 = vshll.u32 %v7849_v29, 16  ;;  %v15167_v61 = vrot.slane %v15166_v9, 4  ;;  %v15179_v7 = vrot.slane %v15177_v56, 5  ;;  %v8191_v2 = vshrl.u32 %v7850_v28, 16  ;;  %21845 = vmatmul.mubr.msk.bf16.gmra.mrb[24].mxu1 %vm2811_vm5, %v26542_v42  ;;  %v26671_v42 = vld [vmem:[#allocation2 + $0x144] sm:$0x1] }
 0x42e   : > { %v15185_v32 = vrot.slane %v15183_v45, 5  ;;  %v8175_v41 = vsel %vm23998_vm4, %v8170_v11, %v8174_v40  ;;  %v8179_v52 = vrot.slane %v8177_v21, 4  ;;  %v8182_v25 = vrot.slane %v8180_v39, 5  ;;  %21848 = vmatprep.mubr.msk.bf16.mxu1 %vm2811_vm5, %v26561_v23  ;;  %21877 = vmatpush3.bf16.msra.mxu1 %v23190_v8  ;;  %v26676_v23 = vld [vmem:[%s27928_s6 + $0x300] sm:$0xff]  }
 0x42f   : > { %v26656_v3 = vrot.slane %v8186_v18, 5  ;;  %v26658_v30 = vcombine.low %v8161_v5, %v8175_v41  ;;  %v15172_v53 = vsel %vm23998_vm4, %v15167_v61, %v15171_v50  ;;  %v15180_v19 = vor.u32 %v15179_v7, %v15176_v47  ;;  %21878 = vmatprep.subr.bf16.mxu1 %v23193_v58  ;;  %v26687_v50 = vld [vmem:[#allocation2 + $0x14c] sm:$0x1]  ;;  %v14911_v47 = vld [vmem:[#allocation2 + $0x168] sm:$0xf] }
 0x430   : > { %v8193_v14 = vrot.slane %v8191_v2, 4  ;;  %v8183_v44 = vor.u32 %v8182_v25, %v8179_v52  ;;  %v8194_v0 = vshll.u32 %v7850_v28, 16  ;;  %v8200_v4 = vshll.u32 %v7851_v37, 16  ;;  %21373 = vmatmul.mubr.msk.bf16.gmra.mrb[44].mxu0 %vm2811_vm5, %v26570_v43  ;;  %v26690_v37 = vld [vmem:[#allocation2 + $0x16c] sm:$0x1] }
 0x431   : > { %v15188_v20 = vshrl.u32 %v14907_v51, 16  ;;  %v15181_v10 = vrot.slane %v15180_v19, 4  ;;  %v15191_v57 = vshll.u32 %v14907_v51, 16  ;;  %v15197_v49 = vshll.u32 %v14908_v63, 16  ;;  %21376 = vmatprep.mubr.msk.bf16.mxu0 %vm2811_vm5, %v26594_v36  ;;  %v26699_v25 = vld [vmem:[#allocation2 + $0x174] sm:$0x1] }
 0x432   : > { %v15202_v33 = vshrl.u32 %v14909_v22, 16  ;;  %v8184_v15 = vrot.slane %v8183_v44, 4  ;;  %v8196_v59 = vrot.slane %v8194_v0, 5  ;;  %v8202_v16 = vrot.slane %v8200_v4, 5  ;;  %21879 = vmatpush3.bf16.msra.mxu1 %v23193_v58  ;;  %v7856_v0 = vld [vmem:[#allocation2 + $0x150] sm:$0xf] }
 0x433   : > { %v15190_v27 = vrot.slane %v15188_v20, 4  ;;  %v15186_v54 = vsel %vm23998_vm4, %v15181_v10, %v15185_v32  ;;  %v15193_v1 = vrot.slane %v15191_v57, 5  ;;  %v15199_v26 = vrot.slane %v15197_v49, 5  ;;  %21912 = vmatprep.subr.bf16.mxu1 %v26676_v23  ;;  %v14913_v32 = vld [vmem:[#allocation2 + $0x170] sm:$0xf] }
 0x434   : > { %v15204_v46 = vrot.slane %v15202_v33, 4  ;;  %v26680_v40 = vcombine.low %v15172_v53, %v15186_v54  ;;  %v8189_v17 = vsel %vm23998_vm4, %v8184_v15, %v26656_v3  ;;  %v8197_v31 = vor.u32 %v8196_v59, %v8193_v14  ;;  %v26709_v10 = vld [vmem:[#allocation2 + $0x154] sm:$0x1]  ;;  %v7858_v59 = vld [vmem:[#allocation2 + $0x158] sm:$0xf] }
 0x435   : > { %v15205_v29 = vshll.u32 %v14909_v22, 16  ;;  %v15194_v5 = vor.u32 %v15193_v1, %v15190_v27  ;;  %v15211_v55 = vshll.u32 %v14910_v12, 16  ;;  %v8205_v28 = vshrl.u32 %v7852_v6, 16  ;;  %21849 = vmatmul.mubr.msk.bf16.gmra.mrb[28].mxu1 %vm2811_vm5, %v26579_v60  ;;  %v26716_v54 = vld [vmem:[#allocation2 + $0x15c] sm:$0x1] }
 0x436   : > { %v8208_v9 = vshll.u32 %v7852_v6, 16  ;;  %v8198_v56 = vrot.slane %v8197_v31, 4  ;;  %v8214_v45 = vshll.u32 %v26671_v42, 16  ;;  %v8219_v8 = vshrl.u32 %v7854_v62, 16  ;;  %21852 = vmatprep.mubr.msk.bf16.mxu1 %vm2811_vm5, %v26607_v35 }
 0x437   : > { %v15207_v43 = vrot.slane %v15205_v29, 5  ;;  %v15195_v11 = vrot.slane %v15194_v5, 4  ;;  %v15213_v21 = vrot.slane %v15211_v55, 5  ;;  %v8207_v39 = vrot.slane %v8205_v28, 4  ;;  %v26719_v55 = vld [vmem:[#allocation2 + $0x17c] sm:$0x1] }
 0x438   : > { %v8210_v18 = vrot.slane %v8208_v9, 5  ;;  %v8203_v36 = vsel %vm23998_vm4, %v8198_v56, %v8202_v16  ;;  %v8216_v61 = vrot.slane %v8214_v45, 5  ;;  %v8221_v7 = vrot.slane %v8219_v8, 4  ;;  %21377 = vmatmul.mubr.msk.bf16.gmra.mrb[48].mxu0 %vm2811_vm5, %v26626_v38 }
 0x439   : > { %v15208_v51 = vor.u32 %v15207_v43, %v15204_v46  ;;  %v19317_v2 = vcombine.low %v8189_v17, %v8203_v36  ;;  %v15200_v63 = vsel %vm23998_vm4, %v15195_v11, %v15199_v26  ;;  %v8222_v52 = vshll.u32 %v7854_v62, 16  ;;  %21380 = vmatprep.mubr.msk.bf16.mxu0 %vm2811_vm5, %v26658_v30  ;;  %v14915_v30 = vld [vmem:[#allocation2 + $0x178] sm:$0xf]  ;;  %v14917_v43 = vld [vmem:[#allocation2 + $0x180] sm:$0xf] }
 0x43a   : > { %v8211_v41 = vor.u32 %v8210_v18, %v8207_v39  ;;  %v8228_v22 = vshll.u32 %v26687_v50, 16  ;;  %v15216_v53 = vshrl.u32 %v14911_v47, 16  ;;  %v15219_v19 = vshll.u32 %v14911_v47, 16 }
 0x43b   : > { %v15209_v3 = vrot.slane %v15208_v51, 4  ;;  %v8224_v58 = vrot.slane %v8222_v52, 5  ;;  %v15225_v60 = vshll.u32 %v26690_v37, 16  ;;  %v15230_v44 = vshrl.u32 %v14913_v32, 16  ;;  %v7860_v51 = vld [vmem:[#allocation2 + $0x160] sm:$0xf] }
 0x43c   : > { %v8212_v14 = vrot.slane %v8211_v41, 4  ;;  %v8230_v12 = vrot.slane %v8228_v22, 5  ;;  %v15218_v20 = vrot.slane %v15216_v53, 4  ;;  %v15221_v35 = vrot.slane %v15219_v19, 5  ;;  %v26735_v22 = vld [vmem:[#allocation2 + $0x184] sm:$0x1] }
 0x43d   : > { %v15214_v4 = vsel %vm23998_vm4, %v15209_v3, %v15213_v21  ;;  %v8225_v33 = vor.u32 %v8224_v58, %v8221_v7  ;;  %v15227_v15 = vrot.slane %v15225_v60, 5  ;;  %v15232_v38 = vrot.slane %v15230_v44, 4  ;;  %21853 = vmatmul.mubr.msk.bf16.gmra.mrb[0].mxu1 %vm2811_vm5, %v26637_v34  ;;  %v7862_v60 = vld [vmem:[#allocation2 + $0x168] sm:$0xf] }
 0x43e   : > { %v19971_v57 = vcombine.low %v15200_v63, %v15214_v4  ;;  %v8217_v49 = vsel %vm23998_vm4, %v8212_v14, %v8216_v61  ;;  %v15222_v16 = vor.u32 %v15221_v35, %v15218_v20  ;;  %v15233_v27 = vshll.u32 %v14913_v32, 16  ;;  %21856 = vmatprep.mubr.msk.bf16.mxu1 %vm2811_vm5, %v26680_v40  ;;  %v26732_v40 = vld [vmem:[#allocation2 + $0x164] sm:$0x1] }
 0x43f   : > { %v15239_v6 = vshll.u32 %v26699_v25, 16  ;;  %v8226_v1 = vrot.slane %v8225_v33, 4  ;;  %v8233_v26 = vshrl.u32 %v7856_v0, 16  ;;  %v8236_v46 = vshll.u32 %v7856_v0, 16 }
 0x440   : > { %v8242_v62 = vshll.u32 %v26709_v10, 16  ;;  %v15223_v17 = vrot.slane %v15222_v16, 4  ;;  %v15235_v31 = vrot.slane %v15233_v27, 5  ;;  %v8247_v5 = vshrl.u32 %v7858_v59, 16  ;;  %21381 = vmatmul.mubr.msk.bf16.gmra.mrb[52].mxu0 %vm2811_vm5, %v19317_v2  ;;  %v26743_v16 = vld [vmem:[#allocation2 + $0x16c] sm:$0x1] }
 0x441   : > { %v15241_v29 = vrot.slane %v15239_v6, 5  ;;  %v8231_v28 = vsel %vm23998_vm4, %v8226_v1, %v8230_v12  ;;  %v8235_v9 = vrot.slane %v8233_v26, 4  ;;  %v8238_v47 = vrot.slane %v8236_v46, 5 }
 0x442   : > { %v8244_v56 = vrot.slane %v8242_v62, 5  ;;  %v19318_v45 = vcombine.low %v8217_v49, %v8231_v28  ;;  %v15228_v8 = vsel %vm23998_vm4, %v15223_v17, %v15227_v15  ;;  %v15236_v11 = vor.u32 %v15235_v31, %v15232_v38  ;;  %v14919_v62 = vld [vmem:[#allocation2 + $0x198] sm:$0xf] }
 0x443   : > { %v8249_v21 = vrot.slane %v8247_v5, 4  ;;  %v8239_v39 = vor.u32 %v8238_v47, %v8235_v9  ;;  %v8250_v18 = vshll.u32 %v7858_v59, 16  ;;  %v8256_v34 = vshll.u32 %v26716_v54, 16  ;;  %v14921_v5 = vld [vmem:[#allocation2 + $0x1a0] sm:$0xf] }
 0x444   : > { %v15244_v36 = vshrl.u32 %v14915_v30, 16  ;;  %v15237_v61 = vrot.slane %v15236_v11, 4  ;;  %v15247_v7 = vshll.u32 %v14915_v30, 16  ;;  %v15253_v32 = vshll.u32 %v26719_v55, 16  ;;  %21384 = vmatprep.mubr.msk.bf16.mxu0 %vm2811_vm5, %v19318_v45 }
 0x445   : > { %v15258_v63 = vshrl.u32 %v14917_v43, 16  ;;  %v8240_v41 = vrot.slane %v8239_v39, 4  ;;  %v8252_v52 = vrot.slane %v8250_v18, 5  ;;  %v8258_v3 = vrot.slane %v8256_v34, 5  ;;  %21857 = vmatmul.mubr.msk.bf16.gmra.mrb[4].mxu1 %vm2811_vm5, %v19971_v57  ;;  %v26755_v34 = vld [vmem:[#allocation2 + $0x1a4] sm:$0x1] }
 0x446   : > { %v15246_v53 = vrot.slane %v15244_v36, 4  ;;  %v15242_v19 = vsel %vm23998_vm4, %v15237_v61, %v15241_v29  ;;  %v15249_v14 = vrot.slane %v15247_v7, 5  ;;  %v15255_v2 = vrot.slane %v15253_v32, 5  ;;  %v26749_v29 = vld [vmem:[#allocation2 + $0x19c] sm:$0x1] }
 0x447   : > { %v15260_v58 = vrot.slane %v15258_v63, 4  ;;  %v19972_v44 = vcombine.low %v15228_v8, %v15242_v19  ;;  %v8245_v0 = vsel %vm23998_vm4, %v8240_v41, %v8244_v56  ;;  %v8253_v4 = vor.u32 %v8252_v52, %v8249_v21  ;;  %v7864_v21 = vld [vmem:[#allocation2 + $0x170] sm:$0xf]  ;;  %v26760_v41 = vld [vmem:[#allocation2 + $0x174] sm:$0x1] }
 0x448   : > { %v15261_v12 = vshll.u32 %v14917_v43, 16  ;;  %v15250_v20 = vor.u32 %v15249_v14, %v15246_v53  ;;  %v15267_v35 = vshll.u32 %v26735_v22, 16  ;;  %v8261_v49 = vshrl.u32 %v7860_v51, 16  ;;  %v7866_v14 = vld [vmem:[#allocation2 + $0x178] sm:$0xf] }
 0x449   : > { %v8264_v33 = vshll.u32 %v7860_v51, 16  ;;  %v8254_v15 = vrot.slane %v8253_v4, 4  ;;  %v8270_v38 = vshll.u32 %v26732_v40, 16  ;;  %v8275_v27 = vshrl.u32 %v7862_v60, 16  ;;  %21860 = vmatprep.mubr.msk.bf16.mxu1 %vm2811_vm5, %v19972_v44 }
 0x44a   : > { %v15263_v59 = vrot.slane %v15261_v12, 5  ;;  %v15251_v6 = vrot.slane %v15250_v20, 4  ;;  %v15269_v1 = vrot.slane %v15267_v35, 5  ;;  %v8263_v26 = vrot.slane %v8261_v49, 4  ;;  %v14923_v49 = vld [vmem:[#allocation2 + $0x1a8] sm:$0xf] }
 0x44b   : > { %v8266_v46 = vrot.slane %v8264_v33, 5  ;;  %v8259_v30 = vsel %vm23998_vm4, %v8254_v15, %v8258_v3  ;;  %v8272_v31 = vrot.slane %v8270_v38, 5  ;;  %v8277_v57 = vrot.slane %v8275_v27, 4  ;;  %v26769_v27 = vld [vmem:[#allocation2 + $0x1ac] sm:$0x1] }
 0x44c   : > { %v15264_v17 = vor.u32 %v15263_v59, %v15260_v58  ;;  %v19319_v28 = vcombine.low %v8245_v0, %v8259_v30  ;;  %v15256_v9 = vsel %vm23998_vm4, %v15251_v6, %v15255_v2  ;;  %v8278_v56 = vshll.u32 %v7862_v60, 16  ;;  %v26765_v0 = vld [vmem:[#allocation2 + $0x17c] sm:$0x1] }
 0x44d   : > { %v8267_v47 = vor.u32 %v8266_v46, %v8263_v26  ;;  %v8284_v45 = vshll.u32 %v26743_v16, 16  ;;  %v15272_v8 = vshrl.u32 %v14919_v62, 16  ;;  %v15275_v11 = vshll.u32 %v14919_v62, 16  ;;  %v14925_v62 = vld [vmem:[#allocation2 + $0x1b0] sm:$0xf] }
 0x44e   : > { %v15265_v43 = vrot.slane %v15264_v17, 4  ;;  %21385 = vmatmul.mubr.msk.bf16.gmra.mrb[56].mxu0 %vm2811_vm5, %v19319_v28  ;;  %v8280_v18 = vrot.slane %v8278_v56, 5  ;;  %v15281_v36 = vshll.u32 %v26749_v29, 16  ;;  %v15286_v51 = vshrl.u32 %v14921_v5, 16 }
 0x44f   : > { %v8268_v39 = vrot.slane %v8267_v47, 4  ;;  %v8286_v7 = vrot.slane %v8284_v45, 5  ;;  %v15274_v32 = vrot.slane %v15272_v8, 4  ;;  %v15277_v63 = vrot.slane %v15275_v11, 5  ;;  %v8638_v11 = vld [vmem:[#allocation2 + $0x50] sm:$0xe] }
 0x450   : > { %v15270_v61 = vsel %vm23998_vm4, %v15265_v43, %v15269_v1  ;;  %v8281_v53 = vor.u32 %v8280_v18, %v8277_v57  ;;  %v15283_v19 = vrot.slane %v15281_v36, 5  ;;  %v15288_v58 = vrot.slane %v15286_v51, 4  ;;  %v26778_v36 = vld [vmem:[#allocation2 + $0x1b4] sm:$0x1] }
 0x451   : > { %v19973_v52 = vcombine.low %v15256_v9, %v15270_v61  ;;  %v8273_v3 = vsel %vm23998_vm4, %v8268_v39, %v8272_v31  ;;  %v15278_v2 = vor.u32 %v15277_v63, %v15274_v32  ;;  %v15289_v60 = vshll.u32 %v14921_v5, 16 }
 0x452   : > { %v15295_v44 = vshll.u32 %v26755_v34, 16  ;;  %v8282_v4 = vrot.slane %v8281_v53, 4  ;;  %v8289_v12 = vshrl.u32 %v7864_v21, 16  ;;  %v8292_v20 = vshll.u32 %v7864_v21, 16 }
 0x453   : > { %21861 = vmatmul.mubr.msk.bf16.gmra.mrb[8].mxu1 %vm2811_vm5, %v19973_v52  ;;  %v8298_v35 = vshll.u32 %v26760_v41, 16  ;;  %v15279_v33 = vrot.slane %v15278_v2, 4  ;;  %v15291_v15 = vrot.slane %v15289_v60, 5  ;;  %v8303_v38 = vshrl.u32 %v7866_v14, 16  ;;  %v8639_v52 = vld [vmem:[#allocation2 + $0x58] sm:$0xe] }
 0x454   : > { %v15297_v59 = vrot.slane %v15295_v44, 5  ;;  %v8287_v6 = vsel %vm23998_vm4, %v8282_v4, %v8286_v7  ;;  %v8291_v1 = vrot.slane %v8289_v12, 4  ;;  %v8294_v26 = vrot.slane %v8292_v20, 5  ;;  %v14927_v2 = vld [vmem:[#allocation2 + $0x1b8] sm:$0xf] }
 0x455   : > { %v8300_v46 = vrot.slane %v8298_v35, 5  ;;  %v19320_v30 = vcombine.low %v8273_v3, %v8287_v6  ;;  %v15284_v17 = vsel %vm23998_vm4, %v15279_v33, %v15283_v19  ;;  %v15292_v31 = vor.u32 %v15291_v15, %v15288_v58  ;;  %v23386_v4 = vld [vmem:[#allocation2 + $0x54] sm:$0x1]  ;;  %v23387_v33 = vld [vmem:[#allocation2 + $0x5c] sm:$0x1] }
 0x456   : > { %v8305_v57 = vrot.slane %v8303_v38, 4  ;;  %v8295_v5 = vor.u32 %v8294_v26, %v8291_v1  ;;  %v8306_v28 = vshll.u32 %v7866_v14, 16  ;;  %v8312_v9 = vshll.u32 %v26765_v0, 16  ;;  %v14929_v26 = vld [vmem:[#allocation2 + $0x1c0] sm:$0xf] }
 0x457   : > { %v15300_v47 = vshrl.u32 %v14923_v49, 16  ;;  %21388 = vmatprep.mubr.msk.bf16.mxu0 %vm2811_vm5, %v19320_v30  ;;  %v15293_v56 = vrot.slane %v15292_v31, 4  ;;  %v15303_v43 = vshll.u32 %v14923_v49, 16  ;;  %v15309_v45 = vshll.u32 %v26769_v27, 16  ;;  %v26794_v31 = vld [vmem:[#allocation2 + $0x1c4] sm:$0x1] }
 0x458   : > { %v15314_v8 = vshrl.u32 %v14925_v62, 16  ;;  %v8296_v21 = vrot.slane %v8295_v5, 4  ;;  %v8308_v39 = vrot.slane %v8306_v28, 5  ;;  %v8314_v18 = vrot.slane %v8312_v9, 5  ;;  %v8640_v5 = vld [vmem:[#allocation2 + $0x60] sm:$0xe] }
 0x459   : > { %v15302_v51 = vrot.slane %v15300_v47, 4  ;;  %v15298_v61 = vsel %vm23998_vm4, %v15293_v56, %v15297_v59  ;;  %v15305_v7 = vrot.slane %v15303_v43, 5  ;;  %v15311_v32 = vrot.slane %v15309_v45, 5  ;;  %v26786_v59 = vld [vmem:[#allocation2 + $0x1bc] sm:$0x1] }
 0x45a   : > { %v15316_v63 = vrot.slane %v15314_v8, 4  ;;  %v19974_v3 = vcombine.low %v15284_v17, %v15298_v61  ;;  %v8301_v53 = vsel %vm23998_vm4, %v8296_v21, %v8300_v46  ;;  %v8309_v19 = vor.u32 %v8308_v39, %v8305_v57  ;;  %v8641_v21 = vld [vmem:[#allocation2 + $0x68] sm:$0xe]  ;;  %v23388_v61 = vld [vmem:[#allocation2 + $0x64] sm:$0x1] }
 0x45b   : > { %v15317_v14 = vshll.u32 %v14925_v62, 16  ;;  %v15306_v58 = vor.u32 %v15305_v7, %v15302_v51  ;;  %v15323_v60 = vshll.u32 %v26778_v36, 16  ;;  %v19342_v44 = vrot.slane %v8638_v11, 9 }
 0x45c   : > { %v8736_v12 = vrot.slane %v23386_v4, 5  ;;  %21864 = vmatprep.mubr.msk.bf16.mxu1 %vm2811_vm5, %v19974_v3  ;;  %v8310_v20 = vrot.slane %v8309_v19, 4  ;;  %v19343_v49 = vrot.slane %v8639_v52, 9  ;;  %v8740_v15 = vrot.slane %v23387_v33, 5  ;;  %v26804_v19 = vld [vmem:[#allocation2 + $0x1cc] sm:$0x1] }
 0x45d   : > { %v15319_v35 = vrot.slane %v15317_v14, 5  ;;  %v15307_v38 = vrot.slane %v15306_v58, 4  ;;  %v15325_v6 = vrot.slane %v15323_v60, 5  ;;  %v15328_v46 = vshrl.u32 %v14927_v2, 16  ;;  %v14933_v14 = vld [vmem:[#allocation2 + $0x1d0] sm:$0xf] }
 0x45e   : > { %v8737_v1 = vsel %vm24807_vm12, %v19342_v44, %v8736_v12  ;;  %v8315_v62 = vsel %vm23998_vm4, %v8310_v20, %v8314_v18  ;;  %v8741_v17 = vsel %vm24807_vm12, %v19343_v49, %v8740_v15  ;;  %v15331_v57 = vshll.u32 %v14927_v2, 16  ;;  %v23389_v20 = vld [vmem:[#allocation2 + $0x6c] sm:$0x1]  ;;  %v8642_v33 = vld [vmem:[#allocation2 + $0x70] sm:$0xe] }
 0x45f   : > { %v15320_v30 = vor.u32 %v15319_v35, %v15316_v63  ;;  %v19321_v28 = vcombine.low %v8301_v53, %v8315_v62  ;;  %v15312_v9 = vsel %vm23998_vm4, %v15307_v38, %v15311_v32  ;;  %v19382_v47 = vcombine.low %v8737_v1, %v8741_v17  ;;  %v14931_v63 = vld [vmem:[#allocation2 + $0x1c8] sm:$0xf]  ;;  %v26809_v38 = vld [vmem:[#allocation2 + $0x1d4] sm:$0x1] }
 0x460   : > { %v15330_v56 = vrot.slane %v15328_v46, 4  ;;  %v15333_v45 = vrot.slane %v15331_v57, 5  ;;  %v15337_v8 = vshll.u32 %v26786_v59, 16  ;;  %v15342_v11 = vshrl.u32 %v14929_v26, 16  ;;  %v8643_v57 = vld [vmem:[#allocation2 + $0x78] sm:$0xe] }
 0x461   : > { %v15321_v43 = vrot.slane %v15320_v30, 4  ;;  %21389 = vmatmul.mubr.msk.bf16.gmra.mrb[60].mxu0 %vm2811_vm5, %v19321_v28  ;;  %v15345_v39 = vshll.u32 %v14929_v26, 16  ;;  %v15351_v18 = vshll.u32 %v26794_v31, 16  ;;  %v19344_v51 = vrot.slane %v8640_v5, 9 }
 0x462   : > { %v8744_v7 = vrot.slane %v23388_v61, 5  ;;  %21400 = vmatprep.mubr.msk.bf16.mxu0 %vm2811_vm5, %v19382_v47  ;;  %v15334_v52 = vor.u32 %v15333_v45, %v15330_v56  ;;  %v15339_v3 = vrot.slane %v15337_v8, 5  ;;  %v15344_v53 = vrot.slane %v15342_v11, 4  ;;  %v15705_v11 = vld [vmem:[#allocation2 + $0xa8] sm:$0xe] }
 0x463   : > { %v15326_v32 = vsel %vm23998_vm4, %v15321_v43, %v15325_v6  ;;  %v15347_v58 = vrot.slane %v15345_v39, 5  ;;  %v15353_v60 = vrot.slane %v15351_v18, 5  ;;  %v19345_v12 = vrot.slane %v8641_v21, 9  ;;  %v23390_v18 = vld [vmem:[#allocation2 + $0x74] sm:$0x1] }
 0x464   : > { %v19975_v2 = vcombine.low %v15312_v9, %v15326_v32  ;;  %v8745_v44 = vsel %vm24807_vm12, %v19344_v51, %v8744_v7  ;;  %v15335_v4 = vrot.slane %v15334_v52, 4  ;;  %v8748_v35 = vrot.slane %v23389_v20, 5  ;;  %v15706_v7 = vld [vmem:[#allocation2 + $0xb0] sm:$0xe]  ;;  %v23393_v20 = vld [vmem:[%s27928_s6 + $0x188] sm:$0xff]  }
 0x465   : > { %v15356_v49 = vshrl.u32 %v14931_v63, 16  ;;  %v15348_v15 = vor.u32 %v15347_v58, %v15344_v53  ;;  %v15359_v6 = vshll.u32 %v14931_v63, 16  ;;  %v15365_v1 = vshll.u32 %v26804_v19, 16 }
 0x466   : > { %21865 = vmatmul.mubr.msk.bf16.gmra.mrb[12].mxu1 %vm2811_vm5, %v19975_v2  ;;  %v15370_v26 = vshrl.u32 %v14933_v14, 16  ;;  %v15340_v46 = vsel %vm23998_vm4, %v15335_v4, %v15339_v3  ;;  %v8749_v62 = vsel %vm24807_vm12, %v19345_v12, %v8748_v35  ;;  %v15373_v17 = vshll.u32 %v14933_v14, 16  ;;  %v23391_v3 = vld [vmem:[#allocation2 + $0x7c] sm:$0x1]  ;;  %v8644_v14 = vld [vmem:[#allocation2 + $0x80] sm:$0xe] }
 0x467   : > { %v15358_v30 = vrot.slane %v15356_v49, 4  ;;  %v15349_v5 = vrot.slane %v15348_v15, 4  ;;  %v19383_v28 = vcombine.low %v8745_v44, %v8749_v62  ;;  %v15361_v9 = vrot.slane %v15359_v6, 5  ;;  %v23392_v44 = vld [vmem:[#allocation2 + $0xac] sm:$0x1] }
 0x468   : > { %v15367_v47 = vrot.slane %v15365_v1, 5  ;;  %v15372_v56 = vrot.slane %v15370_v26, 4  ;;  %v15375_v43 = vrot.slane %v15373_v17, 5  ;;  %v15379_v45 = vshll.u32 %v26809_v38, 16  ;;  %v8645_v12 = vld [vmem:[#allocation2 + $0x88] sm:$0xe] }
 0x469   : > { %v19346_v8 = vrot.slane %v8642_v33, 9  ;;  %v15354_v21 = vsel %vm23998_vm4, %v15349_v5, %v15353_v60  ;;  %21401 = vmatmul.mubr.msk.bf16.vlgmr.msra.gmra.mrb[32].mxu0 %vm2811_vm5, %v19383_v28  ;;  %v15362_v39 = vor.u32 %v15361_v9, %v15358_v30  ;;  %v8752_v51 = vrot.slane %v23390_v18, 5  ;;  %v23394_v33 = vld [vmem:[#allocation2 + $0xb4] sm:$0x1]  ;;  %v15707_v6 = vld [vmem:[#allocation2 + $0xb8] sm:$0xe] }
 0x46a   : > { %v19347_v61 = vrot.slane %v8643_v57, 9  ;;  %v19976_v63 = vcombine.low %v15340_v46, %v15354_v21  ;;  %v15376_v32 = vor.u32 %v15375_v43, %v15372_v56  ;;  %v15381_v52 = vrot.slane %v15379_v45, 5  ;;  %21433 = vmatpush3.bf16.msra.mxu0 %v26647_v13  ;;  %v15708_v30 = vld [vmem:[#allocation2 + $0xc0] sm:$0xe]  ;;  %v23395_v5 = vld [vmem:[#allocation2 + $0x84] sm:$0x1] }
 0x46b   : > { %v8756_v53 = vrot.slane %v23391_v3, 5  ;;  %v15363_v2 = vrot.slane %v15362_v39, 4  ;;  %v8753_v58 = vsel %vm24807_vm12, %v19346_v8, %v8752_v51  ;;  %v19998_v60 = vrot.slane %v15705_v11, 9  ;;  %21434 = vmatprep.subr.bf16.mxu0 %v23393_v20  ;;  %v8646_v56 = vld [vmem:[#allocation2 + $0xa0] sm:$0xe]  ;;  %v23397_v18 = vld [vmem:[%s27928_s6 + $0x190] sm:$0xff]  }
 0x46c   : > { %v15803_v4 = vrot.slane %v23392_v44, 5  ;;  %21868 = vmatprep.mubr.msk.bf16.mxu1 %vm2811_vm5, %v19976_v63  ;;  %v15377_v35 = vrot.slane %v15376_v32, 4  ;;  %v19999_v13 = vrot.slane %v15706_v7, 9  ;;  %v15807_v15 = vrot.slane %v23394_v33, 5  ;;  %v8647_v43 = vld [vmem:[#allocation2 + $0xa8] sm:$0xe] }
 0x46d   : > { %v8757_v49 = vsel %vm24807_vm12, %v19347_v61, %v8756_v53  ;;  %v15368_v1 = vsel %vm23998_vm4, %v15363_v2, %v15367_v47  ;;  %v19348_v62 = vrot.slane %v8644_v14, 9  ;;  %v8760_v28 = vrot.slane %v23395_v5, 5  ;;  %v23396_v8 = vld [vmem:[#allocation2 + $0x8c] sm:$0x1]  ;;  %v8648_v39 = vld [vmem:[#allocation2 + $0xb0] sm:$0xe] }
 0x46e   : > { %v19384_v26 = vcombine.low %v8753_v58, %v8757_v49  ;;  %v15804_v46 = vsel %vm24807_vm12, %v19998_v60, %v15803_v4  ;;  %v15382_v17 = vsel %vm23998_vm4, %v15377_v35, %v15381_v52  ;;  %v15808_v57 = vsel %vm24807_vm12, %v19999_v13, %v15807_v15  ;;  %21435 = vmatpush3.bf16.msra.mxu0 %v23393_v20  ;;  %v23398_v61 = vld [vmem:[#allocation2 + $0xbc] sm:$0x1]  ;;  %v23399_v32 = vld [vmem:[#allocation2 + $0xc4] sm:$0x1]  ;;  %v15709_v3 = vld [vmem:[#allocation2 + $0xc8] sm:$0xe] }
 0x46f   : > { %v19349_v9 = vrot.slane %v8645_v12, 9  ;;  %v19977_v45 = vcombine.low %v15368_v1, %v15382_v17  ;;  %v20038_v47 = vcombine.low %v15804_v46, %v15808_v57  ;;  %v8764_v11 = vrot.slane %v23396_v8, 5  ;;  %21436 = vmatprep.subr.bf16.mxu0 %v23397_v18  ;;  %v23400_v2 = vld [vmem:[#allocation2 + $0xa4] sm:$0x1]  ;;  %v15710_v44 = vld [vmem:[#allocation2 + $0xd0] sm:$0xe] }
 0x470   : > { %21404 = vmatprep.mubr.msk.bf16.mxu0 %vm2811_vm5, %v19384_v26  ;;  %v20000_v21 = vrot.slane %v15707_v6, 9  ;;  %v8761_v51 = vsel %vm24807_vm12, %v19348_v62, %v8760_v28  ;;  %v15811_v7 = vrot.slane %v23398_v61, 5  ;;  %v20001_v63 = vrot.slane %v15708_v30, 9  ;;  %v23401_v20 = vld [vmem:[#allocation2 + $0xac] sm:$0x1]  ;;  %v23403_v46 = vld [vmem:[%s27928_s6 + $0x198] sm:$0xff]  }
 0x471   : > { %v15815_v52 = vrot.slane %v23399_v32, 5  ;;  %21869 = vmatmul.mubr.msk.bf16.gmra.mrb[16].mxu1 %vm2811_vm5, %v19977_v45  ;;  %v8765_v53 = vsel %vm24807_vm12, %v19349_v9, %v8764_v11  ;;  %v19350_v14 = vrot.slane %v8646_v56, 9  ;;  %v8768_v58 = vrot.slane %v23400_v2, 5  ;;  %v8649_v49 = vld [vmem:[#allocation2 + $0xb8] sm:$0xe]  ;;  %v23197_v2 = vld [vmem:[%s27928_s6 + $0x308] sm:$0xff]  }
 0x472   : > { %v19351_v60 = vrot.slane %v8647_v43, 9  ;;  %21880 = vmatprep.mubr.msk.bf16.mxu1 %vm2811_vm5, %v20038_v47  ;;  %v19385_v4 = vcombine.low %v8761_v51, %v8765_v53  ;;  %v8772_v35 = vrot.slane %v23401_v20, 5  ;;  %21437 = vmatpush3.bf16.msra.mxu0 %v23397_v18  ;;  %v15812_v13 = vsel %vm24807_vm12, %v20000_v21, %v15811_v7  ;;  %v23402_v6 = vld [vmem:[#allocation2 + $0xcc] sm:$0x1]  ;;  %v26853_v26 = vld [vmem:[#allocation2 + $0xd8] sm:$0xe] }
 0x473   : > { %v15816_v12 = vsel %vm24807_vm12, %v20001_v63, %v15815_v52  ;;  %v8769_v33 = vsel %vm24807_vm12, %v19350_v14, %v8768_v58  ;;  %v20002_v15 = vrot.slane %v15709_v3, 9  ;;  %v15819_v1 = vrot.slane %v23402_v6, 5  ;;  %21438 = vmatprep.subr.bf16.mxu0 %v23403_v46  ;;  %v23404_v17 = vld [vmem:[#allocation2 + $0xd4] sm:$0x1]  ;;  %v15712_v28 = vld [vmem:[#allocation2 + $0xe0] sm:$0xe] }
 0x474   : > { %21405 = vmatmul.mubr.msk.bf16.gmra.mrb[36].mxu0 %vm2811_vm5, %v19385_v4  ;;  %v8773_v62 = vsel %vm24807_vm12, %v19351_v60, %v8772_v35  ;;  %v20003_v30 = vrot.slane %v15710_v44, 9  ;;  %v15823_v57 = vrot.slane %v23404_v17, 5  ;;  %v19352_v5 = vrot.slane %v8648_v39, 9  ;;  %v23405_v43 = vld [vmem:[#allocation2 + $0xb4] sm:$0x1] }
 0x475   : > { %v20039_v9 = vcombine.low %v15812_v13, %v15816_v12  ;;  %v19386_v56 = vcombine.low %v8769_v33, %v8773_v62  ;;  %v8776_v45 = vrot.slane %v23405_v43, 5  ;;  %v19353_v47 = vrot.slane %v8649_v49, 9  ;;  %v8650_v8 = vld [vmem:[#allocation2 + $0xc0] sm:$0xe]  ;;  %v23406_v18 = vld [vmem:[#allocation2 + $0xbc] sm:$0x1] }
 0x476   : > { %v15820_v11 = vsel %vm24807_vm12, %v20002_v15, %v15819_v1  ;;  %v15824_v21 = vsel %vm24807_vm12, %v20003_v30, %v15823_v57  ;;  %v8780_v51 = vrot.slane %v23406_v18, 5  ;;  %v20004_v61 = vrot.slane %v26853_v26, 9  ;;  %v8651_v7 = vld [vmem:[#allocation2 + $0xc8] sm:$0xe]  ;;  %21439 = vmatpush3.bf16.msra.mxu0 %v23403_v46  ;;  %v23407_v63 = vld [vmem:[#allocation2 + $0xdc] sm:$0x1] }
 0x477   : > { %21408 = vmatprep.mubr.msk.bf16.mxu0 %vm2811_vm5, %v19386_v56  ;;  %v8777_v39 = vsel %vm24807_vm12, %v19352_v5, %v8776_v45  ;;  %v15827_v32 = vrot.slane %v23407_v63, 5  ;;  %v20005_v52 = vrot.slane %v15712_v28, 9  ;;  %v23408_v3 = vld [vmem:[#allocation2 + $0xe4] sm:$0x1]  ;;  %v15713_v14 = vld [vmem:[#allocation2 + $0xf8] sm:$0xe]  ;;  %v20040_v58 = vcombine.low %v15820_v11, %v15824_v21 }
 0x478   : > { %v15831_v53 = vrot.slane %v23408_v3, 5  ;;  %v8781_v60 = vsel %vm24807_vm12, %v19353_v47, %v8780_v51  ;;  %v19354_v44 = vrot.slane %v8650_v8, 9  ;;  %v23409_v4 = vld [vmem:[#allocation2 + $0xc4] sm:$0x1]  ;;  %v15714_v20 = vld [vmem:[#allocation2 + $0x100] sm:$0xe] }
 0x479   : > { %v8784_v12 = vrot.slane %v23409_v4, 5  ;;  %v8652_v35 = vld [vmem:[#allocation2 + $0xd0] sm:$0xe]  ;;  %21881 = vmatmul.mubr.msk.bf16.vlgmr.msra.gmra.mrb[20].mxu1 %vm2811_vm5, %v20039_v9  ;;  %v19387_v49 = vcombine.low %v8777_v39, %v8781_v60  ;;  %v19355_v13 = vrot.slane %v8651_v7, 9  ;;  %v23410_v33 = vld [vmem:[#allocation2 + $0xcc] sm:$0x1]  ;;  %v15828_v43 = vsel %vm24807_vm12, %v20004_v61, %v15827_v32 }
 0x47a   : > { %v8788_v15 = vrot.slane %v23410_v33, 5  ;;  %v8653_v6 = vld [vmem:[#allocation2 + $0xd8] sm:$0xe]  ;;  %21913 = vmatpush3.bf16.msra.mxu1 %v26676_v23  ;;  %21884 = vmatprep.mubr.msk.bf16.mxu1 %vm2811_vm5, %v20040_v58  ;;  %v15832_v1 = vsel %vm24807_vm12, %v20005_v52, %v15831_v53  ;;  %v20006_v46 = vrot.slane %v15713_v14, 9  ;;  %v23411_v62 = vld [vmem:[#allocation2 + $0xfc] sm:$0x1] }
 0x47b   : > { %v8785_v26 = vsel %vm24807_vm12, %v19354_v44, %v8784_v12  ;;  %v15835_v30 = vrot.slane %v23411_v62, 5  ;;  %v20007_v57 = vrot.slane %v15714_v20, 9  ;;  %v23412_v5 = vld [vmem:[#allocation2 + $0x104] sm:$0x1]  ;;  %21914 = vmatprep.subr.bf16.mxu1 %v23197_v2  ;;  %v19356_v9 = vrot.slane %v8652_v35, 9  ;;  %v23198_v56 = vld [vmem:[%s27928_s6 + $0x310] sm:$0xff]  }
 0x47c   : > { %v8789_v17 = vsel %vm24807_vm12, %v19355_v13, %v8788_v15  ;;  %v15839_v28 = vrot.slane %v23412_v5, 5  ;;  %v15716_v23 = vld [vmem:[#allocation2 + $0x110] sm:$0xe]  ;;  %21409 = vmatmul.mubr.msk.bf16.gmra.mrb[40].mxu0 %vm2811_vm5, %v19387_v49  ;;  %v23413_v47 = vld [vmem:[#allocation2 + $0xd4] sm:$0x1]  ;;  %v19357_v11 = vrot.slane %v8653_v6, 9  ;;  %v20041_v51 = vcombine.low %v15828_v43, %v15832_v1 }
 0x47d   : > { %v19388_v45 = vcombine.low %v8785_v26, %v8789_v17  ;;  %v8792_v8 = vrot.slane %v23413_v47, 5  ;;  %v15715_v21 = vld [vmem:[#allocation2 + $0x108] sm:$0xe]  ;;  %v8654_v18 = vld [vmem:[#allocation2 + $0xf0] sm:$0xe]  ;;  %v15836_v3 = vsel %vm24807_vm12, %v20006_v46, %v15835_v30  ;;  %v20009_v32 = vrot.slane %v15716_v23, 9 }
 0x47e   : > { %v15840_v7 = vsel %vm24807_vm12, %v20007_v57, %v15839_v28  ;;  %v23414_v39 = vld [vmem:[#allocation2 + $0xdc] sm:$0x1]  ;;  %v8655_v52 = vld [vmem:[#allocation2 + $0xf8] sm:$0xe]  ;;  %v23415_v53 = vld [vmem:[#allocation2 + $0x114] sm:$0x1]  ;;  %21915 = vmatpush3.bf16.msra.mxu1 %v23197_v2 }
 0x47f   : > { %v8796_v63 = vrot.slane %v23414_v39, 5  ;;  %21412 = vmatprep.mubr.msk.bf16.mxu0 %vm2811_vm5, %v19388_v45  ;;  %v8793_v61 = vsel %vm24807_vm12, %v19356_v9, %v8792_v8  ;;  %v15847_v14 = vrot.slane %v23415_v53, 5  ;;  %v15717_v58 = vld [vmem:[#allocation2 + $0x118] sm:$0xe]  ;;  %v15718_v60 = vld [vmem:[#allocation2 + $0x120] sm:$0xe]  ;;  %21916 = vmatprep.subr.bf16.mxu1 %v23198_v56  ;;  %v20042_v33 = vcombine.low %v15836_v3, %v15840_v7 }
 0x480   : > { %v20008_v44 = vrot.slane %v15715_v21, 9  ;;  %v23416_v4 = vld [vmem:[#allocation2 + $0x10c] sm:$0x1]  ;;  %v19358_v20 = vrot.slane %v8654_v18, 9  ;;  %v23417_v35 = vld [vmem:[#allocation2 + $0xf4] sm:$0x1] }
 0x481   : > { %v15843_v12 = vrot.slane %v23416_v4, 5  ;;  %v8800_v49 = vrot.slane %v23417_v35, 5  ;;  %v23199_v13 = vld [vmem:[%s27928_s6 + $0x318] sm:$0xff]   ;;  %v8797_v15 = vsel %vm24807_vm12, %v19357_v11, %v8796_v63  ;;  %v19359_v6 = vrot.slane %v8655_v52, 9  ;;  %v8656_v26 = vld [vmem:[#allocation2 + $0x100] sm:$0xe]  ;;  %21885 = vmatmul.mubr.msk.bf16.gmra.mrb[24].mxu1 %vm2811_vm5, %v20041_v51 }
 0x482   : > { %v23418_v1 = vld [vmem:[#allocation2 + $0xfc] sm:$0x1]  ;;  %v19389_v46 = vcombine.low %v8793_v61, %v8797_v15  ;;  %v20010_v30 = vrot.slane %v15717_v58, 9  ;;  %v8657_v5 = vld [vmem:[#allocation2 + $0x108] sm:$0xe]  ;;  %21888 = vmatprep.mubr.msk.bf16.mxu1 %vm2811_vm5, %v20042_v33  ;;  %v15848_v28 = vsel %vm24807_vm12, %v20009_v32, %v15847_v14  ;;  %v20011_v23 = vrot.slane %v15718_v60, 9  ;;  %21917 = vmatpush3.bf16.msra.mxu1 %v23198_v56 }
 0x483   : > { %v8804_v2 = vrot.slane %v23418_v1, 5  ;;  %v8801_v62 = vsel %vm24807_vm12, %v19358_v20, %v8800_v49  ;;  %v23419_v17 = vld [vmem:[#allocation2 + $0x11c] sm:$0x1]  ;;  %v23420_v43 = vld [vmem:[#allocation2 + $0x124] sm:$0x1]  ;;  %v19360_v11 = vrot.slane %v8656_v26, 9  ;;  %21918 = vmatprep.subr.bf16.mxu1 %v23199_v13  ;;  %v15844_v39 = vsel %vm24807_vm12, %v20008_v44, %v15843_v12 }
 0x484   : > { %v15851_v57 = vrot.slane %v23419_v17, 5  ;;  %v15855_v45 = vrot.slane %v23420_v43, 5  ;;  %v15719_v47 = vld [vmem:[#allocation2 + $0x128] sm:$0xe]  ;;  %v23421_v21 = vld [vmem:[#allocation2 + $0x104] sm:$0x1]  ;;  %21413 = vmatmul.mubr.msk.bf16.gmra.mrb[44].mxu0 %vm2811_vm5, %v19389_v46  ;;  %v20043_v53 = vcombine.low %v15844_v39, %v15848_v28 }
 0x485   : > { %v8805_v9 = vsel %vm24807_vm12, %v19359_v6, %v8804_v2  ;;  %v8808_v18 = vrot.slane %v23421_v21, 5  ;;  %v8658_v51 = vld [vmem:[#allocation2 + $0x110] sm:$0xe]  ;;  %v26912_v7 = vld [vmem:[%s27928_s6 + $0x320] sm:$0xff]   ;;  %v19361_v56 = vrot.slane %v8657_v5, 9  ;;  %v20012_v58 = vrot.slane %v15719_v47, 9 }
 0x486   : > { %v19390_v8 = vcombine.low %v8801_v62, %v8805_v9  ;;  %v15856_v63 = vsel %vm24807_vm12, %v20011_v23, %v15855_v45  ;;  %v23422_v52 = vld [vmem:[#allocation2 + $0x10c] sm:$0x1]  ;;  %v15720_v61 = vld [vmem:[#allocation2 + $0x130] sm:$0xe]  ;;  %v8659_v32 = vld [vmem:[#allocation2 + $0x118] sm:$0xe]  ;;  %v15852_v14 = vsel %vm24807_vm12, %v20010_v30, %v15851_v57  ;;  %21919 = vmatpush3.bf16.msra.mxu1 %v23199_v13 }
 0x487   : > { %v8812_v3 = vrot.slane %v23422_v52, 5  ;;  %v15721_v60 = vld [vmem:[#allocation2 + $0x148] sm:$0xe]  ;;  %v15722_v4 = vld [vmem:[#allocation2 + $0x150] sm:$0xe]  ;;  %v20044_v20 = vcombine.low %v15852_v14, %v15856_v63  ;;  %v19362_v12 = vrot.slane %v8658_v51, 9  ;;  %v8809_v6 = vsel %vm24807_vm12, %v19360_v11, %v8808_v18  ;;  %21952 = vmatprep.subr.bf16.mxu1 %v26912_v7 }
 0x488   : > { %21416 = vmatprep.mubr.msk.bf16.mxu0 %vm2811_vm5, %v19390_v8  ;;  %v23423_v35 = vld [vmem:[#allocation2 + $0x12c] sm:$0x1]  ;;  %v23424_v49 = vld [vmem:[#allocation2 + $0x114] sm:$0x1]  ;;  %v8660_v15 = vld [vmem:[#allocation2 + $0x120] sm:$0xe] }
 0x489   : > { %v15859_v44 = vrot.slane %v23423_v35, 5  ;;  %v8816_v33 = vrot.slane %v23424_v49, 5  ;;  %v20013_v1 = vrot.slane %v15720_v61, 9  ;;  %v19363_v2 = vrot.slane %v8659_v32, 9  ;;  %v23425_v26 = vld [vmem:[#allocation2 + $0x11c] sm:$0x1]  ;;  %21889 = vmatmul.mubr.msk.bf16.gmra.mrb[28].mxu1 %vm2811_vm5, %v20043_v53 }
 0x48a   : > { %v8820_v46 = vrot.slane %v23425_v26, 5  ;;  %v8813_v62 = vsel %vm24807_vm12, %v19361_v56, %v8812_v3  ;;  %v23426_v30 = vld [vmem:[#allocation2 + $0x134] sm:$0x1]  ;;  %v20014_v57 = vrot.slane %v15721_v60, 9  ;;  %v23427_v5 = vld [vmem:[#allocation2 + $0x14c] sm:$0x1]  ;;  %21892 = vmatprep.mubr.msk.bf16.mxu1 %vm2811_vm5, %v20044_v20 }
 0x48b   : > { %v15863_v17 = vrot.slane %v23426_v30, 5  ;;  %v15867_v28 = vrot.slane %v23427_v5, 5  ;;  %v8661_v9 = vld [vmem:[#allocation2 + $0x128] sm:$0xe]  ;;  %v20015_v23 = vrot.slane %v15722_v4, 9  ;;  %v19364_v47 = vrot.slane %v8660_v15, 9 }
 0x48c   : > { %v8821_v13 = vsel %vm24807_vm12, %v19363_v2, %v8820_v46  ;;  %v23428_v43 = vld [vmem:[#allocation2 + $0x154] sm:$0x1]  ;;  %v15723_v8 = vld [vmem:[#allocation2 + $0x158] sm:$0xe]  ;;  %v19391_v11 = vcombine.low %v8809_v6, %v8813_v62  ;;  %v8817_v21 = vsel %vm24807_vm12, %v19362_v12, %v8816_v33  ;;  %v23429_v18 = vld [vmem:[#allocation2 + $0x124] sm:$0x1]  ;;  %v15860_v63 = vsel %vm24807_vm12, %v20012_v58, %v15859_v44 }
 0x48d   : > { %v15871_v45 = vrot.slane %v23428_v43, 5  ;;  %v8824_v51 = vrot.slane %v23429_v18, 5  ;;  %v8662_v39 = vld [vmem:[#allocation2 + $0x140] sm:$0xe]  ;;  %v19392_v56 = vcombine.low %v8817_v21, %v8821_v13  ;;  %v19365_v52 = vrot.slane %v8661_v9, 9 }
 0x48e   : > { %v23430_v3 = vld [vmem:[#allocation2 + $0x12c] sm:$0x1]  ;;  %v15724_v32 = vld [vmem:[#allocation2 + $0x160] sm:$0xe]  ;;  %v8663_v53 = vld [vmem:[#allocation2 + $0x148] sm:$0xe]  ;;  %21417 = vmatmul.mubr.msk.bf16.gmra.mrb[48].mxu0 %vm2811_vm5, %v19391_v11  ;;  %v15864_v14 = vsel %vm24807_vm12, %v20013_v1, %v15863_v17  ;;  %v15868_v60 = vsel %vm24807_vm12, %v20014_v57, %v15867_v28 }
 0x48f   : > { %v8828_v61 = vrot.slane %v23430_v3, 5  ;;  %v15872_v4 = vsel %vm24807_vm12, %v20015_v23, %v15871_v45  ;;  %v20016_v20 = vrot.slane %v15723_v8, 9  ;;  %v15726_v35 = vld [vmem:[#allocation2 + $0x170] sm:$0xe]  ;;  %21420 = vmatprep.mubr.msk.bf16.mxu0 %vm2811_vm5, %v19392_v56  ;;  %v8825_v58 = vsel %vm24807_vm12, %v19364_v47, %v8824_v51  ;;  %v23431_v44 = vld [vmem:[#allocation2 + $0x15c] sm:$0x1] }
 0x490   : > { %v15875_v12 = vrot.slane %v23431_v44, 5  ;;  %v19366_v49 = vrot.slane %v8662_v39, 9  ;;  %v8832_v33 = vrot.slane %v26671_v42, 5  ;;  %v8664_v15 = vld [vmem:[#allocation2 + $0x150] sm:$0xe]  ;;  %v20017_v6 = vrot.slane %v15724_v32, 9 }
 0x491   : > { %v23432_v1 = vld [vmem:[#allocation2 + $0x164] sm:$0x1]  ;;  %v19367_v26 = vrot.slane %v8663_v53, 9  ;;  %v8836_v46 = vrot.slane %v26687_v50, 5  ;;  %v20045_v62 = vcombine.low %v15860_v63, %v15864_v14  ;;  %v20046_v30 = vcombine.low %v15868_v60, %v15872_v4  ;;  %v15725_v5 = vld [vmem:[#allocation2 + $0x168] sm:$0xe] }
 0x492   : > { %v15879_v2 = vrot.slane %v23432_v1, 5  ;;  %v8829_v17 = vsel %vm24807_vm12, %v19365_v52, %v8828_v61  ;;  %v8833_v57 = vsel %vm24807_vm12, %v19366_v49, %v8832_v33  ;;  %v8665_v28 = vld [vmem:[#allocation2 + $0x158] sm:$0xe]  ;;  %v20019_v9 = vrot.slane %v15726_v35, 9  ;;  %v15728_v8 = vld [vmem:[#allocation2 + $0x180] sm:$0xe] }
 0x493   : > { %v8837_v42 = vsel %vm24807_vm12, %v19367_v26, %v8836_v46  ;;  %v15887_v13 = vrot.slane %v26699_v25, 5  ;;  %v19368_v23 = vrot.slane %v8664_v15, 9  ;;  %v15727_v43 = vld [vmem:[#allocation2 + $0x178] sm:$0xe]  ;;  %21893 = vmatmul.mubr.msk.bf16.gmra.mrb[0].mxu1 %vm2811_vm5, %v20045_v62  ;;  %v19393_v50 = vcombine.low %v8825_v58, %v8829_v17  ;;  %v8666_v51 = vld [vmem:[#allocation2 + $0x160] sm:$0xe] }
 0x494   : > { %v15876_v45 = vsel %vm24807_vm12, %v20016_v20, %v15875_v12  ;;  %v8840_v47 = vrot.slane %v26709_v10, 5  ;;  %21896 = vmatprep.mubr.msk.bf16.mxu1 %vm2811_vm5, %v20046_v30  ;;  %v15880_v11 = vsel %vm24807_vm12, %v20017_v6, %v15879_v2  ;;  %v19394_v21 = vcombine.low %v8833_v57, %v8837_v42  ;;  %v8667_v39 = vld [vmem:[#allocation2 + $0x168] sm:$0xe]  ;;  %v15729_v10 = vld [vmem:[#allocation2 + $0x198] sm:$0xe] }
 0x495   : > { %v20018_v18 = vrot.slane %v15725_v5, 9  ;;  %v15883_v25 = vrot.slane %v26690_v37, 5  ;;  %v15888_v63 = vsel %vm24807_vm12, %v20019_v9, %v15887_v13  ;;  %v19369_v56 = vrot.slane %v8665_v28, 9  ;;  %v15730_v14 = vld [vmem:[#allocation2 + $0x1a0] sm:$0xe] }
 0x496   : > { %v8844_v52 = vrot.slane %v26716_v54, 5  ;;  %v20020_v3 = vrot.slane %v15727_v43, 9  ;;  %21421 = vmatmul.mubr.msk.bf16.gmra.mrb[52].mxu0 %vm2811_vm5, %v19393_v50  ;;  %v8841_v61 = vsel %vm24807_vm12, %v19368_v23, %v8840_v47  ;;  %v15891_v32 = vrot.slane %v26719_v55, 5  ;;  %v8669_v15 = vld [vmem:[#allocation2 + $0x178] sm:$0xe] }
 0x497   : > { %v20021_v53 = vrot.slane %v15728_v8, 9  ;;  %v15895_v37 = vrot.slane %v26735_v22, 5  ;;  %21424 = vmatprep.mubr.msk.bf16.mxu0 %vm2811_vm5, %v19394_v21  ;;  %v19370_v60 = vrot.slane %v8666_v51, 9  ;;  %v8848_v4 = vrot.slane %v26732_v40, 5  ;;  %v8668_v40 = vld [vmem:[#allocation2 + $0x170] sm:$0xe] }
 0x498   : > { %v19371_v20 = vrot.slane %v8667_v39, 9  ;;  %v8852_v54 = vrot.slane %v26743_v16, 5  ;;  %v20047_v35 = vcombine.low %v15876_v45, %v15880_v11  ;;  %v15884_v58 = vsel %vm24807_vm12, %v20018_v18, %v15883_v25  ;;  %v15731_v2 = vld [vmem:[#allocation2 + $0x1a8] sm:$0xe]  ;;  %v15733_v26 = vld [vmem:[#allocation2 + $0x1b8] sm:$0xe] }
 0x499   : > { %v20022_v44 = vrot.slane %v15729_v10, 9  ;;  %v15899_v12 = vrot.slane %v26749_v29, 5  ;;  %v8845_v55 = vsel %vm24807_vm12, %v19369_v56, %v8844_v52  ;;  %v20023_v49 = vrot.slane %v15730_v14, 9  ;;  %v15732_v30 = vld [vmem:[#allocation2 + $0x1b0] sm:$0xe] }
 0x49a   : > { %v8853_v22 = vsel %vm24807_vm12, %v19371_v20, %v8852_v54  ;;  %v15903_v33 = vrot.slane %v26755_v34, 5  ;;  %v20048_v6 = vcombine.low %v15884_v58, %v15888_v63  ;;  %v19395_v16 = vcombine.low %v8841_v61, %v8845_v55  ;;  %v15734_v17 = vld [vmem:[#allocation2 + $0x1c0] sm:$0xe]  ;;  %v15735_v9 = vld [vmem:[#allocation2 + $0x1c8] sm:$0xe] }
 0x49b   : > { %v15892_v1 = vsel %vm24807_vm12, %v20020_v3, %v15891_v32  ;;  %21897 = vmatmul.mubr.msk.bf16.gmra.mrb[4].mxu1 %vm2811_vm5, %v20047_v35  ;;  %v15896_v29 = vsel %vm24807_vm12, %v20021_v53, %v15895_v37  ;;  %v8849_v46 = vsel %vm24807_vm12, %v19370_v60, %v8848_v4  ;;  %v15900_v34 = vsel %vm24807_vm12, %v20022_v44, %v15899_v12  ;;  %v15736_v45 = vld [vmem:[#allocation2 + $0x1d0] sm:$0xe]  ;;  %v23200_v32 = vld [vmem:[#allocation2 + $0x58] ss:$8 sps:$4 sm:$0xff]   ;;  %v23212_v35 = vld [vmem:[%s27928_s6 + $0x328] sm:$0xff]  }
 0x49c   : > { %v15904_v62 = vsel %vm24807_vm12, %v20023_v49, %v15903_v33  ;;  %21900 = vmatprep.mubr.msk.bf16.mxu1 %vm2811_vm5, %v20048_v6  ;;  %v19396_v57 = vcombine.low %v8849_v46, %v8853_v22  ;;  %v19372_v5 = vrot.slane %v8668_v40, 9  ;;  %v8856_v28 = vrot.slane %v26760_v41, 5  ;;  %v23201_v37 = vld [vmem:[#allocation2 + $0x68] ss:$8 sps:$4 sm:$0xff]   ;;  %v23202_v14 = vld [vmem:[#allocation2 + $0x78] ss:$8 sps:$4 sm:$0xff]  }
 0x49d   : > { %v19373_v42 = vrot.slane %v8669_v15, 9  ;;  %v8860_v13 = vrot.slane %v26765_v0, 5  ;;  %v20024_v23 = vrot.slane %v15731_v2, 9  ;;  %v20026_v43 = vrot.slane %v15733_v26, 9  ;;  %v23203_v60 = vld [vmem:[#allocation2 + $0xb0] ss:$8 sps:$4 sm:$0xff]  }
 0x49e   : > { %v15915_v50 = vrot.slane %v26786_v59, 5  ;;  %21425 = vmatmul.mubr.msk.bf16.gmra.mrb[56].mxu0 %vm2811_vm5, %v19395_v16  ;;  %v20050_v47 = vcombine.low %v15900_v34, %v15904_v62  ;;  %v15907_v8 = vrot.slane %v26769_v27, 5  ;;  %v20027_v11 = vrot.slane %v15734_v17, 9  ;;  %v23205_v4 = vld [vmem:[#allocation2 + $0x88] ss:$8 sps:$4 sm:$0xff]   ;;  %v27049_v46 = vld [vmem:[%s27928_s6 + $0x340] sm:$0xff]  }
 0x49f   : > { %v15919_v21 = vrot.slane %v26794_v31, 5  ;;  %21428 = vmatprep.mubr.msk.bf16.mxu0 %vm2811_vm5, %v19396_v57  ;;  %v20025_v41 = vrot.slane %v15732_v30, 9  ;;  %v20028_v0 = vrot.slane %v15735_v9, 9  ;;  %v15923_v25 = vrot.slane %v26804_v19, 5  ;;  %v23207_v20 = vld [vmem:[#allocation2 + $0xa8] ss:$8 sps:$4 sm:$0xff]  }
 0x4a0   : > { %v15916_v18 = vsel %vm24807_vm12, %v20026_v43, %v15915_v50  ;;  %v15911_v59 = vrot.slane %v26778_v36, 5  ;;  %v20029_v39 = vrot.slane %v15736_v45, 9  ;;  %v15927_v27 = vrot.slane %v26809_v38, 5  ;;  %v23206_v54 = vld [vmem:[#allocation2 + $0xc0] ss:$8 sps:$4 sm:$0xff]   ;;  %v23217_v12 = vld [vmem:[%s27928_s6 + $0x330] sm:$0xff]  }
 0x4a1   : > { %v15920_v51 = vsel %vm24807_vm12, %v20027_v11, %v15919_v21  ;;  %v20049_v63 = vcombine.low %v15892_v1, %v15896_v29  ;;  %v8857_v31 = vsel %vm24807_vm12, %v19372_v5, %v8856_v28  ;;  %v15924_v52 = vsel %vm24807_vm12, %v20028_v0, %v15923_v25  ;;  %v23208_v58 = vld [vmem:[#allocation2 + $0xd0] ss:$8 sps:$4 sm:$0xff]   ;;  %v23210_v40 = vld [vmem:[#allocation2 + $0xe0] ss:$8 sps:$4 sm:$0xff]  }
 0x4a2   : > { %v20052_v56 = vcombine.low %v15916_v18, %v15920_v51  ;;  %v15928_v3 = vsel %vm24807_vm12, %v20029_v39, %v15927_v27  ;;  %v8861_v36 = vsel %vm24807_vm12, %v19373_v42, %v8860_v13  ;;  %v15908_v10 = vsel %vm24807_vm12, %v20024_v23, %v15907_v8  ;;  %v23209_v44 = vld [vmem:[#allocation2 + $0xb8] ss:$8 sps:$4 sm:$0xff]   ;;  %v16638_v55 = vld [vmem:[#allocation2 + $0xb0] sm:$0xf]  ;;  %v16644_v6 = vld [vmem:[#allocation2 + $0xc8] sm:$0xf] }
 0x4a3   : > { %21901 = vmatmul.mubr.msk.bf16.gmra.mrb[8].mxu1 %vm2811_vm5, %v20049_v63  ;;  %v20053_v19 = vcombine.low %v15924_v52, %v15928_v3  ;;  %v19397_v38 = vcombine.low %v8857_v31, %v8861_v36  ;;  %v15912_v61 = vsel %vm24807_vm12, %v20025_v41, %v15911_v59  ;;  %v16640_v22 = vld [vmem:[#allocation2 + $0xb8] sm:$0xf]  ;;  %v16703_v49 = vshrl.u32 %v16638_v55, 16  ;;  %v23211_v15 = vld [vmem:[#allocation2 + $0x100] ss:$8 sps:$4 sm:$0xff]  }
 0x4a4   : > { %21904 = vmatprep.mubr.msk.bf16.mxu1 %vm2811_vm5, %v20050_v47  ;;  %v20051_v53 = vcombine.low %v15908_v10, %v15912_v61  ;;  %v16706_v33 = vshll.u32 %v16638_v55, 16  ;;  %v16717_v16 = vshrl.u32 %v16640_v22, 16  ;;  %v16646_v1 = vld [vmem:[#allocation2 + $0xd0] sm:$0xf]  ;;  %v16720_v29 = vshll.u32 %v16640_v22, 16 }
 0x4a5   : > { %v16705_v2 = vrot.slane %v16703_v49, 4  ;;  %v16642_v34 = vld [vmem:[#allocation2 + $0xc0] sm:$0xf]  ;;  %v16745_v62 = vshrl.u32 %v16644_v6, 16  ;;  %v16748_v30 = vshll.u32 %v16644_v6, 16  ;;  %v16759_v57 = vshrl.u32 %v16646_v1, 16 }
 0x4a6   : > { %21429 = vmatmul.mubr.msk.bf16.gmra.mrb[60].mxu0 %vm2811_vm5, %v19397_v38  ;;  %v16708_v26 = vrot.slane %v16706_v33, 5  ;;  %v16648_v17 = vld [vmem:[#allocation2 + $0xd8] sm:$0xf]  ;;  %v16762_v5 = vshll.u32 %v16646_v1, 16  ;;  %v27051_v42 = vld [vmem:[#allocation2 + $0xb4] sm:$0x1] }
 0x4a7   : > { %21440 = vmatprep.mubr.msk.bf16.mxu0 %vm2811_vm5, %v23200_v32  ;;  %v23213_v28 = vld [vmem:[#allocation2 + $0x110] ss:$8 sps:$4 sm:$0xff]   ;;  %v16719_v9 = vrot.slane %v16717_v16, 4  ;;  %v16650_v13 = vld [vmem:[#allocation2 + $0xe0] sm:$0xf]  ;;  %v16722_v50 = vrot.slane %v16720_v29, 5 }
 0x4a8   : > { %v27053_v23 = vld [vmem:[#allocation2 + $0xbc] sm:$0x1]  ;;  %v16709_v43 = vor.u32 %v16708_v26, %v16705_v2  ;;  %v16731_v45 = vshrl.u32 %v16642_v34, 16  ;;  %v16734_v47 = vshll.u32 %v16642_v34, 16  ;;  %v16643_v8 = vld [vmem:[#allocation2 + $0xc4] sm:$0x1] }
 0x4a9   : > { %v16747_v11 = vrot.slane %v16745_v62, 4  ;;  %v16750_v21 = vrot.slane %v16748_v30, 5  ;;  %v16773_v41 = vshrl.u32 %v16648_v17, 16  ;;  %v16776_v18 = vshll.u32 %v16648_v17, 16  ;;  %v23214_v0 = vld [vmem:[#allocation2 + $0x120] ss:$8 sps:$4 sm:$0xff]  }
 0x4aa   : > { %v16761_v25 = vrot.slane %v16759_v57, 4  ;;  %v16764_v59 = vrot.slane %v16762_v5, 5  ;;  %v16787_v51 = vshrl.u32 %v16650_v13, 16  ;;  %v16790_v39 = vshll.u32 %v16650_v13, 16  ;;  %v27058_v63 = vld [vmem:[#allocation2 + $0xcc] sm:$0x1] }
 0x4ab   : > { %21905 = vmatmul.mubr.msk.bf16.gmra.mrb[12].mxu1 %vm2811_vm5, %v20051_v53  ;;  %v16712_v27 = vshll.u32 %v27051_v42, 16  ;;  %v16723_v31 = vor.u32 %v16722_v50, %v16719_v9  ;;  %v16733_v52 = vrot.slane %v16731_v45, 4  ;;  %v16740_v3 = vshll.u32 %v16643_v8, 16  ;;  %v16652_v36 = vld [vmem:[#allocation2 + $0xe8] sm:$0xf] }
 0x4ac   : > { %21908 = vmatprep.mubr.msk.bf16.mxu1 %vm2811_vm5, %v20052_v56  ;;  %v16726_v56 = vshll.u32 %v27053_v23, 16  ;;  %v16736_v38 = vrot.slane %v16734_v47, 5  ;;  %v27064_v10 = vld [vmem:[#allocation2 + $0xd4] sm:$0x1]  ;;  %v16775_v61 = vrot.slane %v16773_v41, 4  ;;  %v16778_v32 = vrot.slane %v16776_v18, 5 }
 0x4ad   : > { %v16751_v53 = vor.u32 %v16750_v21, %v16747_v11  ;;  %v16754_v55 = vshll.u32 %v27058_v63, 16  ;;  %v16768_v22 = vshll.u32 %v27064_v10, 16  ;;  %v16654_v49 = vld [vmem:[#allocation2 + $0x100] sm:$0xf]  ;;  %v23216_v33 = vld [vmem:[#allocation2 + $0x150] ss:$8 sps:$4 sm:$0xff]  }
 0x4ae   : > { %21441 = vmatmul.mubr.msk.bf16.vlgmr.msra.gmra.mrb[32].mxu0 %vm2811_vm5, %v23201_v37  ;;  %v16765_v37 = vor.u32 %v16764_v59, %v16761_v25  ;;  %v16779_v6 = vor.u32 %v16778_v32, %v16775_v61  ;;  %v16656_v16 = vld [vmem:[#allocation2 + $0x108] sm:$0xf]  ;;  %v27074_v29 = vld [vmem:[#allocation2 + $0xe4] sm:$0x1]  ;;  %v27077_v62 = vld [vmem:[#allocation2 + $0xec] sm:$0x1] }
 0x4af   : > { %21444 = vmatprep.mubr.msk.bf16.mxu0 %vm2811_vm5, %v23202_v14  ;;  %v16789_v14 = vrot.slane %v16787_v51, 4  ;;  %v16752_v1 = vrot.slane %v16751_v53, 4  ;;  %v16815_v57 = vshrl.u32 %v16654_v49, 16  ;;  %v16818_v5 = vshll.u32 %v16654_v49, 16  ;;  %v27080_v13 = vld [vmem:[#allocation2 + $0x104] sm:$0x1] }
 0x4b0   : > { %v16766_v2 = vrot.slane %v16765_v37, 4  ;;  %v16770_v9 = vrot.slane %v16768_v22, 5  ;;  %v16832_v50 = vshll.u32 %v16656_v16, 16  ;;  %v16780_v8 = vrot.slane %v16779_v6, 4  ;;  %v16658_v21 = vld [vmem:[#allocation2 + $0x110] sm:$0xf] }
 0x4b1   : > { %v16796_v11 = vshll.u32 %v27074_v29, 16  ;;  %v16810_v25 = vshll.u32 %v27077_v62, 16  ;;  %v16660_v53 = vld [vmem:[#allocation2 + $0x118] sm:$0xf]  ;;  %v16846_v37 = vshll.u32 %v16658_v21, 16 }
 0x4b2   : > { %v16771_v18 = vsel %vm23998_vm4, %v16766_v2, %v16770_v9  ;;  %v16664_v49 = vld [vmem:[#allocation2 + $0x128] sm:$0xf]  ;;  %v16860_v2 = vshll.u32 %v16660_v53, 16 }
 0x4b3   : > { %21909 = vmatmul.mubr.msk.bf16.gmra.mrb[16].mxu1 %vm2811_vm5, %v20053_v19  ;;  %v27062_v19 = vrot.slane %v16709_v43, 4  ;;  %v16829_v43 = vshrl.u32 %v16656_v16, 16  ;;  %v16798_v32 = vrot.slane %v16796_v11, 5  ;;  %v16857_v16 = vshrl.u32 %v16660_v53, 16  ;;  %v23220_v9 = vld [vmem:[#allocation2 + $0x180] ss:$8 sps:$4 sm:$0xff]  }
 0x4b4   : > { %21920 = vmatprep.mubr.msk.bf16.mxu1 %vm2811_vm5, %v23203_v60  ;;  %v16792_v60 = vrot.slane %v16790_v39, 5  ;;  %v16817_v39 = vrot.slane %v16815_v57, 4  ;;  %v16888_v57 = vshll.u32 %v16664_v49, 16  ;;  %v23221_v11 = vld [vmem:[#allocation2 + $0x1a0] ss:$8 sps:$4 sm:$0xff]  }
 0x4b6   : > { %21445 = vmatmul.mubr.msk.bf16.gmra.mrb[36].mxu0 %vm2811_vm5, %v23205_v4  ;;  %v23215_v4 = vld [vmem:[#allocation2 + $0x130] ss:$8 sps:$4 sm:$0xff]   ;;  %v16793_v34 = vor.u32 %v16792_v60, %v16789_v14 }
 0x4b7   : > { %21448 = vmatprep.mubr.msk.bf16.mxu0 %vm2811_vm5, %v23207_v20  ;;  %v16714_v20 = vrot.slane %v16712_v27, 5  ;;  %v16820_v27 = vrot.slane %v16818_v5, 5  ;;  %v23219_v14 = vld [vmem:[#allocation2 + $0x170] ss:$8 sps:$4 sm:$0xff]  }
 0x4b8   : > { %v27090_v59 = vrot.slane %v16793_v34, 4 }
 0x4bb   : > { %21921 = vmatmul.mubr.msk.bf16.vlgmr.msra.gmra.mrb[20].mxu1 %vm2811_vm5, %v23206_v54  ;;  %v27066_v54 = vld [vmem:[#allocation2 + $0xdc] sm:$0x1] }
 0x4bc   : > { %21953 = vmatpush3.bf16.msra.mxu1 %v26912_v7  ;;  %21924 = vmatprep.mubr.msk.bf16.mxu1 %vm2811_vm5, %v23208_v58  ;;  %v23222_v7 = vld [vmem:[%s27928_s6 + $0x338] sm:$0xff]   ;;  %v16804_v58 = vshll.u32 %v16652_v36, 16  ;;  %v16782_v26 = vshll.u32 %v27066_v54, 16 }
 0x4bd   : > { %21954 = vmatprep.subr.bf16.mxu1 %v23212_v35 }
 0x4be   : > { %21449 = vmatmul.mubr.msk.bf16.gmra.mrb[40].mxu0 %vm2811_vm5, %v23209_v44  ;;  %v16728_v44 = vrot.slane %v16726_v56, 5  ;;  %v16806_v17 = vrot.slane %v16804_v58, 5  ;;  %v16824_v56 = vshll.u32 %v27080_v13, 16  ;;  %v16662_v58 = vld [vmem:[#allocation2 + $0x120] sm:$0xf] }
 0x4bf   : > { %v16874_v34 = vshll.u32 %v16662_v58, 16 }
 0x4c0   : > { %21955 = vmatpush3.bf16.msra.mxu1 %v23212_v35  ;;  %v16801_v35 = vshrl.u32 %v16652_v36, 16  ;;  %v16843_v36 = vshrl.u32 %v16658_v21, 16 }
 0x4c1   : > { %21956 = vmatprep.subr.bf16.mxu1 %v23217_v12 }
 0x4c2   : > { %v16803_v30 = vrot.slane %v16801_v35, 4  ;;  %v16812_v35 = vrot.slane %v16810_v25, 5  ;;  %v16845_v6 = vrot.slane %v16843_v36, 4  ;;  %v27118_v25 = vld [vmem:[#allocation2 + $0x11c] sm:$0x1] }
 0x4c3   : > { %21925 = vmatmul.mubr.msk.bf16.gmra.mrb[24].mxu1 %vm2811_vm5, %v23210_v40  ;;  %v16715_v40 = vsel %vm23998_vm4, %v27062_v19, %v16714_v20  ;;  %v23218_v19 = vld [vmem:[#allocation2 + $0x160] ss:$8 sps:$4 sm:$0xff]  }
 0x4c4   : > { %21928 = vmatprep.mubr.msk.bf16.mxu1 %vm2811_vm5, %v23211_v15  ;;  %21957 = vmatpush3.bf16.msra.mxu1 %v23217_v12  ;;  %v16742_v12 = vrot.slane %v16740_v3, 5  ;;  %v16737_v15 = vor.u32 %v16736_v38, %v16733_v52  ;;  %v16807_v51 = vor.u32 %v16806_v17, %v16803_v30  ;;  %v16831_v52 = vrot.slane %v16829_v43, 4  ;;  %v16668_v30 = vld [vmem:[#allocation2 + $0x138] sm:$0xf] }
 0x4c5   : > { %21958 = vmatprep.subr.bf16.mxu1 %v23222_v7  ;;  %v16834_v3 = vrot.slane %v16832_v50, 5  ;;  %v16885_v17 = vshrl.u32 %v16664_v49, 16 }
 0x4c6   : > { %v16738_v47 = vrot.slane %v16737_v15, 4  ;;  %v27113_v15 = vld [vmem:[#allocation2 + $0x114] sm:$0x1] }
 0x4c8   : > { %21959 = vmatpush3.bf16.msra.mxu1 %v23222_v7  ;;  %v16724_v7 = vrot.slane %v16723_v31, 4  ;;  %v27092_v31 = vld [vmem:[#allocation2 + $0x10c] sm:$0x1]  ;;  %v16743_v38 = vsel %vm23998_vm4, %v16738_v47, %v16742_v12  ;;  %v16808_v12 = vrot.slane %v16807_v51, 4  ;;  %v16852_v47 = vshll.u32 %v27113_v15, 16 }
 0x4c9   : > { %21992 = vmatprep.subr.bf16.mxu1 %v27049_v46  ;;  %v16838_v22 = vshll.u32 %v27092_v31, 16  ;;  %v16862_v51 = vrot.slane %v16860_v2, 5  ;;  %v27142_v2 = vld [vmem:[#allocation2 + $0x13c] sm:$0x1] }
 0x4ca   : > { %v16729_v45 = vsel %vm23998_vm4, %v16724_v7, %v16728_v44  ;;  %v16799_v44 = vsel %vm23998_vm4, %v27090_v59, %v16798_v32  ;;  %v16835_v7 = vor.u32 %v16834_v3, %v16831_v52  ;;  %v16813_v43 = vsel %vm23998_vm4, %v16808_v12, %v16812_v35  ;;  %v27128_v32 = vld [vmem:[#allocation2 + $0x12c] sm:$0x1] }
 0x4cb   : > { %21929 = vmatmul.mubr.msk.bf16.gmra.mrb[28].mxu1 %vm2811_vm5, %v23213_v28  ;;  %v16756_v28 = vrot.slane %v16754_v55, 5  ;;  %v27099_v60 = vcombine.low %v16715_v40, %v16729_v45  ;;  %v16821_v55 = vor.u32 %v16820_v27, %v16817_v39  ;;  %v27111_v40 = vrot.slane %v16824_v56, 5  ;;  %v27120_v56 = vld [vmem:[#allocation2 + $0x124] sm:$0x1] }
 0x4cc   : > { %21932 = vmatprep.mubr.msk.bf16.mxu1 %vm2811_vm5, %v23214_v0  ;;  %v16784_v0 = vrot.slane %v16782_v26, 5  ;;  %v16871_v26 = vshrl.u32 %v16662_v58, 16  ;;  %v16840_v45 = vrot.slane %v16838_v22, 5  ;;  %v16836_v21 = vrot.slane %v16835_v7, 4 }
 0x4cd   : > { %v16757_v41 = vsel %vm23998_vm4, %v16752_v1, %v16756_v28  ;;  %v16848_v1 = vrot.slane %v16846_v37, 5  ;;  %v16822_v50 = vrot.slane %v16821_v55, 4  ;;  %v16876_v27 = vrot.slane %v16874_v34, 5  ;;  %v16672_v55 = vld [vmem:[#allocation2 + $0x158] sm:$0xf] }
 0x4ce   : > { %v16785_v61 = vsel %vm23998_vm4, %v16780_v8, %v16784_v0  ;;  %v16670_v8 = vld [vmem:[#allocation2 + $0x150] sm:$0xf]  ;;  %v16916_v0 = vshll.u32 %v16668_v30, 16  ;;  %v16873_v39 = vrot.slane %v16871_v26, 4  ;;  %v16887_v52 = vrot.slane %v16885_v17, 4 }
 0x4cf   : > { %v27103_v20 = vcombine.low %v16771_v18, %v16785_v61  ;;  %v16913_v18 = vshrl.u32 %v16668_v30, 16  ;;  %v16849_v59 = vor.u32 %v16848_v1, %v16845_v6  ;;  %v16890_v3 = vrot.slane %v16888_v57, 5  ;;  %v27140_v1 = vld [vmem:[#allocation2 + $0x134] sm:$0x1]  ;;  %v23223_v34 = vld [vmem:[#allocation2 + $0x1b0] ss:$8 sps:$4 sm:$0xff]  }
 0x4d0   : > { %v16827_v61 = vsel %vm23998_vm4, %v16822_v50, %v27111_v40  ;;  %v16927_v53 = vshrl.u32 %v16670_v8, 16  ;;  %v16930_v37 = vshll.u32 %v16670_v8, 16  ;;  %v16866_v35 = vshll.u32 %v27118_v25, 16  ;;  %v16674_v40 = vld [vmem:[#allocation2 + $0x160] sm:$0xf] }
 0x4d1   : > { %v16915_v58 = vrot.slane %v16913_v18, 4  ;;  %v16918_v12 = vrot.slane %v16916_v0, 5  ;;  %v27136_v22 = vrot.slane %v16849_v59, 4  ;;  %v16877_v7 = vor.u32 %v16876_v27, %v16873_v39  ;;  %v16676_v39 = vld [vmem:[#allocation2 + $0x168] sm:$0xf] }
 0x4d2   : > { %v16891_v6 = vor.u32 %v16890_v3, %v16887_v52  ;;  %v16922_v30 = vshll.u32 %v27142_v2, 16  ;;  %v16929_v17 = vrot.slane %v16927_v53, 4  ;;  %v16932_v57 = vrot.slane %v16930_v37, 5  ;;  %v27151_v3 = vld [vmem:[#allocation2 + $0x15c] sm:$0x1] }
 0x4d3   : > { %21933 = vmatmul.mubr.msk.bf16.gmra.mrb[0].mxu1 %vm2811_vm5, %v23215_v4  ;;  %v27101_v4 = vcombine.low %v16743_v38, %v16757_v41  ;;  %v16859_v41 = vrot.slane %v16857_v16, 4  ;;  %v27123_v38 = vcombine.low %v16799_v44, %v16813_v43  ;;  %v16841_v44 = vsel %vm23998_vm4, %v16836_v21, %v16840_v45  ;;  %v27154_v37 = vld [vmem:[#allocation2 + $0x164] sm:$0x1] }
 0x4d4   : > { %21936 = vmatprep.mubr.msk.bf16.mxu1 %vm2811_vm5, %v23216_v33  ;;  %v16666_v33 = vld [vmem:[#allocation2 + $0x130] sm:$0xf]  ;;  %v16894_v16 = vshll.u32 %v27128_v32, 16  ;;  %v16944_v43 = vshll.u32 %v16672_v55, 16  ;;  %v16955_v50 = vshrl.u32 %v16674_v40, 16  ;;  %v16958_v45 = vshll.u32 %v16674_v40, 16 }
 0x4d5   : > { %v16899_v5 = vshrl.u32 %v16666_v33, 16  ;;  %v16902_v28 = vshll.u32 %v16666_v33, 16  ;;  %v16863_v49 = vor.u32 %v16862_v51, %v16859_v41  ;;  %v16880_v33 = vshll.u32 %v27120_v56, 16  ;;  %v27148_v41 = vld [vmem:[#allocation2 + $0x154] sm:$0x1] }
 0x4d6   : > { %v16868_v8 = vrot.slane %v16866_v35, 5  ;;  %v16908_v21 = vshll.u32 %v27140_v1, 16  ;;  %v16878_v0 = vrot.slane %v16877_v7, 4  ;;  %v16892_v59 = vrot.slane %v16891_v6, 4 }
 0x4d7   : > { %v16901_v36 = vrot.slane %v16899_v5, 4  ;;  %v16941_v5 = vshrl.u32 %v16672_v55, 16  ;;  %v16864_v18 = vrot.slane %v16863_v49, 4  ;;  %v16896_v51 = vrot.slane %v16894_v16, 5 }
 0x4d8   : > { %v16924_v52 = vrot.slane %v16922_v30, 5  ;;  %v16946_v53 = vrot.slane %v16944_v43, 5  ;;  %v16957_v35 = vrot.slane %v16955_v50, 4  ;;  %v16936_v55 = vshll.u32 %v27148_v41, 16 }
 0x4d9   : > { %v16972_v49 = vshll.u32 %v16676_v39, 16  ;;  %v16869_v7 = vsel %vm23998_vm4, %v16864_v18, %v16868_v8  ;;  %v16950_v16 = vshll.u32 %v27151_v3, 16 }
 0x4da   : > { %v27179_v50 = vrot.slane %v16936_v55, 5 }
 0x4db   : > { %21937 = vmatmul.mubr.msk.bf16.gmra.mrb[4].mxu1 %vm2811_vm5, %v23218_v19  ;;  %v16904_v19 = vrot.slane %v16902_v28, 5  ;;  %v23224_v28 = vld [vmem:[#allocation2 + $0x1c0] ss:$8 sps:$4 sm:$0xff]   ;;  %v27183_v8 = vrot.slane %v16972_v49, 5 }
 0x4dc   : > { %21940 = vmatprep.mubr.msk.bf16.mxu1 %vm2811_vm5, %v23219_v14  ;;  %v27131_v14 = vrot.slane %v16852_v47, 5  ;;  %v27145_v47 = vcombine.low %v16827_v61, %v16841_v44  ;;  %v16969_v44 = vshrl.u32 %v16676_v39, 16  ;;  %v27194_v39 = vld [vmem:[#allocation2 + $0x180] sm:$0xf] }
 0x4dd   : > { %v16905_v26 = vor.u32 %v16904_v19, %v16901_v36  ;;  %v16933_v36 = vor.u32 %v16932_v57, %v16929_v17  ;;  %v16943_v19 = vrot.slane %v16941_v5, 4  ;;  %v16964_v57 = vshll.u32 %v27154_v37, 16  ;;  %v17484_v49 = vld [vmem:[#allocation2 + $0x120] sm:$0xe] }
 0x4de   : > { %v16855_v40 = vsel %vm23998_vm4, %v27136_v22, %v27131_v14  ;;  %v27173_v14 = vld [vmem:[#allocation2 + $0x178] sm:$0xf] }
 0x4df   : > { %v16906_v27 = vrot.slane %v16905_v26, 4  ;;  %v23225_v26 = vld [vmem:[#allocation2 + $0x1d0] ss:$8 sps:$4 sm:$0xff]   ;;  %v27170_v17 = vrot.slane %v16933_v36, 4  ;;  %v16947_v5 = vor.u32 %v16946_v53, %v16943_v19  ;;  %v27187_v18 = vcombine.low %v16855_v40, %v16869_v7  ;;  %v23227_v36 = vld [vmem:[%s27928_s6 + $0x348] sm:$0xff]  }
 0x4e0   : > { %v27203_v19 = vrot.slane %v16964_v57, 5  ;;  %v17483_v53 = vld [vmem:[#allocation2 + $0x118] sm:$0xe] }
 0x4e1   : > { %v17487_v57 = vld [vmem:[#allocation2 + $0x138] sm:$0xe] }
 0x4e3   : > { %21941 = vmatmul.mubr.msk.bf16.gmra.mrb[8].mxu1 %vm2811_vm5, %v23220_v9  ;;  %v16919_v9 = vor.u32 %v16918_v12, %v16915_v58  ;;  %v16960_v58 = vrot.slane %v16958_v45, 5  ;;  %v16910_v12 = vrot.slane %v16908_v21, 5  ;;  %v27181_v45 = vrot.slane %v16969_v44, 4 }
 0x4e4   : > { %21944 = vmatprep.mubr.msk.bf16.mxu1 %vm2811_vm5, %v23221_v11  ;;  %v16882_v11 = vrot.slane %v16880_v33, 5  ;;  %v16678_v33 = vld [vmem:[#allocation2 + $0x170] sm:$0xf]  ;;  %v17630_v44 = vrot.slane %v27142_v2, 5  ;;  %v27267_v2 = vld [vmem:[#allocation2 + $0x18c] sm:$0x1] }
 0x4e5   : > { %v16920_v61 = vrot.slane %v16919_v9, 4  ;;  %v16911_v30 = vsel %vm23998_vm4, %v16906_v27, %v16910_v12  ;;  %v16961_v9 = vor.u32 %v16960_v58, %v16957_v35  ;;  %v16983_v43 = vshrl.u32 %v16678_v33, 16  ;;  %v17482_v27 = vld [vmem:[#allocation2 + $0x110] sm:$0xe]  ;;  %v17485_v35 = vld [vmem:[#allocation2 + $0x128] sm:$0xe] }
 0x4e6   : > { %v16883_v6 = vsel %vm23998_vm4, %v16878_v0, %v16882_v11  ;;  %v27185_v11 = vld [vmem:[#allocation2 + $0x174] sm:$0x1]  ;;  %v16986_v21 = vshll.u32 %v16678_v33, 16  ;;  %v27208_v58 = vrot.slane %v16947_v5, 4  ;;  %v20172_v7 = vrot.slane %v17482_v27, 9 }
 0x4e7   : > { %v16925_v22 = vsel %vm23998_vm4, %v16920_v61, %v16924_v52  ;;  %v27210_v12 = vrot.slane %v16961_v9, 4  ;;  %v27212_v55 = vrot.slane %v16983_v43, 4  ;;  %v20174_v9 = vrot.slane %v17484_v49, 9  ;;  %v17491_v5 = vld [vmem:[#allocation2 + $0x168] sm:$0xe] }
 0x4e8   : > { %v27197_v52 = vcombine.low %v16911_v30, %v16925_v22  ;;  %v27217_v40 = vrot.slane %v16986_v21, 5  ;;  %v17614_v30 = vrot.slane %v27118_v25, 5  ;;  %v17618_v43 = vrot.slane %v27120_v56, 5  ;;  %v17488_v21 = vld [vmem:[#allocation2 + $0x150] sm:$0xe] }
 0x4e9   : > { %v20175_v27 = vrot.slane %v17485_v35, 9  ;;  %v17622_v25 = vrot.slane %v27128_v32, 5  ;;  %v20177_v35 = vrot.slane %v17487_v57, 9  ;;  %v20178_v33 = vrot.slane %v17488_v21, 9  ;;  %v17492_v57 = vld [vmem:[#allocation2 + $0x170] sm:$0xe] }
 0x4ea   : > { %v27243_v49 = vsel %vm24807_vm12, %v20174_v9, %v17618_v43  ;;  %v27255_v9 = vld [vmem:[#allocation2 + $0x184] sm:$0x1]  ;;  %v17634_v43 = vrot.slane %v27148_v41, 5  ;;  %v17638_v21 = vrot.slane %v27151_v3, 5  ;;  %v17494_v3 = vld [vmem:[#allocation2 + $0x180] sm:$0xe] }
 0x4eb   : > { %21945 = vmatmul.mubr.msk.bf16.gmra.mrb[12].mxu1 %vm2811_vm5, %v23223_v34  ;;  %v16897_v34 = vsel %vm23998_vm4, %v16892_v59, %v16896_v51  ;;  %v27191_v59 = vrot.slane %v16950_v16, 5  ;;  %v16997_v51 = vshrl.u32 %v27173_v14, 16  ;;  %v17486_v16 = vld [vmem:[#allocation2 + $0x130] sm:$0xe]  ;;  %v27250_v32 = vsel %vm24807_vm12, %v20175_v27, %v17622_v25  ;;  %v17496_v56 = vld [vmem:[#allocation2 + $0x1a0] sm:$0xe] }
 0x4ec   : > { %21948 = vmatprep.mubr.msk.bf16.mxu1 %vm2811_vm5, %v23224_v28  ;;  %v27177_v28 = vld [vmem:[#allocation2 + $0x16c] sm:$0x1]  ;;  %v27189_v0 = vcombine.low %v16883_v6, %v16897_v34  ;;  %v17610_v6 = vrot.slane %v27113_v15, 5  ;;  %v20173_v34 = vrot.slane %v17483_v53, 9  ;;  %v17489_v53 = vld [vmem:[#allocation2 + $0x158] sm:$0xe]  ;;  %v27282_v41 = vsel %vm24807_vm12, %v20178_v33, %v17634_v43 }
 0x4ed   : > { %27959 = vst [vmem:[#allocation6_spill] sm:$0xff] %v27250_v32  ;;  %v20179_v27 = vrot.slane %v17489_v53, 9  ;;  %27962 = vst [vmem:[#allocation9_spill] sm:$0xff] %v27282_v41  ;;  %v17646_v53 = vrot.slane %v27177_v28, 5  ;;  %v27294_v22 = vld [vmem:[#allocation2 + $0x1a4] sm:$0x1] }
 0x4ee   : > { %v27229_v15 = vsel %vm24807_vm12, %v20172_v7, %v17610_v6  ;;  %v20176_v7 = vrot.slane %v17486_v16, 9  ;;  %v17626_v6 = vrot.slane %v27140_v1, 5  ;;  %v17650_v1 = vrot.slane %v27185_v11, 5 }
 0x4ef   : > { %v20184_v33 = vrot.slane %v17494_v3, 9  ;;  %v17501_v3 = vld [vmem:[#allocation2 + $0x1c8] sm:$0xe] }
 0x4f0   : > { %v27261_v16 = vsel %vm24807_vm12, %v20176_v7, %v17626_v6  ;;  %v17642_v7 = vrot.slane %v27154_v37, 5  ;;  %v17493_v6 = vld [vmem:[#allocation2 + $0x178] sm:$0xe]  ;;  %v27287_v37 = vsel %vm24807_vm12, %v20179_v27, %v17638_v21  ;;  %v17497_v21 = vld [vmem:[#allocation2 + $0x1a8] sm:$0xe] }
 0x4f1   : > { %27960 = vst [vmem:[#allocation7_spill] sm:$0xff] %v27261_v16  ;;  %27963 = vst [vmem:[#allocation10_spill] sm:$0xff] %v27287_v37  ;;  %v20183_v43 = vrot.slane %v17493_v6, 9  ;;  %v17666_v37 = vrot.slane %v27294_v22, 5  ;;  %v20187_v41 = vrot.slane %v17497_v21, 9 }
 0x4f3   : > { %21949 = vmatmul.mubr.msk.bf16.gmra.mrb[16].mxu1 %vm2811_vm5, %v23225_v26  ;;  %v27220_v26 = vrot.slane %v16997_v51, 4  ;;  %v27233_v51 = vsel %vm24807_vm12, %v20173_v34, %v17614_v30  ;;  %v17490_v34 = vld [vmem:[#allocation2 + $0x160] sm:$0xe]  ;;  %v27246_v30 = vld [vmem:[#allocation2 + $0x17c] sm:$0x1] }
 0x4f4   : > { %21960 = vmatprep.mubr.msk.bf16.mxu1 %vm2811_vm5, %v27099_v60  ;;  %v20180_v25 = vrot.slane %v17490_v34, 9  ;;  %v17654_v27 = vrot.slane %v27246_v30, 5  ;;  %v27986_v48 = vld [vmem:[#allocation9_spill] sm:$0xff] }
 0x4f6   : > { %v27291_v34 = vsel %vm24807_vm12, %v20180_v25, %v17642_v7  ;;  %v27303_v25 = vld [vmem:[#allocation2 + $0x1ac] sm:$0x1]  ;;  %v27319_v6 = vsel %vm24807_vm12, %v20183_v43, %v17654_v27  ;;  %v17662_v7 = vrot.slane %v27267_v2, 5 }
 0x4f7   : > { %27964 = vst [vmem:[#allocation11_spill] sm:$0xff] %v27291_v34  ;;  %27967 = vst [vmem:[#allocation14_spill] sm:$0xff] %v27319_v6  ;;  %v17499_v34 = vld [vmem:[#allocation2 + $0x1b8] sm:$0xe] }
 0x4fb   : > { %21961 = vmatmul.mubr.msk.bf16.vlgmr.msra.gmra.mrb[20].mxu1 %vm2811_vm5, %v27101_v4  ;;  %v27271_v4 = vsel %vm24807_vm12, %v20177_v35, %v17630_v44  ;;  %v20181_v44 = vrot.slane %v17491_v5, 9  ;;  %v20182_v35 = vrot.slane %v17492_v57, 9  ;;  %v27305_v57 = vld [vmem:[#allocation2 + $0x1b4] sm:$0x1] }
 0x4fc   : > { %21993 = vmatpush3.bf16.msra.mxu1 %v27049_v46  ;;  %21964 = vmatprep.mubr.msk.bf16.mxu1 %vm2811_vm5, %v27103_v20  ;;  %27961 = vst [vmem:[#allocation8_spill] sm:$0xff] %v27271_v4  ;;  %v23228_v46 = vld [vmem:[%s27928_s6 + $0x350] sm:$0xff]   ;;  %v17495_v20 = vld [vmem:[#allocation2 + $0x188] sm:$0xe]  ;;  %v17500_v4 = vld [vmem:[#allocation2 + $0x1c0] sm:$0xe] }
 0x4fd   : > { %21994 = vmatprep.subr.bf16.mxu1 %v23227_v36  ;;  %v27300_v5 = vsel %vm24807_vm12, %v20181_v44, %v17646_v53  ;;  %v27311_v61 = vsel %vm24807_vm12, %v20182_v35, %v17650_v1  ;;  %v17658_v44 = vrot.slane %v27255_v9, 5  ;;  %v17498_v53 = vld [vmem:[#allocation2 + $0x1b0] sm:$0xe]  ;;  %v20185_v60 = vrot.slane %v17495_v20, 9  ;;  %v27322_v1 = vld [vmem:[#allocation2 + $0x1bc] sm:$0x1] }
 0x4fe   : > { %27965 = vst [vmem:[#allocation12_spill] sm:$0xff] %v27300_v5  ;;  %27966 = vst [vmem:[#allocation13_spill] sm:$0xff] %v27311_v61  ;;  %v20186_v5 = vrot.slane %v17496_v56, 9  ;;  %v17670_v20 = vrot.slane %v27303_v25, 5  ;;  %v20188_v43 = vrot.slane %v17498_v53, 9  ;;  %v17674_v27 = vrot.slane %v27305_v57, 5 }
 0x4ff   : > { %v27328_v35 = vsel %vm24807_vm12, %v20184_v33, %v17658_v44  ;;  %v27335_v56 = vsel %vm24807_vm12, %v20185_v60, %v17662_v7  ;;  %v27341_v33 = vld [vmem:[#allocation2 + $0x1c4] sm:$0x1]  ;;  %v20189_v60 = vrot.slane %v17499_v34, 9  ;;  %v17678_v7 = vrot.slane %v27322_v1, 5  ;;  %v17502_v44 = vld [vmem:[#allocation2 + $0x1d0] sm:$0xe] }
 0x500   : > { %21995 = vmatpush3.bf16.msra.mxu1 %v23227_v36  ;;  %v23229_v36 = vld [vmem:[%s27928_s6 + $0x358] sm:$0xff]   ;;  %27968 = vst [vmem:[#allocation15_spill] sm:$0xff] %v27328_v35  ;;  %27969 = vst [vmem:[#allocation16_spill] sm:$0xff] %v27335_v56  ;;  %v27350_v53 = vld [vmem:[#allocation2 + $0x1cc] sm:$0x1]  ;;  %v20190_v21 = vrot.slane %v17500_v4, 9  ;;  %v16989_v4 = vor.u32 %v27217_v40, %v27212_v55 }
 0x501   : > { %21996 = vmatprep.subr.bf16.mxu1 %v23228_v46  ;;  %v17682_v56 = vrot.slane %v27341_v33, 5  ;;  %v27361_v34 = vld [vmem:[#allocation2 + $0x1d4] sm:$0x1]  ;;  %v27367_v6 = vsel %vm24807_vm12, %v20189_v60, %v17678_v7  ;;  %v16686_v61 = vld [vmem:[#allocation2 + $0x1a0] sm:$0xf]  ;;  %v20192_v16 = vrot.slane %v17502_v44, 9 }
 0x502   : > { %v17690_v35 = vrot.slane %v27361_v34, 5  ;;  %v16688_v7 = vld [vmem:[#allocation2 + $0x1a8] sm:$0xf]  ;;  %v27974_v55 = vshll.u32 %v27177_v28, 16 }
 0x503   : > { %21965 = vmatmul.mubr.msk.bf16.gmra.mrb[24].mxu1 %vm2811_vm5, %v27123_v38  ;;  %v27347_v38 = vsel %vm24807_vm12, %v20186_v5, %v17666_v37  ;;  %v17503_v37 = vld [vmem:[#allocation2 + $0x1d8] sm:$0xe]  ;;  %v16684_v5 = vld [vmem:[#allocation2 + $0x188] sm:$0xf] }
 0x504   : > { %21968 = vmatprep.mubr.msk.bf16.mxu1 %vm2811_vm5, %v27145_v47  ;;  %21997 = vmatpush3.bf16.msra.mxu1 %v23228_v46  ;;  %27970 = vst [vmem:[#allocation17_spill] sm:$0xff] %v27347_v38  ;;  %v27354_v47 = vsel %vm24807_vm12, %v20187_v41, %v17670_v20  ;;  %v27358_v46 = vsel %vm24807_vm12, %v20188_v43, %v17674_v27  ;;  %v20191_v41 = vrot.slane %v17501_v3, 9  ;;  %v17686_v20 = vrot.slane %v27350_v53, 5  ;;  %v27370_v43 = vld [vmem:[#allocation2 + $0x1dc] sm:$0x1] }
 0x505   : > { %21998 = vmatprep.subr.bf16.mxu1 %v23229_v36  ;;  %27971 = vst [vmem:[#allocation18_spill] sm:$0xff] %v27354_v47  ;;  %v27376_v27 = vsel %vm24807_vm12, %v20190_v21, %v17682_v56  ;;  %v27972_v47 = vshll.u32 %v27173_v14, 16  ;;  %v20193_v38 = vrot.slane %v17503_v37, 9  ;;  %v17694_v32 = vrot.slane %v27370_v43, 5 }
 0x506   : > { %v27383_v3 = vsel %vm24807_vm12, %v20191_v41, %v17686_v20  ;;  %v17025_v56 = vshrl.u32 %v16684_v5, 16  ;;  %v27392_v14 = vsel %vm24807_vm12, %v20192_v16, %v17690_v35  ;;  %v17028_v44 = vshll.u32 %v16684_v5, 16 }
 0x507   : > { %v17002_v60 = vrot.slane %v27972_v47, 5  ;;  %v17042_v47 = vshll.u32 %v16686_v61, 16  ;;  %v27396_v41 = vsel %vm24807_vm12, %v20193_v38, %v17694_v32  ;;  %v27402_v40 = vrot.slane %v27974_v55, 5 }
 0x508   : > { %21999 = vmatpush3.bf16.msra.mxu1 %v23229_v36  ;;  %v17039_v36 = vshrl.u32 %v16686_v61, 16  ;;  %27973 = vst [vmem:[#allocation19_spill] sm:$0xff] %v27396_v41  ;;  %v17053_v37 = vshrl.u32 %v16688_v7, 16  ;;  %v17056_v20 = vshll.u32 %v16688_v7, 16  ;;  %v16953_v61 = vsel %vm23998_vm4, %v27208_v58, %v27191_v59 }
 0x509   : > { %v17003_v32 = vor.u32 %v17002_v60, %v27220_v26  ;;  %v27976_v35 = vshll.u32 %v27194_v39, 16  ;;  %v27977_v5 = vor.u32 %v27183_v8, %v27181_v45  ;;  %v16990_v55 = vrot.slane %v16989_v4, 4  ;;  %v16690_v4 = vld [vmem:[#allocation2 + $0x1b0] sm:$0xf] }
 0x50a   : > { %v17006_v21 = vshll.u32 %v27246_v30, 16  ;;  %v17027_v41 = vrot.slane %v17025_v56, 4  ;;  %v17030_v59 = vrot.slane %v17028_v44, 5  ;;  %v17041_v58 = vrot.slane %v17039_v36, 4  ;;  %v16692_v36 = vld [vmem:[#allocation2 + $0x1b8] sm:$0xf] }
 0x50b   : > { %21969 = vmatmul.mubr.msk.bf16.gmra.mrb[28].mxu1 %vm2811_vm5, %v27187_v18  ;;  %v27975_v18 = vshrl.u32 %v27194_v39, 16  ;;  %v17016_v38 = vrot.slane %v27976_v35, 5  ;;  %v16976_v7 = vrot.slane %v27977_v5, 4  ;;  %v17044_v26 = vrot.slane %v17042_v47, 5 }
 0x50c   : > { %21972 = vmatprep.mubr.msk.bf16.mxu1 %vm2811_vm5, %v27189_v0  ;;  %v27978_v0 = vshll.u32 %v27185_v11, 16  ;;  %v27979_v39 = vsel %vm23998_vm4, %v27170_v17, %v27179_v50  ;;  %v16967_v45 = vsel %vm23998_vm4, %v27210_v12, %v27203_v19  ;;  %v17055_v8 = vrot.slane %v17053_v37, 4 }
 0x50d   : > { %v17013_v28 = vrot.slane %v27975_v18, 4  ;;  %v20134_v60 = vcombine.low %v27979_v39, %v16953_v61  ;;  %v17058_v11 = vrot.slane %v17056_v20, 5  ;;  %v17004_v18 = vrot.slane %v17003_v32, 4  ;;  %v16694_v32 = vld [vmem:[#allocation2 + $0x1c0] sm:$0xf] }
 0x50e   : > { %v16994_v16 = vrot.slane %v27978_v0, 5  ;;  %v17034_v56 = vshll.u32 %v27267_v2, 16  ;;  %v17048_v44 = vshll.u32 %v27294_v22, 16  ;;  %v16981_v17 = vsel %vm23998_vm4, %v16976_v7, %v27402_v40  ;;  %v16696_v2 = vld [vmem:[#allocation2 + $0x1c8] sm:$0xf] }
 0x50f   : > { %v17017_v30 = vor.u32 %v17016_v38, %v17013_v28  ;;  %v17008_v47 = vrot.slane %v17006_v21, 5  ;;  %v17020_v19 = vshll.u32 %v27255_v9, 16  ;;  %v17031_v12 = vor.u32 %v17030_v59, %v17027_v41 }
 0x510   : > { %v16995_v50 = vsel %vm23998_vm4, %v16990_v55, %v16994_v16  ;;  %v17045_v37 = vor.u32 %v17044_v26, %v17041_v58  ;;  %v17062_v20 = vshll.u32 %v27303_v25, 16  ;;  %v17067_v61 = vshrl.u32 %v16690_v4, 16  ;;  %v23230_v25 = vld [vmem:[%s27931_s9] sm:$0xff]  }
 0x511   : > { %v17059_v22 = vor.u32 %v17058_v11, %v17055_v8  ;;  %v17070_v28 = vshll.u32 %v16690_v4, 16  ;;  %v17081_v35 = vshrl.u32 %v16692_v36, 16  ;;  %v17084_v40 = vshll.u32 %v16692_v36, 16  ;;  %22032 = vmatprep.subr.bf16.mxu0 %v23230_v25 }
 0x512   : > { %v17009_v21 = vsel %vm23998_vm4, %v17004_v18, %v17008_v47  ;;  %v17018_v9 = vrot.slane %v17017_v30, 4  ;;  %v17036_v41 = vrot.slane %v17034_v56, 5  ;;  %v17050_v16 = vrot.slane %v17048_v44, 5  ;;  %22033 = vmatpush3.bf16.msra.mxu0 %v23230_v25  ;;  %v16698_v56 = vld [vmem:[#allocation2 + $0x1d0] sm:$0xf] }
 0x513   : > { %21973 = vmatmul.mubr.msk.bf16.gmra.mrb[0].mxu1 %vm2811_vm5, %v27197_v52  ;;  %v23231_v52 = vld [vmem:[%s27931_s9 + $0x8] sm:$0xff]   ;;  %v17095_v38 = vshrl.u32 %v16694_v32, 16  ;;  %v17098_v5 = vshll.u32 %v16694_v32, 16  ;;  %v17109_v7 = vshrl.u32 %v16696_v2, 16  ;;  %v17112_v55 = vshll.u32 %v16696_v2, 16 }
 0x514   : > { %21976 = vmatprep.mubr.msk.bf16.mxu1 %vm2811_vm5, %v20134_v60  ;;  %v17032_v0 = vrot.slane %v17031_v12, 4  ;;  %v17046_v59 = vrot.slane %v17045_v37, 4  ;;  %v17064_v58 = vrot.slane %v17062_v20, 5  ;;  %v17069_v26 = vrot.slane %v17067_v61, 4  ;;  %22034 = vmatprep.subr.bf16.mxu0 %v23231_v52  ;;  %v16700_v2 = vld [vmem:[#allocation2 + $0x1d8] sm:$0xf] }
 0x515   : > { %v17060_v39 = vrot.slane %v17059_v22, 4  ;;  %v17072_v60 = vrot.slane %v17070_v28, 5  ;;  %v17083_v8 = vrot.slane %v17081_v35, 4  ;;  %v17086_v11 = vrot.slane %v17084_v40, 5 }
 0x516   : > { %v20135_v4 = vcombine.low %v16967_v45, %v16981_v17  ;;  %v20136_v18 = vcombine.low %v16995_v50, %v17009_v21  ;;  %v17022_v30 = vrot.slane %v17020_v19, 5  ;;  %v17097_v44 = vrot.slane %v17095_v38, 4  ;;  %22035 = vmatpush3.bf16.msra.mxu0 %v23231_v52 }
 0x517   : > { %v17100_v36 = vrot.slane %v17098_v5, 5  ;;  %v17111_v47 = vrot.slane %v17109_v7, 4  ;;  %v17114_v32 = vrot.slane %v17112_v55, 5  ;;  %v17037_v37 = vsel %vm23998_vm4, %v17032_v0, %v17036_v41 }
 0x518   : > { %v17023_v12 = vsel %vm23998_vm4, %v17018_v9, %v17022_v30  ;;  %v17051_v20 = vsel %vm23998_vm4, %v17046_v59, %v17050_v16  ;;  %v17076_v45 = vshll.u32 %v27305_v57, 16  ;;  %v17065_v17 = vsel %vm23998_vm4, %v17060_v39, %v17064_v58 }
 0x519   : > { %v17073_v50 = vor.u32 %v17072_v60, %v17069_v26  ;;  %v17087_v19 = vor.u32 %v17086_v11, %v17083_v8  ;;  %v17090_v61 = vshll.u32 %v27322_v1, 16  ;;  %v17123_v22 = vshrl.u32 %v16698_v56, 16 }
 0x51a   : > { %v17126_v28 = vshll.u32 %v16698_v56, 16  ;;  %v17137_v35 = vshrl.u32 %v16700_v2, 16  ;;  %v17140_v40 = vshll.u32 %v16700_v2, 16  ;;  %v17101_v21 = vor.u32 %v17100_v36, %v17097_v44 }
 0x51b   : > { %21977 = vmatmul.mubr.msk.bf16.gmra.mrb[4].mxu1 %vm2811_vm5, %v20135_v4  ;;  %v17104_v9 = vshll.u32 %v27341_v33, 16  ;;  %v17115_v57 = vor.u32 %v17114_v32, %v17111_v47  ;;  %v17118_v41 = vshll.u32 %v27350_v53, 16  ;;  %v20137_v16 = vcombine.low %v17023_v12, %v17037_v37  ;;  %v17472_v12 = vld [vmem:[#allocation2 + $0xb0] sm:$0xe]  ;;  %v17473_v37 = vld [vmem:[#allocation2 + $0xb8] sm:$0xe] }
 0x51c   : > { %21980 = vmatprep.mubr.msk.bf16.mxu1 %vm2811_vm5, %v20136_v18  ;;  %v17078_v25 = vrot.slane %v17076_v45, 5  ;;  %v20138_v38 = vcombine.low %v17051_v20, %v17065_v17  ;;  %v17074_v5 = vrot.slane %v17073_v50, 4  ;;  %v17088_v7 = vrot.slane %v17087_v19, 4 }
 0x51d   : > { %v17092_v55 = vrot.slane %v17090_v61, 5  ;;  %v17125_v1 = vrot.slane %v17123_v22, 4  ;;  %v17128_v52 = vrot.slane %v17126_v28, 5  ;;  %v17139_v0 = vrot.slane %v17137_v35, 4  ;;  %v17475_v28 = vld [vmem:[#allocation2 + $0xc8] sm:$0xe] }
 0x51e   : > { %v17142_v59 = vrot.slane %v17140_v40, 5  ;;  %v17102_v58 = vrot.slane %v17101_v21, 4  ;;  %v17106_v26 = vrot.slane %v17104_v9, 5  ;;  %v17116_v39 = vrot.slane %v17115_v57, 4  ;;  %v17476_v35 = vld [vmem:[#allocation2 + $0xd0] sm:$0xe] }
 0x51f   : > { %v17120_v60 = vrot.slane %v17118_v41, 5  ;;  %v17079_v33 = vsel %vm23998_vm4, %v17074_v5, %v17078_v25  ;;  %v17132_v53 = vshll.u32 %v27361_v34, 16  ;;  %v17093_v8 = vsel %vm23998_vm4, %v17088_v7, %v17092_v55  ;;  %v17474_v40 = vld [vmem:[#allocation2 + $0xc0] sm:$0xe]  ;;  %v17477_v41 = vld [vmem:[#allocation2 + $0xd8] sm:$0xe] }
 0x520   : > { %v17129_v11 = vor.u32 %v17128_v52, %v17125_v1  ;;  %v17143_v4 = vor.u32 %v17142_v59, %v17139_v0  ;;  %v17146_v18 = vshll.u32 %v27370_v43, 16  ;;  %v17107_v30 = vsel %vm23998_vm4, %v17102_v58, %v17106_v26  ;;  %v23433_v25 = vld [vmem:[#allocation2 + $0xc4] sm:$0x1]  ;;  %v17478_v1 = vld [vmem:[#allocation2 + $0xe0] sm:$0xe] }
 0x521   : > { %v17121_v56 = vsel %vm23998_vm4, %v17116_v39, %v17120_v60  ;;  %v20139_v44 = vcombine.low %v17079_v33, %v17093_v8  ;;  %v17134_v36 = vrot.slane %v17132_v53, 5  ;;  %v20162_v20 = vrot.slane %v17472_v12, 9  ;;  %v17479_v52 = vld [vmem:[#allocation2 + $0xe8] sm:$0xe]  ;;  %v27987_v12 = vld [vmem:[#allocation10_spill] sm:$0xff] }
 0x522   : > { %v20140_v47 = vcombine.low %v17107_v30, %v17121_v56  ;;  %v17130_v32 = vrot.slane %v17129_v11, 4  ;;  %v17144_v34 = vrot.slane %v17143_v4, 4  ;;  %v17148_v2 = vrot.slane %v17146_v18, 5  ;;  %v17481_v53 = vld [vmem:[#allocation2 + $0x108] sm:$0xe] }
 0x523   : > { %21981 = vmatmul.mubr.msk.bf16.gmra.mrb[8].mxu1 %vm2811_vm5, %v20137_v16  ;;  %v17570_v45 = vrot.slane %v27051_v42, 5  ;;  %v20163_v50 = vrot.slane %v17473_v37, 9  ;;  %v17574_v19 = vrot.slane %v27053_v23, 5  ;;  %v20165_v9 = vrot.slane %v17475_v28, 9 }
 0x524   : > { %21984 = vmatprep.mubr.msk.bf16.mxu1 %vm2811_vm5, %v20138_v38  ;;  %v17135_v43 = vsel %vm23998_vm4, %v17130_v32, %v17134_v36  ;;  %v17149_v17 = vsel %vm23998_vm4, %v17144_v34, %v17148_v2  ;;  %v17582_v57 = vrot.slane %v27058_v63, 5  ;;  %v20166_v24 = vrot.slane %v17476_v35, 9  ;;  %v27983_v32 = vld [vmem:[#allocation7_spill] sm:$0xff]  ;;  %v27984_v34 = vld [vmem:[#allocation8_spill] sm:$0xff] }
 0x525   : > { %v20141_v61 = vcombine.low %v17135_v43, %v17149_v17  ;;  %v17571_v22 = vsel %vm24807_vm12, %v20162_v20, %v17570_v45  ;;  %v17575_v42 = vsel %vm24807_vm12, %v20163_v50, %v17574_v19  ;;  %v17586_v23 = vrot.slane %v27064_v10, 5  ;;  %v17480_v10 = vld [vmem:[#allocation2 + $0x100] sm:$0xe]  ;;  %v27990_v45 = vld [vmem:[#allocation12_spill] sm:$0xff]  ;;  %v27992_v17 = vld [vmem:[#allocation13_spill] sm:$0xff] }
 0x526   : > { %v20202_v21 = vcombine.low %v17571_v22, %v17575_v42  ;;  %v20164_v16 = vrot.slane %v17474_v40, 9  ;;  %v17578_v38 = vrot.slane %v23433_v25, 5  ;;  %v20167_v5 = vrot.slane %v17477_v41, 9  ;;  %v27993_v50 = vld [vmem:[#allocation14_spill] sm:$0xff]  ;;  %v27995_v35 = vld [vmem:[#allocation15_spill] sm:$0xff]  ;;  %v27996_v42 = vld [vmem:[#allocation16_spill] sm:$0xff] }
 0x527   : > { %v17590_v7 = vrot.slane %v27066_v54, 5  ;;  %v17583_v55 = vsel %vm24807_vm12, %v20165_v9, %v17582_v57  ;;  %v17587_v63 = vsel %vm24807_vm12, %v20166_v24, %v17586_v23  ;;  %v20168_v26 = vrot.slane %v17478_v1, 9  ;;  %v27998_v57 = vld [vmem:[#allocation17_spill] sm:$0xff]  ;;  %v27999_v41 = vld [vmem:[#allocation18_spill] sm:$0xff] }
 0x528   : > { %v17579_v0 = vsel %vm24807_vm12, %v20164_v16, %v17578_v38  ;;  %v17594_v54 = vrot.slane %v27074_v29, 5  ;;  %v20169_v60 = vrot.slane %v17479_v52, 9  ;;  %v17598_v33 = vrot.slane %v27077_v62, 5 }
 0x529   : > { %v20203_v59 = vcombine.low %v17579_v0, %v17583_v55  ;;  %v17591_v58 = vsel %vm24807_vm12, %v20167_v5, %v17590_v7  ;;  %v20170_v8 = vrot.slane %v17480_v10, 9  ;;  %v17602_v11 = vrot.slane %v27080_v13, 5 }
 0x52a   : > { %v20204_v39 = vcombine.low %v17587_v63, %v17591_v58  ;;  %v20171_v4 = vrot.slane %v17481_v53, 9  ;;  %v17606_v18 = vrot.slane %v27092_v31, 5  ;;  %v17595_v30 = vsel %vm24807_vm12, %v20168_v26, %v17594_v54  ;;  %v27981_v31 = vld [vmem:[#allocation6_spill] sm:$0xff]  ;;  %v28003_v63 = vld [vmem:[#allocation19_spill] sm:$0xff] }
 0x52b   : > { %21985 = vmatmul.mubr.msk.bf16.gmra.mrb[12].mxu1 %vm2811_vm5, %v20139_v44  ;;  %v17599_v29 = vsel %vm24807_vm12, %v20169_v60, %v17598_v33  ;;  %v17603_v62 = vsel %vm24807_vm12, %v20170_v8, %v17602_v11  ;;  %v27980_v13 = vcombine.low %v27229_v15, %v27233_v51  ;;  %v27985_v2 = vcombine.low %v27983_v32, %v27984_v34  ;;  %v27989_v51 = vld [vmem:[#allocation11_spill] sm:$0xff] }
 0x52c   : > { %21988 = vmatprep.mubr.msk.bf16.mxu1 %vm2811_vm5, %v20140_v47  ;;  %v20205_v56 = vcombine.low %v17595_v30, %v17599_v29  ;;  %v17607_v44 = vsel %vm24807_vm12, %v20171_v4, %v17606_v18  ;;  %v27982_v47 = vcombine.low %v27243_v49, %v27981_v31  ;;  %v27988_v37 = vcombine.low %v27986_v48, %v27987_v12  ;;  %v23232_v18 = vld [vmem:[%s27931_s9 + $0x10] sm:$0xff]   ;;  %v23233_v30 = vld [vmem:[%s27931_s9 + $0x18] sm:$0xff]  }
 0x52d   : > { %v20206_v36 = vcombine.low %v17603_v62, %v17607_v44  ;;  %v27991_v43 = vcombine.low %v27989_v51, %v27990_v45  ;;  %v27994_v19 = vcombine.low %v27992_v17, %v27993_v50  ;;  %v27997_v40 = vcombine.low %v27995_v35, %v27996_v42  ;;  %22036 = vmatprep.subr.bf16.mxu0 %v23232_v18  ;;  %v27614_v62 = vld [vmem:[%s27929_s7] ss:$0 sm:$0xff] }
 0x52e   : > { %v28000_v24 = vcombine.low %v27998_v57, %v27999_v41  ;;  %v28001_v25 = vcombine.low %v27358_v46, %v27367_v6  ;;  %v28002_v7 = vcombine.low %v27376_v27, %v27383_v3  ;;  %v28004_v52 = vcombine.low %v27392_v14, %v28003_v63  ;;  %22037 = vmatpush3.bf16.msra.mxu0 %v23232_v18 }
 0x52f   : > { %22038 = vmatprep.subr.bf16.mxu0 %v23233_v30 }
 0x532   : > { %22039 = vmatpush3.bf16.msra.mxu0 %v23233_v30 }
 0x533   : > { %21989 = vmatmul.mubr.msk.bf16.gmra.mrb[16].mxu1 %vm2811_vm5, %v20141_v61 }
 0x534   : > { %22000 = vmatprep.mubr.msk.bf16.mxu1 %vm2811_vm5, %v20202_v21 }
 0x53b   : > { %22001 = vmatmul.mubr.msk.bf16.vlgmr.msra.gmra.mrb[20].mxu1 %vm2811_vm5, %v20203_v59 }
 0x53c   : > { %22004 = vmatprep.mubr.msk.bf16.mxu1 %vm2811_vm5, %v20204_v39 }
 0x543   : > { %22005 = vmatmul.mubr.msk.bf16.gmra.mrb[24].mxu1 %vm2811_vm5, %v20205_v56 }
 0x544   : > { %22008 = vmatprep.mubr.msk.bf16.mxu1 %vm2811_vm5, %v20206_v36  ;;  %v27619_v36 = vld [vmem:[%s27930_s8] ss:$0 sm:$0xff] }
 0x54b   : > { %22009 = vmatmul.mubr.msk.bf16.gmra.mrb[28].mxu1 %vm2811_vm5, %v27980_v13 }
 0x54c   : > { %22012 = vmatprep.mubr.msk.bf16.mxu1 %vm2811_vm5, %v27982_v47 }
 0x553   : > { %22013 = vmatmul.mubr.msk.bf16.gmra.mrb[0].mxu1 %vm2811_vm5, %v27985_v2 }
 0x554   : > { %22016 = vmatprep.mubr.msk.bf16.mxu1 %vm2811_vm5, %v27988_v37 }
 0x557   : > { %v27535_v20 = vpop.f32.mrb[44].mxu0 }
 0x558   : > { %v27537_v15 = vpop.f32.mrb[45].mxu0 }
 0x559   : > { %v27543_v49 = vpop.f32.mrb[46].mxu0 }
 0x55a   : > { %v27549_v61 = vpop.f32.mrb[47].mxu0 }
 0x55b   : > { %22017 = vmatmul.mubr.msk.bf16.gmra.mrb[4].mxu1 %vm2811_vm5, %v27991_v43 }
 0x55c   : > { %22020 = vmatprep.mubr.msk.bf16.mxu1 %vm2811_vm5, %v27994_v19 }
 0x561   : > { %v27551_v22 = vpop.f32.mrb[48].mxu0 }
 0x562   : > { %v27553_v28 = vpop.f32.mrb[49].mxu0 }
 0x563   : > { %22021 = vmatmul.mubr.msk.bf16.gmra.mrb[8].mxu1 %vm2811_vm5, %v27997_v40  ;;  %v27559_v21 = vpop.f32.mrb[50].mxu0 }
 0x564   : > { %v27561_v9 = vpop.f32.mrb[51].mxu0  ;;  %22024 = vmatprep.mubr.msk.bf16.mxu1 %vm2811_vm5, %v28000_v24 }
 0x569   : > { %v27567_v23 = vpop.f32.mrb[52].mxu0 }
 0x56a   : > { %v27569_v16 = vpop.f32.mrb[53].mxu0 }
 0x56b   : > { %22025 = vmatmul.mubr.msk.bf16.gmra.mrb[12].mxu1 %vm2811_vm5, %v28001_v25  ;;  %v27575_v38 = vpop.f32.mrb[54].mxu0 }
 0x56c   : > { %v27577_v5 = vpop.f32.mrb[55].mxu0  ;;  %22028 = vmatprep.mubr.msk.bf16.mxu1 %vm2811_vm5, %v28002_v7 }
 0x571   : > { %v27583_v55 = vpop.f32.mrb[56].mxu0 }
 0x572   : > { %v27585_v1 = vpop.f32.mrb[57].mxu0 }
 0x573   : > { %22029 = vmatmul.mubr.msk.bf16.gmra.mrb[16].mxu1 %vm2811_vm5, %v28004_v52  ;;  %v27591_v6 = vpop.f32.mrb[58].mxu0 }
 0x574   : > { %v27593_v46 = vpop.f32.mrb[59].mxu0 }
 0x579   : > { %v27595_v0 = vpop.f32.mrb[60].mxu0 }
 0x57a   : > { %v27597_v10 = vpop.f32.mrb[61].mxu0 }
 0x57b   : > { %v27599_v27 = vpop.f32.mrb[62].mxu0 }
 0x57c   : > { %v27601_v3 = vpop.f32.mrb[63].mxu0 }
 0x581   : > { %v21442_v59 = vpop.f32.mrb[32].mxu0 }
 0x582   : > { %v9411_v58 = vpop.f32.mrb[33].mxu0 }
 0x583   : > { %v21443_v26 = vpop.f32.mrb[34].mxu0 }
 0x584   : > { %v9414_v39 = vpop.f32.mrb[35].mxu0 }
 0x589   : > { %v21446_v54 = vpop.f32.mrb[36].mxu0 }
 0x58a   : > { %v9427_v14 = vpop.f32.mrb[37].mxu0 }
 0x58b   : > { %v21447_v60 = vpop.f32.mrb[38].mxu0 }
 0x58c   : > { %v9430_v33 = vpop.f32.mrb[39].mxu0 }
 0x591   : > { %v21450_v53 = vpop.f32.mrb[40].mxu0 }
 0x592   : > { %v9443_v8 = vpop.f32.mrb[41].mxu0 }
 0x593   : > { %v21451_v11 = vpop.f32.mrb[42].mxu0 }
 0x594   : > { %v27603_v4 = vpop.f32.mrb[43].mxu0 }
 0x60e   : > { %v22002_v29 = vpop.f32.mrb[20].mxu1 }
 0x60f   : > { %v22080_v56 = vadd.f32 %v22002_v29, %v21442_v59  ;;  %v17859_v44 = vpop.f32.mrb[21].mxu1 }
 0x610   : > { %v22081_v13 = vadd.f32 %v17859_v44, %v9411_v58  ;;  %v22003_v31 = vpop.f32.mrb[22].mxu1 }
 0x611   : > { %v18027_v47 = vmul.f32 %v22080_v56, %v27614_v62  ;;  %v22082_v32 = vadd.f32 %v22003_v31, %v21443_v26  ;;  %v17862_v34 = vpop.f32.mrb[23].mxu1 }
 0x612   : > { %v18025_v2 = vmul.f32 %v22081_v13, %v27614_v62  ;;  %v22083_v48 = vadd.f32 %v17862_v34, %v9414_v39 }
 0x613   : > { %v18066_v12 = vadd.f32 %v27619_v36, %v18027_v47  ;;  %v18028_v37 = vmul.f32 %v22082_v32, %v27614_v62 }
 0x614   : > { %v18064_v51 = vadd.f32 %v27619_v36, %v18025_v2  ;;  %v18026_v45 = vmul.f32 %v22083_v48, %v27614_v62 }
 0x615   : > { %v18067_v43 = vadd.f32 %v27619_v36, %v18028_v37  ;;  %v18098_v19 = vmax.f32 %v18066_v12, 0.0 }
 0x616   : > { %v18065_v17 = vadd.f32 %v27619_v36, %v18026_v45  ;;  %v22006_v50 = vpop.f32.mrb[24].mxu1  ;;  %v18096_v57 = vmax.f32 %v18064_v51, 0.0 }
 0x617   : > { %v18099_v35 = vmax.f32 %v18067_v43, 0.0  ;;  %v22084_v42 = vadd.f32 %v22006_v50, %v21446_v54  ;;  %v17875_v40 = vpop.f32.mrb[25].mxu1 }
 0x618   : > { %v18097_v41 = vmax.f32 %v18065_v17, 0.0  ;;  %v22085_v24 = vadd.f32 %v17875_v40, %v9427_v14  ;;  %v22007_v25 = vpop.f32.mrb[26].mxu1 }
 0x619   : > { %v18129_v7 = vpack.c.bf16 %v18099_v35, %v18098_v19  ;;  %v18031_v63 = vmul.f32 %v22084_v42, %v27614_v62  ;;  %v22086_v52 = vadd.f32 %v22007_v25, %v21447_v60  ;;  %v17878_v59 = vpop.f32.mrb[27].mxu1 }
 0x61a   : > { %v18128_v58 = vpack.c.bf16 %v18097_v41, %v18096_v57  ;;  %v18029_v26 = vmul.f32 %v22085_v24, %v27614_v62  ;;  %v22087_v39 = vadd.f32 %v17878_v59, %v9430_v33 }
 0x61b   : > { %v18070_v18 = vadd.f32 %v27619_v36, %v18031_v63  ;;  %v18032_v30 = vmul.f32 %v22086_v52, %v27614_v62 }
 0x61c   : > { %v18068_v54 = vadd.f32 %v27619_v36, %v18029_v26  ;;  %v18030_v29 = vmul.f32 %v22087_v39, %v27614_v62  ;;  %22040 = vmatprep.mubr.msk.bf16.mxu0 %vm2811_vm5, %v18128_v58 }
 0x61d   : > { %v18071_v14 = vadd.f32 %v27619_v36, %v18032_v30  ;;  %22041 = vmatmul.mubr.msk.bf16.vlgmr.msra.gmra.mrb[64].mxu0 %vm2811_vm5, %v18129_v7  ;;  %v18102_v44 = vmax.f32 %v18070_v18, 0.0 }
 0x61e   : > { %v18069_v60 = vadd.f32 %v27619_v36, %v18030_v29  ;;  %v22010_v56 = vpop.f32.mrb[28].mxu1  ;;  %v18100_v47 = vmax.f32 %v18068_v54, 0.0 }
 0x61f   : > { %v18103_v13 = vmax.f32 %v18071_v14, 0.0  ;;  %v22088_v33 = vadd.f32 %v22010_v56, %v21450_v53  ;;  %v17891_v31 = vpop.f32.mrb[29].mxu1 }
 0x620   : > { %v18101_v32 = vmax.f32 %v18069_v60, 0.0  ;;  %v22089_v34 = vadd.f32 %v17891_v31, %v9443_v8  ;;  %v22011_v2 = vpop.f32.mrb[30].mxu1 }
 0x621   : > { %v18131_v48 = vpack.c.bf16 %v18103_v13, %v18102_v44  ;;  %v18035_v12 = vmul.f32 %v22088_v33, %v27614_v62  ;;  %v22090_v37 = vadd.f32 %v22011_v2, %v21451_v11  ;;  %v17894_v51 = vpop.f32.mrb[31].mxu1 }
 0x622   : > { %v18130_v45 = vpack.c.bf16 %v18101_v32, %v18100_v47  ;;  %v18033_v43 = vmul.f32 %v22089_v34, %v27614_v62  ;;  %v22091_v17 = vadd.f32 %v17894_v51, %v27603_v4 }
 0x623   : > { %v18074_v50 = vadd.f32 %v27619_v36, %v18035_v12  ;;  %v18036_v19 = vmul.f32 %v22090_v37, %v27614_v62 }
 0x624   : > { %v18072_v53 = vadd.f32 %v27619_v36, %v18033_v43  ;;  %v18034_v35 = vmul.f32 %v22091_v17, %v27614_v62  ;;  %22044 = vmatprep.mubr.msk.bf16.mxu0 %vm2811_vm5, %v18130_v45 }
 0x625   : > { %v18075_v8 = vadd.f32 %v27619_v36, %v18036_v19  ;;  %22045 = vmatmul.mubr.msk.bf16.gmra.mrb[68].mxu0 %vm2811_vm5, %v18131_v48  ;;  %v18106_v40 = vmax.f32 %v18074_v50, 0.0 }
 0x626   : > { %v18073_v11 = vadd.f32 %v27619_v36, %v18034_v35  ;;  %v22014_v42 = vpop.f32.mrb[0].mxu1  ;;  %v18104_v24 = vmax.f32 %v18072_v53, 0.0 }
 0x627   : > { %v18107_v57 = vmax.f32 %v18075_v8, 0.0  ;;  %v22092_v4 = vadd.f32 %v22014_v42, %v27535_v20  ;;  %v17907_v41 = vpop.f32.mrb[1].mxu1 }
 0x628   : > { %v18105_v25 = vmax.f32 %v18073_v11, 0.0  ;;  %v22093_v7 = vadd.f32 %v17907_v41, %v27537_v15  ;;  %v22015_v63 = vpop.f32.mrb[2].mxu1 }
 0x629   : > { %v18133_v52 = vpack.c.bf16 %v18107_v57, %v18106_v40  ;;  %v18039_v59 = vmul.f32 %v22092_v4, %v27614_v62  ;;  %v22094_v58 = vadd.f32 %v22015_v63, %v27543_v49  ;;  %v17910_v26 = vpop.f32.mrb[3].mxu1 }
 0x62a   : > { %v18132_v39 = vpack.c.bf16 %v18105_v25, %v18104_v24  ;;  %v18037_v18 = vmul.f32 %v22093_v7, %v27614_v62  ;;  %v22095_v30 = vadd.f32 %v17910_v26, %v27549_v61 }
 0x62b   : > { %v18078_v54 = vadd.f32 %v27619_v36, %v18039_v59  ;;  %v18040_v20 = vmul.f32 %v22094_v58, %v27614_v62 }
 0x62c   : > { %v18076_v29 = vadd.f32 %v27619_v36, %v18037_v18  ;;  %v18038_v15 = vmul.f32 %v22095_v30, %v27614_v62  ;;  %22048 = vmatprep.mubr.msk.bf16.mxu0 %vm2811_vm5, %v18132_v39 }
 0x62d   : > { %v18079_v14 = vadd.f32 %v27619_v36, %v18040_v20  ;;  %22049 = vmatmul.mubr.msk.bf16.gmra.mrb[72].mxu0 %vm2811_vm5, %v18133_v52  ;;  %v18110_v56 = vmax.f32 %v18078_v54, 0.0 }
 0x62e   : > { %v18077_v49 = vadd.f32 %v27619_v36, %v18038_v15  ;;  %v22018_v60 = vpop.f32.mrb[4].mxu1  ;;  %v18108_v33 = vmax.f32 %v18076_v29, 0.0 }
 0x62f   : > { %v18111_v44 = vmax.f32 %v18079_v14, 0.0  ;;  %v22096_v61 = vadd.f32 %v22018_v60, %v27551_v22  ;;  %v17923_v13 = vpop.f32.mrb[5].mxu1 }
 0x630   : > { %v18109_v31 = vmax.f32 %v18077_v49, 0.0  ;;  %v22097_v47 = vadd.f32 %v17923_v13, %v27553_v28  ;;  %v22019_v32 = vpop.f32.mrb[6].mxu1 }
 0x631   : > { %v18135_v34 = vpack.c.bf16 %v18111_v44, %v18110_v56  ;;  %v18043_v2 = vmul.f32 %v22096_v61, %v27614_v62  ;;  %v22098_v48 = vadd.f32 %v22019_v32, %v27559_v21  ;;  %v17926_v12 = vpop.f32.mrb[7].mxu1 }
 0x632   : > { %v18134_v37 = vpack.c.bf16 %v18109_v31, %v18108_v33  ;;  %v18041_v51 = vmul.f32 %v22097_v47, %v27614_v62  ;;  %v22099_v45 = vadd.f32 %v17926_v12, %v27561_v9 }
 0x633   : > { %v18082_v43 = vadd.f32 %v27619_v36, %v18043_v2  ;;  %v18044_v22 = vmul.f32 %v22098_v48, %v27614_v62 }
 0x634   : > { %v18080_v17 = vadd.f32 %v27619_v36, %v18041_v51  ;;  %v18042_v28 = vmul.f32 %v22099_v45, %v27614_v62  ;;  %22052 = vmatprep.mubr.msk.bf16.mxu0 %vm2811_vm5, %v18134_v37 }
 0x635   : > { %v18083_v50 = vadd.f32 %v27619_v36, %v18044_v22  ;;  %22053 = vmatmul.mubr.msk.bf16.gmra.mrb[76].mxu0 %vm2811_vm5, %v18135_v34  ;;  %v18114_v53 = vmax.f32 %v18082_v43, 0.0 }
 0x636   : > { %v18081_v21 = vadd.f32 %v27619_v36, %v18042_v28  ;;  %v22022_v19 = vpop.f32.mrb[8].mxu1  ;;  %v18112_v11 = vmax.f32 %v18080_v17, 0.0 }
 0x637   : > { %v18115_v35 = vmax.f32 %v18083_v50, 0.0  ;;  %v22100_v9 = vadd.f32 %v22022_v19, %v27567_v23  ;;  %v17939_v8 = vpop.f32.mrb[9].mxu1 }
 0x638   : > { %v18113_v42 = vmax.f32 %v18081_v21, 0.0  ;;  %v22101_v40 = vadd.f32 %v17939_v8, %v27569_v16  ;;  %v22023_v57 = vpop.f32.mrb[10].mxu1 }
 0x639   : > { %v18137_v4 = vpack.c.bf16 %v18115_v35, %v18114_v53  ;;  %v18047_v41 = vmul.f32 %v22100_v9, %v27614_v62  ;;  %v22102_v24 = vadd.f32 %v22023_v57, %v27575_v38  ;;  %v17942_v25 = vpop.f32.mrb[11].mxu1 }
 0x63a   : > { %v18136_v7 = vpack.c.bf16 %v18113_v42, %v18112_v11  ;;  %v18045_v63 = vmul.f32 %v22101_v40, %v27614_v62  ;;  %v22103_v52 = vadd.f32 %v17942_v25, %v27577_v5 }
 0x63b   : > { %v18086_v59 = vadd.f32 %v27619_v36, %v18047_v41  ;;  %v18048_v23 = vmul.f32 %v22102_v24, %v27614_v62  ;;  %v27731_v41 = vld [vmem:[%s27933_s11] ss:$0 sm:$0xff] }
 0x63c   : > { %v18084_v58 = vadd.f32 %v27619_v36, %v18045_v63  ;;  %v18046_v16 = vmul.f32 %v22103_v52, %v27614_v62  ;;  %22056 = vmatprep.mubr.msk.bf16.mxu0 %vm2811_vm5, %v18136_v7 }
 0x63d   : > { %v18087_v26 = vadd.f32 %v27619_v36, %v18048_v23  ;;  %22057 = vmatmul.mubr.msk.bf16.gmra.mrb[80].mxu0 %vm2811_vm5, %v18137_v4  ;;  %v18118_v18 = vmax.f32 %v18086_v59, 0.0 }
 0x63e   : > { %v18085_v38 = vadd.f32 %v27619_v36, %v18046_v16  ;;  %v22026_v39 = vpop.f32.mrb[12].mxu1  ;;  %v18116_v20 = vmax.f32 %v18084_v58, 0.0 }
 0x63f   : > { %v18119_v30 = vmax.f32 %v18087_v26, 0.0  ;;  %v22104_v5 = vadd.f32 %v22026_v39, %v27583_v55  ;;  %v17955_v54 = vpop.f32.mrb[13].mxu1  ;;  %v23434_v26 = vld [vmem:[%s23814_s13 + $0x10] sm:$0xff] }
 0x640   : > { %v18117_v29 = vmax.f32 %v18085_v38, 0.0  ;;  %v22105_v15 = vadd.f32 %v17955_v54, %v27585_v1  ;;  %v22027_v14 = vpop.f32.mrb[14].mxu1 }
 0x641   : > { %v18139_v49 = vpack.c.bf16 %v18119_v30, %v18118_v18  ;;  %v18051_v60 = vmul.f32 %v22104_v5, %v27614_v62  ;;  %v22106_v56 = vadd.f32 %v22027_v14, %v27591_v6  ;;  %v17958_v44 = vpop.f32.mrb[15].mxu1  ;;  %v23435_v18 = vld [vmem:[%s23814_s13] sm:$0xff]  ;;  %v23437_v14 = vld [vmem:[%s23814_s13 + $0x8] sm:$0xff] }
 0x642   : > { %v18138_v61 = vpack.c.bf16 %v18117_v29, %v18116_v20  ;;  %v18049_v13 = vmul.f32 %v22105_v15, %v27614_v62  ;;  %v22107_v33 = vadd.f32 %v17958_v44, %v27593_v46  ;;  %v23436_v20 = vld [vmem:[%s23814_s13 + $0x18] sm:$0xff] }
 0x643   : > { %v18090_v31 = vadd.f32 %v27619_v36, %v18051_v60  ;;  %v18052_v55 = vmul.f32 %v22106_v56, %v27614_v62 }
 0x644   : > { %v18088_v47 = vadd.f32 %v27619_v36, %v18049_v13  ;;  %v18050_v1 = vmul.f32 %v22107_v33, %v27614_v62  ;;  %22060 = vmatprep.mubr.msk.bf16.mxu0 %vm2811_vm5, %v18138_v61 }
 0x645   : > { %v18091_v32 = vadd.f32 %v27619_v36, %v18052_v55  ;;  %22061 = vmatmul.mubr.msk.bf16.gmra.mrb[84].mxu0 %vm2811_vm5, %v18139_v49  ;;  %v18122_v2 = vmax.f32 %v18090_v31, 0.0 }
 0x646   : > { %v18089_v6 = vadd.f32 %v27619_v36, %v18050_v1  ;;  %v22030_v34 = vpop.f32.mrb[16].mxu1  ;;  %v18120_v37 = vmax.f32 %v18088_v47, 0.0 }
 0x647   : > { %v18123_v48 = vmax.f32 %v18091_v32, 0.0  ;;  %v22108_v46 = vadd.f32 %v22030_v34, %v27595_v0  ;;  %v17971_v12 = vpop.f32.mrb[17].mxu1  ;;  %v23438_v34 = vld [vmem:[%s23814_s13 + $0x30] sm:$0xff] }
 0x648   : > { %v18121_v51 = vmax.f32 %v18089_v6, 0.0  ;;  %v22109_v45 = vadd.f32 %v17971_v12, %v27597_v10  ;;  %v22031_v43 = vpop.f32.mrb[18].mxu1 }
 0x649   : > { %v18141_v22 = vpack.c.bf16 %v18123_v48, %v18122_v2  ;;  %v18055_v17 = vmul.f32 %v22108_v46, %v27614_v62  ;;  %v22110_v28 = vadd.f32 %v22031_v43, %v27599_v27  ;;  %v17974_v50 = vpop.f32.mrb[19].mxu1  ;;  %v23439_v46 = vld [vmem:[%s23814_s13 + $0x20] sm:$0xff] }
 0x64a   : > { %v18140_v21 = vpack.c.bf16 %v18121_v51, %v18120_v37  ;;  %v18053_v19 = vmul.f32 %v22109_v45, %v27614_v62  ;;  %v22111_v53 = vadd.f32 %v17974_v50, %v27601_v3  ;;  %v23440_v45 = vld [vmem:[%s23814_s13 + $0x38] sm:$0xff] }
 0x64b   : > { %v18094_v35 = vadd.f32 %v27619_v36, %v18055_v17  ;;  %v18056_v0 = vmul.f32 %v22110_v28, %v27614_v62  ;;  %v23441_v17 = vld [vmem:[%s23814_s13 + $0x28] sm:$0xff] }
 0x64c   : > { %v18092_v9 = vadd.f32 %v27619_v36, %v18053_v19  ;;  %v18054_v10 = vmul.f32 %v22111_v53, %v27614_v62  ;;  %22064 = vmatprep.mubr.msk.bf16.mxu0 %vm2811_vm5, %v18140_v21  ;;  %v27725_v62 = vld [vmem:[%s27932_s10] ss:$0 sm:$0xff] }
 0x64d   : > { %v18095_v8 = vadd.f32 %v27619_v36, %v18056_v0  ;;  %22065 = vmatmul.mubr.msk.bf16.gmra.mrb[88].mxu0 %vm2811_vm5, %v18141_v22  ;;  %v18126_v11 = vmax.f32 %v18094_v35, 0.0 }
 0x64e   : > { %v18093_v27 = vadd.f32 %v27619_v36, %v18054_v10  ;;  %v18124_v42 = vmax.f32 %v18092_v9, 0.0 }
 0x64f   : > { %v18127_v3 = vmax.f32 %v18095_v8, 0.0 }
 0x650   : > { %v18125_v40 = vmax.f32 %v18093_v27, 0.0 }
 0x651   : > { %v18143_v57 = vpack.c.bf16 %v18127_v3, %v18126_v11 }
 0x652   : > { %v18142_v4 = vpack.c.bf16 %v18125_v40, %v18124_v42  ;;  %v23442_v42 = vld [vmem:[%s23814_s13 + $0x50] sm:$0xff] }
 0x654   : > { %22068 = vmatprep.mubr.msk.bf16.mxu0 %vm2811_vm5, %v18142_v4  ;;  %v23443_v4 = vld [vmem:[%s23814_s13 + $0x40] sm:$0xff] }
 0x655   : > { %22069 = vmatmul.mubr.msk.bf16.gmra.mrb[92].mxu0 %vm2811_vm5, %v18143_v57 }
 0x6f0   : > { %v22042_v36 = vpop.f32.mrb[64].mxu0 }
 0x6f1   : > { %v18394_v24 = vmul.f32 %v22042_v36, %v27725_v62  ;;  %v18258_v25 = vpop.f32.mrb[65].mxu0 }
 0x6f2   : > { %v18392_v7 = vmul.f32 %v27725_v62, %v18258_v25  ;;  %v22043_v63 = vpop.f32.mrb[66].mxu0 }
 0x6f3   : > { %v18433_v52 = vadd.f32 %v27731_v41, %v18394_v24  ;;  %v18395_v59 = vmul.f32 %v22043_v63, %v27725_v62  ;;  %v18261_v23 = vpop.f32.mrb[67].mxu0 }
 0x6f4   : > { %v18431_v58 = vadd.f32 %v27731_v41, %v18392_v7  ;;  %v18393_v16 = vmul.f32 %v27725_v62, %v18261_v23  ;;  %v23444_v7 = vld [vmem:[%s23814_s13 + $0x58] sm:$0xff] }
 0x6f5   : > { %v18465_v38 = vadd.f32 %v23434_v26, %v18433_v52  ;;  %v18434_v39 = vadd.f32 %v27731_v41, %v18395_v59  ;;  %v23445_v59 = vld [vmem:[%s23814_s13 + $0x48] sm:$0xff] }
 0x6f6   : > { %v18463_v30 = vadd.f32 %v23435_v18, %v18431_v58  ;;  %v18432_v5 = vadd.f32 %v27731_v41, %v18393_v16 }
 0x6f7   : > { %v18497_v54 = vmax.f32 %v18465_v38, 0.0  ;;  %v18466_v29 = vadd.f32 %v23436_v20, %v18434_v39 }
 0x6f8   : > { %v18495_v15 = vmax.f32 %v18463_v30, 0.0  ;;  %v18464_v49 = vadd.f32 %v23437_v14, %v18432_v5  ;;  %v22046_v60 = vpop.f32.mrb[68].mxu0  ;;  %v23446_v14 = vld [vmem:[%s23814_s13 + $0x70] sm:$0xff] }
 0x6f9   : > { %18529 = vst [vmem:[%s27747_s1 + $0x10] sm:$0xff] %v18497_v54  ;;  %v18498_v56 = vmax.f32 %v18466_v29, 0.0  ;;  %v18398_v44 = vmul.f32 %v22046_v60, %v27725_v62  ;;  %v18274_v61 = vpop.f32.mrb[69].mxu0 }
 0x6fa   : > { %18527 = vst [vmem:[%s27747_s1] sm:$0xff] %v18495_v15  ;;  %v18496_v13 = vmax.f32 %v18464_v49, 0.0  ;;  %v18396_v33 = vmul.f32 %v27725_v62, %v18274_v61  ;;  %v22047_v31 = vpop.f32.mrb[70].mxu0 }
 0x6fb   : > { %18530 = vst [vmem:[%s27747_s1 + $0x18] sm:$0xff] %v18498_v56  ;;  %v18437_v55 = vadd.f32 %v27731_v41, %v18398_v44  ;;  %v18399_v47 = vmul.f32 %v22047_v31, %v27725_v62  ;;  %v18277_v1 = vpop.f32.mrb[71].mxu0  ;;  %v23447_v56 = vld [vmem:[%s23814_s13 + $0x60] sm:$0xff] }
 0x6fc   : > { %18528 = vst [vmem:[%s27747_s1 + $0x8] sm:$0xff] %v18496_v13  ;;  %v18435_v32 = vadd.f32 %v27731_v41, %v18396_v33  ;;  %v18397_v6 = vmul.f32 %v27725_v62, %v18277_v1  ;;  %v23448_v33 = vld [vmem:[%s23814_s13 + $0x78] sm:$0xff] }
 0x6fd   : > { %v18469_v2 = vadd.f32 %v23438_v34, %v18437_v55  ;;  %v18438_v48 = vadd.f32 %v27731_v41, %v18399_v47  ;;  %v23449_v47 = vld [vmem:[%s23814_s13 + $0x68] sm:$0xff] }
 0x6fe   : > { %v18467_v12 = vadd.f32 %v23439_v46, %v18435_v32  ;;  %v18436_v37 = vadd.f32 %v27731_v41, %v18397_v6 }
 0x6ff   : > { %v18501_v51 = vmax.f32 %v18469_v2, 0.0  ;;  %v18470_v43 = vadd.f32 %v23440_v45, %v18438_v48 }
 0x700   : > { %v18499_v22 = vmax.f32 %v18467_v12, 0.0  ;;  %v18468_v28 = vadd.f32 %v23441_v17, %v18436_v37  ;;  %v22050_v50 = vpop.f32.mrb[72].mxu0  ;;  %v23450_v17 = vld [vmem:[%s23814_s13 + $0x90] sm:$0xff] }
 0x701   : > { %18533 = vst [vmem:[%s27747_s1 + $0x30] sm:$0xff] %v18501_v51  ;;  %v18502_v21 = vmax.f32 %v18470_v43, 0.0  ;;  %v18402_v19 = vmul.f32 %v22050_v50, %v27725_v62  ;;  %v18290_v53 = vpop.f32.mrb[73].mxu0 }
 0x702   : > { %18531 = vst [vmem:[%s27747_s1 + $0x20] sm:$0xff] %v18499_v22  ;;  %v18500_v35 = vmax.f32 %v18468_v28, 0.0  ;;  %v18400_v0 = vmul.f32 %v27725_v62, %v18290_v53  ;;  %v22051_v9 = vpop.f32.mrb[74].mxu0 }
 0x703   : > { %18534 = vst [vmem:[%s27747_s1 + $0x38] sm:$0xff] %v18502_v21  ;;  %v18441_v10 = vadd.f32 %v27731_v41, %v18402_v19  ;;  %v18403_v8 = vmul.f32 %v22051_v9, %v27725_v62  ;;  %v18293_v27 = vpop.f32.mrb[75].mxu0  ;;  %v23451_v21 = vld [vmem:[%s23814_s13 + $0x80] sm:$0xff] }
 0x704   : > { %18532 = vst [vmem:[%s27747_s1 + $0x28] sm:$0xff] %v18500_v35  ;;  %v18439_v11 = vadd.f32 %v27731_v41, %v18400_v0  ;;  %v18401_v3 = vmul.f32 %v27725_v62, %v18293_v27  ;;  %v23452_v0 = vld [vmem:[%s23814_s13 + $0x98] sm:$0xff] }
 0x705   : > { %v18473_v40 = vadd.f32 %v23442_v42, %v18441_v10  ;;  %v18442_v57 = vadd.f32 %v27731_v41, %v18403_v8  ;;  %v23453_v8 = vld [vmem:[%s23814_s13 + $0x88] sm:$0xff] }
 0x706   : > { %v18471_v36 = vadd.f32 %v23443_v4, %v18439_v11  ;;  %v18440_v24 = vadd.f32 %v27731_v41, %v18401_v3 }
 0x707   : > { %v18505_v25 = vmax.f32 %v18473_v40, 0.0  ;;  %v18474_v63 = vadd.f32 %v23444_v7, %v18442_v57 }
 0x708   : > { %v18503_v52 = vmax.f32 %v18471_v36, 0.0  ;;  %v18472_v23 = vadd.f32 %v23445_v59, %v18440_v24  ;;  %v22054_v58 = vpop.f32.mrb[76].mxu0  ;;  %v23454_v59 = vld [vmem:[%s23814_s13 + $0xb0] sm:$0xff] }
 0x709   : > { %18537 = vst [vmem:[%s27747_s1 + $0x50] sm:$0xff] %v18505_v25  ;;  %v18506_v16 = vmax.f32 %v18474_v63, 0.0  ;;  %v18406_v26 = vmul.f32 %v22054_v58, %v27725_v62  ;;  %v18306_v38 = vpop.f32.mrb[77].mxu0 }
 0x70a   : > { %18535 = vst [vmem:[%s27747_s1 + $0x40] sm:$0xff] %v18503_v52  ;;  %v18504_v39 = vmax.f32 %v18472_v23, 0.0  ;;  %v18404_v18 = vmul.f32 %v27725_v62, %v18306_v38  ;;  %v22055_v30 = vpop.f32.mrb[78].mxu0 }
 0x70b   : > { %18538 = vst [vmem:[%s27747_s1 + $0x58] sm:$0xff] %v18506_v16  ;;  %v18445_v5 = vadd.f32 %v27731_v41, %v18406_v26  ;;  %v18407_v54 = vmul.f32 %v22055_v30, %v27725_v62  ;;  %v18309_v20 = vpop.f32.mrb[79].mxu0  ;;  %v23455_v16 = vld [vmem:[%s23814_s13 + $0xa0] sm:$0xff] }
 0x70c   : > { %18536 = vst [vmem:[%s27747_s1 + $0x48] sm:$0xff] %v18504_v39  ;;  %v18443_v29 = vadd.f32 %v27731_v41, %v18404_v18  ;;  %v18405_v15 = vmul.f32 %v27725_v62, %v18309_v20  ;;  %v23456_v18 = vld [vmem:[%s23814_s13 + $0xb8] sm:$0xff] }
 0x70d   : > { %v18477_v49 = vadd.f32 %v23446_v14, %v18445_v5  ;;  %v18446_v60 = vadd.f32 %v27731_v41, %v18407_v54  ;;  %v23457_v54 = vld [vmem:[%s23814_s13 + $0xa8] sm:$0xff] }
 0x70e   : > { %v18475_v44 = vadd.f32 %v23447_v56, %v18443_v29  ;;  %v18444_v61 = vadd.f32 %v27731_v41, %v18405_v15 }
 0x70f   : > { %v18509_v13 = vmax.f32 %v18477_v49, 0.0  ;;  %v18478_v31 = vadd.f32 %v23448_v33, %v18446_v60 }
 0x710   : > { %v18507_v55 = vmax.f32 %v18475_v44, 0.0  ;;  %v18476_v1 = vadd.f32 %v23449_v47, %v18444_v61  ;;  %v22058_v32 = vpop.f32.mrb[80].mxu0  ;;  %v23458_v47 = vld [vmem:[%s23814_s13 + $0xd0] sm:$0xff] }
 0x711   : > { %18541 = vst [vmem:[%s27747_s1 + $0x70] sm:$0xff] %v18509_v13  ;;  %v18510_v6 = vmax.f32 %v18478_v31, 0.0  ;;  %v18410_v34 = vmul.f32 %v22058_v32, %v27725_v62  ;;  %v18322_v2 = vpop.f32.mrb[81].mxu0 }
 0x712   : > { %18539 = vst [vmem:[%s27747_s1 + $0x60] sm:$0xff] %v18507_v55  ;;  %v18508_v48 = vmax.f32 %v18476_v1, 0.0  ;;  %v18408_v46 = vmul.f32 %v27725_v62, %v18322_v2  ;;  %v22059_v12 = vpop.f32.mrb[82].mxu0 }
 0x713   : > { %18542 = vst [vmem:[%s27747_s1 + $0x78] sm:$0xff] %v18510_v6  ;;  %v18449_v37 = vadd.f32 %v27731_v41, %v18410_v34  ;;  %v18411_v51 = vmul.f32 %v22059_v12, %v27725_v62  ;;  %v18325_v45 = vpop.f32.mrb[83].mxu0  ;;  %v23459_v6 = vld [vmem:[%s23814_s13 + $0xc0] sm:$0xff] }
 0x714   : > { %18540 = vst [vmem:[%s27747_s1 + $0x68] sm:$0xff] %v18508_v48  ;;  %v18447_v43 = vadd.f32 %v27731_v41, %v18408_v46  ;;  %v18409_v22 = vmul.f32 %v27725_v62, %v18325_v45  ;;  %v23460_v46 = vld [vmem:[%s23814_s13 + $0xd8] sm:$0xff] }
 0x715   : > { %v18481_v28 = vadd.f32 %v23450_v17, %v18449_v37  ;;  %v18450_v50 = vadd.f32 %v27731_v41, %v18411_v51  ;;  %v23461_v51 = vld [vmem:[%s23814_s13 + $0xc8] sm:$0xff] }
 0x716   : > { %v18479_v19 = vadd.f32 %v23451_v21, %v18447_v43  ;;  %v18448_v53 = vadd.f32 %v27731_v41, %v18409_v22 }
 0x717   : > { %v18513_v35 = vmax.f32 %v18481_v28, 0.0  ;;  %v18482_v9 = vadd.f32 %v23452_v0, %v18450_v50 }
 0x718   : > { %v18511_v10 = vmax.f32 %v18479_v19, 0.0  ;;  %v18480_v27 = vadd.f32 %v23453_v8, %v18448_v53  ;;  %v22062_v11 = vpop.f32.mrb[84].mxu0  ;;  %v23462_v8 = vld [vmem:[%s23814_s13 + $0xf0] sm:$0xff] }
 0x719   : > { %18545 = vst [vmem:[%s27747_s1 + $0x90] sm:$0xff] %v18513_v35  ;;  %v18514_v3 = vmax.f32 %v18482_v9, 0.0  ;;  %v18414_v42 = vmul.f32 %v22062_v11, %v27725_v62  ;;  %v18338_v40 = vpop.f32.mrb[85].mxu0 }
 0x71a   : > { %18543 = vst [vmem:[%s27747_s1 + $0x80] sm:$0xff] %v18511_v10  ;;  %v18512_v57 = vmax.f32 %v18480_v27, 0.0  ;;  %v18412_v4 = vmul.f32 %v27725_v62, %v18338_v40  ;;  %v22063_v36 = vpop.f32.mrb[86].mxu0 }
 0x71b   : > { %18546 = vst [vmem:[%s27747_s1 + $0x98] sm:$0xff] %v18514_v3  ;;  %v18453_v24 = vadd.f32 %v27731_v41, %v18414_v42  ;;  %v18415_v25 = vmul.f32 %v22063_v36, %v27725_v62  ;;  %v18341_v7 = vpop.f32.mrb[87].mxu0  ;;  %v23463_v3 = vld [vmem:[%s23814_s13 + $0xe0] sm:$0xff] }
 0x71c   : > { %18544 = vst [vmem:[%s27747_s1 + $0x88] sm:$0xff] %v18512_v57  ;;  %v18451_v63 = vadd.f32 %v27731_v41, %v18412_v4  ;;  %v18413_v52 = vmul.f32 %v27725_v62, %v18341_v7  ;;  %v23464_v4 = vld [vmem:[%s23814_s13 + $0xf8] sm:$0xff] }
 0x71d   : > { %v18485_v23 = vadd.f32 %v23454_v59, %v18453_v24  ;;  %v18454_v58 = vadd.f32 %v27731_v41, %v18415_v25 }
 0x71e   : > { %v18483_v26 = vadd.f32 %v23455_v16, %v18451_v63  ;;  %v18452_v38 = vadd.f32 %v27731_v41, %v18413_v52 }
 0x71f   : > { %v18517_v39 = vmax.f32 %v18485_v23, 0.0  ;;  %v18486_v30 = vadd.f32 %v23456_v18, %v18454_v58 }
 0x720   : > { %v18515_v5 = vmax.f32 %v18483_v26, 0.0  ;;  %v18484_v20 = vadd.f32 %v23457_v54, %v18452_v38  ;;  %v22066_v29 = vpop.f32.mrb[88].mxu0 }
 0x721   : > { %18549 = vst [vmem:[%s27747_s1 + $0xb0] sm:$0xff] %v18517_v39  ;;  %v18518_v15 = vmax.f32 %v18486_v30, 0.0  ;;  %v18418_v14 = vmul.f32 %v22066_v29, %v27725_v62  ;;  %v18354_v49 = vpop.f32.mrb[89].mxu0 }
 0x722   : > { %18547 = vst [vmem:[%s27747_s1 + $0xa0] sm:$0xff] %v18515_v5  ;;  %v18516_v60 = vmax.f32 %v18484_v20, 0.0  ;;  %v18416_v56 = vmul.f32 %v27725_v62, %v18354_v49  ;;  %v22067_v44 = vpop.f32.mrb[90].mxu0 }
 0x723   : > { %18550 = vst [vmem:[%s27747_s1 + $0xb8] sm:$0xff] %v18518_v15  ;;  %v18457_v61 = vadd.f32 %v27731_v41, %v18418_v14  ;;  %v18419_v13 = vmul.f32 %v22067_v44, %v27725_v62  ;;  %v18357_v33 = vpop.f32.mrb[91].mxu0 }
 0x724   : > { %18548 = vst [vmem:[%s27747_s1 + $0xa8] sm:$0xff] %v18516_v60  ;;  %v18455_v31 = vadd.f32 %v27731_v41, %v18416_v56  ;;  %v18417_v55 = vmul.f32 %v27725_v62, %v18357_v33 }
 0x725   : > { %v18489_v1 = vadd.f32 %v23458_v47, %v18457_v61  ;;  %v18458_v32 = vadd.f32 %v27731_v41, %v18419_v13 }
 0x726   : > { %v18487_v34 = vadd.f32 %v23459_v6, %v18455_v31  ;;  %v18456_v2 = vadd.f32 %v27731_v41, %v18417_v55 }
 0x727   : > { %v18521_v48 = vmax.f32 %v18489_v1, 0.0  ;;  %v18490_v12 = vadd.f32 %v23460_v46, %v18458_v32 }
 0x728   : > { %v18519_v37 = vmax.f32 %v18487_v34, 0.0  ;;  %v18488_v45 = vadd.f32 %v23461_v51, %v18456_v2  ;;  %v22070_v43 = vpop.f32.mrb[92].mxu0 }
 0x729   : > { %18553 = vst [vmem:[%s27747_s1 + $0xd0] sm:$0xff] %v18521_v48  ;;  %v18522_v22 = vmax.f32 %v18490_v12, 0.0  ;;  %v18422_v17 = vmul.f32 %v22070_v43, %v27725_v62  ;;  %v18370_v28 = vpop.f32.mrb[93].mxu0 }
 0x72a   : > { %18551 = vst [vmem:[%s27747_s1 + $0xc0] sm:$0xff] %v18519_v37  ;;  %v18520_v50 = vmax.f32 %v18488_v45, 0.0  ;;  %v18420_v21 = vmul.f32 %v27725_v62, %v18370_v28  ;;  %v22071_v19 = vpop.f32.mrb[94].mxu0 }
 0x72b   : > { %18554 = vst [vmem:[%s27747_s1 + $0xd8] sm:$0xff] %v18522_v22  ;;  %v18461_v53 = vadd.f32 %v27731_v41, %v18422_v17  ;;  %v18423_v35 = vmul.f32 %v22071_v19, %v27725_v62  ;;  %v18373_v0 = vpop.f32.mrb[95].mxu0 }
 0x72c   : > { %18552 = vst [vmem:[%s27747_s1 + $0xc8] sm:$0xff] %v18520_v50  ;;  %v18459_v9 = vadd.f32 %v27731_v41, %v18420_v21  ;;  %v18421_v10 = vmul.f32 %v27725_v62, %v18373_v0  ;;  %v23465_v62 = vld [vmem:[%s23814_s13 + $0xe8] sm:$0xff]  ;;  %s23466_s13 = scalar_lea.vmem %s27869_s15, 4096 }
 0x72d   : > { %v18493_v27 = vadd.f32 %v23462_v8, %v18461_v53  ;;  %v18462_v11 = vadd.f32 %v27731_v41, %v18423_v35  ;;  %p23467_p12 = scmp.ne.s32.totalorder %s27869_s15, %s23466_s13  ;;  %p23474_p2 = scmp.lt.s32.totalorder %s23472_s14, %s23466_s13 }
 0x72e   : > { %v18491_v42 = vadd.f32 %v23463_v3, %v18459_v9  ;;  %v18460_v40 = vadd.f32 %v27731_v41, %v18421_v10 }
 0x72f   : > { %v18525_v57 = vmax.f32 %v18493_v27, 0.0  ;;  %v18494_v36 = vadd.f32 %v23464_v4, %v18462_v11  ;;  %p23468_p13 = pnand %p23467_p12, %p23655_p4  ;;  %p23475_p3 = por %p23474_p2, %p23473_p1 }
 0x730   : > { %v18523_v24 = vmax.f32 %v18491_v42, 0.0  ;;  %v18492_v25 = vadd.f32 %v23465_v62, %v18460_v40 }
 0x731   : > { %18557 = vst [vmem:[%s27747_s1 + $0xf0] sm:$0xff] %v18525_v57  ;;  %v18526_v7 = vmax.f32 %v18494_v36, 0.0  ;;  %p23469_p0 = pneg %p23468_p13 }
 0x732   : > { %18555 = vst [vmem:[%s27747_s1 + $0xe0] sm:$0xff] %v18523_v24  ;;  %v18524_v41 = vmax.f32 %v18492_v25, 0.0 }
 0x733   : > { %18558 = vst [vmem:[%s27747_s1 + $0xf8] sm:$0xff] %v18526_v7  ;;  %p23476_p5 = pnand %p23475_p3, %p23469_p0 }
 0x734   : > { %18556 = vst [vmem:[%s27747_s1 + $0xe8] sm:$0xff] %v18524_v41 }
 0x735   : > { %23479 = shalt.err (!%p23476_p5)
}
 0x736   : > { %s23480_s18 = scalar_lea.hbm %s27867_s25, 4096  ;;  %s23484_s17 = scalar_lea.hbm %s27934_s12, 8192 }
 0x737   : > { %p23481_p6 = scmp.ne.s32.totalorder %s27867_s25, %s23480_s18  ;;  %p23485_p10 = scmp.lt.u32.totalorder %s27867_s25, %s27934_s12 }
 0x738   : > { %p23486_p11 = scmp.lt.u32.totalorder %s23484_s17, %s23480_s18  ;;  %p23488_p13 = scmp.lt.u32.totalorder %s23480_s18, %s27867_s25 }
 0x739   : > { %p23482_p7 = pnand %p23481_p6, %p23655_p4 }
 0x73a   : > { %p23487_p12 = por %p23486_p11, %p23485_p10 }
 0x73b   : > { %p23483_p9 = pneg %p23482_p7 }
 0x73c   : > { %p23489_p0 = por %p23488_p13, %p23487_p12 }
 0x73e   : > { %p23490_p1 = pnand %p23489_p0, %p23483_p9 }
 0x740   : > { %23493 = shalt.err (!%p23490_p1)
}
 0x741   : > { %s23548_s13 = smov 128   ;;  %s23549_s14 = smov 8  }
 0x742   : > { %22912 = dma.vmem_to_hbm [thread:$0]  (%p23655_p4), %s27869_s15, 4096, %s27867_s25, %s27876_s22, %s23548_s13, %s23548_s13, %s23549_s14  }
 0x743 PF: > { %p22918_p2 = scmp.ge.s32.totalorder %s23544_s24, 2  ;;  %s18591_s1 = sand.u32 1, %s23524_s19  }
 0x744   : > { %s18592_s18 = scalar_lea.sflag [#allocation4], %s18591_s1 }
 0x745   : > { %p22915_p3 = pnand %p22918_p2, %p23662_p8 }
 0x747   : > { %23519 = dma.done.wait (!%p22915_p3), %s18592_s18, 4096  }
 0x748   : > { %23521 = vsyncadd (!%p22915_p3), %s18592_s18, 4294963200  ;;  %s25_s24 = sadd.s32 1, %s23544_s24   ;;  %s28005_s19 = smov %s23528_s20 }
 0x749   : > { %p22_p5 = scmp.ge.s32.totalorder %s25_s24, 4   ;;  %s28006_s20 = smov %s23532_s21 }
 0x74a   : > { %s28007_s21 = smov %s23668_s2  ;;  %s28008_s22 = smov %s23540_s23 }
 0x74b   : > { %s28009_s23 = smov %s28011_s27  ;;  %24 = sbr.rel (!%p22_p5) target bundleno = 4 (0x4), region = 153 }
 0x752   :  { %18597 = vsyncpa [#allocation4], 1 }
 0x753   :  { %18599 = vsyncpa [#allocation4 + $0x1], 1 }

</bundles_post_ra>
